<compile_context>
chip_gen: v6e
topology: v6e:2x2x1
jax: 0.10.0
libtpu: 0.0.40
codegen_flags: <defaults>
</compile_context>

<pallas_src>
import functools

import jax
import jax.numpy as jnp
from jax import lax
from jax.experimental import pallas as pl
from jax.experimental.pallas import tpu as pltpu

BN_EPS = 1e-5
NEG_INF = float('-inf')

VMEM_SPEC = pl.BlockSpec(memory_space=pltpu.MemorySpace.VMEM)
SMEM_SPEC = pl.BlockSpec(memory_space=pltpu.MemorySpace.SMEM)


# ----------------------------------------------------------------------------
# Fused cell kernel (single block: the small synthetic tensors fit in VMEM)
# ----------------------------------------------------------------------------

def cell_kernel(wmix_ref,              # SMEM [5*E]   folded beta*alpha per primitive
                s0_ref, s1_ref,        # VMEM [N,H,W*Cpp], [N,H,W*Cp]
                wpre0_ref, wpre1_ref,  # VMEM bf16 [W*Cpp, W*C], [W*Cp, W*C]  (block-diag 1x1)
                band_ref,              # VMEM bf16 [2E, 3, (W+2)*C, W*C]  fused dw+pw bands
                pmat_ref,              # VMEM f32 [W*C, W*C]  channel reduce/broadcast (0/1)
                invc_ref,              # VMEM f32 [1, H, W*C] avg-pool inverse valid counts
                o_ref,                 # VMEM f32 [multiplier, N, H, W*C]
                pad0_ref, padneg_ref,  # VMEM scratch [N, H+2, (W+2)*C]
                states_ref,            # VMEM scratch [steps+2, N, H, W*C]
                *, N, H, W, C, steps, multiplier, step_indexes):
    WC = W * C
    WCP = (W + 2) * C
    NH = N * H
    inv_m = 1.0 / float(N * H * W)

    # ---- one-time halo border init (interior is fully overwritten before use)
    def init_border(ref, val):
        ref[:, 0:1, :] = jnp.full((N, 1, WCP), val, jnp.float32)
        ref[:, H + 1:H + 2, :] = jnp.full((N, 1, WCP), val, jnp.float32)
        ref[:, :, 0:C] = jnp.full((N, H + 2, C), val, jnp.float32)
        ref[:, :, WCP - C:WCP] = jnp.full((N, H + 2, C), val, jnp.float32)

    init_border(pad0_ref, 0.0)
    init_border(padneg_ref, NEG_INF)

    def set_interior(ref, x):            # x: [N, H, WC]
        ref[:, 1:1 + H, C:C + WC] = x

    # ---- BatchNorm(affine=False), training batch stats, two-pass variance ----
    # Per-channel stats over N*H*W with channels folded into the lane axis:
    # dot with the 0/1 matrix P[i,j] = (i%C == j%C) reduces over the W copies
    # of each channel and broadcasts the result back across the lane axis.
    def bn(y):                           # y: [N, H, WC] f32
        y2 = y.reshape(NH, WC)
        pmat = pmat_ref[...]
        chan = jnp.dot(y2, pmat, preferred_element_type=jnp.float32)       # [NH, WC]
        mean = jnp.sum(chan, axis=0, keepdims=True) * inv_m                # [1, WC]
        d = y2 - mean
        chan_sq = jnp.dot(d * d, pmat, preferred_element_type=jnp.float32)
        var = jnp.sum(chan_sq, axis=0, keepdims=True) * inv_m              # >= 0
        return (d * lax.rsqrt(var + BN_EPS)).reshape(N, H, WC)

    # ---- preprocess: ReLU -> 1x1 conv (block-diag matmul, bf16 MXU) -> BN ----
    def relu_conv1x1_bn(x, wblk):        # x: [N, H, W*Cin]
        x2 = jnp.maximum(x, 0.0).reshape(NH, x.shape[-1]).astype(jnp.bfloat16)
        y = jnp.dot(x2, wblk, preferred_element_type=jnp.float32)          # [NH, WC]
        return bn(y.reshape(N, H, WC))

    # ---- fused depthwise-3x3 + pointwise-1x1 as 3 banded MXU matmuls ----
    def band_conv(x, k):                 # x: [N, H, WC] (already ReLU'd)
        set_interior(pad0_ref, x)
        acc = None
        for di in range(3):
            rows = pad0_ref[:, di:di + H, :].reshape(NH, WCP).astype(jnp.bfloat16)
            part = jnp.dot(rows, band_ref[k, di],
                           preferred_element_type=jnp.float32)             # [NH, WC]
            acc = part if acc is None else acc + part
        return acc.reshape(N, H, WC)

    def sep_conv(x, e):
        # ReLU -> (dw3x3 . pw1x1) -> BN -> ReLU -> (dw3x3 . pw1x1) -> BN
        y = bn(band_conv(jnp.maximum(x, 0.0), 2 * e))
        y = bn(band_conv(jnp.maximum(y, 0.0), 2 * e + 1))
        return y

    # ---- 3x3 pools (stride 1, pad 1) via 9 direct halo-scratch loads ----
    def maxpool3x3(x):                   # MaxPool2d(3, 1, 1)
        set_interior(padneg_ref, x)
        acc = None
        for di in range(3):
            for dj in range(3):
                t = padneg_ref[:, di:di + H, dj * C:dj * C + WC]
                acc = t if acc is None else jnp.maximum(acc, t)
        return acc

    def avgpool3x3(x):                   # AvgPool2d(3, 1, 1, count_include_pad=False)
        set_interior(pad0_ref, x)
        acc = None
        for di in range(3):
            for dj in range(3):
                t = pad0_ref[:, di:di + H, dj * C:dj * C + WC]
                acc = t if acc is None else acc + t
        return acc * invc_ref[...]       # precomputed inverse valid counts

    def mixed_op(x, e):
        # PRIMITIVES = (none, skip_connect, avg_pool_3x3, max_pool_3x3, sep_conv_3x3)
        # 'none' contributes exactly zero and is never materialised.
        acc = wmix_ref[5 * e + 1] * x
        acc = acc + wmix_ref[5 * e + 2] * bn(avgpool3x3(x))
        acc = acc + wmix_ref[5 * e + 3] * bn(maxpool3x3(x))
        acc = acc + wmix_ref[5 * e + 4] * sep_conv(x, e)
        return acc

    # ---- cell body: states staged in VMEM to bound vreg pressure ----
    states_ref[0] = relu_conv1x1_bn(s0_ref[...], wpre0_ref[...])
    states_ref[1] = relu_conv1x1_bn(s1_ref[...], wpre1_ref[...])

    e = 0
    for i in range(steps):
        s = None
        for j in step_indexes[i]:
            contrib = mixed_op(states_ref[j], e)
            s = contrib if s is None else s + contrib
            e += 1
        states_ref[2 + i] = s

    # Last `multiplier` states; channel concat folded into the output
    # transpose/reshape outside the kernel.
    for m in range(multiplier):
        o_ref[m] = states_ref[2 + steps - multiplier + m]


# ----------------------------------------------------------------------------
# Host-side weight packing helpers
# ----------------------------------------------------------------------------

def _make_band(dw, pw, W, C):
    """Fold depthwise 3x3 [3,3,C] + pointwise 1x1 [Cin,Cout] into banded matmul
    weights [3, (W+2)*C, W*C] acting on padded lane-dense rows."""
    fused = jnp.einsum('ijc,cd->ijcd', dw, pw)                     # [3,3,C,C]
    bands = []
    for di in range(3):
        b = None
        for dj in range(3):
            shift = jnp.eye(W + 2, W, k=-dj, dtype=jnp.float32)     # [(W+2), W]
            term = jnp.kron(shift, fused[di, dj])                   # [(W+2)*C, W*C]
            b = term if b is None else b + term
        bands.append(b)
    return jnp.stack(bands, axis=0)


def _inv_counts(H, W, C):
    """1 / (valid 3x3 window size) for AvgPool2d(count_include_pad=False)."""
    hv = (jnp.minimum(jnp.arange(H) + 1, H - 1)
          - jnp.maximum(jnp.arange(H) - 1, 0) + 1)
    wv = (jnp.minimum(jnp.arange(W) + 1, W - 1)
          - jnp.maximum(jnp.arange(W) - 1, 0) + 1)
    cnt = (hv[:, None] * wv[None, :]).astype(jnp.float32)           # [H, W]
    inv = 1.0 / cnt
    return jnp.broadcast_to(inv[:, :, None], (H, W, C)).reshape(1, H, W * C)


# ----------------------------------------------------------------------------
# Cell wrapper (parameters are deterministic synthetic weights)
# ----------------------------------------------------------------------------

class CellPallas:
    PRIMITIVES = ('none', 'skip_connect', 'avg_pool_3x3', 'max_pool_3x3',
                  'sep_conv_3x3')

    def __init__(self, steps, multiplier, C_prev_prev, C_prev, C,
                 reduction, reduction_prev, key):
        assert not reduction and not reduction_prev, "normal cell only"
        self._steps = steps
        self._multiplier = multiplier
        self.C = C
        self.num_edges = sum(2 + i for i in range(steps))

        keys = jax.random.split(key, 2 + 4 * self.num_edges)
        scale = 0.1
        # preprocess0 / preprocess1: ReLUConvBN(C_* -> C, 1x1); conv weight as [Cin, Cout]
        self.w_pre0 = scale * jax.random.normal(keys[0], (C_prev_prev, C), jnp.float32)
        self.w_pre1 = scale * jax.random.normal(keys[1], (C_prev, C), jnp.float32)
        # per-edge SepConv weights (depthwise [3,3,C], pointwise [Cin,Cout])
        self.edge_params = []
        ki = 2
        for _ in range(self.num_edges):
            self.edge_params.append(dict(
                dw1=scale * jax.random.normal(keys[ki + 0], (3, 3, C), jnp.float32),
                pw1=scale * jax.random.normal(keys[ki + 1], (C, C), jnp.float32),
                dw2=scale * jax.random.normal(keys[ki + 2], (3, 3, C), jnp.float32),
                pw2=scale * jax.random.normal(keys[ki + 3], (C, C), jnp.float32),
            ))
            ki += 4

    def __call__(self, s0_nchw, s1_nchw, weights, drop_prob=0.0,
                 efficient=False, weights_index_beta=None):
        assert drop_prob == 0.0 and not efficient
        N, C_pp, H, W = s0_nchw.shape
        C_p = s1_nchw.shape[1]
        C = self.C
        WC = W * C

        # Boundary NCHW -> lane-dense [N, H, W*Cin] (interface stays NCHW).
        s0 = jnp.transpose(s0_nchw, (0, 2, 3, 1)).reshape(N, H, W * C_pp)
        s1 = jnp.transpose(s1_nchw, (0, 2, 3, 1)).reshape(N, H, W * C_p)

        # Select only the edges actually consumed (j in indexes), in enumerate
        # order, fold beta_hard into the per-primitive alphas, and pack the
        # fused banded conv weights host-side.
        step_indexes, wmix_rows, band_list = [], [], []
        offset = 0
        for i in range(self._steps):
            beta_hard, indexes = weights_index_beta[i]
            sel = set(int(j) for j in indexes)
            idx = tuple(j for j in range(2 + i) if j in sel)
            assert idx, "each step must select at least one incoming state"
            step_indexes.append(idx)
            for j in idx:
                edge = offset + j
                p = self.edge_params[edge]
                wmix_rows.append(beta_hard[j] * weights[edge])
                band_list.append(_make_band(p['dw1'], p['pw1'], W, C))
                band_list.append(_make_band(p['dw2'], p['pw2'], W, C))
            offset += 2 + i

        E = len(wmix_rows)
        wmix = jnp.concatenate([r.reshape(-1) for r in wmix_rows]).astype(jnp.float32)
        bands = jnp.stack(band_list, axis=0).astype(jnp.bfloat16)   # [2E,3,(W+2)C,WC]

        eye_w = jnp.eye(W, dtype=jnp.float32)
        wpre0_blk = jnp.kron(eye_w, self.w_pre0).astype(jnp.bfloat16)   # [W*Cpp, WC]
        wpre1_blk = jnp.kron(eye_w, self.w_pre1).astype(jnp.bfloat16)   # [W*Cp,  WC]

        lane_idx = jnp.arange(WC)
        pmat = (lane_idx[:, None] % C == lane_idx[None, :] % C).astype(jnp.float32)
        invc = _inv_counts(H, W, C)

        kernel = functools.partial(
            cell_kernel, N=N, H=H, W=W, C=C, steps=self._steps,
            multiplier=self._multiplier, step_indexes=tuple(step_indexes))

        # Advisory cost estimate so XLA can overlap the boundary transposes.
        NH = N * H
        WCP = (W + 2) * C
        num_bn = 2 + 4 * E
        flops = (E * 2 * 3 * (2 * NH * WCP * WC)          # fused dw+pw banded dots
                 + 2 * (2 * NH * WC * WC)                 # preprocess 1x1 dots
                 + num_bn * 2 * (2 * NH * WC * WC)        # BN channel reduce/broadcast dots
                 + (E * 40 + num_bn * 8) * N * H * WC)    # pools / weighted accum / BN ew
        operands = (wmix, s0, s1, wpre0_blk, wpre1_blk, bands, pmat, invc)
        bytes_accessed = (sum(int(a.size) * a.dtype.itemsize for a in operands)
                          + self._multiplier * N * H * WC * 4)
        cost = pl.CostEstimate(flops=int(flops), transcendentals=int(num_bn * WC),
                               bytes_accessed=int(bytes_accessed))

        out = pl.pallas_call(
            kernel,
            out_shape=jax.ShapeDtypeStruct(
                (self._multiplier, N, H, WC), jnp.float32),
            in_specs=[SMEM_SPEC] + [VMEM_SPEC] * 7,
            out_specs=VMEM_SPEC,
            scratch_shapes=[pltpu.VMEM((N, H + 2, (W + 2) * C), jnp.float32),
                            pltpu.VMEM((N, H + 2, (W + 2) * C), jnp.float32),
                            pltpu.VMEM((self._steps + 2, N, H, WC), jnp.float32)],
            cost_estimate=cost,
        )(*operands)

        # Channel concat of the last `multiplier` states folded into the
        # lane-dense -> NCHW output transform (interface preserved).
        out5 = out.reshape(self._multiplier, N, H, W, C)
        return jnp.transpose(out5, (1, 0, 4, 2, 3)).reshape(
            N, self._multiplier * C, H, W)


# ----------------------------------------------------------------------------
# Main
# ----------------------------------------------------------------------------

if __name__ == "__main__":
    key = jax.random.PRNGKey(0)
    N, C_pp, C_p, C, H, W = 2, 8, 8, 8, 8, 8
    steps, multiplier = 2, 2

    k_cell, k0, k1, k_a, k_b = jax.random.split(key, 5)
    cell = CellPallas(steps, multiplier, C_pp, C_p, C,
                      reduction=False, reduction_prev=False, key=k_cell)

    s0 = jax.random.normal(k0, (N, C_pp, H, W), jnp.float32)
    s1 = jax.random.normal(k1, (N, C_p, H, W), jnp.float32)

    num_edges = cell.num_edges
    alphas = jax.nn.softmax(
        jax.random.normal(k_a, (num_edges, len(CellPallas.PRIMITIVES)),
                          jnp.float32), axis=-1)

    # weights_index_beta[i] = (beta_hard over incoming states, selected indexes)
    weights_index_beta = []
    kk = k_b
    for i in range(steps):
        kk, sub = jax.random.split(kk)
        beta = jax.nn.softmax(jax.random.normal(sub, (2 + i,), jnp.float32))
        indexes = (0, 1)     # select the first two incoming states at each step
        weights_index_beta.append((beta, indexes))

    out = cell(s0, s1, alphas, drop_prob=0.0, efficient=False,
               weights_index_beta=weights_index_beta)
    out = jax.block_until_ready(out)
    assert out.shape == (N, multiplier * C, H, W), out.shape
    assert bool(jnp.all(jnp.isfinite(out)))
    print("KERNEL_OK")
</pallas_src>

<mosaic_0001>
module attributes {stable_mosaic.version = 11 : i64} {
  func.func @cell_kernel(%arg0: memref<20xf32, #tpu.memory_space<smem>>, %arg1: memref<2x8x64xf32, #tpu.memory_space<vmem>>, %arg2: memref<2x8x64xf32, #tpu.memory_space<vmem>>, %arg3: memref<64x64xbf16, #tpu.memory_space<vmem>>, %arg4: memref<64x64xbf16, #tpu.memory_space<vmem>>, %arg5: memref<8x3x80x64xbf16, #tpu.memory_space<vmem>>, %arg6: memref<64x64xf32, #tpu.memory_space<vmem>>, %arg7: memref<1x8x64xf32, #tpu.memory_space<vmem>>, %arg8: memref<2x2x8x64xf32, #tpu.memory_space<vmem>>, %arg9: memref<2x10x80xf32, #tpu.memory_space<vmem>>, %arg10: memref<2x10x80xf32, #tpu.memory_space<vmem>>, %arg11: memref<4x2x8x64xf32, #tpu.memory_space<vmem>>) attributes {dimension_semantics = [], scalar_prefetch = 0 : i64, scratch_operands = 3 : i64, tpu.core_type = #tpu.core_type<tc>} {
    %cst = arith.constant 0.000000e+00 : f32
    %0 = vector.broadcast %cst : f32 to vector<2x1x80xf32>
    %c0 = arith.constant 0 : index
    %c0_0 = arith.constant 0 : index
    %c0_1 = arith.constant 0 : index
    %1 = vector.load %arg9[%c0, %c0_0, %c0_1] : memref<2x10x80xf32, #tpu.memory_space<vmem>>, vector<2x1x80xf32>
    tpu.vector_store %arg9[%c0, %c0_0, %c0_1], %0 {strides = array<i32>} : memref<2x10x80xf32, #tpu.memory_space<vmem>>, vector<2x1x80xf32>,
    %cst_2 = arith.constant 0.000000e+00 : f32
    %2 = vector.broadcast %cst_2 : f32 to vector<2x1x80xf32>
    %c0_3 = arith.constant 0 : index
    %c9 = arith.constant 9 : index
    %c0_4 = arith.constant 0 : index
    %3 = vector.load %arg9[%c0_3, %c9, %c0_4] : memref<2x10x80xf32, #tpu.memory_space<vmem>>, vector<2x1x80xf32>
    tpu.vector_store %arg9[%c0_3, %c9, %c0_4], %2 {strides = array<i32>} : memref<2x10x80xf32, #tpu.memory_space<vmem>>, vector<2x1x80xf32>,
    %cst_5 = arith.constant 0.000000e+00 : f32
    %4 = vector.broadcast %cst_5 : f32 to vector<2x10x8xf32>
    %c0_6 = arith.constant 0 : index
    %c0_7 = arith.constant 0 : index
    %c0_8 = arith.constant 0 : index
    %5 = vector.load %arg9[%c0_6, %c0_7, %c0_8] : memref<2x10x80xf32, #tpu.memory_space<vmem>>, vector<2x10x8xf32>
    tpu.vector_store %arg9[%c0_6, %c0_7, %c0_8], %4 {strides = array<i32>} : memref<2x10x80xf32, #tpu.memory_space<vmem>>, vector<2x10x8xf32>,
    %cst_9 = arith.constant 0.000000e+00 : f32
    %6 = vector.broadcast %cst_9 : f32 to vector<2x10x8xf32>
    %c0_10 = arith.constant 0 : index
    %c0_11 = arith.constant 0 : index
    %c72 = arith.constant 72 : index
    %7 = vector.load %arg9[%c0_10, %c0_11, %c72] : memref<2x10x80xf32, #tpu.memory_space<vmem>>, vector<2x10x8xf32>
    tpu.vector_store %arg9[%c0_10, %c0_11, %c72], %6 {strides = array<i32>} : memref<2x10x80xf32, #tpu.memory_space<vmem>>, vector<2x10x8xf32>,
    %cst_12 = arith.constant 0xFF800000 : f32
    %8 = vector.broadcast %cst_12 : f32 to vector<2x1x80xf32>
    %c0_13 = arith.constant 0 : index
    %c0_14 = arith.constant 0 : index
    %c0_15 = arith.constant 0 : index
    %9 = vector.load %arg10[%c0_13, %c0_14, %c0_15] : memref<2x10x80xf32, #tpu.memory_space<vmem>>, vector<2x1x80xf32>
    tpu.vector_store %arg10[%c0_13, %c0_14, %c0_15], %8 {strides = array<i32>} : memref<2x10x80xf32, #tpu.memory_space<vmem>>, vector<2x1x80xf32>,
    %cst_16 = arith.constant 0xFF800000 : f32
    %10 = vector.broadcast %cst_16 : f32 to vector<2x1x80xf32>
    %c0_17 = arith.constant 0 : index
    %c9_18 = arith.constant 9 : index
    %c0_19 = arith.constant 0 : index
    %11 = vector.load %arg10[%c0_17, %c9_18, %c0_19] : memref<2x10x80xf32, #tpu.memory_space<vmem>>, vector<2x1x80xf32>
    tpu.vector_store %arg10[%c0_17, %c9_18, %c0_19], %10 {strides = array<i32>} : memref<2x10x80xf32, #tpu.memory_space<vmem>>, vector<2x1x80xf32>,
    %cst_20 = arith.constant 0xFF800000 : f32
    %12 = vector.broadcast %cst_20 : f32 to vector<2x10x8xf32>
    %c0_21 = arith.constant 0 : index
    %c0_22 = arith.constant 0 : index
    %c0_23 = arith.constant 0 : index
    %13 = vector.load %arg10[%c0_21, %c0_22, %c0_23] : memref<2x10x80xf32, #tpu.memory_space<vmem>>, vector<2x10x8xf32>
    tpu.vector_store %arg10[%c0_21, %c0_22, %c0_23], %12 {strides = array<i32>} : memref<2x10x80xf32, #tpu.memory_space<vmem>>, vector<2x10x8xf32>,
    %cst_24 = arith.constant 0xFF800000 : f32
    %14 = vector.broadcast %cst_24 : f32 to vector<2x10x8xf32>
    %c0_25 = arith.constant 0 : index
    %c0_26 = arith.constant 0 : index
    %c72_27 = arith.constant 72 : index
    %15 = vector.load %arg10[%c0_25, %c0_26, %c72_27] : memref<2x10x80xf32, #tpu.memory_space<vmem>>, vector<2x10x8xf32>
    tpu.vector_store %arg10[%c0_25, %c0_26, %c72_27], %14 {strides = array<i32>} : memref<2x10x80xf32, #tpu.memory_space<vmem>>, vector<2x10x8xf32>,
    %c0_28 = arith.constant 0 : index
    %c0_29 = arith.constant 0 : index
    %c0_30 = arith.constant 0 : index
    %16 = vector.load %arg1[%c0_28, %c0_29, %c0_30] : memref<2x8x64xf32, #tpu.memory_space<vmem>>, vector<2x8x64xf32>
    %c0_31 = arith.constant 0 : index
    %c0_32 = arith.constant 0 : index
    %17 = vector.load %arg3[%c0_31, %c0_32] : memref<64x64xbf16, #tpu.memory_space<vmem>>, vector<64x64xbf16>
    %cst_33 = arith.constant 0.000000e+00 : f32
    %18 = vector.broadcast %cst_33 : f32 to vector<2x8x64xf32>
    %19 = arith.maximumf %16, %18 : vector<2x8x64xf32>
    %20 = vector.shape_cast %19 : vector<2x8x64xf32> to vector<16x64xf32>
    %21 = arith.truncf %20 : vector<16x64xf32> to vector<16x64xbf16>
    %cst_34 = arith.constant dense<0.000000e+00> : vector<16x64xf32>
    %22 = tpu.matmul %21, %17, %cst_34 {dimension_numbers = #tpu.dot_dimension_numbers<[1], [0], [0], [1], [0, 0, 1, 1], [], []>} : vector<16x64xbf16>, vector<64x64xbf16>, vector<16x64xf32> -> vector<16x64xf32>
    %23 = vector.shape_cast %22 : vector<16x64xf32> to vector<2x8x64xf32>
    %24 = vector.shape_cast %23 : vector<2x8x64xf32> to vector<16x64xf32>
    %c0_35 = arith.constant 0 : index
    %c0_36 = arith.constant 0 : index
    %25 = vector.load %arg6[%c0_35, %c0_36] : memref<64x64xf32, #tpu.memory_space<vmem>>, vector<64x64xf32>
    %cst_37 = arith.constant dense<0.000000e+00> : vector<16x64xf32>
    %26 = tpu.matmul %24, %25, %cst_37 {dimension_numbers = #tpu.dot_dimension_numbers<[1], [0], [0], [1], [0, 0, 1, 1], [], []>} : vector<16x64xf32>, vector<64x64xf32>, vector<16x64xf32> -> vector<16x64xf32>
    %cst_38 = arith.constant dense<0.000000e+00> : vector<64xf32>
    %27 = vector.multi_reduction <add>, %26, %cst_38 [0] : vector<16x64xf32> to vector<64xf32>
    %28 = vector.shape_cast %27 : vector<64xf32> to vector<1x64xf32>
    %cst_39 = arith.constant 7.812500e-03 : f32
    %29 = vector.broadcast %cst_39 : f32 to vector<1x64xf32>
    %30 = arith.mulf %28, %29 : vector<1x64xf32>
    %31 = vector.broadcast %30 : vector<1x64xf32> to vector<16x64xf32>
    %32 = arith.subf %24, %31 : vector<16x64xf32>
    %33 = arith.mulf %32, %32 : vector<16x64xf32>
    %cst_40 = arith.constant dense<0.000000e+00> : vector<16x64xf32>
    %34 = tpu.matmul %33, %25, %cst_40 {dimension_numbers = #tpu.dot_dimension_numbers<[1], [0], [0], [1], [0, 0, 1, 1], [], []>} : vector<16x64xf32>, vector<64x64xf32>, vector<16x64xf32> -> vector<16x64xf32>
    %cst_41 = arith.constant dense<0.000000e+00> : vector<64xf32>
    %35 = vector.multi_reduction <add>, %34, %cst_41 [0] : vector<16x64xf32> to vector<64xf32>
    %36 = vector.shape_cast %35 : vector<64xf32> to vector<1x64xf32>
    %cst_42 = arith.constant 7.812500e-03 : f32
    %37 = vector.broadcast %cst_42 : f32 to vector<1x64xf32>
    %38 = arith.mulf %36, %37 : vector<1x64xf32>
    %cst_43 = arith.constant 9.99999974E-6 : f32
    %39 = vector.broadcast %cst_43 : f32 to vector<1x64xf32>
    %40 = arith.addf %38, %39 : vector<1x64xf32>
    %41 = math.rsqrt %40 : vector<1x64xf32>
    %42 = vector.broadcast %41 : vector<1x64xf32> to vector<16x64xf32>
    %43 = arith.mulf %32, %42 : vector<16x64xf32>
    %44 = vector.shape_cast %43 : vector<16x64xf32> to vector<2x8x64xf32>
    %c0_44 = arith.constant 0 : index
    %c0_45 = arith.constant 0 : index
    %c0_46 = arith.constant 0 : index
    %c0_47 = arith.constant 0 : index
    %45 = vector.load %arg11[%c0_44, %c0_45, %c0_46, %c0_47] : memref<4x2x8x64xf32, #tpu.memory_space<vmem>>, vector<1x2x8x64xf32>
    %46 = vector.shape_cast %45 : vector<1x2x8x64xf32> to vector<2x8x64xf32>
    %47 = vector.shape_cast %44 : vector<2x8x64xf32> to vector<1x2x8x64xf32>
    tpu.vector_store %arg11[%c0_44, %c0_45, %c0_46, %c0_47], %47 {strides = array<i32>} : memref<4x2x8x64xf32, #tpu.memory_space<vmem>>, vector<1x2x8x64xf32>,
    %c0_48 = arith.constant 0 : index
    %c0_49 = arith.constant 0 : index
    %c0_50 = arith.constant 0 : index
    %48 = vector.load %arg2[%c0_48, %c0_49, %c0_50] : memref<2x8x64xf32, #tpu.memory_space<vmem>>, vector<2x8x64xf32>
    %c0_51 = arith.constant 0 : index
    %c0_52 = arith.constant 0 : index
    %49 = vector.load %arg4[%c0_51, %c0_52] : memref<64x64xbf16, #tpu.memory_space<vmem>>, vector<64x64xbf16>
    %cst_53 = arith.constant 0.000000e+00 : f32
    %50 = vector.broadcast %cst_53 : f32 to vector<2x8x64xf32>
    %51 = arith.maximumf %48, %50 : vector<2x8x64xf32>
    %52 = vector.shape_cast %51 : vector<2x8x64xf32> to vector<16x64xf32>
    %53 = arith.truncf %52 : vector<16x64xf32> to vector<16x64xbf16>
    %cst_54 = arith.constant dense<0.000000e+00> : vector<16x64xf32>
    %54 = tpu.matmul %53, %49, %cst_54 {dimension_numbers = #tpu.dot_dimension_numbers<[1], [0], [0], [1], [0, 0, 1, 1], [], []>} : vector<16x64xbf16>, vector<64x64xbf16>, vector<16x64xf32> -> vector<16x64xf32>
    %55 = vector.shape_cast %54 : vector<16x64xf32> to vector<2x8x64xf32>
    %56 = vector.shape_cast %55 : vector<2x8x64xf32> to vector<16x64xf32>
    %c0_55 = arith.constant 0 : index
    %c0_56 = arith.constant 0 : index
    %57 = vector.load %arg6[%c0_55, %c0_56] : memref<64x64xf32, #tpu.memory_space<vmem>>, vector<64x64xf32>
    %cst_57 = arith.constant dense<0.000000e+00> : vector<16x64xf32>
    %58 = tpu.matmul %56, %57, %cst_57 {dimension_numbers = #tpu.dot_dimension_numbers<[1], [0], [0], [1], [0, 0, 1, 1], [], []>} : vector<16x64xf32>, vector<64x64xf32>, vector<16x64xf32> -> vector<16x64xf32>
    %cst_58 = arith.constant dense<0.000000e+00> : vector<64xf32>
    %59 = vector.multi_reduction <add>, %58, %cst_58 [0] : vector<16x64xf32> to vector<64xf32>
    %60 = vector.shape_cast %59 : vector<64xf32> to vector<1x64xf32>
    %cst_59 = arith.constant 7.812500e-03 : f32
    %61 = vector.broadcast %cst_59 : f32 to vector<1x64xf32>
    %62 = arith.mulf %60, %61 : vector<1x64xf32>
    %63 = vector.broadcast %62 : vector<1x64xf32> to vector<16x64xf32>
    %64 = arith.subf %56, %63 : vector<16x64xf32>
    %65 = arith.mulf %64, %64 : vector<16x64xf32>
    %cst_60 = arith.constant dense<0.000000e+00> : vector<16x64xf32>
    %66 = tpu.matmul %65, %57, %cst_60 {dimension_numbers = #tpu.dot_dimension_numbers<[1], [0], [0], [1], [0, 0, 1, 1], [], []>} : vector<16x64xf32>, vector<64x64xf32>, vector<16x64xf32> -> vector<16x64xf32>
    %cst_61 = arith.constant dense<0.000000e+00> : vector<64xf32>
    %67 = vector.multi_reduction <add>, %66, %cst_61 [0] : vector<16x64xf32> to vector<64xf32>
    %68 = vector.shape_cast %67 : vector<64xf32> to vector<1x64xf32>
    %cst_62 = arith.constant 7.812500e-03 : f32
    %69 = vector.broadcast %cst_62 : f32 to vector<1x64xf32>
    %70 = arith.mulf %68, %69 : vector<1x64xf32>
    %cst_63 = arith.constant 9.99999974E-6 : f32
    %71 = vector.broadcast %cst_63 : f32 to vector<1x64xf32>
    %72 = arith.addf %70, %71 : vector<1x64xf32>
    %73 = math.rsqrt %72 : vector<1x64xf32>
    %74 = vector.broadcast %73 : vector<1x64xf32> to vector<16x64xf32>
    %75 = arith.mulf %64, %74 : vector<16x64xf32>
    %76 = vector.shape_cast %75 : vector<16x64xf32> to vector<2x8x64xf32>
    %c1 = arith.constant 1 : index
    %c0_64 = arith.constant 0 : index
    %c0_65 = arith.constant 0 : index
    %c0_66 = arith.constant 0 : index
    %77 = vector.load %arg11[%c1, %c0_64, %c0_65, %c0_66] : memref<4x2x8x64xf32, #tpu.memory_space<vmem>>, vector<1x2x8x64xf32>
    %78 = vector.shape_cast %77 : vector<1x2x8x64xf32> to vector<2x8x64xf32>
    %79 = vector.shape_cast %76 : vector<2x8x64xf32> to vector<1x2x8x64xf32>
    tpu.vector_store %arg11[%c1, %c0_64, %c0_65, %c0_66], %79 {strides = array<i32>} : memref<4x2x8x64xf32, #tpu.memory_space<vmem>>, vector<1x2x8x64xf32>,
    %c0_67 = arith.constant 0 : index
    %c0_68 = arith.constant 0 : index
    %c0_69 = arith.constant 0 : index
    %c0_70 = arith.constant 0 : index
    %80 = vector.load %arg11[%c0_67, %c0_68, %c0_69, %c0_70] : memref<4x2x8x64xf32, #tpu.memory_space<vmem>>, vector<1x2x8x64xf32>
    %81 = vector.shape_cast %80 : vector<1x2x8x64xf32> to vector<2x8x64xf32>
    %c1_71 = arith.constant 1 : index
    %82 = memref.load %arg0[%c1_71] : memref<20xf32, #tpu.memory_space<smem>>
    %83 = vector.broadcast %82 : f32 to vector<2x8x64xf32>
    %84 = arith.mulf %83, %81 : vector<2x8x64xf32>
    %c2 = arith.constant 2 : index
    %85 = memref.load %arg0[%c2] : memref<20xf32, #tpu.memory_space<smem>>
    %c0_72 = arith.constant 0 : index
    %c1_73 = arith.constant 1 : index
    %c8 = arith.constant 8 : index
    %86 = vector.load %arg9[%c0_72, %c1_73, %c8] : memref<2x10x80xf32, #tpu.memory_space<vmem>>, vector<2x8x64xf32>
    tpu.vector_store %arg9[%c0_72, %c1_73, %c8], %81 {strides = array<i32>} : memref<2x10x80xf32, #tpu.memory_space<vmem>>, vector<2x8x64xf32>,
    %c0_74 = arith.constant 0 : index
    %c0_75 = arith.constant 0 : index
    %c0_76 = arith.constant 0 : index
    %87 = vector.load %arg9[%c0_74, %c0_75, %c0_76] : memref<2x10x80xf32, #tpu.memory_space<vmem>>, vector<2x8x64xf32>
    %c0_77 = arith.constant 0 : index
    %c0_78 = arith.constant 0 : index
    %c8_79 = arith.constant 8 : index
    %88 = vector.load %arg9[%c0_77, %c0_78, %c8_79] : memref<2x10x80xf32, #tpu.memory_space<vmem>>, vector<2x8x64xf32>
    %89 = arith.addf %87, %88 : vector<2x8x64xf32>
    %c0_80 = arith.constant 0 : index
    %c0_81 = arith.constant 0 : index
    %c16 = arith.constant 16 : index
    %90 = vector.load %arg9[%c0_80, %c0_81, %c16] : memref<2x10x80xf32, #tpu.memory_space<vmem>>, vector<2x8x64xf32>
    %91 = arith.addf %89, %90 : vector<2x8x64xf32>
    %c0_82 = arith.constant 0 : index
    %c1_83 = arith.constant 1 : index
    %c0_84 = arith.constant 0 : index
    %92 = vector.load %arg9[%c0_82, %c1_83, %c0_84] : memref<2x10x80xf32, #tpu.memory_space<vmem>>, vector<2x8x64xf32>
    %93 = arith.addf %91, %92 : vector<2x8x64xf32>
    %c0_85 = arith.constant 0 : index
    %c1_86 = arith.constant 1 : index
    %c8_87 = arith.constant 8 : index
    %94 = vector.load %arg9[%c0_85, %c1_86, %c8_87] : memref<2x10x80xf32, #tpu.memory_space<vmem>>, vector<2x8x64xf32>
    %95 = arith.addf %93, %94 : vector<2x8x64xf32>
    %c0_88 = arith.constant 0 : index
    %c1_89 = arith.constant 1 : index
    %c16_90 = arith.constant 16 : index
    %96 = vector.load %arg9[%c0_88, %c1_89, %c16_90] : memref<2x10x80xf32, #tpu.memory_space<vmem>>, vector<2x8x64xf32>
    %97 = arith.addf %95, %96 : vector<2x8x64xf32>
    %c0_91 = arith.constant 0 : index
    %c2_92 = arith.constant 2 : index
    %c0_93 = arith.constant 0 : index
    %98 = vector.load %arg9[%c0_91, %c2_92, %c0_93] : memref<2x10x80xf32, #tpu.memory_space<vmem>>, vector<2x8x64xf32>
    %99 = arith.addf %97, %98 : vector<2x8x64xf32>
    %c0_94 = arith.constant 0 : index
    %c2_95 = arith.constant 2 : index
    %c8_96 = arith.constant 8 : index
    %100 = vector.load %arg9[%c0_94, %c2_95, %c8_96] : memref<2x10x80xf32, #tpu.memory_space<vmem>>, vector<2x8x64xf32>
    %101 = arith.addf %99, %100 : vector<2x8x64xf32>
    %c0_97 = arith.constant 0 : index
    %c2_98 = arith.constant 2 : index
    %c16_99 = arith.constant 16 : index
    %102 = vector.load %arg9[%c0_97, %c2_98, %c16_99] : memref<2x10x80xf32, #tpu.memory_space<vmem>>, vector<2x8x64xf32>
    %103 = arith.addf %101, %102 : vector<2x8x64xf32>
    %c0_100 = arith.constant 0 : index
    %c0_101 = arith.constant 0 : index
    %c0_102 = arith.constant 0 : index
    %104 = vector.load %arg7[%c0_100, %c0_101, %c0_102] : memref<1x8x64xf32, #tpu.memory_space<vmem>>, vector<1x8x64xf32>
    %105 = vector.broadcast %104 : vector<1x8x64xf32> to vector<2x8x64xf32>
    %106 = arith.mulf %103, %105 : vector<2x8x64xf32>
    %107 = vector.shape_cast %106 : vector<2x8x64xf32> to vector<16x64xf32>
    %c0_103 = arith.constant 0 : index
    %c0_104 = arith.constant 0 : index
    %108 = vector.load %arg6[%c0_103, %c0_104] : memref<64x64xf32, #tpu.memory_space<vmem>>, vector<64x64xf32>
    %cst_105 = arith.constant dense<0.000000e+00> : vector<16x64xf32>
    %109 = tpu.matmul %107, %108, %cst_105 {dimension_numbers = #tpu.dot_dimension_numbers<[1], [0], [0], [1], [0, 0, 1, 1], [], []>} : vector<16x64xf32>, vector<64x64xf32>, vector<16x64xf32> -> vector<16x64xf32>
    %cst_106 = arith.constant dense<0.000000e+00> : vector<64xf32>
    %110 = vector.multi_reduction <add>, %109, %cst_106 [0] : vector<16x64xf32> to vector<64xf32>
    %111 = vector.shape_cast %110 : vector<64xf32> to vector<1x64xf32>
    %cst_107 = arith.constant 7.812500e-03 : f32
    %112 = vector.broadcast %cst_107 : f32 to vector<1x64xf32>
    %113 = arith.mulf %111, %112 : vector<1x64xf32>
    %114 = vector.broadcast %113 : vector<1x64xf32> to vector<16x64xf32>
    %115 = arith.subf %107, %114 : vector<16x64xf32>
    %116 = arith.mulf %115, %115 : vector<16x64xf32>
    %cst_108 = arith.constant dense<0.000000e+00> : vector<16x64xf32>
    %117 = tpu.matmul %116, %108, %cst_108 {dimension_numbers = #tpu.dot_dimension_numbers<[1], [0], [0], [1], [0, 0, 1, 1], [], []>} : vector<16x64xf32>, vector<64x64xf32>, vector<16x64xf32> -> vector<16x64xf32>
    %cst_109 = arith.constant dense<0.000000e+00> : vector<64xf32>
    %118 = vector.multi_reduction <add>, %117, %cst_109 [0] : vector<16x64xf32> to vector<64xf32>
    %119 = vector.shape_cast %118 : vector<64xf32> to vector<1x64xf32>
    %cst_110 = arith.constant 7.812500e-03 : f32
    %120 = vector.broadcast %cst_110 : f32 to vector<1x64xf32>
    %121 = arith.mulf %119, %120 : vector<1x64xf32>
    %cst_111 = arith.constant 9.99999974E-6 : f32
    %122 = vector.broadcast %cst_111 : f32 to vector<1x64xf32>
    %123 = arith.addf %121, %122 : vector<1x64xf32>
    %124 = math.rsqrt %123 : vector<1x64xf32>
    %125 = vector.broadcast %124 : vector<1x64xf32> to vector<16x64xf32>
    %126 = arith.mulf %115, %125 : vector<16x64xf32>
    %127 = vector.shape_cast %126 : vector<16x64xf32> to vector<2x8x64xf32>
    %128 = vector.broadcast %85 : f32 to vector<2x8x64xf32>
    %129 = arith.mulf %128, %127 : vector<2x8x64xf32>
    %130 = arith.addf %84, %129 : vector<2x8x64xf32>
    %c3 = arith.constant 3 : index
    %131 = memref.load %arg0[%c3] : memref<20xf32, #tpu.memory_space<smem>>
    %c0_112 = arith.constant 0 : index
    %c1_113 = arith.constant 1 : index
    %c8_114 = arith.constant 8 : index
    %132 = vector.load %arg10[%c0_112, %c1_113, %c8_114] : memref<2x10x80xf32, #tpu.memory_space<vmem>>, vector<2x8x64xf32>
    tpu.vector_store %arg10[%c0_112, %c1_113, %c8_114], %81 {strides = array<i32>} : memref<2x10x80xf32, #tpu.memory_space<vmem>>, vector<2x8x64xf32>,
    %c0_115 = arith.constant 0 : index
    %c0_116 = arith.constant 0 : index
    %c0_117 = arith.constant 0 : index
    %133 = vector.load %arg10[%c0_115, %c0_116, %c0_117] : memref<2x10x80xf32, #tpu.memory_space<vmem>>, vector<2x8x64xf32>
    %c0_118 = arith.constant 0 : index
    %c0_119 = arith.constant 0 : index
    %c8_120 = arith.constant 8 : index
    %134 = vector.load %arg10[%c0_118, %c0_119, %c8_120] : memref<2x10x80xf32, #tpu.memory_space<vmem>>, vector<2x8x64xf32>
    %135 = arith.maximumf %133, %134 : vector<2x8x64xf32>
    %c0_121 = arith.constant 0 : index
    %c0_122 = arith.constant 0 : index
    %c16_123 = arith.constant 16 : index
    %136 = vector.load %arg10[%c0_121, %c0_122, %c16_123] : memref<2x10x80xf32, #tpu.memory_space<vmem>>, vector<2x8x64xf32>
    %137 = arith.maximumf %135, %136 : vector<2x8x64xf32>
    %c0_124 = arith.constant 0 : index
    %c1_125 = arith.constant 1 : index
    %c0_126 = arith.constant 0 : index
    %138 = vector.load %arg10[%c0_124, %c1_125, %c0_126] : memref<2x10x80xf32, #tpu.memory_space<vmem>>, vector<2x8x64xf32>
    %139 = arith.maximumf %137, %138 : vector<2x8x64xf32>
    %c0_127 = arith.constant 0 : index
    %c1_128 = arith.constant 1 : index
    %c8_129 = arith.constant 8 : index
    %140 = vector.load %arg10[%c0_127, %c1_128, %c8_129] : memref<2x10x80xf32, #tpu.memory_space<vmem>>, vector<2x8x64xf32>
    %141 = arith.maximumf %139, %140 : vector<2x8x64xf32>
    %c0_130 = arith.constant 0 : index
    %c1_131 = arith.constant 1 : index
    %c16_132 = arith.constant 16 : index
    %142 = vector.load %arg10[%c0_130, %c1_131, %c16_132] : memref<2x10x80xf32, #tpu.memory_space<vmem>>, vector<2x8x64xf32>
    %143 = arith.maximumf %141, %142 : vector<2x8x64xf32>
    %c0_133 = arith.constant 0 : index
    %c2_134 = arith.constant 2 : index
    %c0_135 = arith.constant 0 : index
    %144 = vector.load %arg10[%c0_133, %c2_134, %c0_135] : memref<2x10x80xf32, #tpu.memory_space<vmem>>, vector<2x8x64xf32>
    %145 = arith.maximumf %143, %144 : vector<2x8x64xf32>
    %c0_136 = arith.constant 0 : index
    %c2_137 = arith.constant 2 : index
    %c8_138 = arith.constant 8 : index
    %146 = vector.load %arg10[%c0_136, %c2_137, %c8_138] : memref<2x10x80xf32, #tpu.memory_space<vmem>>, vector<2x8x64xf32>
    %147 = arith.maximumf %145, %146 : vector<2x8x64xf32>
    %c0_139 = arith.constant 0 : index
    %c2_140 = arith.constant 2 : index
    %c16_141 = arith.constant 16 : index
    %148 = vector.load %arg10[%c0_139, %c2_140, %c16_141] : memref<2x10x80xf32, #tpu.memory_space<vmem>>, vector<2x8x64xf32>
    %149 = arith.maximumf %147, %148 : vector<2x8x64xf32>
    %150 = vector.shape_cast %149 : vector<2x8x64xf32> to vector<16x64xf32>
    %c0_142 = arith.constant 0 : index
    %c0_143 = arith.constant 0 : index
    %151 = vector.load %arg6[%c0_142, %c0_143] : memref<64x64xf32, #tpu.memory_space<vmem>>, vector<64x64xf32>
    %cst_144 = arith.constant dense<0.000000e+00> : vector<16x64xf32>
    %152 = tpu.matmul %150, %151, %cst_144 {dimension_numbers = #tpu.dot_dimension_numbers<[1], [0], [0], [1], [0, 0, 1, 1], [], []>} : vector<16x64xf32>, vector<64x64xf32>, vector<16x64xf32> -> vector<16x64xf32>
    %cst_145 = arith.constant dense<0.000000e+00> : vector<64xf32>
    %153 = vector.multi_reduction <add>, %152, %cst_145 [0] : vector<16x64xf32> to vector<64xf32>
    %154 = vector.shape_cast %153 : vector<64xf32> to vector<1x64xf32>
    %cst_146 = arith.constant 7.812500e-03 : f32
    %155 = vector.broadcast %cst_146 : f32 to vector<1x64xf32>
    %156 = arith.mulf %154, %155 : vector<1x64xf32>
    %157 = vector.broadcast %156 : vector<1x64xf32> to vector<16x64xf32>
    %158 = arith.subf %150, %157 : vector<16x64xf32>
    %159 = arith.mulf %158, %158 : vector<16x64xf32>
    %cst_147 = arith.constant dense<0.000000e+00> : vector<16x64xf32>
    %160 = tpu.matmul %159, %151, %cst_147 {dimension_numbers = #tpu.dot_dimension_numbers<[1], [0], [0], [1], [0, 0, 1, 1], [], []>} : vector<16x64xf32>, vector<64x64xf32>, vector<16x64xf32> -> vector<16x64xf32>
    %cst_148 = arith.constant dense<0.000000e+00> : vector<64xf32>
    %161 = vector.multi_reduction <add>, %160, %cst_148 [0] : vector<16x64xf32> to vector<64xf32>
    %162 = vector.shape_cast %161 : vector<64xf32> to vector<1x64xf32>
    %cst_149 = arith.constant 7.812500e-03 : f32
    %163 = vector.broadcast %cst_149 : f32 to vector<1x64xf32>
    %164 = arith.mulf %162, %163 : vector<1x64xf32>
    %cst_150 = arith.constant 9.99999974E-6 : f32
    %165 = vector.broadcast %cst_150 : f32 to vector<1x64xf32>
    %166 = arith.addf %164, %165 : vector<1x64xf32>
    %167 = math.rsqrt %166 : vector<1x64xf32>
    %168 = vector.broadcast %167 : vector<1x64xf32> to vector<16x64xf32>
    %169 = arith.mulf %158, %168 : vector<16x64xf32>
    %170 = vector.shape_cast %169 : vector<16x64xf32> to vector<2x8x64xf32>
    %171 = vector.broadcast %131 : f32 to vector<2x8x64xf32>
    %172 = arith.mulf %171, %170 : vector<2x8x64xf32>
    %173 = arith.addf %130, %172 : vector<2x8x64xf32>
    %c4 = arith.constant 4 : index
    %174 = memref.load %arg0[%c4] : memref<20xf32, #tpu.memory_space<smem>>
    %cst_151 = arith.constant 0.000000e+00 : f32
    %175 = vector.broadcast %cst_151 : f32 to vector<2x8x64xf32>
    %176 = arith.maximumf %81, %175 : vector<2x8x64xf32>
    %c0_152 = arith.constant 0 : index
    %c1_153 = arith.constant 1 : index
    %c8_154 = arith.constant 8 : index
    %177 = vector.load %arg9[%c0_152, %c1_153, %c8_154] : memref<2x10x80xf32, #tpu.memory_space<vmem>>, vector<2x8x64xf32>
    tpu.vector_store %arg9[%c0_152, %c1_153, %c8_154], %176 {strides = array<i32>} : memref<2x10x80xf32, #tpu.memory_space<vmem>>, vector<2x8x64xf32>,
    %c0_155 = arith.constant 0 : index
    %c0_156 = arith.constant 0 : index
    %c0_157 = arith.constant 0 : index
    %178 = vector.load %arg9[%c0_155, %c0_156, %c0_157] : memref<2x10x80xf32, #tpu.memory_space<vmem>>, vector<2x8x80xf32>
    %179 = vector.shape_cast %178 : vector<2x8x80xf32> to vector<16x80xf32>
    %180 = arith.truncf %179 : vector<16x80xf32> to vector<16x80xbf16>
    %c0_158 = arith.constant 0 : index
    %c0_159 = arith.constant 0 : index
    %c0_160 = arith.constant 0 : index
    %c0_161 = arith.constant 0 : index
    %181 = vector.load %arg5[%c0_158, %c0_159, %c0_160, %c0_161] : memref<8x3x80x64xbf16, #tpu.memory_space<vmem>>, vector<1x1x80x64xbf16>
    %182 = vector.shape_cast %181 : vector<1x1x80x64xbf16> to vector<80x64xbf16>
    %cst_162 = arith.constant dense<0.000000e+00> : vector<16x64xf32>
    %183 = tpu.matmul %180, %182, %cst_162 {dimension_numbers = #tpu.dot_dimension_numbers<[1], [0], [0], [1], [0, 0, 1, 1], [], []>} : vector<16x80xbf16>, vector<80x64xbf16>, vector<16x64xf32> -> vector<16x64xf32>
    %c0_163 = arith.constant 0 : index
    %c1_164 = arith.constant 1 : index
    %c0_165 = arith.constant 0 : index
    %184 = vector.load %arg9[%c0_163, %c1_164, %c0_165] : memref<2x10x80xf32, #tpu.memory_space<vmem>>, vector<2x8x80xf32>
    %185 = vector.shape_cast %184 : vector<2x8x80xf32> to vector<16x80xf32>
    %186 = arith.truncf %185 : vector<16x80xf32> to vector<16x80xbf16>
    %c0_166 = arith.constant 0 : index
    %c1_167 = arith.constant 1 : index
    %c0_168 = arith.constant 0 : index
    %c0_169 = arith.constant 0 : index
    %187 = vector.load %arg5[%c0_166, %c1_167, %c0_168, %c0_169] : memref<8x3x80x64xbf16, #tpu.memory_space<vmem>>, vector<1x1x80x64xbf16>
    %188 = vector.shape_cast %187 : vector<1x1x80x64xbf16> to vector<80x64xbf16>
    %cst_170 = arith.constant dense<0.000000e+00> : vector<16x64xf32>
    %189 = tpu.matmul %186, %188, %cst_170 {dimension_numbers = #tpu.dot_dimension_numbers<[1], [0], [0], [1], [0, 0, 1, 1], [], []>} : vector<16x80xbf16>, vector<80x64xbf16>, vector<16x64xf32> -> vector<16x64xf32>
    %190 = arith.addf %183, %189 : vector<16x64xf32>
    %c0_171 = arith.constant 0 : index
    %c2_172 = arith.constant 2 : index
    %c0_173 = arith.constant 0 : index
    %191 = vector.load %arg9[%c0_171, %c2_172, %c0_173] : memref<2x10x80xf32, #tpu.memory_space<vmem>>, vector<2x8x80xf32>
    %192 = vector.shape_cast %191 : vector<2x8x80xf32> to vector<16x80xf32>
    %193 = arith.truncf %192 : vector<16x80xf32> to vector<16x80xbf16>
    %c0_174 = arith.constant 0 : index
    %c2_175 = arith.constant 2 : index
    %c0_176 = arith.constant 0 : index
    %c0_177 = arith.constant 0 : index
    %194 = vector.load %arg5[%c0_174, %c2_175, %c0_176, %c0_177] : memref<8x3x80x64xbf16, #tpu.memory_space<vmem>>, vector<1x1x80x64xbf16>
    %195 = vector.shape_cast %194 : vector<1x1x80x64xbf16> to vector<80x64xbf16>
    %cst_178 = arith.constant dense<0.000000e+00> : vector<16x64xf32>
    %196 = tpu.matmul %193, %195, %cst_178 {dimension_numbers = #tpu.dot_dimension_numbers<[1], [0], [0], [1], [0, 0, 1, 1], [], []>} : vector<16x80xbf16>, vector<80x64xbf16>, vector<16x64xf32> -> vector<16x64xf32>
    %197 = arith.addf %190, %196 : vector<16x64xf32>
    %198 = vector.shape_cast %197 : vector<16x64xf32> to vector<2x8x64xf32>
    %199 = vector.shape_cast %198 : vector<2x8x64xf32> to vector<16x64xf32>
    %c0_179 = arith.constant 0 : index
    %c0_180 = arith.constant 0 : index
    %200 = vector.load %arg6[%c0_179, %c0_180] : memref<64x64xf32, #tpu.memory_space<vmem>>, vector<64x64xf32>
    %cst_181 = arith.constant dense<0.000000e+00> : vector<16x64xf32>
    %201 = tpu.matmul %199, %200, %cst_181 {dimension_numbers = #tpu.dot_dimension_numbers<[1], [0], [0], [1], [0, 0, 1, 1], [], []>} : vector<16x64xf32>, vector<64x64xf32>, vector<16x64xf32> -> vector<16x64xf32>
    %cst_182 = arith.constant dense<0.000000e+00> : vector<64xf32>
    %202 = vector.multi_reduction <add>, %201, %cst_182 [0] : vector<16x64xf32> to vector<64xf32>
    %203 = vector.shape_cast %202 : vector<64xf32> to vector<1x64xf32>
    %cst_183 = arith.constant 7.812500e-03 : f32
    %204 = vector.broadcast %cst_183 : f32 to vector<1x64xf32>
    %205 = arith.mulf %203, %204 : vector<1x64xf32>
    %206 = vector.broadcast %205 : vector<1x64xf32> to vector<16x64xf32>
    %207 = arith.subf %199, %206 : vector<16x64xf32>
    %208 = arith.mulf %207, %207 : vector<16x64xf32>
    %cst_184 = arith.constant dense<0.000000e+00> : vector<16x64xf32>
    %209 = tpu.matmul %208, %200, %cst_184 {dimension_numbers = #tpu.dot_dimension_numbers<[1], [0], [0], [1], [0, 0, 1, 1], [], []>} : vector<16x64xf32>, vector<64x64xf32>, vector<16x64xf32> -> vector<16x64xf32>
    %cst_185 = arith.constant dense<0.000000e+00> : vector<64xf32>
    %210 = vector.multi_reduction <add>, %209, %cst_185 [0] : vector<16x64xf32> to vector<64xf32>
    %211 = vector.shape_cast %210 : vector<64xf32> to vector<1x64xf32>
    %cst_186 = arith.constant 7.812500e-03 : f32
    %212 = vector.broadcast %cst_186 : f32 to vector<1x64xf32>
    %213 = arith.mulf %211, %212 : vector<1x64xf32>
    %cst_187 = arith.constant 9.99999974E-6 : f32
    %214 = vector.broadcast %cst_187 : f32 to vector<1x64xf32>
    %215 = arith.addf %213, %214 : vector<1x64xf32>
    %216 = math.rsqrt %215 : vector<1x64xf32>
    %217 = vector.broadcast %216 : vector<1x64xf32> to vector<16x64xf32>
    %218 = arith.mulf %207, %217 : vector<16x64xf32>
    %219 = vector.shape_cast %218 : vector<16x64xf32> to vector<2x8x64xf32>
    %cst_188 = arith.constant 0.000000e+00 : f32
    %220 = vector.broadcast %cst_188 : f32 to vector<2x8x64xf32>
    %221 = arith.maximumf %219, %220 : vector<2x8x64xf32>
    %c0_189 = arith.constant 0 : index
    %c1_190 = arith.constant 1 : index
    %c8_191 = arith.constant 8 : index
    %222 = vector.load %arg9[%c0_189, %c1_190, %c8_191] : memref<2x10x80xf32, #tpu.memory_space<vmem>>, vector<2x8x64xf32>
    tpu.vector_store %arg9[%c0_189, %c1_190, %c8_191], %221 {strides = array<i32>} : memref<2x10x80xf32, #tpu.memory_space<vmem>>, vector<2x8x64xf32>,
    %c0_192 = arith.constant 0 : index
    %c0_193 = arith.constant 0 : index
    %c0_194 = arith.constant 0 : index
    %223 = vector.load %arg9[%c0_192, %c0_193, %c0_194] : memref<2x10x80xf32, #tpu.memory_space<vmem>>, vector<2x8x80xf32>
    %224 = vector.shape_cast %223 : vector<2x8x80xf32> to vector<16x80xf32>
    %225 = arith.truncf %224 : vector<16x80xf32> to vector<16x80xbf16>
    %c1_195 = arith.constant 1 : index
    %c0_196 = arith.constant 0 : index
    %c0_197 = arith.constant 0 : index
    %c0_198 = arith.constant 0 : index
    %226 = vector.load %arg5[%c1_195, %c0_196, %c0_197, %c0_198] : memref<8x3x80x64xbf16, #tpu.memory_space<vmem>>, vector<1x1x80x64xbf16>
    %227 = vector.shape_cast %226 : vector<1x1x80x64xbf16> to vector<80x64xbf16>
    %cst_199 = arith.constant dense<0.000000e+00> : vector<16x64xf32>
    %228 = tpu.matmul %225, %227, %cst_199 {dimension_numbers = #tpu.dot_dimension_numbers<[1], [0], [0], [1], [0, 0, 1, 1], [], []>} : vector<16x80xbf16>, vector<80x64xbf16>, vector<16x64xf32> -> vector<16x64xf32>
    %c0_200 = arith.constant 0 : index
    %c1_201 = arith.constant 1 : index
    %c0_202 = arith.constant 0 : index
    %229 = vector.load %arg9[%c0_200, %c1_201, %c0_202] : memref<2x10x80xf32, #tpu.memory_space<vmem>>, vector<2x8x80xf32>
    %230 = vector.shape_cast %229 : vector<2x8x80xf32> to vector<16x80xf32>
    %231 = arith.truncf %230 : vector<16x80xf32> to vector<16x80xbf16>
    %c1_203 = arith.constant 1 : index
    %c1_204 = arith.constant 1 : index
    %c0_205 = arith.constant 0 : index
    %c0_206 = arith.constant 0 : index
    %232 = vector.load %arg5[%c1_203, %c1_204, %c0_205, %c0_206] : memref<8x3x80x64xbf16, #tpu.memory_space<vmem>>, vector<1x1x80x64xbf16>
    %233 = vector.shape_cast %232 : vector<1x1x80x64xbf16> to vector<80x64xbf16>
    %cst_207 = arith.constant dense<0.000000e+00> : vector<16x64xf32>
    %234 = tpu.matmul %231, %233, %cst_207 {dimension_numbers = #tpu.dot_dimension_numbers<[1], [0], [0], [1], [0, 0, 1, 1], [], []>} : vector<16x80xbf16>, vector<80x64xbf16>, vector<16x64xf32> -> vector<16x64xf32>
    %235 = arith.addf %228, %234 : vector<16x64xf32>
    %c0_208 = arith.constant 0 : index
    %c2_209 = arith.constant 2 : index
    %c0_210 = arith.constant 0 : index
    %236 = vector.load %arg9[%c0_208, %c2_209, %c0_210] : memref<2x10x80xf32, #tpu.memory_space<vmem>>, vector<2x8x80xf32>
    %237 = vector.shape_cast %236 : vector<2x8x80xf32> to vector<16x80xf32>
    %238 = arith.truncf %237 : vector<16x80xf32> to vector<16x80xbf16>
    %c1_211 = arith.constant 1 : index
    %c2_212 = arith.constant 2 : index
    %c0_213 = arith.constant 0 : index
    %c0_214 = arith.constant 0 : index
    %239 = vector.load %arg5[%c1_211, %c2_212, %c0_213, %c0_214] : memref<8x3x80x64xbf16, #tpu.memory_space<vmem>>, vector<1x1x80x64xbf16>
    %240 = vector.shape_cast %239 : vector<1x1x80x64xbf16> to vector<80x64xbf16>
    %cst_215 = arith.constant dense<0.000000e+00> : vector<16x64xf32>
    %241 = tpu.matmul %238, %240, %cst_215 {dimension_numbers = #tpu.dot_dimension_numbers<[1], [0], [0], [1], [0, 0, 1, 1], [], []>} : vector<16x80xbf16>, vector<80x64xbf16>, vector<16x64xf32> -> vector<16x64xf32>
    %242 = arith.addf %235, %241 : vector<16x64xf32>
    %243 = vector.shape_cast %242 : vector<16x64xf32> to vector<2x8x64xf32>
    %244 = vector.shape_cast %243 : vector<2x8x64xf32> to vector<16x64xf32>
    %c0_216 = arith.constant 0 : index
    %c0_217 = arith.constant 0 : index
    %245 = vector.load %arg6[%c0_216, %c0_217] : memref<64x64xf32, #tpu.memory_space<vmem>>, vector<64x64xf32>
    %cst_218 = arith.constant dense<0.000000e+00> : vector<16x64xf32>
    %246 = tpu.matmul %244, %245, %cst_218 {dimension_numbers = #tpu.dot_dimension_numbers<[1], [0], [0], [1], [0, 0, 1, 1], [], []>} : vector<16x64xf32>, vector<64x64xf32>, vector<16x64xf32> -> vector<16x64xf32>
    %cst_219 = arith.constant dense<0.000000e+00> : vector<64xf32>
    %247 = vector.multi_reduction <add>, %246, %cst_219 [0] : vector<16x64xf32> to vector<64xf32>
    %248 = vector.shape_cast %247 : vector<64xf32> to vector<1x64xf32>
    %cst_220 = arith.constant 7.812500e-03 : f32
    %249 = vector.broadcast %cst_220 : f32 to vector<1x64xf32>
    %250 = arith.mulf %248, %249 : vector<1x64xf32>
    %251 = vector.broadcast %250 : vector<1x64xf32> to vector<16x64xf32>
    %252 = arith.subf %244, %251 : vector<16x64xf32>
    %253 = arith.mulf %252, %252 : vector<16x64xf32>
    %cst_221 = arith.constant dense<0.000000e+00> : vector<16x64xf32>
    %254 = tpu.matmul %253, %245, %cst_221 {dimension_numbers = #tpu.dot_dimension_numbers<[1], [0], [0], [1], [0, 0, 1, 1], [], []>} : vector<16x64xf32>, vector<64x64xf32>, vector<16x64xf32> -> vector<16x64xf32>
    %cst_222 = arith.constant dense<0.000000e+00> : vector<64xf32>
    %255 = vector.multi_reduction <add>, %254, %cst_222 [0] : vector<16x64xf32> to vector<64xf32>
    %256 = vector.shape_cast %255 : vector<64xf32> to vector<1x64xf32>
    %cst_223 = arith.constant 7.812500e-03 : f32
    %257 = vector.broadcast %cst_223 : f32 to vector<1x64xf32>
    %258 = arith.mulf %256, %257 : vector<1x64xf32>
    %cst_224 = arith.constant 9.99999974E-6 : f32
    %259 = vector.broadcast %cst_224 : f32 to vector<1x64xf32>
    %260 = arith.addf %258, %259 : vector<1x64xf32>
    %261 = math.rsqrt %260 : vector<1x64xf32>
    %262 = vector.broadcast %261 : vector<1x64xf32> to vector<16x64xf32>
    %263 = arith.mulf %252, %262 : vector<16x64xf32>
    %264 = vector.shape_cast %263 : vector<16x64xf32> to vector<2x8x64xf32>
    %265 = vector.broadcast %174 : f32 to vector<2x8x64xf32>
    %266 = arith.mulf %265, %264 : vector<2x8x64xf32>
    %267 = arith.addf %173, %266 : vector<2x8x64xf32>
    %c1_225 = arith.constant 1 : index
    %c0_226 = arith.constant 0 : index
    %c0_227 = arith.constant 0 : index
    %c0_228 = arith.constant 0 : index
    %268 = vector.load %arg11[%c1_225, %c0_226, %c0_227, %c0_228] : memref<4x2x8x64xf32, #tpu.memory_space<vmem>>, vector<1x2x8x64xf32>
    %269 = vector.shape_cast %268 : vector<1x2x8x64xf32> to vector<2x8x64xf32>
    %c6 = arith.constant 6 : index
    %270 = memref.load %arg0[%c6] : memref<20xf32, #tpu.memory_space<smem>>
    %271 = vector.broadcast %270 : f32 to vector<2x8x64xf32>
    %272 = arith.mulf %271, %269 : vector<2x8x64xf32>
    %c7 = arith.constant 7 : index
    %273 = memref.load %arg0[%c7] : memref<20xf32, #tpu.memory_space<smem>>
    %c0_229 = arith.constant 0 : index
    %c1_230 = arith.constant 1 : index
    %c8_231 = arith.constant 8 : index
    %274 = vector.load %arg9[%c0_229, %c1_230, %c8_231] : memref<2x10x80xf32, #tpu.memory_space<vmem>>, vector<2x8x64xf32>
    tpu.vector_store %arg9[%c0_229, %c1_230, %c8_231], %269 {strides = array<i32>} : memref<2x10x80xf32, #tpu.memory_space<vmem>>, vector<2x8x64xf32>,
    %c0_232 = arith.constant 0 : index
    %c0_233 = arith.constant 0 : index
    %c0_234 = arith.constant 0 : index
    %275 = vector.load %arg9[%c0_232, %c0_233, %c0_234] : memref<2x10x80xf32, #tpu.memory_space<vmem>>, vector<2x8x64xf32>
    %c0_235 = arith.constant 0 : index
    %c0_236 = arith.constant 0 : index
    %c8_237 = arith.constant 8 : index
    %276 = vector.load %arg9[%c0_235, %c0_236, %c8_237] : memref<2x10x80xf32, #tpu.memory_space<vmem>>, vector<2x8x64xf32>
    %277 = arith.addf %275, %276 : vector<2x8x64xf32>
    %c0_238 = arith.constant 0 : index
    %c0_239 = arith.constant 0 : index
    %c16_240 = arith.constant 16 : index
    %278 = vector.load %arg9[%c0_238, %c0_239, %c16_240] : memref<2x10x80xf32, #tpu.memory_space<vmem>>, vector<2x8x64xf32>
    %279 = arith.addf %277, %278 : vector<2x8x64xf32>
    %c0_241 = arith.constant 0 : index
    %c1_242 = arith.constant 1 : index
    %c0_243 = arith.constant 0 : index
    %280 = vector.load %arg9[%c0_241, %c1_242, %c0_243] : memref<2x10x80xf32, #tpu.memory_space<vmem>>, vector<2x8x64xf32>
    %281 = arith.addf %279, %280 : vector<2x8x64xf32>
    %c0_244 = arith.constant 0 : index
    %c1_245 = arith.constant 1 : index
    %c8_246 = arith.constant 8 : index
    %282 = vector.load %arg9[%c0_244, %c1_245, %c8_246] : memref<2x10x80xf32, #tpu.memory_space<vmem>>, vector<2x8x64xf32>
    %283 = arith.addf %281, %282 : vector<2x8x64xf32>
    %c0_247 = arith.constant 0 : index
    %c1_248 = arith.constant 1 : index
    %c16_249 = arith.constant 16 : index
    %284 = vector.load %arg9[%c0_247, %c1_248, %c16_249] : memref<2x10x80xf32, #tpu.memory_space<vmem>>, vector<2x8x64xf32>
    %285 = arith.addf %283, %284 : vector<2x8x64xf32>
    %c0_250 = arith.constant 0 : index
    %c2_251 = arith.constant 2 : index
    %c0_252 = arith.constant 0 : index
    %286 = vector.load %arg9[%c0_250, %c2_251, %c0_252] : memref<2x10x80xf32, #tpu.memory_space<vmem>>, vector<2x8x64xf32>
    %287 = arith.addf %285, %286 : vector<2x8x64xf32>
    %c0_253 = arith.constant 0 : index
    %c2_254 = arith.constant 2 : index
    %c8_255 = arith.constant 8 : index
    %288 = vector.load %arg9[%c0_253, %c2_254, %c8_255] : memref<2x10x80xf32, #tpu.memory_space<vmem>>, vector<2x8x64xf32>
    %289 = arith.addf %287, %288 : vector<2x8x64xf32>
    %c0_256 = arith.constant 0 : index
    %c2_257 = arith.constant 2 : index
    %c16_258 = arith.constant 16 : index
    %290 = vector.load %arg9[%c0_256, %c2_257, %c16_258] : memref<2x10x80xf32, #tpu.memory_space<vmem>>, vector<2x8x64xf32>
    %291 = arith.addf %289, %290 : vector<2x8x64xf32>
    %c0_259 = arith.constant 0 : index
    %c0_260 = arith.constant 0 : index
    %c0_261 = arith.constant 0 : index
    %292 = vector.load %arg7[%c0_259, %c0_260, %c0_261] : memref<1x8x64xf32, #tpu.memory_space<vmem>>, vector<1x8x64xf32>
    %293 = vector.broadcast %292 : vector<1x8x64xf32> to vector<2x8x64xf32>
    %294 = arith.mulf %291, %293 : vector<2x8x64xf32>
    %295 = vector.shape_cast %294 : vector<2x8x64xf32> to vector<16x64xf32>
    %c0_262 = arith.constant 0 : index
    %c0_263 = arith.constant 0 : index
    %296 = vector.load %arg6[%c0_262, %c0_263] : memref<64x64xf32, #tpu.memory_space<vmem>>, vector<64x64xf32>
    %cst_264 = arith.constant dense<0.000000e+00> : vector<16x64xf32>
    %297 = tpu.matmul %295, %296, %cst_264 {dimension_numbers = #tpu.dot_dimension_numbers<[1], [0], [0], [1], [0, 0, 1, 1], [], []>} : vector<16x64xf32>, vector<64x64xf32>, vector<16x64xf32> -> vector<16x64xf32>
    %cst_265 = arith.constant dense<0.000000e+00> : vector<64xf32>
    %298 = vector.multi_reduction <add>, %297, %cst_265 [0] : vector<16x64xf32> to vector<64xf32>
    %299 = vector.shape_cast %298 : vector<64xf32> to vector<1x64xf32>
    %cst_266 = arith.constant 7.812500e-03 : f32
    %300 = vector.broadcast %cst_266 : f32 to vector<1x64xf32>
    %301 = arith.mulf %299, %300 : vector<1x64xf32>
    %302 = vector.broadcast %301 : vector<1x64xf32> to vector<16x64xf32>
    %303 = arith.subf %295, %302 : vector<16x64xf32>
    %304 = arith.mulf %303, %303 : vector<16x64xf32>
    %cst_267 = arith.constant dense<0.000000e+00> : vector<16x64xf32>
    %305 = tpu.matmul %304, %296, %cst_267 {dimension_numbers = #tpu.dot_dimension_numbers<[1], [0], [0], [1], [0, 0, 1, 1], [], []>} : vector<16x64xf32>, vector<64x64xf32>, vector<16x64xf32> -> vector<16x64xf32>
    %cst_268 = arith.constant dense<0.000000e+00> : vector<64xf32>
    %306 = vector.multi_reduction <add>, %305, %cst_268 [0] : vector<16x64xf32> to vector<64xf32>
    %307 = vector.shape_cast %306 : vector<64xf32> to vector<1x64xf32>
    %cst_269 = arith.constant 7.812500e-03 : f32
    %308 = vector.broadcast %cst_269 : f32 to vector<1x64xf32>
    %309 = arith.mulf %307, %308 : vector<1x64xf32>
    %cst_270 = arith.constant 9.99999974E-6 : f32
    %310 = vector.broadcast %cst_270 : f32 to vector<1x64xf32>
    %311 = arith.addf %309, %310 : vector<1x64xf32>
    %312 = math.rsqrt %311 : vector<1x64xf32>
    %313 = vector.broadcast %312 : vector<1x64xf32> to vector<16x64xf32>
    %314 = arith.mulf %303, %313 : vector<16x64xf32>
    %315 = vector.shape_cast %314 : vector<16x64xf32> to vector<2x8x64xf32>
    %316 = vector.broadcast %273 : f32 to vector<2x8x64xf32>
    %317 = arith.mulf %316, %315 : vector<2x8x64xf32>
    %318 = arith.addf %272, %317 : vector<2x8x64xf32>
    %c8_271 = arith.constant 8 : index
    %319 = memref.load %arg0[%c8_271] : memref<20xf32, #tpu.memory_space<smem>>
    %c0_272 = arith.constant 0 : index
    %c1_273 = arith.constant 1 : index
    %c8_274 = arith.constant 8 : index
    %320 = vector.load %arg10[%c0_272, %c1_273, %c8_274] : memref<2x10x80xf32, #tpu.memory_space<vmem>>, vector<2x8x64xf32>
    tpu.vector_store %arg10[%c0_272, %c1_273, %c8_274], %269 {strides = array<i32>} : memref<2x10x80xf32, #tpu.memory_space<vmem>>, vector<2x8x64xf32>,
    %c0_275 = arith.constant 0 : index
    %c0_276 = arith.constant 0 : index
    %c0_277 = arith.constant 0 : index
    %321 = vector.load %arg10[%c0_275, %c0_276, %c0_277] : memref<2x10x80xf32, #tpu.memory_space<vmem>>, vector<2x8x64xf32>
    %c0_278 = arith.constant 0 : index
    %c0_279 = arith.constant 0 : index
    %c8_280 = arith.constant 8 : index
    %322 = vector.load %arg10[%c0_278, %c0_279, %c8_280] : memref<2x10x80xf32, #tpu.memory_space<vmem>>, vector<2x8x64xf32>
    %323 = arith.maximumf %321, %322 : vector<2x8x64xf32>
    %c0_281 = arith.constant 0 : index
    %c0_282 = arith.constant 0 : index
    %c16_283 = arith.constant 16 : index
    %324 = vector.load %arg10[%c0_281, %c0_282, %c16_283] : memref<2x10x80xf32, #tpu.memory_space<vmem>>, vector<2x8x64xf32>
    %325 = arith.maximumf %323, %324 : vector<2x8x64xf32>
    %c0_284 = arith.constant 0 : index
    %c1_285 = arith.constant 1 : index
    %c0_286 = arith.constant 0 : index
    %326 = vector.load %arg10[%c0_284, %c1_285, %c0_286] : memref<2x10x80xf32, #tpu.memory_space<vmem>>, vector<2x8x64xf32>
    %327 = arith.maximumf %325, %326 : vector<2x8x64xf32>
    %c0_287 = arith.constant 0 : index
    %c1_288 = arith.constant 1 : index
    %c8_289 = arith.constant 8 : index
    %328 = vector.load %arg10[%c0_287, %c1_288, %c8_289] : memref<2x10x80xf32, #tpu.memory_space<vmem>>, vector<2x8x64xf32>
    %329 = arith.maximumf %327, %328 : vector<2x8x64xf32>
    %c0_290 = arith.constant 0 : index
    %c1_291 = arith.constant 1 : index
    %c16_292 = arith.constant 16 : index
    %330 = vector.load %arg10[%c0_290, %c1_291, %c16_292] : memref<2x10x80xf32, #tpu.memory_space<vmem>>, vector<2x8x64xf32>
    %331 = arith.maximumf %329, %330 : vector<2x8x64xf32>
    %c0_293 = arith.constant 0 : index
    %c2_294 = arith.constant 2 : index
    %c0_295 = arith.constant 0 : index
    %332 = vector.load %arg10[%c0_293, %c2_294, %c0_295] : memref<2x10x80xf32, #tpu.memory_space<vmem>>, vector<2x8x64xf32>
    %333 = arith.maximumf %331, %332 : vector<2x8x64xf32>
    %c0_296 = arith.constant 0 : index
    %c2_297 = arith.constant 2 : index
    %c8_298 = arith.constant 8 : index
    %334 = vector.load %arg10[%c0_296, %c2_297, %c8_298] : memref<2x10x80xf32, #tpu.memory_space<vmem>>, vector<2x8x64xf32>
    %335 = arith.maximumf %333, %334 : vector<2x8x64xf32>
    %c0_299 = arith.constant 0 : index
    %c2_300 = arith.constant 2 : index
    %c16_301 = arith.constant 16 : index
    %336 = vector.load %arg10[%c0_299, %c2_300, %c16_301] : memref<2x10x80xf32, #tpu.memory_space<vmem>>, vector<2x8x64xf32>
    %337 = arith.maximumf %335, %336 : vector<2x8x64xf32>
    %338 = vector.shape_cast %337 : vector<2x8x64xf32> to vector<16x64xf32>
    %c0_302 = arith.constant 0 : index
    %c0_303 = arith.constant 0 : index
    %339 = vector.load %arg6[%c0_302, %c0_303] : memref<64x64xf32, #tpu.memory_space<vmem>>, vector<64x64xf32>
    %cst_304 = arith.constant dense<0.000000e+00> : vector<16x64xf32>
    %340 = tpu.matmul %338, %339, %cst_304 {dimension_numbers = #tpu.dot_dimension_numbers<[1], [0], [0], [1], [0, 0, 1, 1], [], []>} : vector<16x64xf32>, vector<64x64xf32>, vector<16x64xf32> -> vector<16x64xf32>
    %cst_305 = arith.constant dense<0.000000e+00> : vector<64xf32>
    %341 = vector.multi_reduction <add>, %340, %cst_305 [0] : vector<16x64xf32> to vector<64xf32>
    %342 = vector.shape_cast %341 : vector<64xf32> to vector<1x64xf32>
    %cst_306 = arith.constant 7.812500e-03 : f32
    %343 = vector.broadcast %cst_306 : f32 to vector<1x64xf32>
    %344 = arith.mulf %342, %343 : vector<1x64xf32>
    %345 = vector.broadcast %344 : vector<1x64xf32> to vector<16x64xf32>
    %346 = arith.subf %338, %345 : vector<16x64xf32>
    %347 = arith.mulf %346, %346 : vector<16x64xf32>
    %cst_307 = arith.constant dense<0.000000e+00> : vector<16x64xf32>
    %348 = tpu.matmul %347, %339, %cst_307 {dimension_numbers = #tpu.dot_dimension_numbers<[1], [0], [0], [1], [0, 0, 1, 1], [], []>} : vector<16x64xf32>, vector<64x64xf32>, vector<16x64xf32> -> vector<16x64xf32>
    %cst_308 = arith.constant dense<0.000000e+00> : vector<64xf32>
    %349 = vector.multi_reduction <add>, %348, %cst_308 [0] : vector<16x64xf32> to vector<64xf32>
    %350 = vector.shape_cast %349 : vector<64xf32> to vector<1x64xf32>
    %cst_309 = arith.constant 7.812500e-03 : f32
    %351 = vector.broadcast %cst_309 : f32 to vector<1x64xf32>
    %352 = arith.mulf %350, %351 : vector<1x64xf32>
    %cst_310 = arith.constant 9.99999974E-6 : f32
    %353 = vector.broadcast %cst_310 : f32 to vector<1x64xf32>
    %354 = arith.addf %352, %353 : vector<1x64xf32>
    %355 = math.rsqrt %354 : vector<1x64xf32>
    %356 = vector.broadcast %355 : vector<1x64xf32> to vector<16x64xf32>
    %357 = arith.mulf %346, %356 : vector<16x64xf32>
    %358 = vector.shape_cast %357 : vector<16x64xf32> to vector<2x8x64xf32>
    %359 = vector.broadcast %319 : f32 to vector<2x8x64xf32>
    %360 = arith.mulf %359, %358 : vector<2x8x64xf32>
    %361 = arith.addf %318, %360 : vector<2x8x64xf32>
    %c9_311 = arith.constant 9 : index
    %362 = memref.load %arg0[%c9_311] : memref<20xf32, #tpu.memory_space<smem>>
    %cst_312 = arith.constant 0.000000e+00 : f32
    %363 = vector.broadcast %cst_312 : f32 to vector<2x8x64xf32>
    %364 = arith.maximumf %269, %363 : vector<2x8x64xf32>
    %c0_313 = arith.constant 0 : index
    %c1_314 = arith.constant 1 : index
    %c8_315 = arith.constant 8 : index
    %365 = vector.load %arg9[%c0_313, %c1_314, %c8_315] : memref<2x10x80xf32, #tpu.memory_space<vmem>>, vector<2x8x64xf32>
    tpu.vector_store %arg9[%c0_313, %c1_314, %c8_315], %364 {strides = array<i32>} : memref<2x10x80xf32, #tpu.memory_space<vmem>>, vector<2x8x64xf32>,
    %c0_316 = arith.constant 0 : index
    %c0_317 = arith.constant 0 : index
    %c0_318 = arith.constant 0 : index
    %366 = vector.load %arg9[%c0_316, %c0_317, %c0_318] : memref<2x10x80xf32, #tpu.memory_space<vmem>>, vector<2x8x80xf32>
    %367 = vector.shape_cast %366 : vector<2x8x80xf32> to vector<16x80xf32>
    %368 = arith.truncf %367 : vector<16x80xf32> to vector<16x80xbf16>
    %c2_319 = arith.constant 2 : index
    %c0_320 = arith.constant 0 : index
    %c0_321 = arith.constant 0 : index
    %c0_322 = arith.constant 0 : index
    %369 = vector.load %arg5[%c2_319, %c0_320, %c0_321, %c0_322] : memref<8x3x80x64xbf16, #tpu.memory_space<vmem>>, vector<1x1x80x64xbf16>
    %370 = vector.shape_cast %369 : vector<1x1x80x64xbf16> to vector<80x64xbf16>
    %cst_323 = arith.constant dense<0.000000e+00> : vector<16x64xf32>
    %371 = tpu.matmul %368, %370, %cst_323 {dimension_numbers = #tpu.dot_dimension_numbers<[1], [0], [0], [1], [0, 0, 1, 1], [], []>} : vector<16x80xbf16>, vector<80x64xbf16>, vector<16x64xf32> -> vector<16x64xf32>
    %c0_324 = arith.constant 0 : index
    %c1_325 = arith.constant 1 : index
    %c0_326 = arith.constant 0 : index
    %372 = vector.load %arg9[%c0_324, %c1_325, %c0_326] : memref<2x10x80xf32, #tpu.memory_space<vmem>>, vector<2x8x80xf32>
    %373 = vector.shape_cast %372 : vector<2x8x80xf32> to vector<16x80xf32>
    %374 = arith.truncf %373 : vector<16x80xf32> to vector<16x80xbf16>
    %c2_327 = arith.constant 2 : index
    %c1_328 = arith.constant 1 : index
    %c0_329 = arith.constant 0 : index
    %c0_330 = arith.constant 0 : index
    %375 = vector.load %arg5[%c2_327, %c1_328, %c0_329, %c0_330] : memref<8x3x80x64xbf16, #tpu.memory_space<vmem>>, vector<1x1x80x64xbf16>
    %376 = vector.shape_cast %375 : vector<1x1x80x64xbf16> to vector<80x64xbf16>
    %cst_331 = arith.constant dense<0.000000e+00> : vector<16x64xf32>
    %377 = tpu.matmul %374, %376, %cst_331 {dimension_numbers = #tpu.dot_dimension_numbers<[1], [0], [0], [1], [0, 0, 1, 1], [], []>} : vector<16x80xbf16>, vector<80x64xbf16>, vector<16x64xf32> -> vector<16x64xf32>
    %378 = arith.addf %371, %377 : vector<16x64xf32>
    %c0_332 = arith.constant 0 : index
    %c2_333 = arith.constant 2 : index
    %c0_334 = arith.constant 0 : index
    %379 = vector.load %arg9[%c0_332, %c2_333, %c0_334] : memref<2x10x80xf32, #tpu.memory_space<vmem>>, vector<2x8x80xf32>
    %380 = vector.shape_cast %379 : vector<2x8x80xf32> to vector<16x80xf32>
    %381 = arith.truncf %380 : vector<16x80xf32> to vector<16x80xbf16>
    %c2_335 = arith.constant 2 : index
    %c2_336 = arith.constant 2 : index
    %c0_337 = arith.constant 0 : index
    %c0_338 = arith.constant 0 : index
    %382 = vector.load %arg5[%c2_335, %c2_336, %c0_337, %c0_338] : memref<8x3x80x64xbf16, #tpu.memory_space<vmem>>, vector<1x1x80x64xbf16>
    %383 = vector.shape_cast %382 : vector<1x1x80x64xbf16> to vector<80x64xbf16>
    %cst_339 = arith.constant dense<0.000000e+00> : vector<16x64xf32>
    %384 = tpu.matmul %381, %383, %cst_339 {dimension_numbers = #tpu.dot_dimension_numbers<[1], [0], [0], [1], [0, 0, 1, 1], [], []>} : vector<16x80xbf16>, vector<80x64xbf16>, vector<16x64xf32> -> vector<16x64xf32>
    %385 = arith.addf %378, %384 : vector<16x64xf32>
    %386 = vector.shape_cast %385 : vector<16x64xf32> to vector<2x8x64xf32>
    %387 = vector.shape_cast %386 : vector<2x8x64xf32> to vector<16x64xf32>
    %c0_340 = arith.constant 0 : index
    %c0_341 = arith.constant 0 : index
    %388 = vector.load %arg6[%c0_340, %c0_341] : memref<64x64xf32, #tpu.memory_space<vmem>>, vector<64x64xf32>
    %cst_342 = arith.constant dense<0.000000e+00> : vector<16x64xf32>
    %389 = tpu.matmul %387, %388, %cst_342 {dimension_numbers = #tpu.dot_dimension_numbers<[1], [0], [0], [1], [0, 0, 1, 1], [], []>} : vector<16x64xf32>, vector<64x64xf32>, vector<16x64xf32> -> vector<16x64xf32>
    %cst_343 = arith.constant dense<0.000000e+00> : vector<64xf32>
    %390 = vector.multi_reduction <add>, %389, %cst_343 [0] : vector<16x64xf32> to vector<64xf32>
    %391 = vector.shape_cast %390 : vector<64xf32> to vector<1x64xf32>
    %cst_344 = arith.constant 7.812500e-03 : f32
    %392 = vector.broadcast %cst_344 : f32 to vector<1x64xf32>
    %393 = arith.mulf %391, %392 : vector<1x64xf32>
    %394 = vector.broadcast %393 : vector<1x64xf32> to vector<16x64xf32>
    %395 = arith.subf %387, %394 : vector<16x64xf32>
    %396 = arith.mulf %395, %395 : vector<16x64xf32>
    %cst_345 = arith.constant dense<0.000000e+00> : vector<16x64xf32>
    %397 = tpu.matmul %396, %388, %cst_345 {dimension_numbers = #tpu.dot_dimension_numbers<[1], [0], [0], [1], [0, 0, 1, 1], [], []>} : vector<16x64xf32>, vector<64x64xf32>, vector<16x64xf32> -> vector<16x64xf32>
    %cst_346 = arith.constant dense<0.000000e+00> : vector<64xf32>
    %398 = vector.multi_reduction <add>, %397, %cst_346 [0] : vector<16x64xf32> to vector<64xf32>
    %399 = vector.shape_cast %398 : vector<64xf32> to vector<1x64xf32>
    %cst_347 = arith.constant 7.812500e-03 : f32
    %400 = vector.broadcast %cst_347 : f32 to vector<1x64xf32>
    %401 = arith.mulf %399, %400 : vector<1x64xf32>
    %cst_348 = arith.constant 9.99999974E-6 : f32
    %402 = vector.broadcast %cst_348 : f32 to vector<1x64xf32>
    %403 = arith.addf %401, %402 : vector<1x64xf32>
    %404 = math.rsqrt %403 : vector<1x64xf32>
    %405 = vector.broadcast %404 : vector<1x64xf32> to vector<16x64xf32>
    %406 = arith.mulf %395, %405 : vector<16x64xf32>
    %407 = vector.shape_cast %406 : vector<16x64xf32> to vector<2x8x64xf32>
    %cst_349 = arith.constant 0.000000e+00 : f32
    %408 = vector.broadcast %cst_349 : f32 to vector<2x8x64xf32>
    %409 = arith.maximumf %407, %408 : vector<2x8x64xf32>
    %c0_350 = arith.constant 0 : index
    %c1_351 = arith.constant 1 : index
    %c8_352 = arith.constant 8 : index
    %410 = vector.load %arg9[%c0_350, %c1_351, %c8_352] : memref<2x10x80xf32, #tpu.memory_space<vmem>>, vector<2x8x64xf32>
    tpu.vector_store %arg9[%c0_350, %c1_351, %c8_352], %409 {strides = array<i32>} : memref<2x10x80xf32, #tpu.memory_space<vmem>>, vector<2x8x64xf32>,
    %c0_353 = arith.constant 0 : index
    %c0_354 = arith.constant 0 : index
    %c0_355 = arith.constant 0 : index
    %411 = vector.load %arg9[%c0_353, %c0_354, %c0_355] : memref<2x10x80xf32, #tpu.memory_space<vmem>>, vector<2x8x80xf32>
    %412 = vector.shape_cast %411 : vector<2x8x80xf32> to vector<16x80xf32>
    %413 = arith.truncf %412 : vector<16x80xf32> to vector<16x80xbf16>
    %c3_356 = arith.constant 3 : index
    %c0_357 = arith.constant 0 : index
    %c0_358 = arith.constant 0 : index
    %c0_359 = arith.constant 0 : index
    %414 = vector.load %arg5[%c3_356, %c0_357, %c0_358, %c0_359] : memref<8x3x80x64xbf16, #tpu.memory_space<vmem>>, vector<1x1x80x64xbf16>
    %415 = vector.shape_cast %414 : vector<1x1x80x64xbf16> to vector<80x64xbf16>
    %cst_360 = arith.constant dense<0.000000e+00> : vector<16x64xf32>
    %416 = tpu.matmul %413, %415, %cst_360 {dimension_numbers = #tpu.dot_dimension_numbers<[1], [0], [0], [1], [0, 0, 1, 1], [], []>} : vector<16x80xbf16>, vector<80x64xbf16>, vector<16x64xf32> -> vector<16x64xf32>
    %c0_361 = arith.constant 0 : index
    %c1_362 = arith.constant 1 : index
    %c0_363 = arith.constant 0 : index
    %417 = vector.load %arg9[%c0_361, %c1_362, %c0_363] : memref<2x10x80xf32, #tpu.memory_space<vmem>>, vector<2x8x80xf32>
    %418 = vector.shape_cast %417 : vector<2x8x80xf32> to vector<16x80xf32>
    %419 = arith.truncf %418 : vector<16x80xf32> to vector<16x80xbf16>
    %c3_364 = arith.constant 3 : index
    %c1_365 = arith.constant 1 : index
    %c0_366 = arith.constant 0 : index
    %c0_367 = arith.constant 0 : index
    %420 = vector.load %arg5[%c3_364, %c1_365, %c0_366, %c0_367] : memref<8x3x80x64xbf16, #tpu.memory_space<vmem>>, vector<1x1x80x64xbf16>
    %421 = vector.shape_cast %420 : vector<1x1x80x64xbf16> to vector<80x64xbf16>
    %cst_368 = arith.constant dense<0.000000e+00> : vector<16x64xf32>
    %422 = tpu.matmul %419, %421, %cst_368 {dimension_numbers = #tpu.dot_dimension_numbers<[1], [0], [0], [1], [0, 0, 1, 1], [], []>} : vector<16x80xbf16>, vector<80x64xbf16>, vector<16x64xf32> -> vector<16x64xf32>
    %423 = arith.addf %416, %422 : vector<16x64xf32>
    %c0_369 = arith.constant 0 : index
    %c2_370 = arith.constant 2 : index
    %c0_371 = arith.constant 0 : index
    %424 = vector.load %arg9[%c0_369, %c2_370, %c0_371] : memref<2x10x80xf32, #tpu.memory_space<vmem>>, vector<2x8x80xf32>
    %425 = vector.shape_cast %424 : vector<2x8x80xf32> to vector<16x80xf32>
    %426 = arith.truncf %425 : vector<16x80xf32> to vector<16x80xbf16>
    %c3_372 = arith.constant 3 : index
    %c2_373 = arith.constant 2 : index
    %c0_374 = arith.constant 0 : index
    %c0_375 = arith.constant 0 : index
    %427 = vector.load %arg5[%c3_372, %c2_373, %c0_374, %c0_375] : memref<8x3x80x64xbf16, #tpu.memory_space<vmem>>, vector<1x1x80x64xbf16>
    %428 = vector.shape_cast %427 : vector<1x1x80x64xbf16> to vector<80x64xbf16>
    %cst_376 = arith.constant dense<0.000000e+00> : vector<16x64xf32>
    %429 = tpu.matmul %426, %428, %cst_376 {dimension_numbers = #tpu.dot_dimension_numbers<[1], [0], [0], [1], [0, 0, 1, 1], [], []>} : vector<16x80xbf16>, vector<80x64xbf16>, vector<16x64xf32> -> vector<16x64xf32>
    %430 = arith.addf %423, %429 : vector<16x64xf32>
    %431 = vector.shape_cast %430 : vector<16x64xf32> to vector<2x8x64xf32>
    %432 = vector.shape_cast %431 : vector<2x8x64xf32> to vector<16x64xf32>
    %c0_377 = arith.constant 0 : index
    %c0_378 = arith.constant 0 : index
    %433 = vector.load %arg6[%c0_377, %c0_378] : memref<64x64xf32, #tpu.memory_space<vmem>>, vector<64x64xf32>
    %cst_379 = arith.constant dense<0.000000e+00> : vector<16x64xf32>
    %434 = tpu.matmul %432, %433, %cst_379 {dimension_numbers = #tpu.dot_dimension_numbers<[1], [0], [0], [1], [0, 0, 1, 1], [], []>} : vector<16x64xf32>, vector<64x64xf32>, vector<16x64xf32> -> vector<16x64xf32>
    %cst_380 = arith.constant dense<0.000000e+00> : vector<64xf32>
    %435 = vector.multi_reduction <add>, %434, %cst_380 [0] : vector<16x64xf32> to vector<64xf32>
    %436 = vector.shape_cast %435 : vector<64xf32> to vector<1x64xf32>
    %cst_381 = arith.constant 7.812500e-03 : f32
    %437 = vector.broadcast %cst_381 : f32 to vector<1x64xf32>
    %438 = arith.mulf %436, %437 : vector<1x64xf32>
    %439 = vector.broadcast %438 : vector<1x64xf32> to vector<16x64xf32>
    %440 = arith.subf %432, %439 : vector<16x64xf32>
    %441 = arith.mulf %440, %440 : vector<16x64xf32>
    %cst_382 = arith.constant dense<0.000000e+00> : vector<16x64xf32>
    %442 = tpu.matmul %441, %433, %cst_382 {dimension_numbers = #tpu.dot_dimension_numbers<[1], [0], [0], [1], [0, 0, 1, 1], [], []>} : vector<16x64xf32>, vector<64x64xf32>, vector<16x64xf32> -> vector<16x64xf32>
    %cst_383 = arith.constant dense<0.000000e+00> : vector<64xf32>
    %443 = vector.multi_reduction <add>, %442, %cst_383 [0] : vector<16x64xf32> to vector<64xf32>
    %444 = vector.shape_cast %443 : vector<64xf32> to vector<1x64xf32>
    %cst_384 = arith.constant 7.812500e-03 : f32
    %445 = vector.broadcast %cst_384 : f32 to vector<1x64xf32>
    %446 = arith.mulf %444, %445 : vector<1x64xf32>
    %cst_385 = arith.constant 9.99999974E-6 : f32
    %447 = vector.broadcast %cst_385 : f32 to vector<1x64xf32>
    %448 = arith.addf %446, %447 : vector<1x64xf32>
    %449 = math.rsqrt %448 : vector<1x64xf32>
    %450 = vector.broadcast %449 : vector<1x64xf32> to vector<16x64xf32>
    %451 = arith.mulf %440, %450 : vector<16x64xf32>
    %452 = vector.shape_cast %451 : vector<16x64xf32> to vector<2x8x64xf32>
    %453 = vector.broadcast %362 : f32 to vector<2x8x64xf32>
    %454 = arith.mulf %453, %452 : vector<2x8x64xf32>
    %455 = arith.addf %361, %454 : vector<2x8x64xf32>
    %456 = arith.addf %267, %455 : vector<2x8x64xf32>
    %c2_386 = arith.constant 2 : index
    %c0_387 = arith.constant 0 : index
    %c0_388 = arith.constant 0 : index
    %c0_389 = arith.constant 0 : index
    %457 = vector.load %arg11[%c2_386, %c0_387, %c0_388, %c0_389] : memref<4x2x8x64xf32, #tpu.memory_space<vmem>>, vector<1x2x8x64xf32>
    %458 = vector.shape_cast %457 : vector<1x2x8x64xf32> to vector<2x8x64xf32>
    %459 = vector.shape_cast %456 : vector<2x8x64xf32> to vector<1x2x8x64xf32>
    tpu.vector_store %arg11[%c2_386, %c0_387, %c0_388, %c0_389], %459 {strides = array<i32>} : memref<4x2x8x64xf32, #tpu.memory_space<vmem>>, vector<1x2x8x64xf32>,
    %c0_390 = arith.constant 0 : index
    %c0_391 = arith.constant 0 : index
    %c0_392 = arith.constant 0 : index
    %c0_393 = arith.constant 0 : index
    %460 = vector.load %arg11[%c0_390, %c0_391, %c0_392, %c0_393] : memref<4x2x8x64xf32, #tpu.memory_space<vmem>>, vector<1x2x8x64xf32>
    %461 = vector.shape_cast %460 : vector<1x2x8x64xf32> to vector<2x8x64xf32>
    %c11 = arith.constant 11 : index
    %462 = memref.load %arg0[%c11] : memref<20xf32, #tpu.memory_space<smem>>
    %463 = vector.broadcast %462 : f32 to vector<2x8x64xf32>
    %464 = arith.mulf %463, %461 : vector<2x8x64xf32>
    %c12 = arith.constant 12 : index
    %465 = memref.load %arg0[%c12] : memref<20xf32, #tpu.memory_space<smem>>
    %c0_394 = arith.constant 0 : index
    %c1_395 = arith.constant 1 : index
    %c8_396 = arith.constant 8 : index
    %466 = vector.load %arg9[%c0_394, %c1_395, %c8_396] : memref<2x10x80xf32, #tpu.memory_space<vmem>>, vector<2x8x64xf32>
    tpu.vector_store %arg9[%c0_394, %c1_395, %c8_396], %461 {strides = array<i32>} : memref<2x10x80xf32, #tpu.memory_space<vmem>>, vector<2x8x64xf32>,
    %c0_397 = arith.constant 0 : index
    %c0_398 = arith.constant 0 : index
    %c0_399 = arith.constant 0 : index
    %467 = vector.load %arg9[%c0_397, %c0_398, %c0_399] : memref<2x10x80xf32, #tpu.memory_space<vmem>>, vector<2x8x64xf32>
    %c0_400 = arith.constant 0 : index
    %c0_401 = arith.constant 0 : index
    %c8_402 = arith.constant 8 : index
    %468 = vector.load %arg9[%c0_400, %c0_401, %c8_402] : memref<2x10x80xf32, #tpu.memory_space<vmem>>, vector<2x8x64xf32>
    %469 = arith.addf %467, %468 : vector<2x8x64xf32>
    %c0_403 = arith.constant 0 : index
    %c0_404 = arith.constant 0 : index
    %c16_405 = arith.constant 16 : index
    %470 = vector.load %arg9[%c0_403, %c0_404, %c16_405] : memref<2x10x80xf32, #tpu.memory_space<vmem>>, vector<2x8x64xf32>
    %471 = arith.addf %469, %470 : vector<2x8x64xf32>
    %c0_406 = arith.constant 0 : index
    %c1_407 = arith.constant 1 : index
    %c0_408 = arith.constant 0 : index
    %472 = vector.load %arg9[%c0_406, %c1_407, %c0_408] : memref<2x10x80xf32, #tpu.memory_space<vmem>>, vector<2x8x64xf32>
    %473 = arith.addf %471, %472 : vector<2x8x64xf32>
    %c0_409 = arith.constant 0 : index
    %c1_410 = arith.constant 1 : index
    %c8_411 = arith.constant 8 : index
    %474 = vector.load %arg9[%c0_409, %c1_410, %c8_411] : memref<2x10x80xf32, #tpu.memory_space<vmem>>, vector<2x8x64xf32>
    %475 = arith.addf %473, %474 : vector<2x8x64xf32>
    %c0_412 = arith.constant 0 : index
    %c1_413 = arith.constant 1 : index
    %c16_414 = arith.constant 16 : index
    %476 = vector.load %arg9[%c0_412, %c1_413, %c16_414] : memref<2x10x80xf32, #tpu.memory_space<vmem>>, vector<2x8x64xf32>
    %477 = arith.addf %475, %476 : vector<2x8x64xf32>
    %c0_415 = arith.constant 0 : index
    %c2_416 = arith.constant 2 : index
    %c0_417 = arith.constant 0 : index
    %478 = vector.load %arg9[%c0_415, %c2_416, %c0_417] : memref<2x10x80xf32, #tpu.memory_space<vmem>>, vector<2x8x64xf32>
    %479 = arith.addf %477, %478 : vector<2x8x64xf32>
    %c0_418 = arith.constant 0 : index
    %c2_419 = arith.constant 2 : index
    %c8_420 = arith.constant 8 : index
    %480 = vector.load %arg9[%c0_418, %c2_419, %c8_420] : memref<2x10x80xf32, #tpu.memory_space<vmem>>, vector<2x8x64xf32>
    %481 = arith.addf %479, %480 : vector<2x8x64xf32>
    %c0_421 = arith.constant 0 : index
    %c2_422 = arith.constant 2 : index
    %c16_423 = arith.constant 16 : index
    %482 = vector.load %arg9[%c0_421, %c2_422, %c16_423] : memref<2x10x80xf32, #tpu.memory_space<vmem>>, vector<2x8x64xf32>
    %483 = arith.addf %481, %482 : vector<2x8x64xf32>
    %c0_424 = arith.constant 0 : index
    %c0_425 = arith.constant 0 : index
    %c0_426 = arith.constant 0 : index
    %484 = vector.load %arg7[%c0_424, %c0_425, %c0_426] : memref<1x8x64xf32, #tpu.memory_space<vmem>>, vector<1x8x64xf32>
    %485 = vector.broadcast %484 : vector<1x8x64xf32> to vector<2x8x64xf32>
    %486 = arith.mulf %483, %485 : vector<2x8x64xf32>
    %487 = vector.shape_cast %486 : vector<2x8x64xf32> to vector<16x64xf32>
    %c0_427 = arith.constant 0 : index
    %c0_428 = arith.constant 0 : index
    %488 = vector.load %arg6[%c0_427, %c0_428] : memref<64x64xf32, #tpu.memory_space<vmem>>, vector<64x64xf32>
    %cst_429 = arith.constant dense<0.000000e+00> : vector<16x64xf32>
    %489 = tpu.matmul %487, %488, %cst_429 {dimension_numbers = #tpu.dot_dimension_numbers<[1], [0], [0], [1], [0, 0, 1, 1], [], []>} : vector<16x64xf32>, vector<64x64xf32>, vector<16x64xf32> -> vector<16x64xf32>
    %cst_430 = arith.constant dense<0.000000e+00> : vector<64xf32>
    %490 = vector.multi_reduction <add>, %489, %cst_430 [0] : vector<16x64xf32> to vector<64xf32>
    %491 = vector.shape_cast %490 : vector<64xf32> to vector<1x64xf32>
    %cst_431 = arith.constant 7.812500e-03 : f32
    %492 = vector.broadcast %cst_431 : f32 to vector<1x64xf32>
    %493 = arith.mulf %491, %492 : vector<1x64xf32>
    %494 = vector.broadcast %493 : vector<1x64xf32> to vector<16x64xf32>
    %495 = arith.subf %487, %494 : vector<16x64xf32>
    %496 = arith.mulf %495, %495 : vector<16x64xf32>
    %cst_432 = arith.constant dense<0.000000e+00> : vector<16x64xf32>
    %497 = tpu.matmul %496, %488, %cst_432 {dimension_numbers = #tpu.dot_dimension_numbers<[1], [0], [0], [1], [0, 0, 1, 1], [], []>} : vector<16x64xf32>, vector<64x64xf32>, vector<16x64xf32> -> vector<16x64xf32>
    %cst_433 = arith.constant dense<0.000000e+00> : vector<64xf32>
    %498 = vector.multi_reduction <add>, %497, %cst_433 [0] : vector<16x64xf32> to vector<64xf32>
    %499 = vector.shape_cast %498 : vector<64xf32> to vector<1x64xf32>
    %cst_434 = arith.constant 7.812500e-03 : f32
    %500 = vector.broadcast %cst_434 : f32 to vector<1x64xf32>
    %501 = arith.mulf %499, %500 : vector<1x64xf32>
    %cst_435 = arith.constant 9.99999974E-6 : f32
    %502 = vector.broadcast %cst_435 : f32 to vector<1x64xf32>
    %503 = arith.addf %501, %502 : vector<1x64xf32>
    %504 = math.rsqrt %503 : vector<1x64xf32>
    %505 = vector.broadcast %504 : vector<1x64xf32> to vector<16x64xf32>
    %506 = arith.mulf %495, %505 : vector<16x64xf32>
    %507 = vector.shape_cast %506 : vector<16x64xf32> to vector<2x8x64xf32>
    %508 = vector.broadcast %465 : f32 to vector<2x8x64xf32>
    %509 = arith.mulf %508, %507 : vector<2x8x64xf32>
    %510 = arith.addf %464, %509 : vector<2x8x64xf32>
    %c13 = arith.constant 13 : index
    %511 = memref.load %arg0[%c13] : memref<20xf32, #tpu.memory_space<smem>>
    %c0_436 = arith.constant 0 : index
    %c1_437 = arith.constant 1 : index
    %c8_438 = arith.constant 8 : index
    %512 = vector.load %arg10[%c0_436, %c1_437, %c8_438] : memref<2x10x80xf32, #tpu.memory_space<vmem>>, vector<2x8x64xf32>
    tpu.vector_store %arg10[%c0_436, %c1_437, %c8_438], %461 {strides = array<i32>} : memref<2x10x80xf32, #tpu.memory_space<vmem>>, vector<2x8x64xf32>,
    %c0_439 = arith.constant 0 : index
    %c0_440 = arith.constant 0 : index
    %c0_441 = arith.constant 0 : index
    %513 = vector.load %arg10[%c0_439, %c0_440, %c0_441] : memref<2x10x80xf32, #tpu.memory_space<vmem>>, vector<2x8x64xf32>
    %c0_442 = arith.constant 0 : index
    %c0_443 = arith.constant 0 : index
    %c8_444 = arith.constant 8 : index
    %514 = vector.load %arg10[%c0_442, %c0_443, %c8_444] : memref<2x10x80xf32, #tpu.memory_space<vmem>>, vector<2x8x64xf32>
    %515 = arith.maximumf %513, %514 : vector<2x8x64xf32>
    %c0_445 = arith.constant 0 : index
    %c0_446 = arith.constant 0 : index
    %c16_447 = arith.constant 16 : index
    %516 = vector.load %arg10[%c0_445, %c0_446, %c16_447] : memref<2x10x80xf32, #tpu.memory_space<vmem>>, vector<2x8x64xf32>
    %517 = arith.maximumf %515, %516 : vector<2x8x64xf32>
    %c0_448 = arith.constant 0 : index
    %c1_449 = arith.constant 1 : index
    %c0_450 = arith.constant 0 : index
    %518 = vector.load %arg10[%c0_448, %c1_449, %c0_450] : memref<2x10x80xf32, #tpu.memory_space<vmem>>, vector<2x8x64xf32>
    %519 = arith.maximumf %517, %518 : vector<2x8x64xf32>
    %c0_451 = arith.constant 0 : index
    %c1_452 = arith.constant 1 : index
    %c8_453 = arith.constant 8 : index
    %520 = vector.load %arg10[%c0_451, %c1_452, %c8_453] : memref<2x10x80xf32, #tpu.memory_space<vmem>>, vector<2x8x64xf32>
    %521 = arith.maximumf %519, %520 : vector<2x8x64xf32>
    %c0_454 = arith.constant 0 : index
    %c1_455 = arith.constant 1 : index
    %c16_456 = arith.constant 16 : index
    %522 = vector.load %arg10[%c0_454, %c1_455, %c16_456] : memref<2x10x80xf32, #tpu.memory_space<vmem>>, vector<2x8x64xf32>
    %523 = arith.maximumf %521, %522 : vector<2x8x64xf32>
    %c0_457 = arith.constant 0 : index
    %c2_458 = arith.constant 2 : index
    %c0_459 = arith.constant 0 : index
    %524 = vector.load %arg10[%c0_457, %c2_458, %c0_459] : memref<2x10x80xf32, #tpu.memory_space<vmem>>, vector<2x8x64xf32>
    %525 = arith.maximumf %523, %524 : vector<2x8x64xf32>
    %c0_460 = arith.constant 0 : index
    %c2_461 = arith.constant 2 : index
    %c8_462 = arith.constant 8 : index
    %526 = vector.load %arg10[%c0_460, %c2_461, %c8_462] : memref<2x10x80xf32, #tpu.memory_space<vmem>>, vector<2x8x64xf32>
    %527 = arith.maximumf %525, %526 : vector<2x8x64xf32>
    %c0_463 = arith.constant 0 : index
    %c2_464 = arith.constant 2 : index
    %c16_465 = arith.constant 16 : index
    %528 = vector.load %arg10[%c0_463, %c2_464, %c16_465] : memref<2x10x80xf32, #tpu.memory_space<vmem>>, vector<2x8x64xf32>
    %529 = arith.maximumf %527, %528 : vector<2x8x64xf32>
    %530 = vector.shape_cast %529 : vector<2x8x64xf32> to vector<16x64xf32>
    %c0_466 = arith.constant 0 : index
    %c0_467 = arith.constant 0 : index
    %531 = vector.load %arg6[%c0_466, %c0_467] : memref<64x64xf32, #tpu.memory_space<vmem>>, vector<64x64xf32>
    %cst_468 = arith.constant dense<0.000000e+00> : vector<16x64xf32>
    %532 = tpu.matmul %530, %531, %cst_468 {dimension_numbers = #tpu.dot_dimension_numbers<[1], [0], [0], [1], [0, 0, 1, 1], [], []>} : vector<16x64xf32>, vector<64x64xf32>, vector<16x64xf32> -> vector<16x64xf32>
    %cst_469 = arith.constant dense<0.000000e+00> : vector<64xf32>
    %533 = vector.multi_reduction <add>, %532, %cst_469 [0] : vector<16x64xf32> to vector<64xf32>
    %534 = vector.shape_cast %533 : vector<64xf32> to vector<1x64xf32>
    %cst_470 = arith.constant 7.812500e-03 : f32
    %535 = vector.broadcast %cst_470 : f32 to vector<1x64xf32>
    %536 = arith.mulf %534, %535 : vector<1x64xf32>
    %537 = vector.broadcast %536 : vector<1x64xf32> to vector<16x64xf32>
    %538 = arith.subf %530, %537 : vector<16x64xf32>
    %539 = arith.mulf %538, %538 : vector<16x64xf32>
    %cst_471 = arith.constant dense<0.000000e+00> : vector<16x64xf32>
    %540 = tpu.matmul %539, %531, %cst_471 {dimension_numbers = #tpu.dot_dimension_numbers<[1], [0], [0], [1], [0, 0, 1, 1], [], []>} : vector<16x64xf32>, vector<64x64xf32>, vector<16x64xf32> -> vector<16x64xf32>
    %cst_472 = arith.constant dense<0.000000e+00> : vector<64xf32>
    %541 = vector.multi_reduction <add>, %540, %cst_472 [0] : vector<16x64xf32> to vector<64xf32>
    %542 = vector.shape_cast %541 : vector<64xf32> to vector<1x64xf32>
    %cst_473 = arith.constant 7.812500e-03 : f32
    %543 = vector.broadcast %cst_473 : f32 to vector<1x64xf32>
    %544 = arith.mulf %542, %543 : vector<1x64xf32>
    %cst_474 = arith.constant 9.99999974E-6 : f32
    %545 = vector.broadcast %cst_474 : f32 to vector<1x64xf32>
    %546 = arith.addf %544, %545 : vector<1x64xf32>
    %547 = math.rsqrt %546 : vector<1x64xf32>
    %548 = vector.broadcast %547 : vector<1x64xf32> to vector<16x64xf32>
    %549 = arith.mulf %538, %548 : vector<16x64xf32>
    %550 = vector.shape_cast %549 : vector<16x64xf32> to vector<2x8x64xf32>
    %551 = vector.broadcast %511 : f32 to vector<2x8x64xf32>
    %552 = arith.mulf %551, %550 : vector<2x8x64xf32>
    %553 = arith.addf %510, %552 : vector<2x8x64xf32>
    %c14 = arith.constant 14 : index
    %554 = memref.load %arg0[%c14] : memref<20xf32, #tpu.memory_space<smem>>
    %cst_475 = arith.constant 0.000000e+00 : f32
    %555 = vector.broadcast %cst_475 : f32 to vector<2x8x64xf32>
    %556 = arith.maximumf %461, %555 : vector<2x8x64xf32>
    %c0_476 = arith.constant 0 : index
    %c1_477 = arith.constant 1 : index
    %c8_478 = arith.constant 8 : index
    %557 = vector.load %arg9[%c0_476, %c1_477, %c8_478] : memref<2x10x80xf32, #tpu.memory_space<vmem>>, vector<2x8x64xf32>
    tpu.vector_store %arg9[%c0_476, %c1_477, %c8_478], %556 {strides = array<i32>} : memref<2x10x80xf32, #tpu.memory_space<vmem>>, vector<2x8x64xf32>,
    %c0_479 = arith.constant 0 : index
    %c0_480 = arith.constant 0 : index
    %c0_481 = arith.constant 0 : index
    %558 = vector.load %arg9[%c0_479, %c0_480, %c0_481] : memref<2x10x80xf32, #tpu.memory_space<vmem>>, vector<2x8x80xf32>
    %559 = vector.shape_cast %558 : vector<2x8x80xf32> to vector<16x80xf32>
    %560 = arith.truncf %559 : vector<16x80xf32> to vector<16x80xbf16>
    %c4_482 = arith.constant 4 : index
    %c0_483 = arith.constant 0 : index
    %c0_484 = arith.constant 0 : index
    %c0_485 = arith.constant 0 : index
    %561 = vector.load %arg5[%c4_482, %c0_483, %c0_484, %c0_485] : memref<8x3x80x64xbf16, #tpu.memory_space<vmem>>, vector<1x1x80x64xbf16>
    %562 = vector.shape_cast %561 : vector<1x1x80x64xbf16> to vector<80x64xbf16>
    %cst_486 = arith.constant dense<0.000000e+00> : vector<16x64xf32>
    %563 = tpu.matmul %560, %562, %cst_486 {dimension_numbers = #tpu.dot_dimension_numbers<[1], [0], [0], [1], [0, 0, 1, 1], [], []>} : vector<16x80xbf16>, vector<80x64xbf16>, vector<16x64xf32> -> vector<16x64xf32>
    %c0_487 = arith.constant 0 : index
    %c1_488 = arith.constant 1 : index
    %c0_489 = arith.constant 0 : index
    %564 = vector.load %arg9[%c0_487, %c1_488, %c0_489] : memref<2x10x80xf32, #tpu.memory_space<vmem>>, vector<2x8x80xf32>
    %565 = vector.shape_cast %564 : vector<2x8x80xf32> to vector<16x80xf32>
    %566 = arith.truncf %565 : vector<16x80xf32> to vector<16x80xbf16>
    %c4_490 = arith.constant 4 : index
    %c1_491 = arith.constant 1 : index
    %c0_492 = arith.constant 0 : index
    %c0_493 = arith.constant 0 : index
    %567 = vector.load %arg5[%c4_490, %c1_491, %c0_492, %c0_493] : memref<8x3x80x64xbf16, #tpu.memory_space<vmem>>, vector<1x1x80x64xbf16>
    %568 = vector.shape_cast %567 : vector<1x1x80x64xbf16> to vector<80x64xbf16>
    %cst_494 = arith.constant dense<0.000000e+00> : vector<16x64xf32>
    %569 = tpu.matmul %566, %568, %cst_494 {dimension_numbers = #tpu.dot_dimension_numbers<[1], [0], [0], [1], [0, 0, 1, 1], [], []>} : vector<16x80xbf16>, vector<80x64xbf16>, vector<16x64xf32> -> vector<16x64xf32>
    %570 = arith.addf %563, %569 : vector<16x64xf32>
    %c0_495 = arith.constant 0 : index
    %c2_496 = arith.constant 2 : index
    %c0_497 = arith.constant 0 : index
    %571 = vector.load %arg9[%c0_495, %c2_496, %c0_497] : memref<2x10x80xf32, #tpu.memory_space<vmem>>, vector<2x8x80xf32>
    %572 = vector.shape_cast %571 : vector<2x8x80xf32> to vector<16x80xf32>
    %573 = arith.truncf %572 : vector<16x80xf32> to vector<16x80xbf16>
    %c4_498 = arith.constant 4 : index
    %c2_499 = arith.constant 2 : index
    %c0_500 = arith.constant 0 : index
    %c0_501 = arith.constant 0 : index
    %574 = vector.load %arg5[%c4_498, %c2_499, %c0_500, %c0_501] : memref<8x3x80x64xbf16, #tpu.memory_space<vmem>>, vector<1x1x80x64xbf16>
    %575 = vector.shape_cast %574 : vector<1x1x80x64xbf16> to vector<80x64xbf16>
    %cst_502 = arith.constant dense<0.000000e+00> : vector<16x64xf32>
    %576 = tpu.matmul %573, %575, %cst_502 {dimension_numbers = #tpu.dot_dimension_numbers<[1], [0], [0], [1], [0, 0, 1, 1], [], []>} : vector<16x80xbf16>, vector<80x64xbf16>, vector<16x64xf32> -> vector<16x64xf32>
    %577 = arith.addf %570, %576 : vector<16x64xf32>
    %578 = vector.shape_cast %577 : vector<16x64xf32> to vector<2x8x64xf32>
    %579 = vector.shape_cast %578 : vector<2x8x64xf32> to vector<16x64xf32>
    %c0_503 = arith.constant 0 : index
    %c0_504 = arith.constant 0 : index
    %580 = vector.load %arg6[%c0_503, %c0_504] : memref<64x64xf32, #tpu.memory_space<vmem>>, vector<64x64xf32>
    %cst_505 = arith.constant dense<0.000000e+00> : vector<16x64xf32>
    %581 = tpu.matmul %579, %580, %cst_505 {dimension_numbers = #tpu.dot_dimension_numbers<[1], [0], [0], [1], [0, 0, 1, 1], [], []>} : vector<16x64xf32>, vector<64x64xf32>, vector<16x64xf32> -> vector<16x64xf32>
    %cst_506 = arith.constant dense<0.000000e+00> : vector<64xf32>
    %582 = vector.multi_reduction <add>, %581, %cst_506 [0] : vector<16x64xf32> to vector<64xf32>
    %583 = vector.shape_cast %582 : vector<64xf32> to vector<1x64xf32>
    %cst_507 = arith.constant 7.812500e-03 : f32
    %584 = vector.broadcast %cst_507 : f32 to vector<1x64xf32>
    %585 = arith.mulf %583, %584 : vector<1x64xf32>
    %586 = vector.broadcast %585 : vector<1x64xf32> to vector<16x64xf32>
    %587 = arith.subf %579, %586 : vector<16x64xf32>
    %588 = arith.mulf %587, %587 : vector<16x64xf32>
    %cst_508 = arith.constant dense<0.000000e+00> : vector<16x64xf32>
    %589 = tpu.matmul %588, %580, %cst_508 {dimension_numbers = #tpu.dot_dimension_numbers<[1], [0], [0], [1], [0, 0, 1, 1], [], []>} : vector<16x64xf32>, vector<64x64xf32>, vector<16x64xf32> -> vector<16x64xf32>
    %cst_509 = arith.constant dense<0.000000e+00> : vector<64xf32>
    %590 = vector.multi_reduction <add>, %589, %cst_509 [0] : vector<16x64xf32> to vector<64xf32>
    %591 = vector.shape_cast %590 : vector<64xf32> to vector<1x64xf32>
    %cst_510 = arith.constant 7.812500e-03 : f32
    %592 = vector.broadcast %cst_510 : f32 to vector<1x64xf32>
    %593 = arith.mulf %591, %592 : vector<1x64xf32>
    %cst_511 = arith.constant 9.99999974E-6 : f32
    %594 = vector.broadcast %cst_511 : f32 to vector<1x64xf32>
    %595 = arith.addf %593, %594 : vector<1x64xf32>
    %596 = math.rsqrt %595 : vector<1x64xf32>
    %597 = vector.broadcast %596 : vector<1x64xf32> to vector<16x64xf32>
    %598 = arith.mulf %587, %597 : vector<16x64xf32>
    %599 = vector.shape_cast %598 : vector<16x64xf32> to vector<2x8x64xf32>
    %cst_512 = arith.constant 0.000000e+00 : f32
    %600 = vector.broadcast %cst_512 : f32 to vector<2x8x64xf32>
    %601 = arith.maximumf %599, %600 : vector<2x8x64xf32>
    %c0_513 = arith.constant 0 : index
    %c1_514 = arith.constant 1 : index
    %c8_515 = arith.constant 8 : index
    %602 = vector.load %arg9[%c0_513, %c1_514, %c8_515] : memref<2x10x80xf32, #tpu.memory_space<vmem>>, vector<2x8x64xf32>
    tpu.vector_store %arg9[%c0_513, %c1_514, %c8_515], %601 {strides = array<i32>} : memref<2x10x80xf32, #tpu.memory_space<vmem>>, vector<2x8x64xf32>,
    %c0_516 = arith.constant 0 : index
    %c0_517 = arith.constant 0 : index
    %c0_518 = arith.constant 0 : index
    %603 = vector.load %arg9[%c0_516, %c0_517, %c0_518] : memref<2x10x80xf32, #tpu.memory_space<vmem>>, vector<2x8x80xf32>
    %604 = vector.shape_cast %603 : vector<2x8x80xf32> to vector<16x80xf32>
    %605 = arith.truncf %604 : vector<16x80xf32> to vector<16x80xbf16>
    %c5 = arith.constant 5 : index
    %c0_519 = arith.constant 0 : index
    %c0_520 = arith.constant 0 : index
    %c0_521 = arith.constant 0 : index
    %606 = vector.load %arg5[%c5, %c0_519, %c0_520, %c0_521] : memref<8x3x80x64xbf16, #tpu.memory_space<vmem>>, vector<1x1x80x64xbf16>
    %607 = vector.shape_cast %606 : vector<1x1x80x64xbf16> to vector<80x64xbf16>
    %cst_522 = arith.constant dense<0.000000e+00> : vector<16x64xf32>
    %608 = tpu.matmul %605, %607, %cst_522 {dimension_numbers = #tpu.dot_dimension_numbers<[1], [0], [0], [1], [0, 0, 1, 1], [], []>} : vector<16x80xbf16>, vector<80x64xbf16>, vector<16x64xf32> -> vector<16x64xf32>
    %c0_523 = arith.constant 0 : index
    %c1_524 = arith.constant 1 : index
    %c0_525 = arith.constant 0 : index
    %609 = vector.load %arg9[%c0_523, %c1_524, %c0_525] : memref<2x10x80xf32, #tpu.memory_space<vmem>>, vector<2x8x80xf32>
    %610 = vector.shape_cast %609 : vector<2x8x80xf32> to vector<16x80xf32>
    %611 = arith.truncf %610 : vector<16x80xf32> to vector<16x80xbf16>
    %c5_526 = arith.constant 5 : index
    %c1_527 = arith.constant 1 : index
    %c0_528 = arith.constant 0 : index
    %c0_529 = arith.constant 0 : index
    %612 = vector.load %arg5[%c5_526, %c1_527, %c0_528, %c0_529] : memref<8x3x80x64xbf16, #tpu.memory_space<vmem>>, vector<1x1x80x64xbf16>
    %613 = vector.shape_cast %612 : vector<1x1x80x64xbf16> to vector<80x64xbf16>
    %cst_530 = arith.constant dense<0.000000e+00> : vector<16x64xf32>
    %614 = tpu.matmul %611, %613, %cst_530 {dimension_numbers = #tpu.dot_dimension_numbers<[1], [0], [0], [1], [0, 0, 1, 1], [], []>} : vector<16x80xbf16>, vector<80x64xbf16>, vector<16x64xf32> -> vector<16x64xf32>
    %615 = arith.addf %608, %614 : vector<16x64xf32>
    %c0_531 = arith.constant 0 : index
    %c2_532 = arith.constant 2 : index
    %c0_533 = arith.constant 0 : index
    %616 = vector.load %arg9[%c0_531, %c2_532, %c0_533] : memref<2x10x80xf32, #tpu.memory_space<vmem>>, vector<2x8x80xf32>
    %617 = vector.shape_cast %616 : vector<2x8x80xf32> to vector<16x80xf32>
    %618 = arith.truncf %617 : vector<16x80xf32> to vector<16x80xbf16>
    %c5_534 = arith.constant 5 : index
    %c2_535 = arith.constant 2 : index
    %c0_536 = arith.constant 0 : index
    %c0_537 = arith.constant 0 : index
    %619 = vector.load %arg5[%c5_534, %c2_535, %c0_536, %c0_537] : memref<8x3x80x64xbf16, #tpu.memory_space<vmem>>, vector<1x1x80x64xbf16>
    %620 = vector.shape_cast %619 : vector<1x1x80x64xbf16> to vector<80x64xbf16>
    %cst_538 = arith.constant dense<0.000000e+00> : vector<16x64xf32>
    %621 = tpu.matmul %618, %620, %cst_538 {dimension_numbers = #tpu.dot_dimension_numbers<[1], [0], [0], [1], [0, 0, 1, 1], [], []>} : vector<16x80xbf16>, vector<80x64xbf16>, vector<16x64xf32> -> vector<16x64xf32>
    %622 = arith.addf %615, %621 : vector<16x64xf32>
    %623 = vector.shape_cast %622 : vector<16x64xf32> to vector<2x8x64xf32>
    %624 = vector.shape_cast %623 : vector<2x8x64xf32> to vector<16x64xf32>
    %c0_539 = arith.constant 0 : index
    %c0_540 = arith.constant 0 : index
    %625 = vector.load %arg6[%c0_539, %c0_540] : memref<64x64xf32, #tpu.memory_space<vmem>>, vector<64x64xf32>
    %cst_541 = arith.constant dense<0.000000e+00> : vector<16x64xf32>
    %626 = tpu.matmul %624, %625, %cst_541 {dimension_numbers = #tpu.dot_dimension_numbers<[1], [0], [0], [1], [0, 0, 1, 1], [], []>} : vector<16x64xf32>, vector<64x64xf32>, vector<16x64xf32> -> vector<16x64xf32>
    %cst_542 = arith.constant dense<0.000000e+00> : vector<64xf32>
    %627 = vector.multi_reduction <add>, %626, %cst_542 [0] : vector<16x64xf32> to vector<64xf32>
    %628 = vector.shape_cast %627 : vector<64xf32> to vector<1x64xf32>
    %cst_543 = arith.constant 7.812500e-03 : f32
    %629 = vector.broadcast %cst_543 : f32 to vector<1x64xf32>
    %630 = arith.mulf %628, %629 : vector<1x64xf32>
    %631 = vector.broadcast %630 : vector<1x64xf32> to vector<16x64xf32>
    %632 = arith.subf %624, %631 : vector<16x64xf32>
    %633 = arith.mulf %632, %632 : vector<16x64xf32>
    %cst_544 = arith.constant dense<0.000000e+00> : vector<16x64xf32>
    %634 = tpu.matmul %633, %625, %cst_544 {dimension_numbers = #tpu.dot_dimension_numbers<[1], [0], [0], [1], [0, 0, 1, 1], [], []>} : vector<16x64xf32>, vector<64x64xf32>, vector<16x64xf32> -> vector<16x64xf32>
    %cst_545 = arith.constant dense<0.000000e+00> : vector<64xf32>
    %635 = vector.multi_reduction <add>, %634, %cst_545 [0] : vector<16x64xf32> to vector<64xf32>
    %636 = vector.shape_cast %635 : vector<64xf32> to vector<1x64xf32>
    %cst_546 = arith.constant 7.812500e-03 : f32
    %637 = vector.broadcast %cst_546 : f32 to vector<1x64xf32>
    %638 = arith.mulf %636, %637 : vector<1x64xf32>
    %cst_547 = arith.constant 9.99999974E-6 : f32
    %639 = vector.broadcast %cst_547 : f32 to vector<1x64xf32>
    %640 = arith.addf %638, %639 : vector<1x64xf32>
    %641 = math.rsqrt %640 : vector<1x64xf32>
    %642 = vector.broadcast %641 : vector<1x64xf32> to vector<16x64xf32>
    %643 = arith.mulf %632, %642 : vector<16x64xf32>
    %644 = vector.shape_cast %643 : vector<16x64xf32> to vector<2x8x64xf32>
    %645 = vector.broadcast %554 : f32 to vector<2x8x64xf32>
    %646 = arith.mulf %645, %644 : vector<2x8x64xf32>
    %647 = arith.addf %553, %646 : vector<2x8x64xf32>
    %c1_548 = arith.constant 1 : index
    %c0_549 = arith.constant 0 : index
    %c0_550 = arith.constant 0 : index
    %c0_551 = arith.constant 0 : index
    %648 = vector.load %arg11[%c1_548, %c0_549, %c0_550, %c0_551] : memref<4x2x8x64xf32, #tpu.memory_space<vmem>>, vector<1x2x8x64xf32>
    %649 = vector.shape_cast %648 : vector<1x2x8x64xf32> to vector<2x8x64xf32>
    %c16_552 = arith.constant 16 : index
    %650 = memref.load %arg0[%c16_552] : memref<20xf32, #tpu.memory_space<smem>>
    %651 = vector.broadcast %650 : f32 to vector<2x8x64xf32>
    %652 = arith.mulf %651, %649 : vector<2x8x64xf32>
    %c17 = arith.constant 17 : index
    %653 = memref.load %arg0[%c17] : memref<20xf32, #tpu.memory_space<smem>>
    %c0_553 = arith.constant 0 : index
    %c1_554 = arith.constant 1 : index
    %c8_555 = arith.constant 8 : index
    %654 = vector.load %arg9[%c0_553, %c1_554, %c8_555] : memref<2x10x80xf32, #tpu.memory_space<vmem>>, vector<2x8x64xf32>
    tpu.vector_store %arg9[%c0_553, %c1_554, %c8_555], %649 {strides = array<i32>} : memref<2x10x80xf32, #tpu.memory_space<vmem>>, vector<2x8x64xf32>,
    %c0_556 = arith.constant 0 : index
    %c0_557 = arith.constant 0 : index
    %c0_558 = arith.constant 0 : index
    %655 = vector.load %arg9[%c0_556, %c0_557, %c0_558] : memref<2x10x80xf32, #tpu.memory_space<vmem>>, vector<2x8x64xf32>
    %c0_559 = arith.constant 0 : index
    %c0_560 = arith.constant 0 : index
    %c8_561 = arith.constant 8 : index
    %656 = vector.load %arg9[%c0_559, %c0_560, %c8_561] : memref<2x10x80xf32, #tpu.memory_space<vmem>>, vector<2x8x64xf32>
    %657 = arith.addf %655, %656 : vector<2x8x64xf32>
    %c0_562 = arith.constant 0 : index
    %c0_563 = arith.constant 0 : index
    %c16_564 = arith.constant 16 : index
    %658 = vector.load %arg9[%c0_562, %c0_563, %c16_564] : memref<2x10x80xf32, #tpu.memory_space<vmem>>, vector<2x8x64xf32>
    %659 = arith.addf %657, %658 : vector<2x8x64xf32>
    %c0_565 = arith.constant 0 : index
    %c1_566 = arith.constant 1 : index
    %c0_567 = arith.constant 0 : index
    %660 = vector.load %arg9[%c0_565, %c1_566, %c0_567] : memref<2x10x80xf32, #tpu.memory_space<vmem>>, vector<2x8x64xf32>
    %661 = arith.addf %659, %660 : vector<2x8x64xf32>
    %c0_568 = arith.constant 0 : index
    %c1_569 = arith.constant 1 : index
    %c8_570 = arith.constant 8 : index
    %662 = vector.load %arg9[%c0_568, %c1_569, %c8_570] : memref<2x10x80xf32, #tpu.memory_space<vmem>>, vector<2x8x64xf32>
    %663 = arith.addf %661, %662 : vector<2x8x64xf32>
    %c0_571 = arith.constant 0 : index
    %c1_572 = arith.constant 1 : index
    %c16_573 = arith.constant 16 : index
    %664 = vector.load %arg9[%c0_571, %c1_572, %c16_573] : memref<2x10x80xf32, #tpu.memory_space<vmem>>, vector<2x8x64xf32>
    %665 = arith.addf %663, %664 : vector<2x8x64xf32>
    %c0_574 = arith.constant 0 : index
    %c2_575 = arith.constant 2 : index
    %c0_576 = arith.constant 0 : index
    %666 = vector.load %arg9[%c0_574, %c2_575, %c0_576] : memref<2x10x80xf32, #tpu.memory_space<vmem>>, vector<2x8x64xf32>
    %667 = arith.addf %665, %666 : vector<2x8x64xf32>
    %c0_577 = arith.constant 0 : index
    %c2_578 = arith.constant 2 : index
    %c8_579 = arith.constant 8 : index
    %668 = vector.load %arg9[%c0_577, %c2_578, %c8_579] : memref<2x10x80xf32, #tpu.memory_space<vmem>>, vector<2x8x64xf32>
    %669 = arith.addf %667, %668 : vector<2x8x64xf32>
    %c0_580 = arith.constant 0 : index
    %c2_581 = arith.constant 2 : index
    %c16_582 = arith.constant 16 : index
    %670 = vector.load %arg9[%c0_580, %c2_581, %c16_582] : memref<2x10x80xf32, #tpu.memory_space<vmem>>, vector<2x8x64xf32>
    %671 = arith.addf %669, %670 : vector<2x8x64xf32>
    %c0_583 = arith.constant 0 : index
    %c0_584 = arith.constant 0 : index
    %c0_585 = arith.constant 0 : index
    %672 = vector.load %arg7[%c0_583, %c0_584, %c0_585] : memref<1x8x64xf32, #tpu.memory_space<vmem>>, vector<1x8x64xf32>
    %673 = vector.broadcast %672 : vector<1x8x64xf32> to vector<2x8x64xf32>
    %674 = arith.mulf %671, %673 : vector<2x8x64xf32>
    %675 = vector.shape_cast %674 : vector<2x8x64xf32> to vector<16x64xf32>
    %c0_586 = arith.constant 0 : index
    %c0_587 = arith.constant 0 : index
    %676 = vector.load %arg6[%c0_586, %c0_587] : memref<64x64xf32, #tpu.memory_space<vmem>>, vector<64x64xf32>
    %cst_588 = arith.constant dense<0.000000e+00> : vector<16x64xf32>
    %677 = tpu.matmul %675, %676, %cst_588 {dimension_numbers = #tpu.dot_dimension_numbers<[1], [0], [0], [1], [0, 0, 1, 1], [], []>} : vector<16x64xf32>, vector<64x64xf32>, vector<16x64xf32> -> vector<16x64xf32>
    %cst_589 = arith.constant dense<0.000000e+00> : vector<64xf32>
    %678 = vector.multi_reduction <add>, %677, %cst_589 [0] : vector<16x64xf32> to vector<64xf32>
    %679 = vector.shape_cast %678 : vector<64xf32> to vector<1x64xf32>
    %cst_590 = arith.constant 7.812500e-03 : f32
    %680 = vector.broadcast %cst_590 : f32 to vector<1x64xf32>
    %681 = arith.mulf %679, %680 : vector<1x64xf32>
    %682 = vector.broadcast %681 : vector<1x64xf32> to vector<16x64xf32>
    %683 = arith.subf %675, %682 : vector<16x64xf32>
    %684 = arith.mulf %683, %683 : vector<16x64xf32>
    %cst_591 = arith.constant dense<0.000000e+00> : vector<16x64xf32>
    %685 = tpu.matmul %684, %676, %cst_591 {dimension_numbers = #tpu.dot_dimension_numbers<[1], [0], [0], [1], [0, 0, 1, 1], [], []>} : vector<16x64xf32>, vector<64x64xf32>, vector<16x64xf32> -> vector<16x64xf32>
    %cst_592 = arith.constant dense<0.000000e+00> : vector<64xf32>
    %686 = vector.multi_reduction <add>, %685, %cst_592 [0] : vector<16x64xf32> to vector<64xf32>
    %687 = vector.shape_cast %686 : vector<64xf32> to vector<1x64xf32>
    %cst_593 = arith.constant 7.812500e-03 : f32
    %688 = vector.broadcast %cst_593 : f32 to vector<1x64xf32>
    %689 = arith.mulf %687, %688 : vector<1x64xf32>
    %cst_594 = arith.constant 9.99999974E-6 : f32
    %690 = vector.broadcast %cst_594 : f32 to vector<1x64xf32>
    %691 = arith.addf %689, %690 : vector<1x64xf32>
    %692 = math.rsqrt %691 : vector<1x64xf32>
    %693 = vector.broadcast %692 : vector<1x64xf32> to vector<16x64xf32>
    %694 = arith.mulf %683, %693 : vector<16x64xf32>
    %695 = vector.shape_cast %694 : vector<16x64xf32> to vector<2x8x64xf32>
    %696 = vector.broadcast %653 : f32 to vector<2x8x64xf32>
    %697 = arith.mulf %696, %695 : vector<2x8x64xf32>
    %698 = arith.addf %652, %697 : vector<2x8x64xf32>
    %c18 = arith.constant 18 : index
    %699 = memref.load %arg0[%c18] : memref<20xf32, #tpu.memory_space<smem>>
    %c0_595 = arith.constant 0 : index
    %c1_596 = arith.constant 1 : index
    %c8_597 = arith.constant 8 : index
    %700 = vector.load %arg10[%c0_595, %c1_596, %c8_597] : memref<2x10x80xf32, #tpu.memory_space<vmem>>, vector<2x8x64xf32>
    tpu.vector_store %arg10[%c0_595, %c1_596, %c8_597], %649 {strides = array<i32>} : memref<2x10x80xf32, #tpu.memory_space<vmem>>, vector<2x8x64xf32>,
    %c0_598 = arith.constant 0 : index
    %c0_599 = arith.constant 0 : index
    %c0_600 = arith.constant 0 : index
    %701 = vector.load %arg10[%c0_598, %c0_599, %c0_600] : memref<2x10x80xf32, #tpu.memory_space<vmem>>, vector<2x8x64xf32>
    %c0_601 = arith.constant 0 : index
    %c0_602 = arith.constant 0 : index
    %c8_603 = arith.constant 8 : index
    %702 = vector.load %arg10[%c0_601, %c0_602, %c8_603] : memref<2x10x80xf32, #tpu.memory_space<vmem>>, vector<2x8x64xf32>
    %703 = arith.maximumf %701, %702 : vector<2x8x64xf32>
    %c0_604 = arith.constant 0 : index
    %c0_605 = arith.constant 0 : index
    %c16_606 = arith.constant 16 : index
    %704 = vector.load %arg10[%c0_604, %c0_605, %c16_606] : memref<2x10x80xf32, #tpu.memory_space<vmem>>, vector<2x8x64xf32>
    %705 = arith.maximumf %703, %704 : vector<2x8x64xf32>
    %c0_607 = arith.constant 0 : index
    %c1_608 = arith.constant 1 : index
    %c0_609 = arith.constant 0 : index
    %706 = vector.load %arg10[%c0_607, %c1_608, %c0_609] : memref<2x10x80xf32, #tpu.memory_space<vmem>>, vector<2x8x64xf32>
    %707 = arith.maximumf %705, %706 : vector<2x8x64xf32>
    %c0_610 = arith.constant 0 : index
    %c1_611 = arith.constant 1 : index
    %c8_612 = arith.constant 8 : index
    %708 = vector.load %arg10[%c0_610, %c1_611, %c8_612] : memref<2x10x80xf32, #tpu.memory_space<vmem>>, vector<2x8x64xf32>
    %709 = arith.maximumf %707, %708 : vector<2x8x64xf32>
    %c0_613 = arith.constant 0 : index
    %c1_614 = arith.constant 1 : index
    %c16_615 = arith.constant 16 : index
    %710 = vector.load %arg10[%c0_613, %c1_614, %c16_615] : memref<2x10x80xf32, #tpu.memory_space<vmem>>, vector<2x8x64xf32>
    %711 = arith.maximumf %709, %710 : vector<2x8x64xf32>
    %c0_616 = arith.constant 0 : index
    %c2_617 = arith.constant 2 : index
    %c0_618 = arith.constant 0 : index
    %712 = vector.load %arg10[%c0_616, %c2_617, %c0_618] : memref<2x10x80xf32, #tpu.memory_space<vmem>>, vector<2x8x64xf32>
    %713 = arith.maximumf %711, %712 : vector<2x8x64xf32>
    %c0_619 = arith.constant 0 : index
    %c2_620 = arith.constant 2 : index
    %c8_621 = arith.constant 8 : index
    %714 = vector.load %arg10[%c0_619, %c2_620, %c8_621] : memref<2x10x80xf32, #tpu.memory_space<vmem>>, vector<2x8x64xf32>
    %715 = arith.maximumf %713, %714 : vector<2x8x64xf32>
    %c0_622 = arith.constant 0 : index
    %c2_623 = arith.constant 2 : index
    %c16_624 = arith.constant 16 : index
    %716 = vector.load %arg10[%c0_622, %c2_623, %c16_624] : memref<2x10x80xf32, #tpu.memory_space<vmem>>, vector<2x8x64xf32>
    %717 = arith.maximumf %715, %716 : vector<2x8x64xf32>
    %718 = vector.shape_cast %717 : vector<2x8x64xf32> to vector<16x64xf32>
    %c0_625 = arith.constant 0 : index
    %c0_626 = arith.constant 0 : index
    %719 = vector.load %arg6[%c0_625, %c0_626] : memref<64x64xf32, #tpu.memory_space<vmem>>, vector<64x64xf32>
    %cst_627 = arith.constant dense<0.000000e+00> : vector<16x64xf32>
    %720 = tpu.matmul %718, %719, %cst_627 {dimension_numbers = #tpu.dot_dimension_numbers<[1], [0], [0], [1], [0, 0, 1, 1], [], []>} : vector<16x64xf32>, vector<64x64xf32>, vector<16x64xf32> -> vector<16x64xf32>
    %cst_628 = arith.constant dense<0.000000e+00> : vector<64xf32>
    %721 = vector.multi_reduction <add>, %720, %cst_628 [0] : vector<16x64xf32> to vector<64xf32>
    %722 = vector.shape_cast %721 : vector<64xf32> to vector<1x64xf32>
    %cst_629 = arith.constant 7.812500e-03 : f32
    %723 = vector.broadcast %cst_629 : f32 to vector<1x64xf32>
    %724 = arith.mulf %722, %723 : vector<1x64xf32>
    %725 = vector.broadcast %724 : vector<1x64xf32> to vector<16x64xf32>
    %726 = arith.subf %718, %725 : vector<16x64xf32>
    %727 = arith.mulf %726, %726 : vector<16x64xf32>
    %cst_630 = arith.constant dense<0.000000e+00> : vector<16x64xf32>
    %728 = tpu.matmul %727, %719, %cst_630 {dimension_numbers = #tpu.dot_dimension_numbers<[1], [0], [0], [1], [0, 0, 1, 1], [], []>} : vector<16x64xf32>, vector<64x64xf32>, vector<16x64xf32> -> vector<16x64xf32>
    %cst_631 = arith.constant dense<0.000000e+00> : vector<64xf32>
    %729 = vector.multi_reduction <add>, %728, %cst_631 [0] : vector<16x64xf32> to vector<64xf32>
    %730 = vector.shape_cast %729 : vector<64xf32> to vector<1x64xf32>
    %cst_632 = arith.constant 7.812500e-03 : f32
    %731 = vector.broadcast %cst_632 : f32 to vector<1x64xf32>
    %732 = arith.mulf %730, %731 : vector<1x64xf32>
    %cst_633 = arith.constant 9.99999974E-6 : f32
    %733 = vector.broadcast %cst_633 : f32 to vector<1x64xf32>
    %734 = arith.addf %732, %733 : vector<1x64xf32>
    %735 = math.rsqrt %734 : vector<1x64xf32>
    %736 = vector.broadcast %735 : vector<1x64xf32> to vector<16x64xf32>
    %737 = arith.mulf %726, %736 : vector<16x64xf32>
    %738 = vector.shape_cast %737 : vector<16x64xf32> to vector<2x8x64xf32>
    %739 = vector.broadcast %699 : f32 to vector<2x8x64xf32>
    %740 = arith.mulf %739, %738 : vector<2x8x64xf32>
    %741 = arith.addf %698, %740 : vector<2x8x64xf32>
    %c19 = arith.constant 19 : index
    %742 = memref.load %arg0[%c19] : memref<20xf32, #tpu.memory_space<smem>>
    %cst_634 = arith.constant 0.000000e+00 : f32
    %743 = vector.broadcast %cst_634 : f32 to vector<2x8x64xf32>
    %744 = arith.maximumf %649, %743 : vector<2x8x64xf32>
    %c0_635 = arith.constant 0 : index
    %c1_636 = arith.constant 1 : index
    %c8_637 = arith.constant 8 : index
    %745 = vector.load %arg9[%c0_635, %c1_636, %c8_637] : memref<2x10x80xf32, #tpu.memory_space<vmem>>, vector<2x8x64xf32>
    tpu.vector_store %arg9[%c0_635, %c1_636, %c8_637], %744 {strides = array<i32>} : memref<2x10x80xf32, #tpu.memory_space<vmem>>, vector<2x8x64xf32>,
    %c0_638 = arith.constant 0 : index
    %c0_639 = arith.constant 0 : index
    %c0_640 = arith.constant 0 : index
    %746 = vector.load %arg9[%c0_638, %c0_639, %c0_640] : memref<2x10x80xf32, #tpu.memory_space<vmem>>, vector<2x8x80xf32>
    %747 = vector.shape_cast %746 : vector<2x8x80xf32> to vector<16x80xf32>
    %748 = arith.truncf %747 : vector<16x80xf32> to vector<16x80xbf16>
    %c6_641 = arith.constant 6 : index
    %c0_642 = arith.constant 0 : index
    %c0_643 = arith.constant 0 : index
    %c0_644 = arith.constant 0 : index
    %749 = vector.load %arg5[%c6_641, %c0_642, %c0_643, %c0_644] : memref<8x3x80x64xbf16, #tpu.memory_space<vmem>>, vector<1x1x80x64xbf16>
    %750 = vector.shape_cast %749 : vector<1x1x80x64xbf16> to vector<80x64xbf16>
    %cst_645 = arith.constant dense<0.000000e+00> : vector<16x64xf32>
    %751 = tpu.matmul %748, %750, %cst_645 {dimension_numbers = #tpu.dot_dimension_numbers<[1], [0], [0], [1], [0, 0, 1, 1], [], []>} : vector<16x80xbf16>, vector<80x64xbf16>, vector<16x64xf32> -> vector<16x64xf32>
    %c0_646 = arith.constant 0 : index
    %c1_647 = arith.constant 1 : index
    %c0_648 = arith.constant 0 : index
    %752 = vector.load %arg9[%c0_646, %c1_647, %c0_648] : memref<2x10x80xf32, #tpu.memory_space<vmem>>, vector<2x8x80xf32>
    %753 = vector.shape_cast %752 : vector<2x8x80xf32> to vector<16x80xf32>
    %754 = arith.truncf %753 : vector<16x80xf32> to vector<16x80xbf16>
    %c6_649 = arith.constant 6 : index
    %c1_650 = arith.constant 1 : index
    %c0_651 = arith.constant 0 : index
    %c0_652 = arith.constant 0 : index
    %755 = vector.load %arg5[%c6_649, %c1_650, %c0_651, %c0_652] : memref<8x3x80x64xbf16, #tpu.memory_space<vmem>>, vector<1x1x80x64xbf16>
    %756 = vector.shape_cast %755 : vector<1x1x80x64xbf16> to vector<80x64xbf16>
    %cst_653 = arith.constant dense<0.000000e+00> : vector<16x64xf32>
    %757 = tpu.matmul %754, %756, %cst_653 {dimension_numbers = #tpu.dot_dimension_numbers<[1], [0], [0], [1], [0, 0, 1, 1], [], []>} : vector<16x80xbf16>, vector<80x64xbf16>, vector<16x64xf32> -> vector<16x64xf32>
    %758 = arith.addf %751, %757 : vector<16x64xf32>
    %c0_654 = arith.constant 0 : index
    %c2_655 = arith.constant 2 : index
    %c0_656 = arith.constant 0 : index
    %759 = vector.load %arg9[%c0_654, %c2_655, %c0_656] : memref<2x10x80xf32, #tpu.memory_space<vmem>>, vector<2x8x80xf32>
    %760 = vector.shape_cast %759 : vector<2x8x80xf32> to vector<16x80xf32>
    %761 = arith.truncf %760 : vector<16x80xf32> to vector<16x80xbf16>
    %c6_657 = arith.constant 6 : index
    %c2_658 = arith.constant 2 : index
    %c0_659 = arith.constant 0 : index
    %c0_660 = arith.constant 0 : index
    %762 = vector.load %arg5[%c6_657, %c2_658, %c0_659, %c0_660] : memref<8x3x80x64xbf16, #tpu.memory_space<vmem>>, vector<1x1x80x64xbf16>
    %763 = vector.shape_cast %762 : vector<1x1x80x64xbf16> to vector<80x64xbf16>
    %cst_661 = arith.constant dense<0.000000e+00> : vector<16x64xf32>
    %764 = tpu.matmul %761, %763, %cst_661 {dimension_numbers = #tpu.dot_dimension_numbers<[1], [0], [0], [1], [0, 0, 1, 1], [], []>} : vector<16x80xbf16>, vector<80x64xbf16>, vector<16x64xf32> -> vector<16x64xf32>
    %765 = arith.addf %758, %764 : vector<16x64xf32>
    %766 = vector.shape_cast %765 : vector<16x64xf32> to vector<2x8x64xf32>
    %767 = vector.shape_cast %766 : vector<2x8x64xf32> to vector<16x64xf32>
    %c0_662 = arith.constant 0 : index
    %c0_663 = arith.constant 0 : index
    %768 = vector.load %arg6[%c0_662, %c0_663] : memref<64x64xf32, #tpu.memory_space<vmem>>, vector<64x64xf32>
    %cst_664 = arith.constant dense<0.000000e+00> : vector<16x64xf32>
    %769 = tpu.matmul %767, %768, %cst_664 {dimension_numbers = #tpu.dot_dimension_numbers<[1], [0], [0], [1], [0, 0, 1, 1], [], []>} : vector<16x64xf32>, vector<64x64xf32>, vector<16x64xf32> -> vector<16x64xf32>
    %cst_665 = arith.constant dense<0.000000e+00> : vector<64xf32>
    %770 = vector.multi_reduction <add>, %769, %cst_665 [0] : vector<16x64xf32> to vector<64xf32>
    %771 = vector.shape_cast %770 : vector<64xf32> to vector<1x64xf32>
    %cst_666 = arith.constant 7.812500e-03 : f32
    %772 = vector.broadcast %cst_666 : f32 to vector<1x64xf32>
    %773 = arith.mulf %771, %772 : vector<1x64xf32>
    %774 = vector.broadcast %773 : vector<1x64xf32> to vector<16x64xf32>
    %775 = arith.subf %767, %774 : vector<16x64xf32>
    %776 = arith.mulf %775, %775 : vector<16x64xf32>
    %cst_667 = arith.constant dense<0.000000e+00> : vector<16x64xf32>
    %777 = tpu.matmul %776, %768, %cst_667 {dimension_numbers = #tpu.dot_dimension_numbers<[1], [0], [0], [1], [0, 0, 1, 1], [], []>} : vector<16x64xf32>, vector<64x64xf32>, vector<16x64xf32> -> vector<16x64xf32>
    %cst_668 = arith.constant dense<0.000000e+00> : vector<64xf32>
    %778 = vector.multi_reduction <add>, %777, %cst_668 [0] : vector<16x64xf32> to vector<64xf32>
    %779 = vector.shape_cast %778 : vector<64xf32> to vector<1x64xf32>
    %cst_669 = arith.constant 7.812500e-03 : f32
    %780 = vector.broadcast %cst_669 : f32 to vector<1x64xf32>
    %781 = arith.mulf %779, %780 : vector<1x64xf32>
    %cst_670 = arith.constant 9.99999974E-6 : f32
    %782 = vector.broadcast %cst_670 : f32 to vector<1x64xf32>
    %783 = arith.addf %781, %782 : vector<1x64xf32>
    %784 = math.rsqrt %783 : vector<1x64xf32>
    %785 = vector.broadcast %784 : vector<1x64xf32> to vector<16x64xf32>
    %786 = arith.mulf %775, %785 : vector<16x64xf32>
    %787 = vector.shape_cast %786 : vector<16x64xf32> to vector<2x8x64xf32>
    %cst_671 = arith.constant 0.000000e+00 : f32
    %788 = vector.broadcast %cst_671 : f32 to vector<2x8x64xf32>
    %789 = arith.maximumf %787, %788 : vector<2x8x64xf32>
    %c0_672 = arith.constant 0 : index
    %c1_673 = arith.constant 1 : index
    %c8_674 = arith.constant 8 : index
    %790 = vector.load %arg9[%c0_672, %c1_673, %c8_674] : memref<2x10x80xf32, #tpu.memory_space<vmem>>, vector<2x8x64xf32>
    tpu.vector_store %arg9[%c0_672, %c1_673, %c8_674], %789 {strides = array<i32>} : memref<2x10x80xf32, #tpu.memory_space<vmem>>, vector<2x8x64xf32>,
    %c0_675 = arith.constant 0 : index
    %c0_676 = arith.constant 0 : index
    %c0_677 = arith.constant 0 : index
    %791 = vector.load %arg9[%c0_675, %c0_676, %c0_677] : memref<2x10x80xf32, #tpu.memory_space<vmem>>, vector<2x8x80xf32>
    %792 = vector.shape_cast %791 : vector<2x8x80xf32> to vector<16x80xf32>
    %793 = arith.truncf %792 : vector<16x80xf32> to vector<16x80xbf16>
    %c7_678 = arith.constant 7 : index
    %c0_679 = arith.constant 0 : index
    %c0_680 = arith.constant 0 : index
    %c0_681 = arith.constant 0 : index
    %794 = vector.load %arg5[%c7_678, %c0_679, %c0_680, %c0_681] : memref<8x3x80x64xbf16, #tpu.memory_space<vmem>>, vector<1x1x80x64xbf16>
    %795 = vector.shape_cast %794 : vector<1x1x80x64xbf16> to vector<80x64xbf16>
    %cst_682 = arith.constant dense<0.000000e+00> : vector<16x64xf32>
    %796 = tpu.matmul %793, %795, %cst_682 {dimension_numbers = #tpu.dot_dimension_numbers<[1], [0], [0], [1], [0, 0, 1, 1], [], []>} : vector<16x80xbf16>, vector<80x64xbf16>, vector<16x64xf32> -> vector<16x64xf32>
    %c0_683 = arith.constant 0 : index
    %c1_684 = arith.constant 1 : index
    %c0_685 = arith.constant 0 : index
    %797 = vector.load %arg9[%c0_683, %c1_684, %c0_685] : memref<2x10x80xf32, #tpu.memory_space<vmem>>, vector<2x8x80xf32>
    %798 = vector.shape_cast %797 : vector<2x8x80xf32> to vector<16x80xf32>
    %799 = arith.truncf %798 : vector<16x80xf32> to vector<16x80xbf16>
    %c7_686 = arith.constant 7 : index
    %c1_687 = arith.constant 1 : index
    %c0_688 = arith.constant 0 : index
    %c0_689 = arith.constant 0 : index
    %800 = vector.load %arg5[%c7_686, %c1_687, %c0_688, %c0_689] : memref<8x3x80x64xbf16, #tpu.memory_space<vmem>>, vector<1x1x80x64xbf16>
    %801 = vector.shape_cast %800 : vector<1x1x80x64xbf16> to vector<80x64xbf16>
    %cst_690 = arith.constant dense<0.000000e+00> : vector<16x64xf32>
    %802 = tpu.matmul %799, %801, %cst_690 {dimension_numbers = #tpu.dot_dimension_numbers<[1], [0], [0], [1], [0, 0, 1, 1], [], []>} : vector<16x80xbf16>, vector<80x64xbf16>, vector<16x64xf32> -> vector<16x64xf32>
    %803 = arith.addf %796, %802 : vector<16x64xf32>
    %c0_691 = arith.constant 0 : index
    %c2_692 = arith.constant 2 : index
    %c0_693 = arith.constant 0 : index
    %804 = vector.load %arg9[%c0_691, %c2_692, %c0_693] : memref<2x10x80xf32, #tpu.memory_space<vmem>>, vector<2x8x80xf32>
    %805 = vector.shape_cast %804 : vector<2x8x80xf32> to vector<16x80xf32>
    %806 = arith.truncf %805 : vector<16x80xf32> to vector<16x80xbf16>
    %c7_694 = arith.constant 7 : index
    %c2_695 = arith.constant 2 : index
    %c0_696 = arith.constant 0 : index
    %c0_697 = arith.constant 0 : index
    %807 = vector.load %arg5[%c7_694, %c2_695, %c0_696, %c0_697] : memref<8x3x80x64xbf16, #tpu.memory_space<vmem>>, vector<1x1x80x64xbf16>
    %808 = vector.shape_cast %807 : vector<1x1x80x64xbf16> to vector<80x64xbf16>
    %cst_698 = arith.constant dense<0.000000e+00> : vector<16x64xf32>
    %809 = tpu.matmul %806, %808, %cst_698 {dimension_numbers = #tpu.dot_dimension_numbers<[1], [0], [0], [1], [0, 0, 1, 1], [], []>} : vector<16x80xbf16>, vector<80x64xbf16>, vector<16x64xf32> -> vector<16x64xf32>
    %810 = arith.addf %803, %809 : vector<16x64xf32>
    %811 = vector.shape_cast %810 : vector<16x64xf32> to vector<2x8x64xf32>
    %812 = vector.shape_cast %811 : vector<2x8x64xf32> to vector<16x64xf32>
    %c0_699 = arith.constant 0 : index
    %c0_700 = arith.constant 0 : index
    %813 = vector.load %arg6[%c0_699, %c0_700] : memref<64x64xf32, #tpu.memory_space<vmem>>, vector<64x64xf32>
    %cst_701 = arith.constant dense<0.000000e+00> : vector<16x64xf32>
    %814 = tpu.matmul %812, %813, %cst_701 {dimension_numbers = #tpu.dot_dimension_numbers<[1], [0], [0], [1], [0, 0, 1, 1], [], []>} : vector<16x64xf32>, vector<64x64xf32>, vector<16x64xf32> -> vector<16x64xf32>
    %cst_702 = arith.constant dense<0.000000e+00> : vector<64xf32>
    %815 = vector.multi_reduction <add>, %814, %cst_702 [0] : vector<16x64xf32> to vector<64xf32>
    %816 = vector.shape_cast %815 : vector<64xf32> to vector<1x64xf32>
    %cst_703 = arith.constant 7.812500e-03 : f32
    %817 = vector.broadcast %cst_703 : f32 to vector<1x64xf32>
    %818 = arith.mulf %816, %817 : vector<1x64xf32>
    %819 = vector.broadcast %818 : vector<1x64xf32> to vector<16x64xf32>
    %820 = arith.subf %812, %819 : vector<16x64xf32>
    %821 = arith.mulf %820, %820 : vector<16x64xf32>
    %cst_704 = arith.constant dense<0.000000e+00> : vector<16x64xf32>
    %822 = tpu.matmul %821, %813, %cst_704 {dimension_numbers = #tpu.dot_dimension_numbers<[1], [0], [0], [1], [0, 0, 1, 1], [], []>} : vector<16x64xf32>, vector<64x64xf32>, vector<16x64xf32> -> vector<16x64xf32>
    %cst_705 = arith.constant dense<0.000000e+00> : vector<64xf32>
    %823 = vector.multi_reduction <add>, %822, %cst_705 [0] : vector<16x64xf32> to vector<64xf32>
    %824 = vector.shape_cast %823 : vector<64xf32> to vector<1x64xf32>
    %cst_706 = arith.constant 7.812500e-03 : f32
    %825 = vector.broadcast %cst_706 : f32 to vector<1x64xf32>
    %826 = arith.mulf %824, %825 : vector<1x64xf32>
    %cst_707 = arith.constant 9.99999974E-6 : f32
    %827 = vector.broadcast %cst_707 : f32 to vector<1x64xf32>
    %828 = arith.addf %826, %827 : vector<1x64xf32>
    %829 = math.rsqrt %828 : vector<1x64xf32>
    %830 = vector.broadcast %829 : vector<1x64xf32> to vector<16x64xf32>
    %831 = arith.mulf %820, %830 : vector<16x64xf32>
    %832 = vector.shape_cast %831 : vector<16x64xf32> to vector<2x8x64xf32>
    %833 = vector.broadcast %742 : f32 to vector<2x8x64xf32>
    %834 = arith.mulf %833, %832 : vector<2x8x64xf32>
    %835 = arith.addf %741, %834 : vector<2x8x64xf32>
    %836 = arith.addf %647, %835 : vector<2x8x64xf32>
    %c3_708 = arith.constant 3 : index
    %c0_709 = arith.constant 0 : index
    %c0_710 = arith.constant 0 : index
    %c0_711 = arith.constant 0 : index
    %837 = vector.load %arg11[%c3_708, %c0_709, %c0_710, %c0_711] : memref<4x2x8x64xf32, #tpu.memory_space<vmem>>, vector<1x2x8x64xf32>
    %838 = vector.shape_cast %837 : vector<1x2x8x64xf32> to vector<2x8x64xf32>
    %839 = vector.shape_cast %836 : vector<2x8x64xf32> to vector<1x2x8x64xf32>
    tpu.vector_store %arg11[%c3_708, %c0_709, %c0_710, %c0_711], %839 {strides = array<i32>} : memref<4x2x8x64xf32, #tpu.memory_space<vmem>>, vector<1x2x8x64xf32>,
    %c2_712 = arith.constant 2 : index
    %c0_713 = arith.constant 0 : index
    %c0_714 = arith.constant 0 : index
    %c0_715 = arith.constant 0 : index
    %840 = vector.load %arg11[%c2_712, %c0_713, %c0_714, %c0_715] : memref<4x2x8x64xf32, #tpu.memory_space<vmem>>, vector<1x2x8x64xf32>
    %841 = vector.shape_cast %840 : vector<1x2x8x64xf32> to vector<2x8x64xf32>
    %c0_716 = arith.constant 0 : index
    %c0_717 = arith.constant 0 : index
    %c0_718 = arith.constant 0 : index
    %c0_719 = arith.constant 0 : index
    %842 = vector.load %arg8[%c0_716, %c0_717, %c0_718, %c0_719] : memref<2x2x8x64xf32, #tpu.memory_space<vmem>>, vector<1x2x8x64xf32>
    %843 = vector.shape_cast %842 : vector<1x2x8x64xf32> to vector<2x8x64xf32>
    %844 = vector.shape_cast %841 : vector<2x8x64xf32> to vector<1x2x8x64xf32>
    tpu.vector_store %arg8[%c0_716, %c0_717, %c0_718, %c0_719], %844 {strides = array<i32>} : memref<2x2x8x64xf32, #tpu.memory_space<vmem>>, vector<1x2x8x64xf32>,
    %c3_720 = arith.constant 3 : index
    %c0_721 = arith.constant 0 : index
    %c0_722 = arith.constant 0 : index
    %c0_723 = arith.constant 0 : index
    %845 = vector.load %arg11[%c3_720, %c0_721, %c0_722, %c0_723] : memref<4x2x8x64xf32, #tpu.memory_space<vmem>>, vector<1x2x8x64xf32>
    %846 = vector.shape_cast %845 : vector<1x2x8x64xf32> to vector<2x8x64xf32>
    %c1_724 = arith.constant 1 : index
    %c0_725 = arith.constant 0 : index
    %c0_726 = arith.constant 0 : index
    %c0_727 = arith.constant 0 : index
    %847 = vector.load %arg8[%c1_724, %c0_725, %c0_726, %c0_727] : memref<2x2x8x64xf32, #tpu.memory_space<vmem>>, vector<1x2x8x64xf32>
    %848 = vector.shape_cast %847 : vector<1x2x8x64xf32> to vector<2x8x64xf32>
    %849 = vector.shape_cast %846 : vector<2x8x64xf32> to vector<1x2x8x64xf32>
    tpu.vector_store %arg8[%c1_724, %c0_725, %c0_726, %c0_727], %849 {strides = array<i32>} : memref<2x2x8x64xf32, #tpu.memory_space<vmem>>, vector<1x2x8x64xf32>,
    return
  }
}

</mosaic_0001>

<bundles_post_ra>
// kernel: tpu_custom_call.1
= control target key start
LH: loop header
LB: loop body
LE: loop exit
PB: predicated region body
PF: predicated region fallthrough
CT: control target
= control target key end

     0   :  { %13 = vsyncpa [#allocation7], 0  ;;  %s11362_s0 = inlined_call_operand.vmem [shape: f32[20], index: 0, kind: input, shape index: {}]   ;;  %s11363_s1 = inlined_call_operand.vmem [shape: f32[2,8,64], index: 1, kind: input, shape index: {}]   ;;  %s11364_s2 = inlined_call_operand.vmem [shape: f32[2,8,64], index: 2, kind: input, shape index: {}]   ;;  %s11365_s3 = inlined_call_operand.vmem [shape: bf16[64,64], index: 3, kind: input, shape index: {}]   ;;  %s11366_s4 = inlined_call_operand.vmem [shape: bf16[64,64], index: 4, kind: input, shape index: {}]   ;;  %s11367_s5 = inlined_call_operand.vmem [shape: bf16[8,3,80,64], index: 5, kind: input, shape index: {}]   ;;  %s11368_s6 = inlined_call_operand.vmem [shape: f32[64,64], index: 6, kind: input, shape index: {}]   ;;  %s11369_s7 = inlined_call_operand.vmem [shape: f32[1,8,64], index: 7, kind: input, shape index: {}]   ;;  %s11370_s8 = inlined_call_operand.hbm [shape: f32[2,2,8,64], index: 8, kind: output, shape index: {}]  }
   0x1   :  { %14 = vsyncpa [#allocation6], 0  ;;  %s21_s29 = sshll.u32 %s11362_s0, 4  ;;  %s22_s29 = int_to_ptr.vmem [resolvable:$true] %s21_s29 }
   0x2   :  { %s8959_s30 = scalar_lea.vmem %s22_s29, 16  ;;  %p8964_p1 = scmp.lt.s32.totalorder %s22_s29, %s22_s29 }
   0x3   :  { %p8960_p0 = scmp.ne.s32.totalorder %s22_s29, %s8959_s30  ;;  %p8965_p2 = scmp.lt.s32.totalorder %s8959_s30, %s8959_s30 }
   0x5   :  { %p8966_p3 = por %p8965_p2, %p8964_p1 }
   0x7   :  { %p8967_p4 = pnand %p8966_p3, %p8960_p0 }
   0x9   :  { %8970 = shalt.err (!%p8967_p4)
}
   0xa   :  { %s8995_s9 = smov [#allocation5]  }
   0xb   :  { %24 = dma.vmem_to_smem %s22_s29, 16, %s8995_s9, [#allocation7]  }
   0xc   :  { %8991 = dma.done.wait [#allocation7], 16  }
   0xd   :  { %8992 = vsyncadd [#allocation7], 4294967280 }
   0xe   :  { %42 = sfence }
   0xf   :  { %v8773_v0 = vld [vmem:[%s11365_s3 + $0x18] sm:$0xff]   ;;  %v8996_v1 = vmov 0.0   ;;  %v8774_v2 = vld [vmem:[%s11365_s3 + $0x10] sm:$0xff]   ;;  %vm8997_vm0 = vmmov 0   ;;  %v73_v3 = vld [vmem:[%s11363_s1] sm:$0xff]  ;;  %vm110_vm1 = vcmask 523264  }
  0x10   :  { %7720 = vmatprep.subr.bf16.mxu0 %v8996_v1  ;;  %7728 = vmatprep.mubr.msk.bf16.mxu0 %vm8997_vm0, %v8996_v1  ;;  %v74_v4 = vld [vmem:[%s11363_s1 + $0x8] sm:$0xff]  ;;  %v9071_v5 = vld [vmem:[%s11368_s6 + $0x38] sm:$0xff]  ;;  %v9080_v7 = vld [vmem:[%s11368_s6 + $0x30] sm:$0xff]  ;;  %v83_v8 = vmax.f32 %v73_v3, 0.0  ;;  %vm49_vm2 = vcmask 64512   ;;  %vm51_vm3 = vcmask 58368  }
  0x11   :  { %7721 = vmatpush3.bf16.msra.mxu0 %v8773_v0  ;;  %v8775_v6 = vld [vmem:[%s11365_s3 + $0x8] sm:$0xff]   ;;  %7732 = vmatprep.subr.mxu1 %v9071_v5  ;;  %v84_v9 = vmax.f32 %v74_v4, 0.0  ;;  %v9091_v11 = vld [vmem:[%s11368_s6 + $0x20] sm:$0xff]  ;;  %v9102_v13 = vld [vmem:[%s11368_s6 + $0x18] sm:$0xff]  ;;  %vm55_vm4 = vcmask 654912   ;;  %vm57_vm5 = vcmask 648768  }
  0x12   :  { %7722 = vmatprep.subr.bf16.mxu0 %v8996_v1  ;;  %7733 = vmatpush3.msra.mxu1 %v9071_v5  ;;  %v9086_v10 = vld [vmem:[%s11368_s6 + $0x28] sm:$0xff]  ;;  %v8776_v12 = vld [vmem:[%s11365_s3] sm:$0xff]   ;;  %v9109_v14 = vld [vmem:[%s11368_s6 + $0x10] sm:$0xff]  ;;  %vm44_vm6 = vcmask 647168   ;;  %vm652_vm7 = vcmask 588864   ;;  %s9001_s23 = smov 120  }
  0x13   :  { %7734 = vmatprep.subr.mxu1 %v9080_v7  ;;  %v85_v15 = vpack.c.bf16 %v84_v9, %v83_v8  ;;  %v9134_v16 = vld [vmem:[%s11368_s6 + $0x8] sm:$0xff]  ;;  %v9142_v17 = vld [vmem:[%s11368_s6] sm:$0xff]  ;;  %v8777_v20 = vld [vmem:[%s11366_s4 + $0x18] sm:$0xff]   ;;  %45 = vst.msk [vmem:[#allocation2] sm:$0x1] %vm44_vm6, %v8996_v1  ;;  %vm1265_vm8 = vcmask 654336  }
  0x14   :  { %7735 = vmatpush3.msra.mxu1 %v9080_v7  ;;  %v8778_v23 = vld [vmem:[%s11366_s4 + $0x10] sm:$0xff]   ;;  %v8779_v24 = vld [vmem:[%s11366_s4 + $0x8] sm:$0xff]   ;;  %v355_v25 = vld [vmem:[%s11364_s2] sm:$0xff]  ;;  %46 = vst.msk [vmem:[#allocation2 + $0x10] sm:$0x1] %vm44_vm6, %v8996_v1  ;;  %s6752_s12 = sld [smem:[#allocation5 + $0x1]] }
  0x15   :  { %7723 = vmatpush3.bf16.msra.mxu0 %v8774_v2  ;;  %7736 = vmatprep.subr.mxu1 %v9086_v10  ;;  %v356_v26 = vld [vmem:[%s11364_s2 + $0x8] sm:$0xff]  ;;  %v365_v27 = vmax.f32 %v355_v25, 0.0  ;;  %v8780_v29 = vld [vmem:[%s11366_s4] sm:$0xff]   ;;  %47 = vst.msk [vmem:[#allocation2 + $0x9] sm:$0x1] %vm44_vm6, %v8996_v1  ;;  %s8999_s2 = smov 8  }
  0x16   :  { %7724 = vmatprep.subr.bf16.mxu0 %v8996_v1  ;;  %7737 = vmatpush3.msra.mxu1 %v9086_v10  ;;  %v366_v28 = vmax.f32 %v356_v26, 0.0  ;;  %48 = vst.msk [vmem:[#allocation2 + $0x19] sm:$0x1] %vm44_vm6, %v8996_v1  ;;  %s9000_s4 = smov 112   ;;  %s6753_s13 = sld [smem:[#allocation5 + $0x2]] }
  0x17   :  { %7738 = vmatprep.subr.mxu1 %v9091_v11  ;;  %50 = vst.msk [vmem:[#allocation2] sm:$0xff] %vm49_vm2, %v8996_v1  ;;  %53 = vst.msk [vmem:[#allocation2 + $0x10] sm:$0xff] %vm49_vm2, %v8996_v1  ;;  %s6758_s14 = sld [smem:[#allocation5 + $0x3]] }
  0x18   :  { %7739 = vmatpush3.msra.mxu1 %v9091_v11  ;;  %v367_v30 = vpack.c.bf16 %v366_v28, %v365_v27  ;;  %52 = vst.msk [vmem:[#allocation2 + $0x8] sm:$0x3] %vm51_vm3, %v8996_v1  ;;  %54 = vst.msk [vmem:[#allocation2 + $0x18] sm:$0x3] %vm51_vm3, %v8996_v1  ;;  %s6763_s21 = sld [smem:[#allocation5 + $0x4]] }
  0x19   :  { %7725 = vmatpush3.bf16.msra.mxu0 %v8775_v6  ;;  %7740 = vmatprep.subr.mxu1 %v9102_v13  ;;  %56 = vst.msk [vmem:[#allocation2] sm:$0xff] %vm55_vm4, %v8996_v1  ;;  %59 = vst.msk [vmem:[#allocation2 + $0x10] sm:$0xff] %vm55_vm4, %v8996_v1  ;;  %s6859_s22 = sld [smem:[#allocation5 + $0x7]] }
  0x1a   :  { %7726 = vmatprep.subr.bf16.mxu0 %v8996_v1  ;;  %7741 = vmatpush3.msra.mxu1 %v9102_v13  ;;  %58 = vst.msk [vmem:[#allocation2 + $0x8] sm:$0x3] %vm57_vm5, %v8996_v1  ;;  %60 = vst.msk [vmem:[#allocation2 + $0x18] sm:$0x3] %vm57_vm5, %v8996_v1  ;;  %s6858_s1 = sld [smem:[#allocation5 + $0x6]] }
  0x1b   :  { %7742 = vmatprep.subr.mxu1 %v9109_v14  ;;  %s6864_s24 = sld [smem:[#allocation5 + $0x8]] }
  0x1c   :  { %7743 = vmatpush3.msra.mxu1 %v9109_v14  ;;  %s6974_s25 = sld [smem:[#allocation5 + $0xb]] }
  0x1d   :  { %7727 = vmatpush3.bf16.msra.mxu0 %v8776_v12  ;;  %7744 = vmatprep.subr.mxu1 %v9134_v16  ;;  %s6980_s26 = sld [smem:[#allocation5 + $0xd]] }
  0x1e   :  { %7751 = vmatprep.subr.mxu0 %v9071_v5  ;;  %7745 = vmatpush3.msra.mxu1 %v9134_v16  ;;  %s7091_s16 = sld [smem:[#allocation5 + $0x11]] }
  0x1f   :  { %7746 = vmatprep.subr.mxu1 %v9142_v17  ;;  %s7090_s17 = sld [smem:[#allocation5 + $0x10]] }
  0x20   :  { %7729 = vmatmul.mubr.msk.bf16.vlgmr.msra.gmra.mxu0 %vm110_vm1, %v85_v15  ;;  %7747 = vmatpush3.msra.mxu1 %v9142_v17  ;;  %s7096_s18 = sld [smem:[#allocation5 + $0x12]] }
  0x21   :  { %7752 = vmatpush3.msra.mxu0 %v9071_v5  ;;  %7770 = vmatprep.subr.bf16.mxu1 %v8996_v1 }
  0x22   :  { %7753 = vmatprep.subr.mxu0 %v9080_v7 }
  0x23   :  { %7754 = vmatpush3.msra.mxu0 %v9080_v7 }
  0x24   :  { %7755 = vmatprep.subr.mxu0 %v9086_v10 }
  0x25   :  { %7756 = vmatpush3.msra.mxu0 %v9086_v10 }
  0x26   :  { %7757 = vmatprep.subr.mxu0 %v9091_v11 }
  0x27   :  { %7758 = vmatpush3.msra.mxu0 %v9091_v11 }
  0x28   :  { %7759 = vmatprep.subr.mxu0 %v9102_v13 }
  0x29   :  { %7760 = vmatpush3.msra.mxu0 %v9102_v13 }
  0x2a   :  { %7761 = vmatprep.subr.mxu0 %v9109_v14 }
  0x2b   :  { %7762 = vmatpush3.msra.mxu0 %v9109_v14 }
  0x2c   :  { %7763 = vmatprep.subr.mxu0 %v9134_v16 }
  0x2d   :  { %7764 = vmatpush3.msra.mxu0 %v9134_v16 }
  0x2e   :  { %7765 = vmatprep.subr.mxu0 %v9142_v17 }
  0x2f   :  { %7766 = vmatpush3.msra.mxu0 %v9142_v17 }
  0x30   :  { %7782 = vmatprep.subr.mxu0 %v9071_v5 }
  0xe0   :  { %v148_v18 = vpop.f32.mrf.mxu0 }
  0xe1   :  { %7748 = vmatprep.mubr.msk.f32.mxu1 %vm110_vm1, %v148_v18 }
  0xe2   :  { %v7730_v19 = vpop.f32.mrf.mxu0 }
  0xe3   :  { %v8998_v19 = vmov -inf  }
  0xe4   :  { %v151_v21 = vpop.f32.mrf.mxu0  ;;  %61 = vst.msk [vmem:[#allocation3] sm:$0x1] %vm44_vm6, %v8998_v19  ;;  %63 = vst.msk [vmem:[#allocation3 + $0x9] sm:$0x1] %vm44_vm6, %v8998_v19 }
  0xe5   :  { %7749 = vmatmul.mubr.msk.f32.vlgmr.msra.gmra.mxu1 %vm110_vm1, %v151_v21  ;;  %62 = vst.msk [vmem:[#allocation3 + $0x10] sm:$0x1] %vm44_vm6, %v8998_v19  ;;  %64 = vst.msk [vmem:[#allocation3 + $0x19] sm:$0x1] %vm44_vm6, %v8998_v19 }
  0xe6   :  { %v7731_v22 = vpop.f32.mrf.mxu0  ;;  %7771 = vmatpush3.bf16.msra.mxu1 %v8777_v20  ;;  %7778 = vmatprep.mubr.msk.bf16.mxu1 %vm8997_vm0, %v8996_v1  ;;  %65 = vst.msk [vmem:[#allocation3] sm:$0xff] %vm49_vm2, %v8998_v19  ;;  %67 = vst.msk [vmem:[#allocation3 + $0x10] sm:$0xff] %vm49_vm2, %v8998_v19 }
  0xe7   :  { %7772 = vmatprep.subr.bf16.mxu1 %v8996_v1  ;;  %66 = vst.msk [vmem:[#allocation3 + $0x8] sm:$0x3] %vm51_vm3, %v8998_v19  ;;  %68 = vst.msk [vmem:[#allocation3 + $0x18] sm:$0x3] %vm51_vm3, %v8998_v19 }
  0xe8   :  { %69 = vst.msk [vmem:[#allocation3] sm:$0xff] %vm55_vm4, %v8998_v19  ;;  %71 = vst.msk [vmem:[#allocation3 + $0x10] sm:$0xff] %vm55_vm4, %v8998_v19 }
  0xe9   :  { %70 = vst.msk [vmem:[#allocation3 + $0x8] sm:$0x3] %vm57_vm5, %v8998_v19  ;;  %72 = vst.msk [vmem:[#allocation3 + $0x18] sm:$0x3] %vm57_vm5, %v8998_v19 }
  0xea   :  { %7773 = vmatpush3.bf16.msra.mxu1 %v8778_v23 }
  0xeb   :  { %7774 = vmatprep.subr.bf16.mxu1 %v8996_v1 }
  0xee   :  { %7775 = vmatpush3.bf16.msra.mxu1 %v8779_v24 }
  0xef   :  { %7776 = vmatprep.subr.bf16.mxu1 %v8996_v1 }
  0xf2   :  { %7777 = vmatpush3.bf16.msra.mxu1 %v8780_v29 }
  0xf3   :  { %7801 = vmatprep.subr.mxu1 %v9071_v5 }
  0xf5   :  { %7779 = vmatmul.mubr.msk.bf16.vlgmr.msra.gmra.mxu1 %vm110_vm1, %v367_v30 }
  0xf6   :  { %7802 = vmatpush3.msra.mxu1 %v9071_v5 }
  0xf7   :  { %7803 = vmatprep.subr.mxu1 %v9080_v7 }
  0xf8   :  { %7804 = vmatpush3.msra.mxu1 %v9080_v7 }
  0xf9   :  { %7805 = vmatprep.subr.mxu1 %v9086_v10 }
  0xfa   :  { %7806 = vmatpush3.msra.mxu1 %v9086_v10 }
  0xfb   :  { %7807 = vmatprep.subr.mxu1 %v9091_v11 }
  0xfc   :  { %7808 = vmatpush3.msra.mxu1 %v9091_v11 }
  0xfd   :  { %7809 = vmatprep.subr.mxu1 %v9102_v13 }
  0xfe   :  { %7810 = vmatpush3.msra.mxu1 %v9102_v13 }
  0xff   :  { %7811 = vmatprep.subr.mxu1 %v9109_v14 }
 0x100   :  { %7812 = vmatpush3.msra.mxu1 %v9109_v14 }
 0x101   :  { %7813 = vmatprep.subr.mxu1 %v9134_v16 }
 0x102   :  { %7814 = vmatpush3.msra.mxu1 %v9134_v16 }
 0x103   :  { %7815 = vmatprep.subr.mxu1 %v9142_v17 }
 0x104   :  { %7816 = vmatpush3.msra.mxu1 %v9142_v17 }
 0x105   :  { %7839 = vmatprep.subr.mxu1 %v9071_v5 }
 0x1a5   :  { %v7750_v31 = vpop.f32.mrf.mxu1 }
 0x1a6   :  { %v245_v33 = vsel %vm110_vm1, %v7750_v31, 0.0 }
 0x1a7   :  { %v235_v32 = vpop.f32.mrf.mxu1 }
 0x1a8   :  { %v244_v34 = vsel %vm110_vm1, %v235_v32, 0.0 }
 0x1a9   :  { %v246_v35 = vadd.f32 %v245_v33, %v244_v34 }
 0x1ab   :  { %v247_v36 = vrot.slane %v246_v35, 4 }
 0x1ad   :  { %v248_v37 = vadd.f32 %v247_v36, %v246_v35 }
 0x1af   :  { %v249_v38 = vrot.slane %v248_v37, 2 }
 0x1b1   :  { %v250_v39 = vadd.f32 %v249_v38, %v248_v37 }
 0x1b3   :  { %v251_v40 = vrot.slane %v250_v39, 1 }
 0x1b5   :  { %v252_v41 = vadd.f32 %v251_v40, %v250_v39  ;;  %v9196_v42 = vpop.f32.mrf.mxu1 }
 0x1b7   :  { %v253_v43 = vmul.f32 0.0078125, %v252_v41  ;;  %v7780_v44 = vpop.f32.mrf.mxu1 }
 0x1b9   :  { %v9198_v45 = vsub.f32 %v151_v21, %v253_v43  ;;  %v9200_v46 = vsub.f32 %v148_v18, %v253_v43  ;;  %v9202_v47 = vpop.f32.mrf.mxu1 }
 0x1bb   :  { %v256_v48 = vmul.f32 %v9200_v46, %v9200_v46  ;;  %v257_v49 = vmul.f32 %v9198_v45, %v9198_v45  ;;  %v7781_v50 = vpop.f32.mrf.mxu1 }
 0x1bd   :  { %7767 = vmatprep.mubr.msk.f32.mxu0 %vm110_vm1, %v256_v48 }
 0x1be   :  { %7768 = vmatmul.mubr.msk.f32.vlgmr.msra.gmra.mxu0 %vm110_vm1, %v257_v49 }
 0x1bf   :  { %7783 = vmatpush3.msra.mxu0 %v9071_v5  ;;  %7798 = vmatprep.mubr.msk.f32.mxu0 %vm110_vm1, %v9196_v42 }
 0x1c0   :  { %7784 = vmatprep.subr.mxu0 %v9080_v7 }
 0x1c1   :  { %7785 = vmatpush3.msra.mxu0 %v9080_v7 }
 0x1c2   :  { %7786 = vmatprep.subr.mxu0 %v9086_v10 }
 0x1c3   :  { %7787 = vmatpush3.msra.mxu0 %v9086_v10 }
 0x1c4   :  { %7788 = vmatprep.subr.mxu0 %v9091_v11 }
 0x1c5   :  { %7789 = vmatpush3.msra.mxu0 %v9091_v11 }
 0x1c6   :  { %7790 = vmatprep.subr.mxu0 %v9102_v13 }
 0x1c7   :  { %7791 = vmatpush3.msra.mxu0 %v9102_v13 }
 0x1c8   :  { %7792 = vmatprep.subr.mxu0 %v9109_v14 }
 0x1c9   :  { %7793 = vmatpush3.msra.mxu0 %v9109_v14 }
 0x1ca   :  { %7794 = vmatprep.subr.mxu0 %v9134_v16 }
 0x1cb   :  { %7795 = vmatpush3.msra.mxu0 %v9134_v16 }
 0x1cc   :  { %7796 = vmatprep.subr.mxu0 %v9142_v17 }
 0x1cd   :  { %7797 = vmatpush3.msra.mxu0 %v9142_v17 }
 0x1ce   :  { %7799 = vmatmul.mubr.msk.f32.vlgmr.msra.gmra.mxu0 %vm110_vm1, %v9202_v47  ;;  %7820 = vmatprep.subr.mxu0 %v9071_v5 }
 0x1cf   :  { %7821 = vmatpush3.msra.mxu0 %v9071_v5 }
 0x1d0   :  { %7822 = vmatprep.subr.mxu0 %v9080_v7 }
 0x1d1   :  { %7823 = vmatpush3.msra.mxu0 %v9080_v7 }
 0x1d2   :  { %7824 = vmatprep.subr.mxu0 %v9086_v10 }
 0x1d3   :  { %7825 = vmatpush3.msra.mxu0 %v9086_v10 }
 0x1d4   :  { %7826 = vmatprep.subr.mxu0 %v9091_v11 }
 0x1d5   :  { %7827 = vmatpush3.msra.mxu0 %v9091_v11 }
 0x1d6   :  { %7828 = vmatprep.subr.mxu0 %v9102_v13 }
 0x1d7   :  { %7829 = vmatpush3.msra.mxu0 %v9102_v13 }
 0x1d8   :  { %7830 = vmatprep.subr.mxu0 %v9109_v14 }
 0x1d9   :  { %7831 = vmatpush3.msra.mxu0 %v9109_v14 }
 0x1da   :  { %7832 = vmatprep.subr.mxu0 %v9134_v16 }
 0x1db   :  { %7833 = vmatpush3.msra.mxu0 %v9134_v16 }
 0x1dc   :  { %7834 = vmatprep.subr.mxu0 %v9142_v17 }
 0x1dd   :  { %7835 = vmatpush3.msra.mxu0 %v9142_v17 }
 0x1de   :  { %7858 = vmatprep.subr.mxu0 %v9071_v5 }
 0x27e   :  { %v7769_v51 = vpop.f32.mrf.mxu0 }
 0x27f   :  { %v340_v53 = vsel %vm110_vm1, %v7769_v51, 0.0 }
 0x280   :  { %v330_v52 = vpop.f32.mrf.mxu0 }
 0x281   :  { %v339_v54 = vsel %vm110_vm1, %v330_v52, 0.0 }
 0x282   :  { %v341_v55 = vadd.f32 %v340_v53, %v339_v54 }
 0x284   :  { %v342_v56 = vrot.slane %v341_v55, 4 }
 0x286   :  { %v343_v57 = vadd.f32 %v342_v56, %v341_v55 }
 0x288   :  { %v344_v58 = vrot.slane %v343_v57, 2 }
 0x28a   :  { %v345_v59 = vadd.f32 %v344_v58, %v343_v57 }
 0x28c   :  { %v346_v60 = vrot.slane %v345_v59, 1 }
 0x28e   :  { %v347_v61 = vadd.f32 %v346_v60, %v345_v59  ;;  %v7800_v62 = vpop.f32.mrf.mxu0 }
 0x28f   :  { %v526_v63 = vsel %vm110_vm1, %v7800_v62, 0.0 }
 0x290   :  { %v348_v0 = vmul.f32 0.0078125, %v347_v61  ;;  %v516_v2 = vpop.f32.mrf.mxu0 }
 0x291   :  { %v525_v3 = vsel %vm110_vm1, %v516_v2, 0.0 }
 0x292   :  { %v349_v4 = vadd.f32 1e-05, %v348_v0  ;;  %v527_v6 = vadd.f32 %v526_v63, %v525_v3 }
 0x294   :  { %8901 = vrsqrt.f32 %v349_v4  ;;  %v528_v8 = vrot.slane %v527_v6, 4 }
 0x296   :  { %v529_v9 = vadd.f32 %v528_v8, %v527_v6 }
 0x298   :  { %v530_v12 = vrot.slane %v529_v9, 2 }
 0x29a   :  { %v531_v15 = vadd.f32 %v530_v12, %v529_v9 }
 0x29c   :  { %v532_v18 = vrot.slane %v531_v15, 1 }
 0x29e   :  { %v533_v20 = vadd.f32 %v532_v18, %v531_v15 }
 0x2a0   :  { %v534_v21 = vmul.f32 0.0078125, %v533_v20 }
 0x2a1   :  { %v8902_v22 = vpop.eup %8901 }
 0x2a2   :  { %v351_v23 = vmul.f32 %v8902_v22, %v9200_v46  ;;  %v352_v24 = vmul.f32 %v8902_v22, %v9198_v45  ;;  %v9281_v25 = vsub.f32 %v9202_v47, %v534_v21  ;;  %v9284_v26 = vsub.f32 %v9196_v42, %v534_v21  ;;  %v719_v21 = vld [vmem:[%s11369_s7] sm:$0xff] }
 0x2a4   :  { %353 = vst.msk [vmem:[#allocation4] sm:$0xff] %vm110_vm1, %v351_v23  ;;  %354 = vst.msk [vmem:[#allocation4 + $0x8] sm:$0xff] %vm110_vm1, %v352_v24  ;;  %v537_v27 = vmul.f32 %v9284_v26, %v9284_v26  ;;  %v538_v28 = vmul.f32 %v9281_v25, %v9281_v25 }
 0x2a6   :  { %7817 = vmatprep.mubr.msk.f32.mxu1 %vm110_vm1, %v537_v27 }
 0x2a7   :  { %7818 = vmatmul.mubr.msk.f32.vlgmr.msra.gmra.mxu1 %vm110_vm1, %v538_v28 }
 0x2a8   :  { %7840 = vmatpush3.msra.mxu1 %v9071_v5 }
 0x2a9   :  { %7841 = vmatprep.subr.mxu1 %v9080_v7 }
 0x2aa   :  { %7842 = vmatpush3.msra.mxu1 %v9080_v7 }
 0x2ab   :  { %v9297_v29 = vld [vmem:[#allocation4] sm:$0xff]  ;;  %7843 = vmatprep.subr.mxu1 %v9086_v10  ;;  %v9305_v30 = vld [vmem:[#allocation4 + $0x8] sm:$0xff] }
 0x2ac   :  { %646 = vrot.lane.b32.xlu0 %v9297_v29, %s8999_s2  ;;  %7844 = vmatpush3.msra.mxu1 %v9086_v10  ;;  %v1196_v38 = vmax.f32 %v9297_v29, 0.0  ;;  %v1197_v40 = vmax.f32 %v9305_v30, 0.0 }
 0x2ad   :  { %7845 = vmatprep.subr.mxu1 %v9091_v11 }
 0x2ae   :  { %7846 = vmatpush3.msra.mxu1 %v9091_v11 }
 0x2af   :  { %7847 = vmatprep.subr.mxu1 %v9102_v13 }
 0x2b0   :  { %648 = vrot.lane.b32.xlu0 %v9305_v30, %s8999_s2  ;;  %7848 = vmatpush3.msra.mxu1 %v9102_v13 }
 0x2b1   :  { %7849 = vmatprep.subr.mxu1 %v9109_v14 }
 0x2b2   :  { %7850 = vmatpush3.msra.mxu1 %v9109_v14 }
 0x2b3   :  { %7851 = vmatprep.subr.mxu1 %v9134_v16 }
 0x2b4   :  { %7852 = vmatpush3.msra.mxu1 %v9134_v16 }
 0x2b5   :  { %7853 = vmatprep.subr.mxu1 %v9142_v17 }
 0x2b6   :  { %7854 = vmatpush3.msra.mxu1 %v9142_v17 }
 0x2b7   :  { %7877 = vmatprep.subr.mxu1 %v9071_v5 }
 0x31e   :  { %v647_v7 = vpop.permute.xlu0 %646 }
 0x31f   :  { %653 = vst.msk [vmem:[#allocation2 + $0x1] sm:$0xff] %vm652_vm7, %v647_v7  ;;  %926 = vst.msk [vmem:[#allocation3 + $0x1] sm:$0xff] %vm652_vm7, %v647_v7 }
 0x322   :  { %v649_v10 = vpop.permute.xlu0 %648 }
 0x323   :  { %654 = vst.msk [vmem:[#allocation2 + $0x11] sm:$0xff] %vm652_vm7, %v649_v10  ;;  %927 = vst.msk [vmem:[#allocation3 + $0x11] sm:$0xff] %vm652_vm7, %v649_v10 }
 0x326   :  { %v9322_v11 = vld [vmem:[#allocation2] sm:$0xff] }
 0x327   :  { %667 = vrot.lane.b32.xlu0 %v9322_v11, %s9000_s4  ;;  %659 = vrot.lane.b32.xlu1 %v9322_v11, %s9001_s23  ;;  %v675_v13 = vld [vmem:[#allocation2 + $0x1] sm:$0xff] }
 0x328   :  { %v9336_v14 = vld [vmem:[#allocation2 + $0x2] sm:$0xff] }
 0x329   :  { %v9350_v33 = vld [vmem:[#allocation3] sm:$0xff] }
 0x32a   :  { %v9328_v5 = vld [vmem:[#allocation2 + $0x10] sm:$0xff]  ;;  %v9360_v34 = vld [vmem:[#allocation3 + $0x1] sm:$0xff] }
 0x32b   :  { %681 = vrot.lane.b32.xlu0 %v675_v13, %s9001_s23  ;;  %661 = vrot.lane.b32.xlu1 %v9328_v5, %s9001_s23  ;;  %v9338_v31 = vld [vmem:[#allocation2 + $0x11] sm:$0xff]  ;;  %v9372_v36 = vld [vmem:[#allocation3 + $0x2] sm:$0xff] }
 0x32c   :  { %v9348_v32 = vld [vmem:[#allocation2 + $0x12] sm:$0xff] }
 0x32d   :  { %v9362_v35 = vld [vmem:[#allocation3 + $0x10] sm:$0xff] }
 0x32e   :  { %v9374_v37 = vld [vmem:[#allocation3 + $0x11] sm:$0xff] }
 0x32f   :  { %689 = vrot.lane.b32.xlu0 %v675_v13, %s9000_s4  ;;  %669 = vrot.lane.b32.xlu1 %v9328_v5, %s9000_s4  ;;  %v9385_v39 = vld [vmem:[#allocation3 + $0x12] sm:$0xff] }
 0x333   :  { %703 = vrot.lane.b32.xlu0 %v9336_v14, %s9001_s23  ;;  %683 = vrot.lane.b32.xlu1 %v9338_v31, %s9001_s23 }
 0x337   :  { %711 = vrot.lane.b32.xlu0 %v9336_v14, %s9000_s4  ;;  %691 = vrot.lane.b32.xlu1 %v9338_v31, %s9000_s4 }
 0x33b   :  { %932 = vrot.lane.b32.xlu0 %v9350_v33, %s9001_s23  ;;  %705 = vrot.lane.b32.xlu1 %v9348_v32, %s9001_s23 }
 0x33f   :  { %940 = vrot.lane.b32.xlu0 %v9350_v33, %s9000_s4  ;;  %713 = vrot.lane.b32.xlu1 %v9348_v32, %s9000_s4 }
 0x343   :  { %954 = vrot.lane.b32.xlu0 %v9360_v34, %s9001_s23  ;;  %934 = vrot.lane.b32.xlu1 %v9362_v35, %s9001_s23 }
 0x347   :  { %962 = vrot.lane.b32.xlu0 %v9360_v34, %s9000_s4  ;;  %942 = vrot.lane.b32.xlu1 %v9362_v35, %s9000_s4 }
 0x34b   :  { %976 = vrot.lane.b32.xlu0 %v9372_v36, %s9001_s23  ;;  %956 = vrot.lane.b32.xlu1 %v9374_v37, %s9001_s23 }
 0x34f   :  { %984 = vrot.lane.b32.xlu0 %v9372_v36, %s9000_s4  ;;  %964 = vrot.lane.b32.xlu1 %v9374_v37, %s9000_s4 }
 0x353   :  { %1200 = vrot.lane.b32.xlu0 %v1196_v38, %s8999_s2  ;;  %978 = vrot.lane.b32.xlu1 %v9385_v39, %s9001_s23 }
 0x357   :  { %986 = vrot.lane.b32.xlu1 %v9385_v39, %s9000_s4 }
 0x35b   :  { %1202 = vrot.lane.b32.xlu1 %v1197_v40, %s8999_s2 }
 0x367   :  { %v7819_v41 = vpop.f32.mrf.mxu1 }
 0x368   :  { %v621_v42 = vsel %vm110_vm1, %v7819_v41, 0.0 }
 0x369   :  { %v611_v43 = vpop.f32.mrf.mxu1 }
 0x36a   :  { %v620_v44 = vsel %vm110_vm1, %v611_v43, 0.0 }
 0x36b   :  { %v622_v45 = vadd.f32 %v621_v42, %v620_v44  ;;  %v9428_v44 = vld [vmem:[%s11368_s6 + $0x30] sm:$0xff] }
 0x36d   :  { %v623_v46 = vrot.slane %v622_v45, 4 }
 0x36f   :  { %v624_v47 = vadd.f32 %v623_v46, %v622_v45 }
 0x371   :  { %v625_v48 = vrot.slane %v624_v47, 2 }
 0x373   :  { %v626_v49 = vadd.f32 %v625_v48, %v624_v47  ;;  %v9435_v48 = vld [vmem:[%s11368_s6 + $0x28] sm:$0xff] }
 0x375   :  { %v627_v50 = vrot.slane %v626_v49, 1 }
 0x377   :  { %v628_v51 = vadd.f32 %v627_v50, %v626_v49  ;;  %v9444_v50 = vld [vmem:[%s11368_s6 + $0x20] sm:$0xff] }
 0x379   :  { %v629_v52 = vmul.f32 0.0078125, %v628_v51 }
 0x37b   :  { %v630_v53 = vadd.f32 1e-05, %v629_v52 }
 0x37d   :  { %8903 = vrsqrt.f32 %v630_v53  ;;  %v9451_v53 = vld [vmem:[%s11368_s6 + $0x18] sm:$0xff] }
 0x38a   :  { %v8904_v54 = vpop.eup %8903 }
 0x38b   :  { %v632_v55 = vmul.f32 %v8904_v54, %v9284_v26  ;;  %v633_v56 = vmul.f32 %v8904_v54, %v9281_v25  ;;  %v9458_v54 = vld [vmem:[%s11368_s6 + $0x10] sm:$0xff] }
 0x38d   :  { %635 = vst.msk [vmem:[#allocation4 + $0x10] sm:$0xff] %vm110_vm1, %v632_v55  ;;  %636 = vst.msk [vmem:[#allocation4 + $0x18] sm:$0xff] %vm110_vm1, %v633_v56 }
 0x399   :  { %v668_v57 = vpop.permute.xlu0 %667  ;;  %v660_v58 = vpop.permute.xlu1 %659 }
 0x39a   :  { %v665_v59 = vadd.f32 %v660_v58, %v9322_v11 }
 0x39c   :  { %v673_v60 = vadd.f32 %v668_v57, %v665_v59 }
 0x39d   :  { %v682_v61 = vpop.permute.xlu0 %681  ;;  %v662_v62 = vpop.permute.xlu1 %661 }
 0x39e   :  { %v677_v63 = vadd.f32 %v675_v13, %v673_v60  ;;  %v666_v2 = vadd.f32 %v662_v62, %v9328_v5 }
 0x3a0   :  { %v687_v0 = vadd.f32 %v682_v61, %v677_v63 }
 0x3a1   :  { %v690_v3 = vpop.permute.xlu0 %689  ;;  %v670_v4 = vpop.permute.xlu1 %669 }
 0x3a2   :  { %v695_v6 = vadd.f32 %v690_v3, %v687_v0  ;;  %v674_v8 = vadd.f32 %v670_v4, %v666_v2  ;;  %v8781_v0 = vld [vmem:[%s11367_s5 + $0x48] sm:$0xff]   ;;  %v8782_v3 = vld [vmem:[%s11367_s5 + $0x40] sm:$0xff]   ;;  %v8783_v4 = vld [vmem:[%s11367_s5 + $0x38] sm:$0xff]  }
 0x3a4   :  { %v699_v9 = vadd.f32 %v9336_v14, %v695_v6  ;;  %v678_v12 = vadd.f32 %v9338_v31, %v674_v8  ;;  %v8784_v6 = vld [vmem:[%s11367_s5 + $0x30] sm:$0xff]   ;;  %v8785_v8 = vld [vmem:[%s11367_s5 + $0x28] sm:$0xff]  }
 0x3a5   :  { %v704_v15 = vpop.permute.xlu0 %703  ;;  %v684_v18 = vpop.permute.xlu1 %683 }
 0x3a6   :  { %v709_v19 = vadd.f32 %v704_v15, %v699_v9  ;;  %v688_v20 = vadd.f32 %v684_v18, %v678_v12  ;;  %v8786_v15 = vld [vmem:[%s11367_s5 + $0x70] sm:$0xff]  }
 0x3a9   :  { %v712_v22 = vpop.permute.xlu0 %711  ;;  %v692_v23 = vpop.permute.xlu1 %691 }
 0x3aa   :  { %v717_v24 = vadd.f32 %v712_v22, %v709_v19  ;;  %v696_v25 = vadd.f32 %v692_v23, %v688_v20  ;;  %v8787_v19 = vld [vmem:[%s11367_s5 + $0x68] sm:$0xff]   ;;  %v8788_v20 = vld [vmem:[%s11367_s5 + $0x60] sm:$0xff]   ;;  %v8790_v22 = vld [vmem:[%s11367_s5 + $0x50] sm:$0xff]  }
 0x3ac   :  { %v9407_v26 = vmul.f32 %v719_v21, %v717_v24  ;;  %v700_v27 = vadd.f32 %v9348_v32, %v696_v25  ;;  %v9421_v32 = vld [vmem:[%s11368_s6 + $0x38] sm:$0xff] }
 0x3ad   :  { %v933_v28 = vpop.permute.xlu0 %932  ;;  %v706_v7 = vpop.permute.xlu1 %705 }
 0x3ae   :  { %7836 = vmatprep.mubr.msk.f32.mxu0 %vm110_vm1, %v9407_v26  ;;  %v938_v10 = vmax.f32 %v9350_v33, %v933_v28  ;;  %v710_v11 = vadd.f32 %v706_v7, %v700_v27 }
 0x3b1   :  { %v941_v5 = vpop.permute.xlu0 %940  ;;  %v714_v13 = vpop.permute.xlu1 %713 }
 0x3b2   :  { %v946_v14 = vmax.f32 %v938_v10, %v941_v5  ;;  %v718_v31 = vadd.f32 %v714_v13, %v710_v11 }
 0x3b4   :  { %v9413_v38 = vmul.f32 %v719_v21, %v718_v31  ;;  %v950_v40 = vmax.f32 %v946_v14, %v9360_v34  ;;  %v8789_v21 = vld [vmem:[%s11367_s5 + $0x58] sm:$0xff]  }
 0x3b5   :  { %v955_v41 = vpop.permute.xlu0 %954  ;;  %v935_v42 = vpop.permute.xlu1 %934 }
 0x3b6   :  { %7837 = vmatmul.mubr.msk.f32.vlgmr.msra.gmra.mxu0 %vm110_vm1, %v9413_v38  ;;  %v960_v33 = vmax.f32 %v950_v40, %v955_v41  ;;  %v939_v43 = vmax.f32 %v9362_v35, %v935_v42 }
 0x3b7   :  { %7859 = vmatpush3.msra.mxu0 %v9421_v32 }
 0x3b8   :  { %7860 = vmatprep.subr.mxu0 %v9428_v44 }
 0x3b9   :  { %v963_v34 = vpop.permute.xlu0 %962  ;;  %v943_v45 = vpop.permute.xlu1 %942  ;;  %7861 = vmatpush3.msra.mxu0 %v9428_v44 }
 0x3ba   :  { %v968_v46 = vmax.f32 %v960_v33, %v963_v34  ;;  %v947_v47 = vmax.f32 %v939_v43, %v943_v45  ;;  %7862 = vmatprep.subr.mxu0 %v9435_v48 }
 0x3bb   :  { %7863 = vmatpush3.msra.mxu0 %v9435_v48 }
 0x3bc   :  { %v972_v35 = vmax.f32 %v968_v46, %v9372_v36  ;;  %v951_v49 = vmax.f32 %v947_v47, %v9374_v37  ;;  %7864 = vmatprep.subr.mxu0 %v9444_v50 }
 0x3bd   :  { %v977_v51 = vpop.permute.xlu0 %976  ;;  %v957_v52 = vpop.permute.xlu1 %956  ;;  %7865 = vmatpush3.msra.mxu0 %v9444_v50 }
 0x3be   :  { %7866 = vmatprep.subr.mxu0 %v9451_v53  ;;  %v982_v36 = vmax.f32 %v972_v35, %v977_v51  ;;  %v961_v37 = vmax.f32 %v951_v49, %v957_v52 }
 0x3bf   :  { %7867 = vmatpush3.msra.mxu0 %v9451_v53 }
 0x3c0   :  { %7868 = vmatprep.subr.mxu0 %v9458_v54 }
 0x3c1   :  { %v985_v55 = vpop.permute.xlu0 %984  ;;  %v965_v56 = vpop.permute.xlu1 %964  ;;  %7869 = vmatpush3.msra.mxu0 %v9458_v54 }
 0x3c2   :  { %v9462_v57 = vmax.f32 %v982_v36, %v985_v55  ;;  %v969_v58 = vmax.f32 %v961_v37, %v965_v56  ;;  %7870 = vmatprep.subr.mxu0 %v9134_v16 }
 0x3c3   :  { %7871 = vmatpush3.msra.mxu0 %v9134_v16 }
 0x3c4   :  { %7874 = vmatprep.mubr.msk.f32.mxu0 %vm110_vm1, %v9462_v57  ;;  %v973_v59 = vmax.f32 %v969_v58, %v9385_v39  ;;  %7872 = vmatprep.subr.mxu0 %v9142_v17 }
 0x3c5   :  { %v1201_v60 = vpop.permute.xlu0 %1200  ;;  %v979_v61 = vpop.permute.xlu1 %978  ;;  %7873 = vmatpush3.msra.mxu0 %v9142_v17 }
 0x3c6   :  { %1206 = vst.msk [vmem:[#allocation2 + $0x1] sm:$0xff] %vm652_vm7, %v1201_v60  ;;  %7896 = vmatprep.subr.bf16.mxu0 %v8996_v1  ;;  %v983_v62 = vmax.f32 %v973_v59, %v979_v61  ;;  %v8793_v59 = vld [vmem:[%s11367_s5 + $0x10] sm:$0xff]   ;;  %v8794_v60 = vld [vmem:[%s11367_s5 + $0x8] sm:$0xff]   ;;  %v8795_v61 = vld [vmem:[%s11367_s5] sm:$0xff]  }
 0x3c9   :  { %v987_v63 = vpop.permute.xlu1 %986 }
 0x3ca   :  { %v9476_v2 = vmax.f32 %v983_v62, %v987_v63 }
 0x3cc   :  { %7875 = vmatmul.mubr.msk.f32.vlgmr.msra.gmra.mxu0 %vm110_vm1, %v9476_v2 }
 0x3cd   :  { %7897 = vmatpush3.bf16.msra.mxu0 %v8781_v0  ;;  %v1203_v39 = vpop.permute.xlu1 %1202  ;;  %7906 = vmatprep.mubr.msk.bf16.mxu0 %vm8997_vm0, %v8996_v1  ;;  %v1221_v12 = vld [vmem:[#allocation2 + $0x1] sm:$0xff] }
 0x3ce   :  { %1207 = vst.msk [vmem:[#allocation2 + $0x11] sm:$0xff] %vm652_vm7, %v1203_v39  ;;  %7898 = vmatprep.subr.bf16.mxu0 %v8996_v1  ;;  %v1384_v24 = vld [vmem:[#allocation2 + $0x2] sm:$0xff] }
 0x3cf   :  { %v1208_v0 = vld [vmem:[#allocation2] sm:$0xff] }
 0x3d1   :  { %7899 = vmatpush3.bf16.msra.mxu0 %v8782_v3 }
 0x3d2   :  { %7900 = vmatprep.subr.bf16.mxu0 %v8996_v1 }
 0x3d5   :  { %7901 = vmatpush3.bf16.msra.mxu0 %v8783_v4  ;;  %v1222_v9 = vld [vmem:[#allocation2 + $0x11] sm:$0xff] }
 0x3d6   :  { %7902 = vmatprep.subr.bf16.mxu0 %v8996_v1  ;;  %v1223_v18 = vpack.c.bf16 %v1222_v9, %v1221_v12  ;;  %v1385_v23 = vld [vmem:[#allocation2 + $0x12] sm:$0xff]  ;;  %v9617_v9 = vld [vmem:[%s11368_s6 + $0x28] sm:$0xff]  ;;  %v9624_v12 = vld [vmem:[%s11368_s6 + $0x20] sm:$0xff] }
 0x3d7   :  { %v1386_v25 = vpack.c.bf16 %v1385_v23, %v1384_v24  ;;  %v1209_v62 = vld [vmem:[#allocation2 + $0x10] sm:$0xff] }
 0x3d8   :  { %v1210_v39 = vpack.c.bf16 %v1209_v62, %v1208_v0 }
 0x3d9   :  { %7903 = vmatpush3.bf16.msra.mxu0 %v8784_v6  ;;  %v9603_v6 = vld [vmem:[%s11368_s6 + $0x38] sm:$0xff] }
 0x3da   :  { %7904 = vmatprep.subr.bf16.mxu0 %v8996_v1 }
 0x3dd   :  { %7905 = vmatpush3.bf16.msra.mxu0 %v8785_v8  ;;  %v9610_v8 = vld [vmem:[%s11368_s6 + $0x30] sm:$0xff] }
 0x3de   :  { %7924 = vmatprep.subr.bf16.mxu0 %v8996_v1 }
 0x3e0   :  { %7907 = vmatmul.mubr.msk.bf16.vlgmr.msra.gmra.mxu0 %vm1265_vm8, %v1223_v18  ;;  %v9638_v18 = vld [vmem:[%s11368_s6 + $0x10] sm:$0xff] }
 0x3e1   :  { %7925 = vmatpush3.bf16.msra.mxu0 %v8786_v15  ;;  %7934 = vmatprep.mubr.msk.bf16.mxu0 %vm8997_vm0, %v8996_v1  ;;  %v9631_v15 = vld [vmem:[%s11368_s6 + $0x18] sm:$0xff] }
 0x3e2   :  { %7926 = vmatprep.subr.bf16.mxu0 %v8996_v1 }
 0x3e5   :  { %7927 = vmatpush3.bf16.msra.mxu0 %v8787_v19  ;;  %v9645_v19 = vld [vmem:[%s11368_s6 + $0x8] sm:$0xff] }
 0x3e6   :  { %7928 = vmatprep.subr.bf16.mxu0 %v8996_v1 }
 0x3e9   :  { %7929 = vmatpush3.bf16.msra.mxu0 %v8788_v20  ;;  %v9652_v20 = vld [vmem:[%s11368_s6] sm:$0xff] }
 0x3ea   :  { %7930 = vmatprep.subr.bf16.mxu0 %v8996_v1 }
 0x3ed   :  { %7931 = vmatpush3.bf16.msra.mxu0 %v8789_v21 }
 0x3ee   :  { %7932 = vmatprep.subr.bf16.mxu0 %v8996_v1 }
 0x3f1   :  { %7933 = vmatpush3.bf16.msra.mxu0 %v8790_v22 }
 0x3f2   :  { %7976 = vmatprep.subr.bf16.mxu0 %v8996_v1 }
 0x3f4   :  { %7935 = vmatmul.mubr.msk.bf16.vlgmr.msra.gmra.mxu0 %vm1265_vm8, %v1386_v25 }
 0x3f5   :  { %7986 = vmatprep.mubr.msk.bf16.mxu0 %vm8997_vm0, %v8996_v1 }
 0x476   :  { %v7838_v27 = vpop.f32.mrf.mxu0 }
 0x477   :  { %v812_v7 = vsel %vm110_vm1, %v7838_v27, 0.0 }
 0x478   :  { %v802_v28 = vpop.f32.mrf.mxu0 }
 0x479   :  { %v811_v10 = vsel %vm110_vm1, %v802_v28, 0.0 }
 0x47a   :  { %v813_v11 = vadd.f32 %v812_v7, %v811_v10 }
 0x47c   :  { %v814_v5 = vrot.slane %v813_v11, 4 }
 0x47e   :  { %v815_v13 = vadd.f32 %v814_v5, %v813_v11 }
 0x480   :  { %v816_v14 = vrot.slane %v815_v13, 2 }
 0x482   :  { %v817_v31 = vadd.f32 %v816_v14, %v815_v13 }
 0x484   :  { %v818_v40 = vrot.slane %v817_v31, 1 }
 0x486   :  { %v819_v41 = vadd.f32 %v818_v40, %v817_v31 }
 0x488   :  { %v820_v42 = vmul.f32 0.0078125, %v819_v41 }
 0x48a   :  { %v9529_v33 = vsub.f32 %v9413_v38, %v820_v42  ;;  %v9532_v43 = vsub.f32 %v9407_v26, %v820_v42 }
 0x48c   :  { %v7876_v34 = vpop.f32.mrf.mxu0  ;;  %v823_v45 = vmul.f32 %v9532_v43, %v9532_v43  ;;  %v824_v46 = vmul.f32 %v9529_v33, %v9529_v33 }
 0x48d   :  { %v1082_v35 = vsel %vm110_vm1, %v7876_v34, 0.0 }
 0x48e   :  { %7855 = vmatprep.mubr.msk.f32.mxu1 %vm110_vm1, %v823_v45  ;;  %v1072_v47 = vpop.f32.mrf.mxu0 }
 0x48f   :  { %v1081_v49 = vsel %vm110_vm1, %v1072_v47, 0.0  ;;  %7856 = vmatmul.mubr.msk.f32.vlgmr.msra.gmra.mxu1 %vm110_vm1, %v824_v46 }
 0x490   :  { %v1083_v38 = vadd.f32 %v1082_v35, %v1081_v49  ;;  %7878 = vmatpush3.msra.mxu1 %v9421_v32  ;;  %v640_v35 = vstv %s6752_s12 }
 0x491   :  { %7879 = vmatprep.subr.mxu1 %v9428_v44 }
 0x492   :  { %v1084_v26 = vrot.slane %v1083_v38, 4  ;;  %7880 = vmatpush3.msra.mxu1 %v9428_v44 }
 0x493   :  { %7881 = vmatprep.subr.mxu1 %v9435_v48 }
 0x494   :  { %v1085_v51 = vadd.f32 %v1084_v26, %v1083_v38  ;;  %7882 = vmatpush3.msra.mxu1 %v9435_v48  ;;  %v920_v26 = vstv %s6753_s13 }
 0x495   :  { %7883 = vmatprep.subr.mxu1 %v9444_v50 }
 0x496   :  { %v1086_v52 = vrot.slane %v1085_v51, 2  ;;  %7884 = vmatpush3.msra.mxu1 %v9444_v50 }
 0x497   :  { %7885 = vmatprep.subr.mxu1 %v9451_v53 }
 0x498   :  { %v1087_v36 = vadd.f32 %v1086_v52, %v1085_v51  ;;  %7886 = vmatpush3.msra.mxu1 %v9451_v53 }
 0x499   :  { %7887 = vmatprep.subr.mxu1 %v9458_v54 }
 0x49a   :  { %v1088_v32 = vrot.slane %v1087_v36, 1  ;;  %7888 = vmatpush3.msra.mxu1 %v9458_v54 }
 0x49b   :  { %7889 = vmatprep.subr.mxu1 %v9134_v16 }
 0x49c   :  { %v1089_v44 = vadd.f32 %v1088_v32, %v1087_v36  ;;  %7890 = vmatpush3.msra.mxu1 %v9134_v16  ;;  %v641_v32 = vmul.f32 %v640_v35, %v9297_v29 }
 0x49d   :  { %7891 = vmatprep.subr.mxu1 %v9142_v17 }
 0x49e   :  { %v1090_v48 = vmul.f32 0.0078125, %v1089_v44  ;;  %7892 = vmatpush3.msra.mxu1 %v9142_v17  ;;  %v8791_v17 = vld [vmem:[%s11367_s5 + $0x20] sm:$0xff]   ;;  %v642_v44 = vmul.f32 %v640_v35, %v9305_v30 }
 0x49f   :  { %7910 = vmatprep.subr.bf16.mxu1 %v8996_v1 }
 0x4a0   :  { %v9559_v50 = vsub.f32 %v9476_v2, %v1090_v48  ;;  %v9561_v53 = vpop.f32.mrf.mxu0  ;;  %v9564_v37 = vsub.f32 %v9462_v57, %v1090_v48  ;;  %v8792_v57 = vld [vmem:[%s11367_s5 + $0x18] sm:$0xff]  }
 0x4a2   :  { %v7908_v54 = vpop.f32.mrf.mxu0  ;;  %v1093_v55 = vmul.f32 %v9564_v37, %v9564_v37  ;;  %v1094_v16 = vmul.f32 %v9559_v50, %v9559_v50 }
 0x4a4   :  { %v9573_v56 = vpop.f32.mrf.mxu0  ;;  %7893 = vmatprep.mubr.msk.f32.mxu1 %vm110_vm1, %v1093_v55 }
 0x4a5   :  { %7894 = vmatmul.mubr.msk.f32.vlgmr.msra.gmra.mxu1 %vm110_vm1, %v1094_v16 }
 0x4a6   :  { %v7909_v58 = vpop.f32.mrf.mxu0  ;;  %7911 = vmatpush3.bf16.msra.mxu1 %v8791_v17  ;;  %7920 = vmatprep.mubr.msk.bf16.mxu1 %vm8997_vm0, %v8996_v1 }
 0x4a7   :  { %7912 = vmatprep.subr.bf16.mxu1 %v8996_v1 }
 0x4aa   :  { %7913 = vmatpush3.bf16.msra.mxu1 %v8792_v57 }
 0x4ab   :  { %7914 = vmatprep.subr.bf16.mxu1 %v8996_v1 }
 0x4ae   :  { %7915 = vmatpush3.bf16.msra.mxu1 %v8793_v59 }
 0x4af   :  { %7916 = vmatprep.subr.bf16.mxu1 %v8996_v1 }
 0x4b2   :  { %7917 = vmatpush3.bf16.msra.mxu1 %v8794_v60 }
 0x4b3   :  { %7918 = vmatprep.subr.bf16.mxu1 %v8996_v1 }
 0x4b4   :  { %v9595_v63 = vpop.f32.mrf.mxu0 }
 0x4b6   :  { %7919 = vmatpush3.bf16.msra.mxu1 %v8795_v61  ;;  %v7936_v2 = vpop.f32.mrf.mxu0 }
 0x4b7   :  { %7938 = vmatprep.subr.mxu1 %v9603_v6 }
 0x4b8   :  { %v9597_v3 = vpop.f32.mrf.mxu0 }
 0x4b9   :  { %7921 = vmatmul.mubr.msk.bf16.vlgmr.msra.gmra.mxu1 %vm1265_vm8, %v1210_v39 }
 0x4ba   :  { %v7937_v4 = vpop.f32.mrf.mxu0  ;;  %7939 = vmatpush3.msra.mxu1 %v9603_v6 }
 0x4bb   :  { %7940 = vmatprep.subr.mxu1 %v9610_v8 }
 0x4bc   :  { %7941 = vmatpush3.msra.mxu1 %v9610_v8 }
 0x4bd   :  { %7942 = vmatprep.subr.mxu1 %v9617_v9 }
 0x4be   :  { %7943 = vmatpush3.msra.mxu1 %v9617_v9 }
 0x4bf   :  { %7944 = vmatprep.subr.mxu1 %v9624_v12 }
 0x4c0   :  { %7945 = vmatpush3.msra.mxu1 %v9624_v12 }
 0x4c1   :  { %7946 = vmatprep.subr.mxu1 %v9631_v15 }
 0x4c2   :  { %7947 = vmatpush3.msra.mxu1 %v9631_v15 }
 0x4c3   :  { %7948 = vmatprep.subr.mxu1 %v9638_v18 }
 0x4c4   :  { %7949 = vmatpush3.msra.mxu1 %v9638_v18 }
 0x4c5   :  { %7950 = vmatprep.subr.mxu1 %v9645_v19 }
 0x4c6   :  { %7951 = vmatpush3.msra.mxu1 %v9645_v19 }
 0x4c7   :  { %7952 = vmatprep.subr.mxu1 %v9652_v20 }
 0x4c8   :  { %7953 = vmatpush3.msra.mxu1 %v9652_v20 }
 0x4c9   :  { %7957 = vmatprep.subr.mxu1 %v9603_v6 }
 0x54f   :  { %v7857_v21 = vpop.f32.mrf.mxu1 }
 0x550   :  { %v907_v23 = vsel %vm110_vm1, %v7857_v21, 0.0 }
 0x551   :  { %v897_v22 = vpop.f32.mrf.mxu1 }
 0x552   :  { %v906_v24 = vsel %vm110_vm1, %v897_v22, 0.0 }
 0x553   :  { %v908_v25 = vadd.f32 %v907_v23, %v906_v24 }
 0x555   :  { %v909_v27 = vrot.slane %v908_v25, 4 }
 0x557   :  { %v910_v28 = vadd.f32 %v909_v27, %v908_v25 }
 0x559   :  { %v911_v7 = vrot.slane %v910_v28, 2 }
 0x55b   :  { %v912_v10 = vadd.f32 %v911_v7, %v910_v28 }
 0x55d   :  { %v913_v11 = vrot.slane %v912_v10, 1 }
 0x55f   :  { %v914_v5 = vadd.f32 %v913_v11, %v912_v10 }
 0x561   :  { %v915_v13 = vmul.f32 0.0078125, %v914_v5 }
 0x563   :  { %v916_v14 = vadd.f32 1e-05, %v915_v13 }
 0x565   :  { %8905 = vrsqrt.f32 %v916_v14  ;;  %v7895_v31 = vpop.f32.mrf.mxu1 }
 0x566   :  { %v1177_v41 = vsel %vm110_vm1, %v7895_v31, 0.0 }
 0x567   :  { %v1167_v40 = vpop.f32.mrf.mxu1 }
 0x568   :  { %v1176_v42 = vsel %vm110_vm1, %v1167_v40, 0.0  ;;  %v8796_v40 = vld [vmem:[%s11367_s5 + $0xc0] sm:$0xff]  }
 0x569   :  { %v1178_v34 = vadd.f32 %v1177_v41, %v1176_v42  ;;  %v8797_v41 = vld [vmem:[%s11367_s5 + $0x98] sm:$0xff]   ;;  %7977 = vmatpush3.bf16.msra.mxu0 %v8796_v40 }
 0x56a   :  { %v8798_v42 = vld [vmem:[%s11367_s5 + $0xb8] sm:$0xff]   ;;  %7978 = vmatprep.subr.bf16.mxu0 %v8996_v1 }
 0x56b   :  { %v1179_v45 = vrot.slane %v1178_v34, 4 }
 0x56d   :  { %v1180_v46 = vadd.f32 %v1179_v45, %v1178_v34  ;;  %v8799_v34 = vld [vmem:[%s11367_s5 + $0x90] sm:$0xff]   ;;  %7979 = vmatpush3.bf16.msra.mxu0 %v8798_v42 }
 0x56e   :  { %v8800_v45 = vld [vmem:[%s11367_s5 + $0xb0] sm:$0xff]   ;;  %7980 = vmatprep.subr.bf16.mxu0 %v8996_v1 }
 0x56f   :  { %v1181_v47 = vrot.slane %v1180_v46, 2 }
 0x571   :  { %v1182_v49 = vadd.f32 %v1181_v47, %v1180_v46  ;;  %v8801_v46 = vld [vmem:[%s11367_s5 + $0x88] sm:$0xff]   ;;  %7981 = vmatpush3.bf16.msra.mxu0 %v8800_v45 }
 0x572   :  { %v8906_v38 = vpop.eup %8905  ;;  %7982 = vmatprep.subr.bf16.mxu0 %v8996_v1 }
 0x573   :  { %v918_v51 = vmul.f32 %v8906_v38, %v9532_v43  ;;  %v919_v52 = vmul.f32 %v8906_v38, %v9529_v33  ;;  %v1183_v36 = vrot.slane %v1182_v49, 1 }
 0x575   :  { %v921_v48 = vmul.f32 %v920_v26, %v918_v51  ;;  %v922_v54 = vmul.f32 %v920_v26, %v919_v52  ;;  %v1184_v55 = vadd.f32 %v1183_v36, %v1182_v49 }
 0x577   :  { %v923_v16 = vadd.f32 %v921_v48, %v641_v32  ;;  %v924_v17 = vadd.f32 %v922_v54, %v642_v44  ;;  %v1185_v58 = vmul.f32 0.0078125, %v1184_v55 }
 0x579   :  { %v1186_v57 = vadd.f32 1e-05, %v1185_v58  ;;  %v1377_v59 = vpop.f32.mrf.mxu1  ;;  %v8804_v58 = vld [vmem:[%s11367_s5 + $0xa0] sm:$0xff]  }
 0x57a   :  { %v1378_v60 = vadd.f32 %v1377_v59, %v9561_v53 }
 0x57b   :  { %8907 = vrsqrt.f32 %v1186_v57  ;;  %v7922_v61 = vpop.f32.mrf.mxu1  ;;  %v8805_v57 = vld [vmem:[%s11367_s5 + $0x78] sm:$0xff]  }
 0x57c   :  { %v1472_v43 = vadd.f32 %v9595_v63, %v1378_v60 }
 0x57d   :  { %v1380_v33 = vpop.f32.mrf.mxu1 }
 0x57e   :  { %v1381_v62 = vadd.f32 %v1380_v33, %v9573_v56  ;;  %7954 = vmatprep.mubr.msk.f32.mxu1 %vm110_vm1, %v1472_v43  ;;  %v1190_v56 = vstv %s6758_s14 }
 0x57f   :  { %v7923_v29 = vpop.f32.mrf.mxu1 }
 0x580   :  { %v1473_v30 = vadd.f32 %v9597_v3, %v1381_v62  ;;  %v9743_v62 = vld [vmem:[#allocation4 + $0x18] sm:$0xff]  ;;  %v9745_v29 = vld [vmem:[#allocation4 + $0x10] sm:$0xff] }
 0x582   :  { %7955 = vmatmul.mubr.msk.f32.vlgmr.msra.gmra.mxu1 %vm110_vm1, %v1473_v30 }
 0x583   :  { %7958 = vmatpush3.msra.mxu1 %v9603_v6 }
 0x584   :  { %7959 = vmatprep.subr.mxu1 %v9610_v8 }
 0x585   :  { %7960 = vmatpush3.msra.mxu1 %v9610_v8 }
 0x586   :  { %7961 = vmatprep.subr.mxu1 %v9617_v9 }
 0x587   :  { %7962 = vmatpush3.msra.mxu1 %v9617_v9 }
 0x588   :  { %v8908_v53 = vpop.eup %8907  ;;  %7963 = vmatprep.subr.mxu1 %v9624_v12 }
 0x589   :  { %v1188_v63 = vmul.f32 %v8908_v53, %v9564_v37  ;;  %v1189_v0 = vmul.f32 %v8908_v53, %v9559_v50  ;;  %7964 = vmatpush3.msra.mxu1 %v9624_v12 }
 0x58a   :  { %7965 = vmatprep.subr.mxu1 %v9631_v15 }
 0x58b   :  { %v1191_v2 = vmul.f32 %v1190_v56, %v1188_v63  ;;  %v1192_v39 = vmul.f32 %v1190_v56, %v1189_v0  ;;  %7966 = vmatpush3.msra.mxu1 %v9631_v15  ;;  %v8806_v0 = vld [vmem:[%s11367_s5 + $0xe8] sm:$0xff]  }
 0x58c   :  { %7967 = vmatprep.subr.mxu1 %v9638_v18 }
 0x58d   :  { %v9683_v3 = vadd.f32 %v1191_v2, %v923_v16  ;;  %v9685_v4 = vadd.f32 %v1192_v39, %v924_v17  ;;  %7968 = vmatpush3.msra.mxu1 %v9638_v18  ;;  %v8802_v16 = vld [vmem:[%s11367_s5 + $0xa8] sm:$0xff]   ;;  %v8803_v17 = vld [vmem:[%s11367_s5 + $0x80] sm:$0xff]  }
 0x58e   :  { %7969 = vmatprep.subr.mxu1 %v9645_v19  ;;  %7983 = vmatpush3.bf16.msra.mxu0 %v8802_v16 }
 0x58f   :  { %7970 = vmatpush3.msra.mxu1 %v9645_v19  ;;  %7984 = vmatprep.subr.bf16.mxu0 %v8996_v1 }
 0x590   :  { %7971 = vmatprep.subr.mxu1 %v9652_v20 }
 0x591   :  { %7972 = vmatpush3.msra.mxu1 %v9652_v20 }
 0x592   :  { %7990 = vmatprep.subr.bf16.mxu1 %v8996_v1  ;;  %7985 = vmatpush3.bf16.msra.mxu0 %v8804_v58 }
 0x593   :  { %8004 = vmatprep.subr.bf16.mxu0 %v8996_v1 }
 0x642   :  { %v7956_v50 = vpop.f32.mrf.mxu1 }
 0x643   :  { %v1564_v21 = vsel %vm110_vm1, %v7956_v50, 0.0 }
 0x644   :  { %v1554_v37 = vpop.f32.mrf.mxu1 }
 0x645   :  { %v1563_v22 = vsel %vm110_vm1, %v1554_v37, 0.0 }
 0x646   :  { %v1565_v23 = vadd.f32 %v1564_v21, %v1563_v22 }
 0x648   :  { %v1566_v24 = vrot.slane %v1565_v23, 4 }
 0x64a   :  { %v1567_v25 = vadd.f32 %v1566_v24, %v1565_v23 }
 0x64c   :  { %v1568_v27 = vrot.slane %v1567_v25, 2 }
 0x64e   :  { %v1569_v28 = vadd.f32 %v1568_v27, %v1567_v25 }
 0x650   :  { %v1570_v7 = vrot.slane %v1569_v28, 1 }
 0x652   :  { %v1571_v10 = vadd.f32 %v1570_v7, %v1569_v28  ;;  %v8807_v28 = vld [vmem:[%s11367_s5 + $0xe0] sm:$0xff]  }
 0x654   :  { %v1572_v11 = vmul.f32 0.0078125, %v1571_v10 }
 0x656   :  { %v1574_v5 = vsub.f32 %v1473_v30, %v1572_v11  ;;  %v1573_v13 = vsub.f32 %v1472_v43, %v1572_v11  ;;  %v8808_v11 = vld [vmem:[%s11367_s5 + $0xd8] sm:$0xff]  }
 0x658   :  { %v1575_v14 = vmul.f32 %v1573_v13, %v1573_v13  ;;  %v1576_v31 = vmul.f32 %v1574_v5, %v1574_v5 }
 0x65a   :  { %7973 = vmatprep.mubr.msk.f32.mxu1 %vm110_vm1, %v1575_v14 }
 0x65b   :  { %7974 = vmatmul.mubr.msk.f32.vlgmr.msra.gmra.mxu1 %vm110_vm1, %v1576_v31  ;;  %v8810_v31 = vld [vmem:[%s11367_s5 + $0xc8] sm:$0xff]  }
 0x65c   :  { %8000 = vmatprep.mubr.msk.bf16.mxu1 %vm8997_vm0, %v8996_v1  ;;  %7991 = vmatpush3.bf16.msra.mxu1 %v8797_v41 }
 0x65d   :  { %7992 = vmatprep.subr.bf16.mxu1 %v8996_v1 }
 0x660   :  { %7993 = vmatpush3.bf16.msra.mxu1 %v8799_v34 }
 0x661   :  { %7994 = vmatprep.subr.bf16.mxu1 %v8996_v1 }
 0x664   :  { %7995 = vmatpush3.bf16.msra.mxu1 %v8801_v46 }
 0x665   :  { %7996 = vmatprep.subr.bf16.mxu1 %v8996_v1 }
 0x668   :  { %7997 = vmatpush3.bf16.msra.mxu1 %v8803_v17 }
 0x669   :  { %7998 = vmatprep.subr.bf16.mxu1 %v8996_v1 }
 0x66c   :  { %7999 = vmatpush3.bf16.msra.mxu1 %v8805_v57 }
 0x66d   :  { %8018 = vmatprep.subr.mxu1 %v9603_v6 }
 0x71b   :  { %v7975_v47 = vpop.f32.mrf.mxu1 }
 0x71c   :  { %v1659_v49 = vsel %vm110_vm1, %v7975_v47, 0.0 }
 0x71d   :  { %v1649_v35 = vpop.f32.mrf.mxu1 }
 0x71e   :  { %v1658_v38 = vsel %vm110_vm1, %v1649_v35, 0.0  ;;  %v2712_v35 = vmax.f32 %v9743_v62, 0.0 }
 0x71f   :  { %v1660_v26 = vadd.f32 %v1659_v49, %v1658_v38  ;;  %v2711_v49 = vmax.f32 %v9745_v29, 0.0 }
 0x721   :  { %v1661_v51 = vrot.slane %v1660_v26, 4 }
 0x723   :  { %v1662_v52 = vadd.f32 %v1661_v51, %v1660_v26 }
 0x725   :  { %v1663_v36 = vrot.slane %v1662_v52, 2 }
 0x727   :  { %v1664_v32 = vadd.f32 %v1663_v36, %v1662_v52 }
 0x729   :  { %v1665_v44 = vrot.slane %v1664_v32, 1 }
 0x72b   :  { %v1666_v48 = vadd.f32 %v1665_v44, %v1664_v32 }
 0x72d   :  { %v1667_v54 = vmul.f32 0.0078125, %v1666_v48 }
 0x72f   :  { %v1668_v55 = vadd.f32 1e-05, %v1667_v54 }
 0x731   :  { %8909 = vrsqrt.f32 %v1668_v55 }
 0x73e   :  { %v8910_v59 = vpop.eup %8909 }
 0x73f   :  { %v1671_v60 = vmul.f32 %v8910_v59, %v1574_v5  ;;  %v1670_v61 = vmul.f32 %v8910_v59, %v1573_v13  ;;  %v8809_v5 = vld [vmem:[%s11367_s5 + $0xd0] sm:$0xff]  }
 0x741   :  { %v1673_v43 = vmax.f32 %v1671_v60, 0.0  ;;  %v1672_v33 = vmax.f32 %v1670_v61, 0.0 }
 0x743   :  { %1678 = vrot.lane.b32.xlu1 %v1673_v43, %s8999_s2  ;;  %1676 = vrot.lane.b32.xlu0 %v1672_v33, %s8999_s2 }
 0x747   :  { %2164 = vrot.lane.b32.xlu1 %v9743_v62, %s8999_s2  ;;  %2162 = vrot.lane.b32.xlu0 %v9745_v29, %s8999_s2 }
 0x7b5   :  { %v1679_v30 = vpop.permute.xlu1 %1678  ;;  %v1677_v53 = vpop.permute.xlu0 %1676 }
 0x7b6   :  { %1683 = vst.msk [vmem:[#allocation2 + $0x11] sm:$0xff] %vm652_vm7, %v1679_v30  ;;  %1682 = vst.msk [vmem:[#allocation2 + $0x1] sm:$0xff] %vm652_vm7, %v1677_v53 }
 0x7b9   :  { %v2165_v56 = vpop.permute.xlu1 %2164  ;;  %v2163_v63 = vpop.permute.xlu0 %2162 }
 0x7ba   :  { %2442 = vst.msk [vmem:[#allocation3 + $0x11] sm:$0xff] %vm652_vm7, %v2165_v56  ;;  %2441 = vst.msk [vmem:[#allocation3 + $0x1] sm:$0xff] %vm652_vm7, %v2163_v63 }
 0x7bd   :  { %v1685_v2 = vld [vmem:[#allocation2 + $0x10] sm:$0xff]  ;;  %v1684_v50 = vld [vmem:[#allocation2] sm:$0xff] }
 0x7be   :  { %v1861_v39 = vld [vmem:[#allocation2 + $0x12] sm:$0xff]  ;;  %v1860_v37 = vld [vmem:[#allocation2 + $0x2] sm:$0xff]  ;;  %v1686_v23 = vpack.c.bf16 %v1685_v2, %v1684_v50 }
 0x7bf   :  { %v1698_v21 = vld [vmem:[#allocation2 + $0x1] sm:$0xff]  ;;  %v1699_v22 = vld [vmem:[#allocation2 + $0x11] sm:$0xff]  ;;  %v1862_v40 = vpack.c.bf16 %v1861_v39, %v1860_v37 }
 0x7c0   :  { %v1700_v24 = vpack.c.bf16 %v1699_v22, %v1698_v21  ;;  %2168 = vst.msk [vmem:[#allocation2 + $0x1] sm:$0xff] %vm652_vm7, %v2163_v63  ;;  %2169 = vst.msk [vmem:[#allocation2 + $0x11] sm:$0xff] %vm652_vm7, %v2165_v56  ;;  %8001 = vmatmul.mubr.msk.bf16.vlgmr.msra.gmra.mxu1 %vm1265_vm8, %v1686_v23 }
 0x7c1   :  { %v9762_v25 = vld [vmem:[#allocation3 + $0x10] sm:$0xff]  ;;  %v9764_v27 = vld [vmem:[#allocation3] sm:$0xff]  ;;  %8019 = vmatpush3.msra.mxu1 %v9603_v6 }
 0x7c2   :  { %7987 = vmatmul.mubr.msk.bf16.vlgmr.msra.gmra.mxu0 %vm1265_vm8, %v1700_v24  ;;  %2449 = vrot.lane.b32.xlu1 %v9762_v25, %s9001_s23  ;;  %v9847_v34 = vld [vmem:[#allocation3 + $0x11] sm:$0xff]  ;;  %v9849_v45 = vld [vmem:[#allocation3 + $0x1] sm:$0xff] }
 0x7c3   :  { %8005 = vmatpush3.bf16.msra.mxu0 %v8806_v0  ;;  %2447 = vrot.lane.b32.xlu0 %v9764_v27, %s9001_s23  ;;  %v2486_v46 = vld [vmem:[#allocation3 + $0x12] sm:$0xff]  ;;  %v2485_v47 = vld [vmem:[#allocation3 + $0x2] sm:$0xff] }
 0x7c4   :  { %8006 = vmatprep.subr.bf16.mxu0 %v8996_v1  ;;  %8014 = vmatprep.mubr.msk.bf16.mxu0 %vm8997_vm0, %v8996_v1 }
 0x7c5   :  { %8020 = vmatprep.subr.mxu1 %v9610_v8 }
 0x7c6   :  { %8021 = vmatpush3.msra.mxu1 %v9610_v8 }
 0x7c7   :  { %8007 = vmatpush3.bf16.msra.mxu0 %v8807_v28  ;;  %v9779_v7 = vld [vmem:[#allocation2 + $0x10] sm:$0xff]  ;;  %v9781_v10 = vld [vmem:[#allocation2] sm:$0xff]  ;;  %8022 = vmatprep.subr.mxu1 %v9617_v9 }
 0x7c8   :  { %2176 = vrot.lane.b32.xlu1 %v9779_v7, %s9001_s23  ;;  %2174 = vrot.lane.b32.xlu0 %v9781_v10, %s9001_s23  ;;  %v9805_v13 = vld [vmem:[#allocation2 + $0x11] sm:$0xff]  ;;  %v9807_v14 = vld [vmem:[#allocation2 + $0x1] sm:$0xff] }
 0x7c9   :  { %8008 = vmatprep.subr.bf16.mxu0 %v8996_v1  ;;  %8023 = vmatpush3.msra.mxu1 %v9617_v9  ;;  %v2213_v41 = vld [vmem:[#allocation2 + $0x12] sm:$0xff]  ;;  %v2212_v42 = vld [vmem:[#allocation2 + $0x2] sm:$0xff] }
 0x7ca   :  { %8024 = vmatprep.subr.mxu1 %v9624_v12 }
 0x7cb   :  { %8009 = vmatpush3.bf16.msra.mxu0 %v8808_v11  ;;  %8025 = vmatpush3.msra.mxu1 %v9624_v12 }
 0x7cc   :  { %2184 = vrot.lane.b32.xlu1 %v9779_v7, %s9000_s4  ;;  %2182 = vrot.lane.b32.xlu0 %v9781_v10, %s9000_s4 }
 0x7cd   :  { %8010 = vmatprep.subr.bf16.mxu0 %v8996_v1  ;;  %8026 = vmatprep.subr.mxu1 %v9631_v15 }
 0x7ce   :  { %8027 = vmatpush3.msra.mxu1 %v9631_v15 }
 0x7cf   :  { %8011 = vmatpush3.bf16.msra.mxu0 %v8809_v5  ;;  %8028 = vmatprep.subr.mxu1 %v9638_v18 }
 0x7d0   :  { %2198 = vrot.lane.b32.xlu1 %v9805_v13, %s9001_s23  ;;  %2196 = vrot.lane.b32.xlu0 %v9807_v14, %s9001_s23 }
 0x7d1   :  { %8012 = vmatprep.subr.bf16.mxu0 %v8996_v1  ;;  %8029 = vmatpush3.msra.mxu1 %v9638_v18 }
 0x7d2   :  { %8030 = vmatprep.subr.mxu1 %v9645_v19 }
 0x7d3   :  { %8013 = vmatpush3.bf16.msra.mxu0 %v8810_v31  ;;  %8031 = vmatpush3.msra.mxu1 %v9645_v19 }
 0x7d4   :  { %2206 = vrot.lane.b32.xlu1 %v9805_v13, %s9000_s4  ;;  %2204 = vrot.lane.b32.xlu0 %v9807_v14, %s9000_s4 }
 0x7d5   :  { %8032 = vmatprep.subr.mxu1 %v9652_v20  ;;  %8037 = vmatprep.subr.mxu0 %v9603_v6 }
 0x7d6   :  { %8015 = vmatmul.mubr.msk.bf16.vlgmr.msra.gmra.mxu0 %vm1265_vm8, %v1862_v40  ;;  %8033 = vmatpush3.msra.mxu1 %v9652_v20 }
 0x7d7   :  { %8056 = vmatprep.subr.mxu1 %v9603_v6  ;;  %8038 = vmatpush3.msra.mxu0 %v9603_v6 }
 0x7d8   :  { %2220 = vrot.lane.b32.xlu1 %v2213_v41, %s9001_s23  ;;  %2218 = vrot.lane.b32.xlu0 %v2212_v42, %s9001_s23 }
 0x7d9   :  { %8039 = vmatprep.subr.mxu0 %v9610_v8 }
 0x7da   :  { %8040 = vmatpush3.msra.mxu0 %v9610_v8 }
 0x7db   :  { %8041 = vmatprep.subr.mxu0 %v9617_v9 }
 0x7dc   :  { %2228 = vrot.lane.b32.xlu1 %v2213_v41, %s9000_s4  ;;  %2226 = vrot.lane.b32.xlu0 %v2212_v42, %s9000_s4 }
 0x7dd   :  { %8042 = vmatpush3.msra.mxu0 %v9617_v9 }
 0x7de   :  { %8043 = vmatprep.subr.mxu0 %v9624_v12 }
 0x7df   :  { %8044 = vmatpush3.msra.mxu0 %v9624_v12 }
 0x7e0   :  { %2457 = vrot.lane.b32.xlu1 %v9762_v25, %s9000_s4  ;;  %2455 = vrot.lane.b32.xlu0 %v9764_v27, %s9000_s4 }
 0x7e1   :  { %8045 = vmatprep.subr.mxu0 %v9631_v15 }
 0x7e2   :  { %8046 = vmatpush3.msra.mxu0 %v9631_v15 }
 0x7e3   :  { %8047 = vmatprep.subr.mxu0 %v9638_v18 }
 0x7e4   :  { %2471 = vrot.lane.b32.xlu1 %v9847_v34, %s9001_s23  ;;  %2469 = vrot.lane.b32.xlu0 %v9849_v45, %s9001_s23 }
 0x7e5   :  { %8048 = vmatpush3.msra.mxu0 %v9638_v18 }
 0x7e6   :  { %8049 = vmatprep.subr.mxu0 %v9645_v19 }
 0x7e7   :  { %8050 = vmatpush3.msra.mxu0 %v9645_v19 }
 0x7e8   :  { %2479 = vrot.lane.b32.xlu1 %v9847_v34, %s9000_s4  ;;  %2477 = vrot.lane.b32.xlu0 %v9849_v45, %s9000_s4 }
 0x7e9   :  { %8051 = vmatprep.subr.mxu0 %v9652_v20 }
 0x7ea   :  { %8052 = vmatpush3.msra.mxu0 %v9652_v20 }
 0x7eb   :  { %8075 = vmatprep.subr.mxu0 %v9603_v6 }
 0x7ec   :  { %2493 = vrot.lane.b32.xlu1 %v2486_v46, %s9001_s23  ;;  %2491 = vrot.lane.b32.xlu0 %v2485_v47, %s9001_s23 }
 0x7f0   :  { %2501 = vrot.lane.b32.xlu1 %v2486_v46, %s9000_s4  ;;  %2499 = vrot.lane.b32.xlu0 %v2485_v47, %s9000_s4 }
 0x7f4   :  { %2717 = vrot.lane.b32.xlu1 %v2712_v35, %s8999_s2  ;;  %2715 = vrot.lane.b32.xlu0 %v2711_v49, %s8999_s2 }
 0x834   :  { %v2450_v38 = vpop.permute.xlu1 %2449 }
 0x835   :  { %v2448_v26 = vpop.permute.xlu0 %2447  ;;  %v2454_v23 = vmax.f32 %v9762_v25, %v2450_v38 }
 0x836   :  { %v2453_v24 = vmax.f32 %v9764_v27, %v2448_v26 }
 0x83a   :  { %v2177_v51 = vpop.permute.xlu1 %2176  ;;  %v2175_v52 = vpop.permute.xlu0 %2174 }
 0x83b   :  { %v2181_v36 = vadd.f32 %v2177_v51, %v9779_v7  ;;  %v2180_v32 = vadd.f32 %v2175_v52, %v9781_v10 }
 0x83e   :  { %v2185_v44 = vpop.permute.xlu1 %2184  ;;  %v2183_v48 = vpop.permute.xlu0 %2182 }
 0x83f   :  { %v2189_v54 = vadd.f32 %v2185_v44, %v2181_v36  ;;  %v2188_v55 = vadd.f32 %v2183_v48, %v2180_v32 }
 0x841   :  { %v2193_v16 = vadd.f32 %v9805_v13, %v2189_v54  ;;  %v2192_v17 = vadd.f32 %v9807_v14, %v2188_v55 }
 0x842   :  { %v2199_v58 = vpop.permute.xlu1 %2198  ;;  %v2197_v57 = vpop.permute.xlu0 %2196 }
 0x843   :  { %v2203_v59 = vadd.f32 %v2199_v58, %v2193_v16  ;;  %v2202_v60 = vadd.f32 %v2197_v57, %v2192_v17 }
 0x846   :  { %v2207_v61 = vpop.permute.xlu1 %2206  ;;  %v2205_v43 = vpop.permute.xlu0 %2204 }
 0x847   :  { %v2211_v33 = vadd.f32 %v2207_v61, %v2203_v59  ;;  %v2210_v30 = vadd.f32 %v2205_v43, %v2202_v60 }
 0x849   :  { %v2215_v53 = vadd.f32 %v2213_v41, %v2211_v33  ;;  %v2214_v56 = vadd.f32 %v2212_v42, %v2210_v30  ;;  %v2234_v30 = vld [vmem:[%s11369_s7] sm:$0xff] }
 0x84a   :  { %v2221_v63 = vpop.permute.xlu1 %2220  ;;  %v2219_v0 = vpop.permute.xlu0 %2218 }
 0x84b   :  { %v2225_v2 = vadd.f32 %v2221_v63, %v2215_v53  ;;  %v2224_v39 = vadd.f32 %v2219_v0, %v2214_v56 }
 0x84e   :  { %v2229_v50 = vpop.permute.xlu1 %2228  ;;  %v2227_v37 = vpop.permute.xlu0 %2226 }
 0x84f   :  { %v9878_v21 = vadd.f32 %v2229_v50, %v2225_v2  ;;  %v2232_v22 = vadd.f32 %v2227_v37, %v2224_v39  ;;  %v8811_v50 = vld [vmem:[%s11367_s5 + $0x138] sm:$0xff]   ;;  %v8812_v37 = vld [vmem:[%s11367_s5 + $0x130] sm:$0xff]  }
 0x851   :  { %v9899_v0 = vmul.f32 %v2234_v30, %v2232_v22  ;;  %v9919_v39 = vmul.f32 %v2234_v30, %v9878_v21  ;;  %v8813_v21 = vld [vmem:[%s11367_s5 + $0x128] sm:$0xff]   ;;  %v8814_v22 = vld [vmem:[%s11367_s5 + $0x120] sm:$0xff]  }
 0x852   :  { %v2458_v28 = vpop.permute.xlu1 %2457  ;;  %v2456_v7 = vpop.permute.xlu0 %2455 }
 0x853   :  { %v2462_v10 = vmax.f32 %v2454_v23, %v2458_v28  ;;  %v2461_v11 = vmax.f32 %v2453_v24, %v2456_v7  ;;  %v8815_v23 = vld [vmem:[%s11367_s5 + $0x118] sm:$0xff]   ;;  %v8816_v7 = vld [vmem:[%s11367_s5 + $0x160] sm:$0xff]  }
 0x855   :  { %v2466_v5 = vmax.f32 %v2462_v10, %v9847_v34  ;;  %v2465_v13 = vmax.f32 %v2461_v11, %v9849_v45  ;;  %v8817_v11 = vld [vmem:[%s11367_s5 + $0x158] sm:$0xff]  }
 0x856   :  { %v2472_v14 = vpop.permute.xlu1 %2471  ;;  %v2470_v31 = vpop.permute.xlu0 %2469 }
 0x857   :  { %v2476_v40 = vmax.f32 %v2466_v5, %v2472_v14  ;;  %v2475_v41 = vmax.f32 %v2465_v13, %v2470_v31  ;;  %v8818_v5 = vld [vmem:[%s11367_s5 + $0x150] sm:$0xff]   ;;  %v8819_v13 = vld [vmem:[%s11367_s5 + $0x148] sm:$0xff]   ;;  %v8820_v14 = vld [vmem:[%s11367_s5 + $0x140] sm:$0xff]  }
 0x85a   :  { %v2480_v42 = vpop.permute.xlu1 %2479  ;;  %v2478_v35 = vpop.permute.xlu0 %2477 }
 0x85b   :  { %v2484_v49 = vmax.f32 %v2476_v40, %v2480_v42  ;;  %v2483_v51 = vmax.f32 %v2475_v41, %v2478_v35 }
 0x85d   :  { %v2488_v52 = vmax.f32 %v2484_v49, %v2486_v46  ;;  %v2487_v25 = vmax.f32 %v2483_v51, %v2485_v47 }
 0x85e   :  { %v2494_v38 = vpop.permute.xlu1 %2493  ;;  %v2492_v27 = vpop.permute.xlu0 %2491 }
 0x85f   :  { %v2498_v26 = vmax.f32 %v2488_v52, %v2494_v38  ;;  %v2497_v36 = vmax.f32 %v2487_v25, %v2492_v27 }
 0x862   :  { %v2502_v32 = vpop.permute.xlu1 %2501  ;;  %v2500_v44 = vpop.permute.xlu0 %2499 }
 0x863   :  { %v9884_v48 = vmax.f32 %v2498_v26, %v2502_v32  ;;  %v9886_v34 = vmax.f32 %v2497_v36, %v2500_v44 }
 0x866   :  { %v2718_v45 = vpop.permute.xlu1 %2717  ;;  %v2716_v54 = vpop.permute.xlu0 %2715 }
 0x867   :  { %2722 = vst.msk [vmem:[#allocation2 + $0x11] sm:$0xff] %vm652_vm7, %v2718_v45  ;;  %2721 = vst.msk [vmem:[#allocation2 + $0x1] sm:$0xff] %vm652_vm7, %v2716_v54 }
 0x86e   :  { %v2737_v24 = vld [vmem:[#allocation2 + $0x1] sm:$0xff]  ;;  %v2738_v28 = vld [vmem:[#allocation2 + $0x11] sm:$0xff] }
 0x86f   :  { %v2739_v10 = vpack.c.bf16 %v2738_v28, %v2737_v24  ;;  %v2899_v31 = vld [vmem:[#allocation2 + $0x2] sm:$0xff]  ;;  %v2900_v40 = vld [vmem:[#allocation2 + $0x12] sm:$0xff] }
 0x870   :  { %v2901_v41 = vpack.c.bf16 %v2900_v40, %v2899_v31  ;;  %v8825_v31 = vld [vmem:[%s11367_s5 + $0xf0] sm:$0xff]  }
 0x880   :  { %v1853_v55 = vpop.f32.mrf.mxu1 }
 0x882   :  { %v1779_v16 = vpop.f32.mrf.mxu0  ;;  %v8002_v46 = vpop.f32.mrf.mxu1 }
 0x883   :  { %v1854_v60 = vadd.f32 %v1853_v55, %v1779_v16 }
 0x884   :  { %v7988_v47 = vpop.f32.mrf.mxu0  ;;  %v1856_v17 = vpop.f32.mrf.mxu1 }
 0x886   :  { %v1782_v58 = vpop.f32.mrf.mxu0  ;;  %v8003_v57 = vpop.f32.mrf.mxu1 }
 0x887   :  { %v1857_v53 = vadd.f32 %v1856_v17, %v1782_v58 }
 0x888   :  { %v7989_v59 = vpop.f32.mrf.mxu0 }
 0x896   :  { %v1941_v61 = vpop.f32.mrf.mxu0 }
 0x897   :  { %v9890_v43 = vadd.f32 %v1941_v61, %v1854_v60 }
 0x898   :  { %v8016_v33 = vpop.f32.mrf.mxu0 }
 0x899   :  { %8034 = vmatprep.mubr.msk.f32.mxu1 %vm110_vm1, %v9890_v43 }
 0x89a   :  { %v1944_v56 = vpop.f32.mrf.mxu0 }
 0x89b   :  { %v9897_v63 = vadd.f32 %v1944_v56, %v1857_v53 }
 0x89c   :  { %v8017_v2 = vpop.f32.mrf.mxu0 }
 0x89d   :  { %8035 = vmatmul.mubr.msk.f32.vlgmr.msra.gmra.mxu1 %vm110_vm1, %v9897_v63 }
 0x89e   :  { %8057 = vmatpush3.msra.mxu1 %v9603_v6  ;;  %8072 = vmatprep.mubr.msk.f32.mxu1 %vm110_vm1, %v9899_v0 }
 0x89f   :  { %8058 = vmatprep.subr.mxu1 %v9610_v8 }
 0x8a0   :  { %8059 = vmatpush3.msra.mxu1 %v9610_v8 }
 0x8a1   :  { %8060 = vmatprep.subr.mxu1 %v9617_v9 }
 0x8a2   :  { %8061 = vmatpush3.msra.mxu1 %v9617_v9 }
 0x8a3   :  { %8062 = vmatprep.subr.mxu1 %v9624_v12 }
 0x8a4   :  { %8063 = vmatpush3.msra.mxu1 %v9624_v12 }
 0x8a5   :  { %8064 = vmatprep.subr.mxu1 %v9631_v15 }
 0x8a6   :  { %8065 = vmatpush3.msra.mxu1 %v9631_v15 }
 0x8a7   :  { %8066 = vmatprep.subr.mxu1 %v9638_v18 }
 0x8a8   :  { %8067 = vmatpush3.msra.mxu1 %v9638_v18 }
 0x8a9   :  { %8068 = vmatprep.subr.mxu1 %v9645_v19 }
 0x8aa   :  { %8069 = vmatpush3.msra.mxu1 %v9645_v19 }
 0x8ab   :  { %8070 = vmatprep.subr.mxu1 %v9652_v20 }
 0x8ac   :  { %8071 = vmatpush3.msra.mxu1 %v9652_v20 }
 0x8ad   :  { %8073 = vmatmul.mubr.msk.f32.vlgmr.msra.gmra.mxu1 %vm110_vm1, %v9919_v39  ;;  %8094 = vmatprep.subr.mxu1 %v9603_v6 }
 0x8ae   :  { %8095 = vmatpush3.msra.mxu1 %v9603_v6  ;;  %8110 = vmatprep.mubr.msk.f32.mxu1 %vm110_vm1, %v9886_v34 }
 0x8af   :  { %8096 = vmatprep.subr.mxu1 %v9610_v8 }
 0x8b0   :  { %8097 = vmatpush3.msra.mxu1 %v9610_v8 }
 0x8b1   :  { %8098 = vmatprep.subr.mxu1 %v9617_v9 }
 0x8b2   :  { %8099 = vmatpush3.msra.mxu1 %v9617_v9 }
 0x8b3   :  { %8100 = vmatprep.subr.mxu1 %v9624_v12 }
 0x8b4   :  { %8101 = vmatpush3.msra.mxu1 %v9624_v12 }
 0x8b5   :  { %8102 = vmatprep.subr.mxu1 %v9631_v15 }
 0x8b6   :  { %8103 = vmatpush3.msra.mxu1 %v9631_v15 }
 0x8b7   :  { %8104 = vmatprep.subr.mxu1 %v9638_v18 }
 0x8b8   :  { %8105 = vmatpush3.msra.mxu1 %v9638_v18 }
 0x8b9   :  { %8106 = vmatprep.subr.mxu1 %v9645_v19 }
 0x8ba   :  { %8107 = vmatpush3.msra.mxu1 %v9645_v19 }
 0x8bb   :  { %8108 = vmatprep.subr.mxu1 %v9652_v20 }
 0x8bc   :  { %8109 = vmatpush3.msra.mxu1 %v9652_v20 }
 0x8bd   :  { %8111 = vmatmul.mubr.msk.f32.vlgmr.msra.gmra.mxu1 %vm110_vm1, %v9884_v48  ;;  %8132 = vmatprep.subr.bf16.mxu1 %v8996_v1 }
 0x8be   :  { %8133 = vmatpush3.bf16.msra.mxu1 %v8811_v50  ;;  %8142 = vmatprep.mubr.msk.bf16.mxu1 %vm8997_vm0, %v8996_v1 }
 0x8bf   :  { %8134 = vmatprep.subr.bf16.mxu1 %v8996_v1 }
 0x8c2   :  { %8135 = vmatpush3.bf16.msra.mxu1 %v8812_v37 }
 0x8c3   :  { %8136 = vmatprep.subr.bf16.mxu1 %v8996_v1 }
 0x8c6   :  { %8137 = vmatpush3.bf16.msra.mxu1 %v8813_v21 }
 0x8c7   :  { %8138 = vmatprep.subr.bf16.mxu1 %v8996_v1 }
 0x8ca   :  { %8139 = vmatpush3.bf16.msra.mxu1 %v8814_v22 }
 0x8cb   :  { %8140 = vmatprep.subr.bf16.mxu1 %v8996_v1 }
 0x8ce   :  { %8141 = vmatpush3.bf16.msra.mxu1 %v8815_v23 }
 0x8cf   :  { %8160 = vmatprep.subr.bf16.mxu1 %v8996_v1 }
 0x8d1   :  { %8143 = vmatmul.mubr.msk.bf16.vlgmr.msra.gmra.mxu1 %vm1265_vm8, %v2739_v10 }
 0x8d2   :  { %8161 = vmatpush3.bf16.msra.mxu1 %v8816_v7  ;;  %8170 = vmatprep.mubr.msk.bf16.mxu1 %vm8997_vm0, %v8996_v1 }
 0x8d3   :  { %8162 = vmatprep.subr.bf16.mxu1 %v8996_v1 }
 0x8d6   :  { %8163 = vmatpush3.bf16.msra.mxu1 %v8817_v11 }
 0x8d7   :  { %8164 = vmatprep.subr.bf16.mxu1 %v8996_v1 }
 0x8da   :  { %8165 = vmatpush3.bf16.msra.mxu1 %v8818_v5 }
 0x8db   :  { %8166 = vmatprep.subr.bf16.mxu1 %v8996_v1 }
 0x8de   :  { %8167 = vmatpush3.bf16.msra.mxu1 %v8819_v13 }
 0x8df   :  { %8168 = vmatprep.subr.bf16.mxu1 %v8996_v1 }
 0x8e2   :  { %8169 = vmatpush3.bf16.msra.mxu1 %v8820_v14  ;;  %v8824_v14 = vld [vmem:[%s11367_s5 + $0xf8] sm:$0xff]  }
 0x8e5   :  { %8171 = vmatmul.mubr.msk.bf16.vlgmr.msra.gmra.mxu1 %vm1265_vm8, %v2901_v41  ;;  %v2723_v41 = vld [vmem:[#allocation2] sm:$0xff] }
 0x95d   :  { %v8036_v42 = vpop.f32.mrf.mxu1 }
 0x95e   :  { %v2040_v49 = vsel %vm110_vm1, %v8036_v42, 0.0  ;;  %v2724_v42 = vld [vmem:[#allocation2 + $0x10] sm:$0xff] }
 0x95f   :  { %v2030_v35 = vpop.f32.mrf.mxu1 }
 0x960   :  { %v2039_v51 = vsel %vm110_vm1, %v2030_v35, 0.0 }
 0x961   :  { %v2041_v52 = vadd.f32 %v2040_v49, %v2039_v51  ;;  %v2725_v49 = vpack.c.bf16 %v2724_v42, %v2723_v41 }
 0x963   :  { %v2042_v25 = vrot.slane %v2041_v52, 4 }
 0x965   :  { %v2043_v38 = vadd.f32 %v2042_v25, %v2041_v52  ;;  %v10098_v25 = vld [vmem:[%s11368_s6 + $0x38] sm:$0xff] }
 0x966   :  { %8193 = vmatprep.subr.mxu1 %v10098_v25 }
 0x967   :  { %v2044_v27 = vrot.slane %v2043_v38, 2  ;;  %8194 = vmatpush3.msra.mxu1 %v10098_v25 }
 0x969   :  { %v2045_v26 = vadd.f32 %v2044_v27, %v2043_v38  ;;  %v10106_v38 = vld [vmem:[%s11368_s6 + $0x30] sm:$0xff]  ;;  %v10115_v27 = vld [vmem:[%s11368_s6 + $0x28] sm:$0xff] }
 0x96a   :  { %8195 = vmatprep.subr.mxu1 %v10106_v38 }
 0x96b   :  { %v2046_v36 = vrot.slane %v2045_v26, 1  ;;  %8196 = vmatpush3.msra.mxu1 %v10106_v38 }
 0x96c   :  { %8197 = vmatprep.subr.mxu1 %v10115_v27 }
 0x96d   :  { %v2047_v32 = vadd.f32 %v2046_v36, %v2045_v26  ;;  %v8074_v44 = vpop.f32.mrf.mxu1  ;;  %v10124_v26 = vld [vmem:[%s11368_s6 + $0x20] sm:$0xff]  ;;  %8198 = vmatpush3.msra.mxu1 %v10115_v27  ;;  %v10133_v36 = vld [vmem:[%s11368_s6 + $0x18] sm:$0xff] }
 0x96e   :  { %v2327_v55 = vsel %vm110_vm1, %v8074_v44, 0.0  ;;  %8199 = vmatprep.subr.mxu1 %v10124_v26  ;;  %v10151_v44 = vld [vmem:[%s11368_s6 + $0x8] sm:$0xff] }
 0x96f   :  { %v2048_v45 = vmul.f32 0.0078125, %v2047_v32  ;;  %v2317_v54 = vpop.f32.mrf.mxu1  ;;  %8200 = vmatpush3.msra.mxu1 %v10124_v26  ;;  %v10142_v32 = vld [vmem:[%s11368_s6 + $0x10] sm:$0xff] }
 0x970   :  { %v2326_v16 = vsel %vm110_vm1, %v2317_v54, 0.0  ;;  %8201 = vmatprep.subr.mxu1 %v10133_v36 }
 0x971   :  { %v9996_v46 = vsub.f32 %v9897_v63, %v2048_v45  ;;  %v2328_v47 = vadd.f32 %v2327_v55, %v2326_v16  ;;  %v9999_v17 = vsub.f32 %v9890_v43, %v2048_v45  ;;  %8202 = vmatpush3.msra.mxu1 %v10133_v36  ;;  %v10160_v45 = vld [vmem:[%s11368_s6] sm:$0xff] }
 0x972   :  { %8203 = vmatprep.subr.mxu1 %v10142_v32 }
 0x973   :  { %v2329_v58 = vrot.slane %v2328_v47, 4  ;;  %v2051_v57 = vmul.f32 %v9999_v17, %v9999_v17  ;;  %v2052_v59 = vmul.f32 %v9996_v46, %v9996_v46  ;;  %8204 = vmatpush3.msra.mxu1 %v10142_v32 }
 0x974   :  { %8205 = vmatprep.subr.mxu1 %v10151_v44 }
 0x975   :  { %v2330_v60 = vadd.f32 %v2329_v58, %v2328_v47  ;;  %8053 = vmatprep.mubr.msk.f32.mxu0 %vm110_vm1, %v2051_v57  ;;  %8206 = vmatpush3.msra.mxu1 %v10151_v44 }
 0x976   :  { %8054 = vmatmul.mubr.msk.f32.vlgmr.msra.gmra.mxu0 %vm110_vm1, %v2052_v59  ;;  %8207 = vmatprep.subr.mxu1 %v10160_v45 }
 0x977   :  { %v2331_v61 = vrot.slane %v2330_v60, 2  ;;  %8076 = vmatpush3.msra.mxu0 %v9603_v6  ;;  %8208 = vmatpush3.msra.mxu1 %v10160_v45 }
 0x978   :  { %8077 = vmatprep.subr.mxu0 %v9610_v8  ;;  %8226 = vmatprep.subr.bf16.mxu1 %v8996_v1 }
 0x979   :  { %v2332_v33 = vadd.f32 %v2331_v61, %v2330_v60  ;;  %8078 = vmatpush3.msra.mxu0 %v9610_v8 }
 0x97a   :  { %8079 = vmatprep.subr.mxu0 %v9617_v9 }
 0x97b   :  { %v2333_v43 = vrot.slane %v2332_v33, 1  ;;  %8080 = vmatpush3.msra.mxu0 %v9617_v9 }
 0x97c   :  { %8081 = vmatprep.subr.mxu0 %v9624_v12 }
 0x97d   :  { %v2334_v30 = vadd.f32 %v2333_v43, %v2332_v33  ;;  %8082 = vmatpush3.msra.mxu0 %v9624_v12  ;;  %v8112_v53 = vpop.f32.mrf.mxu1 }
 0x97e   :  { %8083 = vmatprep.subr.mxu0 %v9631_v15  ;;  %v2597_v2 = vsel %vm110_vm1, %v8112_v53, 0.0 }
 0x97f   :  { %v2335_v56 = vmul.f32 0.0078125, %v2334_v30  ;;  %8084 = vmatpush3.msra.mxu0 %v9631_v15  ;;  %v2587_v63 = vpop.f32.mrf.mxu1 }
 0x980   :  { %v2596_v50 = vsel %vm110_vm1, %v2587_v63, 0.0  ;;  %8085 = vmatprep.subr.mxu0 %v9638_v18 }
 0x981   :  { %v10020_v37 = vsub.f32 %v9919_v39, %v2335_v56  ;;  %v2598_v21 = vadd.f32 %v2597_v2, %v2596_v50  ;;  %8086 = vmatpush3.msra.mxu0 %v9638_v18  ;;  %v10024_v22 = vsub.f32 %v9899_v0, %v2335_v56 }
 0x982   :  { %8087 = vmatprep.subr.mxu0 %v9645_v19 }
 0x983   :  { %v2599_v23 = vrot.slane %v2598_v21, 4  ;;  %8088 = vmatpush3.msra.mxu0 %v9645_v19  ;;  %v2338_v24 = vmul.f32 %v10024_v22, %v10024_v22  ;;  %v2339_v28 = vmul.f32 %v10020_v37, %v10020_v37 }
 0x984   :  { %8089 = vmatprep.subr.mxu0 %v9652_v20 }
 0x985   :  { %v2600_v39 = vadd.f32 %v2599_v23, %v2598_v21  ;;  %8090 = vmatpush3.msra.mxu0 %v9652_v20  ;;  %8091 = vmatprep.mubr.msk.f32.mxu0 %vm110_vm1, %v2338_v24 }
 0x986   :  { %8092 = vmatmul.mubr.msk.f32.vlgmr.msra.gmra.mxu0 %vm110_vm1, %v2339_v28  ;;  %8113 = vmatprep.subr.mxu0 %v9603_v6 }
 0x987   :  { %v2601_v0 = vrot.slane %v2600_v39, 2  ;;  %8114 = vmatpush3.msra.mxu0 %v9603_v6 }
 0x988   :  { %8115 = vmatprep.subr.mxu0 %v9610_v8 }
 0x989   :  { %v2602_v7 = vadd.f32 %v2601_v0, %v2600_v39  ;;  %8116 = vmatpush3.msra.mxu0 %v9610_v8 }
 0x98a   :  { %8117 = vmatprep.subr.mxu0 %v9617_v9 }
 0x98b   :  { %v2603_v10 = vrot.slane %v2602_v7, 1  ;;  %8118 = vmatpush3.msra.mxu0 %v9617_v9 }
 0x98c   :  { %8119 = vmatprep.subr.mxu0 %v9624_v12 }
 0x98d   :  { %v2604_v11 = vadd.f32 %v2603_v10, %v2602_v7  ;;  %8120 = vmatpush3.msra.mxu0 %v9624_v12 }
 0x98e   :  { %8121 = vmatprep.subr.mxu0 %v9631_v15 }
 0x98f   :  { %v2605_v5 = vmul.f32 0.0078125, %v2604_v11  ;;  %8122 = vmatpush3.msra.mxu0 %v9631_v15 }
 0x990   :  { %8123 = vmatprep.subr.mxu0 %v9638_v18 }
 0x991   :  { %v10048_v6 = vsub.f32 %v9884_v48, %v2605_v5  ;;  %8124 = vmatpush3.msra.mxu0 %v9638_v18  ;;  %v10051_v8 = vpop.f32.mrf.mxu1  ;;  %v10054_v9 = vsub.f32 %v9886_v34, %v2605_v5  ;;  %v8821_v18 = vld [vmem:[%s11367_s5 + $0x110] sm:$0xff]   ;;  %v8822_v34 = vld [vmem:[%s11367_s5 + $0x108] sm:$0xff]  }
 0x992   :  { %8125 = vmatprep.subr.mxu0 %v9645_v19 }
 0x993   :  { %8126 = vmatpush3.msra.mxu0 %v9645_v19  ;;  %v8144_v12 = vpop.f32.mrf.mxu1  ;;  %v2608_v15 = vmul.f32 %v10054_v9, %v10054_v9  ;;  %v2609_v13 = vmul.f32 %v10048_v6, %v10048_v6 }
 0x994   :  { %8127 = vmatprep.subr.mxu0 %v9652_v20  ;;  %v2148_v12 = vstv %s6763_s21  ;;  %s9002_s21 = smov [#allocation8]  }
 0x995   :  { %8128 = vmatpush3.msra.mxu0 %v9652_v20  ;;  %8129 = vmatprep.mubr.msk.f32.mxu0 %vm110_vm1, %v2608_v15  ;;  %v10068_v48 = vpop.f32.mrf.mxu1  ;;  %v8823_v20 = vld [vmem:[%s11367_s5 + $0x100] sm:$0xff]  }
 0x996   :  { %8130 = vmatmul.mubr.msk.f32.vlgmr.msra.gmra.mxu0 %vm110_vm1, %v2609_v13  ;;  %8146 = vmatprep.subr.bf16.mxu0 %v8996_v1 }
 0x997   :  { %v8145_v19 = vpop.f32.mrf.mxu1  ;;  %8147 = vmatpush3.bf16.msra.mxu0 %v8821_v18  ;;  %8156 = vmatprep.mubr.msk.bf16.mxu0 %vm8997_vm0, %v8996_v1 }
 0x998   :  { %8148 = vmatprep.subr.bf16.mxu0 %v8996_v1 }
 0x99b   :  { %8149 = vmatpush3.bf16.msra.mxu0 %v8822_v34 }
 0x99c   :  { %8150 = vmatprep.subr.bf16.mxu0 %v8996_v1 }
 0x99f   :  { %8151 = vmatpush3.bf16.msra.mxu0 %v8823_v20 }
 0x9a0   :  { %8152 = vmatprep.subr.bf16.mxu0 %v8996_v1 }
 0x9a3   :  { %8153 = vmatpush3.bf16.msra.mxu0 %v8824_v14 }
 0x9a4   :  { %8154 = vmatprep.subr.bf16.mxu0 %v8996_v1 }
 0x9a5   :  { %v10090_v40 = vpop.f32.mrf.mxu1 }
 0x9a7   :  { %8155 = vmatpush3.bf16.msra.mxu0 %v8825_v31  ;;  %v8172_v35 = vpop.f32.mrf.mxu1 }
 0x9a8   :  { %8174 = vmatprep.subr.mxu0 %v10098_v25 }
 0x9a9   :  { %v10092_v51 = vpop.f32.mrf.mxu1 }
 0x9aa   :  { %8157 = vmatmul.mubr.msk.bf16.vlgmr.msra.gmra.mxu0 %vm1265_vm8, %v2725_v49 }
 0x9ab   :  { %v8173_v52 = vpop.f32.mrf.mxu1  ;;  %8175 = vmatpush3.msra.mxu0 %v10098_v25 }
 0x9ac   :  { %8176 = vmatprep.subr.mxu0 %v10106_v38 }
 0x9ad   :  { %8177 = vmatpush3.msra.mxu0 %v10106_v38 }
 0x9ae   :  { %8178 = vmatprep.subr.mxu0 %v10115_v27 }
 0x9af   :  { %8179 = vmatpush3.msra.mxu0 %v10115_v27 }
 0x9b0   :  { %8180 = vmatprep.subr.mxu0 %v10124_v26 }
 0x9b1   :  { %8181 = vmatpush3.msra.mxu0 %v10124_v26 }
 0x9b2   :  { %8182 = vmatprep.subr.mxu0 %v10133_v36 }
 0x9b3   :  { %8183 = vmatpush3.msra.mxu0 %v10133_v36 }
 0x9b4   :  { %8184 = vmatprep.subr.mxu0 %v10142_v32 }
 0x9b5   :  { %8185 = vmatpush3.msra.mxu0 %v10142_v32 }
 0x9b6   :  { %8186 = vmatprep.subr.mxu0 %v10151_v44 }
 0x9b7   :  { %8187 = vmatpush3.msra.mxu0 %v10151_v44 }
 0x9b8   :  { %8188 = vmatprep.subr.mxu0 %v10160_v45 }
 0x9b9   :  { %8189 = vmatpush3.msra.mxu0 %v10160_v45 }
 0x9ba   :  { %8212 = vmatprep.subr.bf16.mxu0 %v8996_v1 }
 0xa36   :  { %v8055_v54 = vpop.f32.mrf.mxu0 }
 0xa37   :  { %v2135_v16 = vsel %vm110_vm1, %v8055_v54, 0.0 }
 0xa38   :  { %v2125_v55 = vpop.f32.mrf.mxu0 }
 0xa39   :  { %v2134_v47 = vsel %vm110_vm1, %v2125_v55, 0.0 }
 0xa3a   :  { %v2136_v58 = vadd.f32 %v2135_v16, %v2134_v47 }
 0xa3c   :  { %v2137_v57 = vrot.slane %v2136_v58, 4 }
 0xa3e   :  { %v2138_v59 = vadd.f32 %v2137_v57, %v2136_v58 }
 0xa40   :  { %v2139_v60 = vrot.slane %v2138_v59, 2 }
 0xa42   :  { %v2140_v61 = vadd.f32 %v2139_v60, %v2138_v59 }
 0xa44   :  { %v2141_v33 = vrot.slane %v2140_v61, 1 }
 0xa46   :  { %v2142_v43 = vadd.f32 %v2141_v33, %v2140_v61  ;;  %v8093_v30 = vpop.f32.mrf.mxu0 }
 0xa47   :  { %v2422_v63 = vsel %vm110_vm1, %v8093_v30, 0.0 }
 0xa48   :  { %v2143_v53 = vmul.f32 0.0078125, %v2142_v43  ;;  %v2412_v56 = vpop.f32.mrf.mxu0 }
 0xa49   :  { %v2421_v2 = vsel %vm110_vm1, %v2412_v56, 0.0 }
 0xa4a   :  { %v2144_v50 = vadd.f32 1e-05, %v2143_v53  ;;  %v2423_v21 = vadd.f32 %v2422_v63, %v2421_v2  ;;  %v2156_v53 = vstv %s6858_s1  ;;  %v2705_v2 = vstv %s6864_s24  ;;  %s6869_s1 = sld [smem:[#allocation5 + $0x9]] }
 0xa4b   :  { %s6975_s24 = sld [smem:[#allocation5 + $0xc]] }
 0xa4c   :  { %8911 = vrsqrt.f32 %v2144_v50  ;;  %v2424_v23 = vrot.slane %v2423_v21, 4  ;;  %v2158_v50 = vmul.f32 %v2156_v53, %v9743_v62 }
 0xa4e   :  { %v2425_v24 = vadd.f32 %v2424_v23, %v2423_v21  ;;  %v2157_v21 = vmul.f32 %v2156_v53, %v9745_v29  ;;  %v8835_v53 = vld [vmem:[%s11367_s5 + $0x168] sm:$0xff]  }
 0xa50   :  { %v2426_v28 = vrot.slane %v2425_v24, 2 }
 0xa52   :  { %v2427_v39 = vadd.f32 %v2426_v28, %v2425_v24 }
 0xa54   :  { %v2428_v0 = vrot.slane %v2427_v39, 1 }
 0xa56   :  { %v8131_v7 = vpop.f32.mrf.mxu0  ;;  %v2429_v10 = vadd.f32 %v2428_v0, %v2427_v39 }
 0xa57   :  { %v2692_v15 = vsel %vm110_vm1, %v8131_v7, 0.0 }
 0xa58   :  { %v2682_v11 = vpop.f32.mrf.mxu0  ;;  %v2430_v31 = vmul.f32 0.0078125, %v2429_v10 }
 0xa59   :  { %v8912_v5 = vpop.eup %8911  ;;  %v2691_v13 = vsel %vm110_vm1, %v2682_v11, 0.0 }
 0xa5a   :  { %v2146_v18 = vmul.f32 %v8912_v5, %v9999_v17  ;;  %v2147_v19 = vmul.f32 %v8912_v5, %v9996_v46  ;;  %v2693_v34 = vadd.f32 %v2692_v15, %v2691_v13  ;;  %v2431_v52 = vadd.f32 1e-05, %v2430_v31  ;;  %v8826_v31 = vld [vmem:[%s11367_s5 + $0x1b0] sm:$0xff]  }
 0xa5c   :  { %v2149_v20 = vmul.f32 %v2148_v12, %v2146_v18  ;;  %v2150_v14 = vmul.f32 %v2148_v12, %v2147_v19  ;;  %v2694_v41 = vrot.slane %v2693_v34, 4  ;;  %8913 = vrsqrt.f32 %v2431_v52  ;;  %v8829_v52 = vld [vmem:[%s11367_s5 + $0x180] sm:$0xff]  }
 0xa5e   :  { %v10178_v42 = vadd.f32 %v2149_v20, %v9683_v3  ;;  %v10181_v35 = vadd.f32 %v2150_v14, %v9685_v4  ;;  %v2695_v49 = vadd.f32 %v2694_v41, %v2693_v34  ;;  %v8827_v41 = vld [vmem:[%s11367_s5 + $0x188] sm:$0xff]  }
 0xa60   :  { %v2696_v54 = vrot.slane %v2695_v49, 2 }
 0xa62   :  { %v2697_v55 = vadd.f32 %v2696_v54, %v2695_v49  ;;  %v8828_v49 = vld [vmem:[%s11367_s5 + $0x1a8] sm:$0xff]   ;;  %v8830_v54 = vld [vmem:[%s11367_s5 + $0x1a0] sm:$0xff]  }
 0xa64   :  { %v2698_v16 = vrot.slane %v2697_v55, 1 }
 0xa66   :  { %v2699_v17 = vadd.f32 %v2698_v16, %v2697_v55  ;;  %v8831_v55 = vld [vmem:[%s11367_s5 + $0x178] sm:$0xff]  }
 0xa68   :  { %v2700_v47 = vmul.f32 0.0078125, %v2699_v17 }
 0xa69   :  { %v8914_v33 = vpop.eup %8913 }
 0xa6a   :  { %v2701_v46 = vadd.f32 1e-05, %v2700_v47  ;;  %v2892_v58 = vpop.f32.mrf.mxu0  ;;  %v2434_v30 = vmul.f32 %v8914_v33, %v10020_v37 }
 0xa6b   :  { %v2893_v57 = vadd.f32 %v2892_v58, %v10051_v8  ;;  %v2433_v8 = vmul.f32 %v8914_v33, %v10024_v22 }
 0xa6c   :  { %8915 = vrsqrt.f32 %v2701_v46  ;;  %v8158_v59 = vpop.f32.mrf.mxu0 }
 0xa6d   :  { %v2987_v3 = vadd.f32 %v10090_v40, %v2893_v57  ;;  %v2435_v40 = vstv %s6859_s22  ;;  %s6722_s22 = sshll.u32 %s9002_s21, 4  ;;  %s6723_s22 = int_to_ptr.vmem [resolvable:$true] %s6722_s22 }
 0xa6e   :  { %v2895_v60 = vpop.f32.mrf.mxu0  ;;  %v2436_v56 = vmul.f32 %v2435_v40, %v2433_v8  ;;  %v8832_v8 = vld [vmem:[%s11367_s5 + $0x198] sm:$0xff]   ;;  %p8976_p6 = scmp.lt.s32.totalorder %s6723_s22, %s6723_s22 }
 0xa6f   :  { %v2896_v4 = vadd.f32 %v2895_v60, %v10068_v48  ;;  %8190 = vmatprep.mubr.msk.f32.mxu0 %vm110_vm1, %v2987_v3  ;;  %v2437_v48 = vmul.f32 %v2435_v40, %v2434_v30  ;;  %v8833_v30 = vld [vmem:[%s11367_s5 + $0x170] sm:$0xff]  }
 0xa70   :  { %v8159_v61 = vpop.f32.mrf.mxu0  ;;  %v2438_v22 = vadd.f32 %v2436_v56, %v2157_v21  ;;  %v8834_v40 = vld [vmem:[%s11367_s5 + $0x190] sm:$0xff]   ;;  %v10251_v21 = vld [vmem:[#allocation4 + $0x8] sm:$0xff] }
 0xa71   :  { %v2988_v43 = vadd.f32 %v10092_v51, %v2896_v4  ;;  %v2439_v24 = vadd.f32 %v2437_v48, %v2158_v50 }
 0xa73   :  { %8191 = vmatmul.mubr.msk.f32.vlgmr.msra.gmra.mxu0 %vm110_vm1, %v2988_v43 }
 0xa74   :  { %8222 = vmatprep.mubr.msk.bf16.mxu0 %vm8997_vm0, %v8996_v1  ;;  %8213 = vmatpush3.bf16.msra.mxu0 %v8826_v31 }
 0xa75   :  { %8214 = vmatprep.subr.bf16.mxu0 %v8996_v1 }
 0xa78   :  { %8215 = vmatpush3.bf16.msra.mxu0 %v8828_v49 }
 0xa79   :  { %v8916_v63 = vpop.eup %8915  ;;  %8216 = vmatprep.subr.bf16.mxu0 %v8996_v1 }
 0xa7a   :  { %v2703_v51 = vmul.f32 %v8916_v63, %v10054_v9  ;;  %v2704_v23 = vmul.f32 %v8916_v63, %v10048_v6 }
 0xa7c   :  { %v2706_v37 = vmul.f32 %v2705_v2, %v2703_v51  ;;  %v2707_v28 = vmul.f32 %v2705_v2, %v2704_v23  ;;  %8217 = vmatpush3.bf16.msra.mxu0 %v8830_v54  ;;  %v10253_v51 = vld [vmem:[#allocation4] sm:$0xff] }
 0xa7d   :  { %8218 = vmatprep.subr.bf16.mxu0 %v8996_v1 }
 0xa7e   :  { %v10197_v39 = vadd.f32 %v2706_v37, %v2438_v22  ;;  %v10199_v0 = vadd.f32 %v2707_v28, %v2439_v24  ;;  %v8836_v28 = vld [vmem:[%s11367_s5 + $0x1d8] sm:$0xff]  }
 0xa80   :  { %8219 = vmatpush3.bf16.msra.mxu0 %v8832_v8 }
 0xa81   :  { %8220 = vmatprep.subr.bf16.mxu0 %v8996_v1 }
 0xa84   :  { %8221 = vmatpush3.bf16.msra.mxu0 %v8834_v40 }
 0xa85   :  { %8240 = vmatprep.subr.bf16.mxu0 %v8996_v1 }
 0xb33   :  { %v8192_v7 = vpop.f32.mrf.mxu0 }
 0xb34   :  { %v3079_v11 = vsel %vm110_vm1, %v8192_v7, 0.0 }
 0xb35   :  { %v3069_v10 = vpop.f32.mrf.mxu0 }
 0xb36   :  { %v3078_v62 = vsel %vm110_vm1, %v3069_v10, 0.0 }
 0xb37   :  { %v3080_v5 = vadd.f32 %v3079_v11, %v3078_v62 }
 0xb39   :  { %v3081_v29 = vrot.slane %v3080_v5, 4 }
 0xb3b   :  { %v3082_v12 = vadd.f32 %v3081_v29, %v3080_v5 }
 0xb3d   :  { %v3083_v9 = vrot.slane %v3082_v12, 2 }
 0xb3f   :  { %v3084_v15 = vadd.f32 %v3083_v9, %v3082_v12 }
 0xb41   :  { %v3085_v6 = vrot.slane %v3084_v15, 1 }
 0xb43   :  { %v3086_v13 = vadd.f32 %v3085_v6, %v3084_v15 }
 0xb45   :  { %v3087_v18 = vmul.f32 0.0078125, %v3086_v13  ;;  %v8837_v13 = vld [vmem:[%s11367_s5 + $0x1d0] sm:$0xff]  }
 0xb47   :  { %v3089_v19 = vsub.f32 %v2988_v43, %v3087_v18  ;;  %v3088_v34 = vsub.f32 %v2987_v3, %v3087_v18  ;;  %v8838_v18 = vld [vmem:[%s11367_s5 + $0x1c8] sm:$0xff]  }
 0xb49   :  { %v3090_v20 = vmul.f32 %v3088_v34, %v3088_v34  ;;  %v3091_v14 = vmul.f32 %v3089_v19, %v3089_v19 }
 0xb4b   :  { %8209 = vmatprep.mubr.msk.f32.mxu1 %vm110_vm1, %v3090_v20  ;;  %v8839_v20 = vld [vmem:[%s11367_s5 + $0x1c0] sm:$0xff]  }
 0xb4c   :  { %8210 = vmatmul.mubr.msk.f32.vlgmr.msra.gmra.mxu1 %vm110_vm1, %v3091_v14  ;;  %v8840_v14 = vld [vmem:[%s11367_s5 + $0x1b8] sm:$0xff]  }
 0xb4d   :  { %8236 = vmatprep.mubr.msk.bf16.mxu1 %vm8997_vm0, %v8996_v1  ;;  %8227 = vmatpush3.bf16.msra.mxu1 %v8827_v41 }
 0xb4e   :  { %8228 = vmatprep.subr.bf16.mxu1 %v8996_v1 }
 0xb51   :  { %8229 = vmatpush3.bf16.msra.mxu1 %v8829_v52 }
 0xb52   :  { %8230 = vmatprep.subr.bf16.mxu1 %v8996_v1 }
 0xb55   :  { %8231 = vmatpush3.bf16.msra.mxu1 %v8831_v55 }
 0xb56   :  { %8232 = vmatprep.subr.bf16.mxu1 %v8996_v1 }
 0xb59   :  { %8233 = vmatpush3.bf16.msra.mxu1 %v8833_v30 }
 0xb5a   :  { %8234 = vmatprep.subr.bf16.mxu1 %v8996_v1 }
 0xb5d   :  { %8235 = vmatpush3.bf16.msra.mxu1 %v8835_v53 }
 0xb5e   :  { %8254 = vmatprep.subr.mxu1 %v10098_v25 }
 0xc0c   :  { %v8211_v16 = vpop.f32.mrf.mxu1 }
 0xc0d   :  { %v3174_v47 = vsel %vm110_vm1, %v8211_v16, 0.0 }
 0xc0e   :  { %v3164_v17 = vpop.f32.mrf.mxu1 }
 0xc0f   :  { %v3173_v46 = vsel %vm110_vm1, %v3164_v17, 0.0 }
 0xc10   :  { %v3175_v58 = vadd.f32 %v3174_v47, %v3173_v46  ;;  %v4232_v46 = vmax.f32 %v10251_v21, 0.0 }
 0xc12   :  { %v3176_v57 = vrot.slane %v3175_v58, 4 }
 0xc14   :  { %v3177_v59 = vadd.f32 %v3176_v57, %v3175_v58  ;;  %v4231_v58 = vmax.f32 %v10253_v51, 0.0 }
 0xc16   :  { %v3178_v3 = vrot.slane %v3177_v59, 2 }
 0xc18   :  { %v3179_v60 = vadd.f32 %v3178_v3, %v3177_v59 }
 0xc1a   :  { %v3180_v4 = vrot.slane %v3179_v60, 1 }
 0xc1c   :  { %v3181_v61 = vadd.f32 %v3180_v4, %v3179_v60 }
 0xc1e   :  { %v3182_v33 = vmul.f32 0.0078125, %v3181_v61 }
 0xc20   :  { %v3183_v43 = vadd.f32 1e-05, %v3182_v33 }
 0xc22   :  { %8917 = vrsqrt.f32 %v3183_v43 }
 0xc2f   :  { %v8918_v56 = vpop.eup %8917 }
 0xc30   :  { %v3186_v48 = vmul.f32 %v8918_v56, %v3089_v19  ;;  %v3185_v63 = vmul.f32 %v8918_v56, %v3088_v34 }
 0xc32   :  { %v3188_v2 = vmax.f32 %v3186_v48, 0.0  ;;  %v3187_v50 = vmax.f32 %v3185_v63, 0.0 }
 0xc34   :  { %3193 = vrot.lane.b32.xlu1 %v3188_v2, %s8999_s2  ;;  %3191 = vrot.lane.b32.xlu0 %v3187_v50, %s8999_s2 }
 0xc38   :  { %3684 = vrot.lane.b32.xlu1 %v10251_v21, %s8999_s2  ;;  %3682 = vrot.lane.b32.xlu0 %v10253_v51, %s8999_s2 }
 0xca6   :  { %v3194_v23 = vpop.permute.xlu1 %3193  ;;  %v3192_v22 = vpop.permute.xlu0 %3191 }
 0xca7   :  { %3198 = vst.msk [vmem:[#allocation2 + $0x11] sm:$0xff] %vm652_vm7, %v3194_v23  ;;  %3197 = vst.msk [vmem:[#allocation2 + $0x1] sm:$0xff] %vm652_vm7, %v3192_v22 }
 0xcaa   :  { %v3685_v24 = vpop.permute.xlu1 %3684  ;;  %v3683_v37 = vpop.permute.xlu0 %3682 }
 0xcab   :  { %3962 = vst.msk [vmem:[#allocation3 + $0x11] sm:$0xff] %vm652_vm7, %v3685_v24  ;;  %3961 = vst.msk [vmem:[#allocation3 + $0x1] sm:$0xff] %vm652_vm7, %v3683_v37 }
 0xcae   :  { %v3213_v7 = vld [vmem:[#allocation2 + $0x1] sm:$0xff]  ;;  %v3214_v10 = vld [vmem:[#allocation2 + $0x11] sm:$0xff] }
 0xcaf   :  { %v3375_v11 = vld [vmem:[#allocation2 + $0x2] sm:$0xff]  ;;  %v3215_v62 = vpack.c.bf16 %v3214_v10, %v3213_v7  ;;  %v3376_v5 = vld [vmem:[#allocation2 + $0x12] sm:$0xff] }
 0xcb0   :  { %v3199_v29 = vld [vmem:[#allocation2] sm:$0xff]  ;;  %v3200_v12 = vld [vmem:[#allocation2 + $0x10] sm:$0xff]  ;;  %v3377_v49 = vpack.c.bf16 %v3376_v5, %v3375_v11 }
 0xcb1   :  { %v3201_v9 = vpack.c.bf16 %v3200_v12, %v3199_v29  ;;  %3688 = vst.msk [vmem:[#allocation2 + $0x1] sm:$0xff] %vm652_vm7, %v3683_v37  ;;  %3689 = vst.msk [vmem:[#allocation2 + $0x11] sm:$0xff] %vm652_vm7, %v3685_v24  ;;  %8223 = vmatmul.mubr.msk.bf16.vlgmr.msra.gmra.mxu0 %vm1265_vm8, %v3215_v62 }
 0xcb2   :  { %8241 = vmatpush3.bf16.msra.mxu0 %v8836_v28  ;;  %v10270_v15 = vld [vmem:[#allocation3 + $0x10] sm:$0xff]  ;;  %v10272_v6 = vld [vmem:[#allocation3] sm:$0xff]  ;;  %8250 = vmatprep.mubr.msk.bf16.mxu0 %vm8997_vm0, %v8996_v1 }
 0xcb3   :  { %8237 = vmatmul.mubr.msk.bf16.vlgmr.msra.gmra.mxu1 %vm1265_vm8, %v3201_v9  ;;  %3969 = vrot.lane.b32.xlu1 %v10270_v15, %s9001_s23  ;;  %v10356_v55 = vld [vmem:[#allocation3 + $0x11] sm:$0xff]  ;;  %v10358_v16 = vld [vmem:[#allocation3 + $0x1] sm:$0xff] }
 0xcb4   :  { %3967 = vrot.lane.b32.xlu0 %v10272_v6, %s9001_s23  ;;  %8242 = vmatprep.subr.bf16.mxu0 %v8996_v1  ;;  %v4006_v17 = vld [vmem:[#allocation3 + $0x12] sm:$0xff]  ;;  %v4005_v47 = vld [vmem:[#allocation3 + $0x2] sm:$0xff] }
 0xcb5   :  { %8255 = vmatpush3.msra.mxu1 %v10098_v25 }
 0xcb6   :  { %8243 = vmatpush3.bf16.msra.mxu0 %v8837_v13  ;;  %8256 = vmatprep.subr.mxu1 %v10106_v38 }
 0xcb7   :  { %8244 = vmatprep.subr.bf16.mxu0 %v8996_v1  ;;  %8257 = vmatpush3.msra.mxu1 %v10106_v38 }
 0xcb8   :  { %v10289_v19 = vld [vmem:[#allocation2 + $0x10] sm:$0xff]  ;;  %v10291_v34 = vld [vmem:[#allocation2] sm:$0xff]  ;;  %8258 = vmatprep.subr.mxu1 %v10115_v27 }
 0xcb9   :  { %3696 = vrot.lane.b32.xlu1 %v10289_v19, %s9001_s23  ;;  %3694 = vrot.lane.b32.xlu0 %v10291_v34, %s9001_s23  ;;  %v10315_v31 = vld [vmem:[#allocation2 + $0x11] sm:$0xff]  ;;  %v10317_v41 = vld [vmem:[#allocation2 + $0x1] sm:$0xff] }
 0xcba   :  { %8245 = vmatpush3.bf16.msra.mxu0 %v8838_v18  ;;  %8259 = vmatpush3.msra.mxu1 %v10115_v27  ;;  %v3733_v52 = vld [vmem:[#allocation2 + $0x12] sm:$0xff]  ;;  %v3732_v54 = vld [vmem:[#allocation2 + $0x2] sm:$0xff] }
 0xcbb   :  { %8246 = vmatprep.subr.bf16.mxu0 %v8996_v1  ;;  %8260 = vmatprep.subr.mxu1 %v10124_v26 }
 0xcbc   :  { %8261 = vmatpush3.msra.mxu1 %v10124_v26 }
 0xcbd   :  { %3704 = vrot.lane.b32.xlu1 %v10289_v19, %s9000_s4  ;;  %3702 = vrot.lane.b32.xlu0 %v10291_v34, %s9000_s4 }
 0xcbe   :  { %8247 = vmatpush3.bf16.msra.mxu0 %v8839_v20  ;;  %8262 = vmatprep.subr.mxu1 %v10133_v36 }
 0xcbf   :  { %8248 = vmatprep.subr.bf16.mxu0 %v8996_v1  ;;  %8263 = vmatpush3.msra.mxu1 %v10133_v36 }
 0xcc0   :  { %8264 = vmatprep.subr.mxu1 %v10142_v32 }
 0xcc1   :  { %3718 = vrot.lane.b32.xlu1 %v10315_v31, %s9001_s23  ;;  %3716 = vrot.lane.b32.xlu0 %v10317_v41, %s9001_s23 }
 0xcc2   :  { %8249 = vmatpush3.bf16.msra.mxu0 %v8840_v14  ;;  %8265 = vmatpush3.msra.mxu1 %v10142_v32 }
 0xcc3   :  { %8266 = vmatprep.subr.mxu1 %v10151_v44  ;;  %8273 = vmatprep.subr.mxu0 %v10098_v25 }
 0xcc4   :  { %8267 = vmatpush3.msra.mxu1 %v10151_v44 }
 0xcc5   :  { %3726 = vrot.lane.b32.xlu1 %v10315_v31, %s9000_s4  ;;  %3724 = vrot.lane.b32.xlu0 %v10317_v41, %s9000_s4 }
 0xcc6   :  { %8251 = vmatmul.mubr.msk.bf16.vlgmr.msra.gmra.mxu0 %vm1265_vm8, %v3377_v49  ;;  %8268 = vmatprep.subr.mxu1 %v10160_v45 }
 0xcc7   :  { %8274 = vmatpush3.msra.mxu0 %v10098_v25  ;;  %8269 = vmatpush3.msra.mxu1 %v10160_v45 }
 0xcc8   :  { %8275 = vmatprep.subr.mxu0 %v10106_v38  ;;  %8292 = vmatprep.subr.mxu1 %v10098_v25 }
 0xcc9   :  { %3740 = vrot.lane.b32.xlu1 %v3733_v52, %s9001_s23  ;;  %3738 = vrot.lane.b32.xlu0 %v3732_v54, %s9001_s23 }
 0xcca   :  { %8276 = vmatpush3.msra.mxu0 %v10106_v38 }
 0xccb   :  { %8277 = vmatprep.subr.mxu0 %v10115_v27 }
 0xccc   :  { %8278 = vmatpush3.msra.mxu0 %v10115_v27 }
 0xccd   :  { %3748 = vrot.lane.b32.xlu1 %v3733_v52, %s9000_s4  ;;  %3746 = vrot.lane.b32.xlu0 %v3732_v54, %s9000_s4 }
 0xcce   :  { %8279 = vmatprep.subr.mxu0 %v10124_v26 }
 0xccf   :  { %8280 = vmatpush3.msra.mxu0 %v10124_v26 }
 0xcd0   :  { %8281 = vmatprep.subr.mxu0 %v10133_v36 }
 0xcd1   :  { %3977 = vrot.lane.b32.xlu1 %v10270_v15, %s9000_s4  ;;  %3975 = vrot.lane.b32.xlu0 %v10272_v6, %s9000_s4 }
 0xcd2   :  { %8282 = vmatpush3.msra.mxu0 %v10133_v36 }
 0xcd3   :  { %8283 = vmatprep.subr.mxu0 %v10142_v32 }
 0xcd4   :  { %8284 = vmatpush3.msra.mxu0 %v10142_v32 }
 0xcd5   :  { %3991 = vrot.lane.b32.xlu1 %v10356_v55, %s9001_s23  ;;  %3989 = vrot.lane.b32.xlu0 %v10358_v16, %s9001_s23 }
 0xcd6   :  { %8285 = vmatprep.subr.mxu0 %v10151_v44 }
 0xcd7   :  { %8286 = vmatpush3.msra.mxu0 %v10151_v44 }
 0xcd8   :  { %8287 = vmatprep.subr.mxu0 %v10160_v45 }
 0xcd9   :  { %3999 = vrot.lane.b32.xlu1 %v10356_v55, %s9000_s4  ;;  %3997 = vrot.lane.b32.xlu0 %v10358_v16, %s9000_s4 }
 0xcda   :  { %8288 = vmatpush3.msra.mxu0 %v10160_v45 }
 0xcdb   :  { %8311 = vmatprep.subr.mxu0 %v10098_v25 }
 0xcdd   :  { %4013 = vrot.lane.b32.xlu1 %v4006_v17, %s9001_s23  ;;  %4011 = vrot.lane.b32.xlu0 %v4005_v47, %s9001_s23 }
 0xce1   :  { %4021 = vrot.lane.b32.xlu1 %v4006_v17, %s9000_s4  ;;  %4019 = vrot.lane.b32.xlu0 %v4005_v47, %s9000_s4 }
 0xce5   :  { %4237 = vrot.lane.b32.xlu1 %v4232_v46, %s8999_s2  ;;  %4235 = vrot.lane.b32.xlu0 %v4231_v58, %s8999_s2 }
 0xd25   :  { %v3970_v57 = vpop.permute.xlu1 %3969 }
 0xd26   :  { %v3968_v59 = vpop.permute.xlu0 %3967  ;;  %v3974_v13 = vmax.f32 %v10270_v15, %v3970_v57 }
 0xd27   :  { %v3973_v18 = vmax.f32 %v10272_v6, %v3968_v59 }
 0xd2b   :  { %v3697_v3 = vpop.permute.xlu1 %3696  ;;  %v3695_v60 = vpop.permute.xlu0 %3694 }
 0xd2c   :  { %v3701_v4 = vadd.f32 %v3697_v3, %v10289_v19  ;;  %v3700_v61 = vadd.f32 %v3695_v60, %v10291_v34 }
 0xd2f   :  { %v3705_v33 = vpop.permute.xlu1 %3704  ;;  %v3703_v43 = vpop.permute.xlu0 %3702 }
 0xd30   :  { %v3709_v8 = vadd.f32 %v3705_v33, %v3701_v4  ;;  %v3708_v30 = vadd.f32 %v3703_v43, %v3700_v61 }
 0xd32   :  { %v3713_v40 = vadd.f32 %v10315_v31, %v3709_v8  ;;  %v3712_v53 = vadd.f32 %v10317_v41, %v3708_v30 }
 0xd33   :  { %v3719_v56 = vpop.permute.xlu1 %3718  ;;  %v3717_v48 = vpop.permute.xlu0 %3716 }
 0xd34   :  { %v3723_v63 = vadd.f32 %v3719_v56, %v3713_v40  ;;  %v3722_v2 = vadd.f32 %v3717_v48, %v3712_v53 }
 0xd37   :  { %v3727_v50 = vpop.permute.xlu1 %3726  ;;  %v3725_v23 = vpop.permute.xlu0 %3724 }
 0xd38   :  { %v3731_v22 = vadd.f32 %v3727_v50, %v3723_v63  ;;  %v3730_v24 = vadd.f32 %v3725_v23, %v3722_v2 }
 0xd3a   :  { %v3735_v37 = vadd.f32 %v3733_v52, %v3731_v22  ;;  %v3734_v28 = vadd.f32 %v3732_v54, %v3730_v24 }
 0xd3b   :  { %v3741_v7 = vpop.permute.xlu1 %3740  ;;  %v3739_v10 = vpop.permute.xlu0 %3738 }
 0xd3c   :  { %v3745_v11 = vadd.f32 %v3741_v7, %v3735_v37  ;;  %v3744_v62 = vadd.f32 %v3739_v10, %v3734_v28  ;;  %v3754_v28 = vld [vmem:[%s11369_s7] sm:$0xff] }
 0xd3f   :  { %v3749_v5 = vpop.permute.xlu1 %3748  ;;  %v3747_v29 = vpop.permute.xlu0 %3746 }
 0xd40   :  { %v10386_v12 = vadd.f32 %v3749_v5, %v3745_v11  ;;  %v3752_v9 = vadd.f32 %v3747_v29, %v3744_v62 }
 0xd42   :  { %v10407_v62 = vmul.f32 %v3754_v28, %v3752_v9  ;;  %v10427_v29 = vmul.f32 %v3754_v28, %v10386_v12  ;;  %v8841_v12 = vld [vmem:[%s11367_s5 + $0x228] sm:$0xff]   ;;  %v8842_v9 = vld [vmem:[%s11367_s5 + $0x220] sm:$0xff]  }
 0xd43   :  { %v3978_v19 = vpop.permute.xlu1 %3977  ;;  %v3976_v34 = vpop.permute.xlu0 %3975 }
 0xd44   :  { %v3982_v20 = vmax.f32 %v3974_v13, %v3978_v19  ;;  %v3981_v14 = vmax.f32 %v3973_v18, %v3976_v34  ;;  %v8843_v13 = vld [vmem:[%s11367_s5 + $0x218] sm:$0xff]   ;;  %v8844_v18 = vld [vmem:[%s11367_s5 + $0x210] sm:$0xff]   ;;  %v8845_v19 = vld [vmem:[%s11367_s5 + $0x208] sm:$0xff]  }
 0xd46   :  { %v3986_v31 = vmax.f32 %v3982_v20, %v10356_v55  ;;  %v3985_v41 = vmax.f32 %v3981_v14, %v10358_v16  ;;  %v8846_v14 = vld [vmem:[%s11367_s5 + $0x250] sm:$0xff]  }
 0xd47   :  { %v3992_v49 = vpop.permute.xlu1 %3991  ;;  %v3990_v52 = vpop.permute.xlu0 %3989 }
 0xd48   :  { %v3996_v54 = vmax.f32 %v3986_v31, %v3992_v49  ;;  %v3995_v46 = vmax.f32 %v3985_v41, %v3990_v52  ;;  %v8847_v41 = vld [vmem:[%s11367_s5 + $0x248] sm:$0xff]   ;;  %v8848_v49 = vld [vmem:[%s11367_s5 + $0x240] sm:$0xff]   ;;  %v8849_v52 = vld [vmem:[%s11367_s5 + $0x238] sm:$0xff]  }
 0xd4b   :  { %v4000_v58 = vpop.permute.xlu1 %3999  ;;  %v3998_v3 = vpop.permute.xlu0 %3997 }
 0xd4c   :  { %v4004_v60 = vmax.f32 %v3996_v54, %v4000_v58  ;;  %v4003_v4 = vmax.f32 %v3995_v46, %v3998_v3  ;;  %v8850_v54 = vld [vmem:[%s11367_s5 + $0x230] sm:$0xff]  }
 0xd4e   :  { %v4008_v61 = vmax.f32 %v4004_v60, %v4006_v17  ;;  %v4007_v15 = vmax.f32 %v4003_v4, %v4005_v47 }
 0xd4f   :  { %v4014_v57 = vpop.permute.xlu1 %4013  ;;  %v4012_v6 = vpop.permute.xlu0 %4011 }
 0xd50   :  { %v4018_v59 = vmax.f32 %v4008_v61, %v4014_v57  ;;  %v4017_v33 = vmax.f32 %v4007_v15, %v4012_v6 }
 0xd53   :  { %v4022_v43 = vpop.permute.xlu1 %4021  ;;  %v4020_v8 = vpop.permute.xlu0 %4019 }
 0xd54   :  { %v10392_v30 = vmax.f32 %v4018_v59, %v4022_v43  ;;  %v10394_v55 = vmax.f32 %v4017_v33, %v4020_v8 }
 0xd57   :  { %v4238_v16 = vpop.permute.xlu1 %4237  ;;  %v4236_v40 = vpop.permute.xlu0 %4235 }
 0xd58   :  { %4242 = vst.msk [vmem:[#allocation2 + $0x11] sm:$0xff] %vm652_vm7, %v4238_v16  ;;  %4241 = vst.msk [vmem:[#allocation2 + $0x1] sm:$0xff] %vm652_vm7, %v4236_v40 }
 0xd5f   :  { %v4257_v34 = vld [vmem:[#allocation2 + $0x1] sm:$0xff]  ;;  %v4258_v20 = vld [vmem:[#allocation2 + $0x11] sm:$0xff] }
 0xd60   :  { %v4259_v31 = vpack.c.bf16 %v4258_v20, %v4257_v34  ;;  %v4419_v46 = vld [vmem:[#allocation2 + $0x2] sm:$0xff]  ;;  %v4420_v58 = vld [vmem:[#allocation2 + $0x12] sm:$0xff] }
 0xd61   :  { %v4421_v3 = vpack.c.bf16 %v4420_v58, %v4419_v46  ;;  %v8946_v20 = vld [vmem:[%s11368_s6 + $0x20] sm:$0xff]  ;;  %v8949_v58 = vld [vmem:[%s11368_s6 + $0x8] sm:$0xff] }
 0xd71   :  { %v3294_v53 = vpop.f32.mrf.mxu0 }
 0xd73   :  { %v3368_v56 = vpop.f32.mrf.mxu1  ;;  %v8224_v17 = vpop.f32.mrf.mxu0 }
 0xd74   :  { %v3369_v23 = vadd.f32 %v3368_v56, %v3294_v53 }
 0xd75   :  { %v8238_v47 = vpop.f32.mrf.mxu1  ;;  %v3297_v48 = vpop.f32.mrf.mxu0 }
 0xd77   :  { %v3371_v63 = vpop.f32.mrf.mxu1  ;;  %v8225_v2 = vpop.f32.mrf.mxu0 }
 0xd78   :  { %v3372_v7 = vadd.f32 %v3371_v63, %v3297_v48 }
 0xd79   :  { %v8239_v50 = vpop.f32.mrf.mxu1 }
 0xd86   :  { %v3456_v22 = vpop.f32.mrf.mxu0 }
 0xd87   :  { %v10398_v24 = vadd.f32 %v3456_v22, %v3369_v23 }
 0xd88   :  { %v8252_v37 = vpop.f32.mrf.mxu0 }
 0xd89   :  { %8270 = vmatprep.mubr.msk.f32.mxu1 %vm110_vm1, %v10398_v24 }
 0xd8a   :  { %v3459_v10 = vpop.f32.mrf.mxu0 }
 0xd8b   :  { %v10405_v11 = vadd.f32 %v3459_v10, %v3372_v7 }
 0xd8c   :  { %v8253_v5 = vpop.f32.mrf.mxu0 }
 0xd8d   :  { %8271 = vmatmul.mubr.msk.f32.vlgmr.msra.gmra.mxu1 %vm110_vm1, %v10405_v11 }
 0xd8e   :  { %8293 = vmatpush3.msra.mxu1 %v10098_v25  ;;  %8308 = vmatprep.mubr.msk.f32.mxu1 %vm110_vm1, %v10407_v62 }
 0xd8f   :  { %8294 = vmatprep.subr.mxu1 %v10106_v38 }
 0xd90   :  { %8295 = vmatpush3.msra.mxu1 %v10106_v38 }
 0xd91   :  { %8296 = vmatprep.subr.mxu1 %v10115_v27 }
 0xd92   :  { %8297 = vmatpush3.msra.mxu1 %v10115_v27 }
 0xd93   :  { %8298 = vmatprep.subr.mxu1 %v10124_v26 }
 0xd94   :  { %8299 = vmatpush3.msra.mxu1 %v10124_v26 }
 0xd95   :  { %8300 = vmatprep.subr.mxu1 %v10133_v36 }
 0xd96   :  { %8301 = vmatpush3.msra.mxu1 %v10133_v36 }
 0xd97   :  { %8302 = vmatprep.subr.mxu1 %v10142_v32 }
 0xd98   :  { %8303 = vmatpush3.msra.mxu1 %v10142_v32 }
 0xd99   :  { %8304 = vmatprep.subr.mxu1 %v10151_v44 }
 0xd9a   :  { %8305 = vmatpush3.msra.mxu1 %v10151_v44 }
 0xd9b   :  { %8306 = vmatprep.subr.mxu1 %v10160_v45 }
 0xd9c   :  { %8307 = vmatpush3.msra.mxu1 %v10160_v45 }
 0xd9d   :  { %8309 = vmatmul.mubr.msk.f32.vlgmr.msra.gmra.mxu1 %vm110_vm1, %v10427_v29  ;;  %8330 = vmatprep.subr.mxu1 %v10098_v25 }
 0xd9e   :  { %8331 = vmatpush3.msra.mxu1 %v10098_v25  ;;  %8346 = vmatprep.mubr.msk.f32.mxu1 %vm110_vm1, %v10394_v55 }
 0xd9f   :  { %8332 = vmatprep.subr.mxu1 %v10106_v38 }
 0xda0   :  { %8333 = vmatpush3.msra.mxu1 %v10106_v38 }
 0xda1   :  { %8334 = vmatprep.subr.mxu1 %v10115_v27 }
 0xda2   :  { %8335 = vmatpush3.msra.mxu1 %v10115_v27 }
 0xda3   :  { %8336 = vmatprep.subr.mxu1 %v10124_v26 }
 0xda4   :  { %8337 = vmatpush3.msra.mxu1 %v10124_v26 }
 0xda5   :  { %8338 = vmatprep.subr.mxu1 %v10133_v36 }
 0xda6   :  { %8339 = vmatpush3.msra.mxu1 %v10133_v36 }
 0xda7   :  { %8340 = vmatprep.subr.mxu1 %v10142_v32 }
 0xda8   :  { %8341 = vmatpush3.msra.mxu1 %v10142_v32 }
 0xda9   :  { %8342 = vmatprep.subr.mxu1 %v10151_v44 }
 0xdaa   :  { %8343 = vmatpush3.msra.mxu1 %v10151_v44 }
 0xdab   :  { %8344 = vmatprep.subr.mxu1 %v10160_v45 }
 0xdac   :  { %8345 = vmatpush3.msra.mxu1 %v10160_v45 }
 0xdad   :  { %8347 = vmatmul.mubr.msk.f32.vlgmr.msra.gmra.mxu1 %vm110_vm1, %v10392_v30  ;;  %8368 = vmatprep.subr.bf16.mxu1 %v8996_v1 }
 0xdae   :  { %8369 = vmatpush3.bf16.msra.mxu1 %v8841_v12  ;;  %8378 = vmatprep.mubr.msk.bf16.mxu1 %vm8997_vm0, %v8996_v1 }
 0xdaf   :  { %8370 = vmatprep.subr.bf16.mxu1 %v8996_v1 }
 0xdb2   :  { %8371 = vmatpush3.bf16.msra.mxu1 %v8842_v9 }
 0xdb3   :  { %8372 = vmatprep.subr.bf16.mxu1 %v8996_v1 }
 0xdb6   :  { %8373 = vmatpush3.bf16.msra.mxu1 %v8843_v13 }
 0xdb7   :  { %8374 = vmatprep.subr.bf16.mxu1 %v8996_v1 }
 0xdba   :  { %8375 = vmatpush3.bf16.msra.mxu1 %v8844_v18 }
 0xdbb   :  { %8376 = vmatprep.subr.bf16.mxu1 %v8996_v1 }
 0xdbe   :  { %8377 = vmatpush3.bf16.msra.mxu1 %v8845_v19 }
 0xdbf   :  { %8396 = vmatprep.subr.bf16.mxu1 %v8996_v1 }
 0xdc1   :  { %8379 = vmatmul.mubr.msk.bf16.vlgmr.msra.gmra.mxu1 %vm1265_vm8, %v4259_v31  ;;  %v8947_v31 = vld [vmem:[%s11368_s6 + $0x18] sm:$0xff] }
 0xdc2   :  { %8397 = vmatpush3.bf16.msra.mxu1 %v8846_v14  ;;  %8406 = vmatprep.mubr.msk.bf16.mxu1 %vm8997_vm0, %v8996_v1 }
 0xdc3   :  { %8398 = vmatprep.subr.bf16.mxu1 %v8996_v1 }
 0xdc6   :  { %8399 = vmatpush3.bf16.msra.mxu1 %v8847_v41 }
 0xdc7   :  { %8400 = vmatprep.subr.bf16.mxu1 %v8996_v1 }
 0xdca   :  { %8401 = vmatpush3.bf16.msra.mxu1 %v8848_v49  ;;  %v8948_v49 = vld [vmem:[%s11368_s6 + $0x10] sm:$0xff] }
 0xdcb   :  { %8402 = vmatprep.subr.bf16.mxu1 %v8996_v1 }
 0xdce   :  { %8403 = vmatpush3.bf16.msra.mxu1 %v8849_v52 }
 0xdcf   :  { %8404 = vmatprep.subr.bf16.mxu1 %v8996_v1 }
 0xdd2   :  { %8405 = vmatpush3.bf16.msra.mxu1 %v8850_v54 }
 0xdd5   :  { %8407 = vmatmul.mubr.msk.bf16.vlgmr.msra.gmra.mxu1 %vm1265_vm8, %v4421_v3 }
 0xe4d   :  { %v8272_v60 = vpop.f32.mrf.mxu1 }
 0xe4e   :  { %v3555_v61 = vsel %vm110_vm1, %v8272_v60, 0.0 }
 0xe4f   :  { %v3545_v4 = vpop.f32.mrf.mxu1 }
 0xe50   :  { %v3554_v15 = vsel %vm110_vm1, %v3545_v4, 0.0  ;;  %v8851_v4 = vld [vmem:[%s11367_s5 + $0x200] sm:$0xff]  }
 0xe51   :  { %v3556_v57 = vadd.f32 %v3555_v61, %v3554_v15 }
 0xe53   :  { %v3557_v6 = vrot.slane %v3556_v57, 4 }
 0xe55   :  { %v3558_v59 = vadd.f32 %v3557_v6, %v3556_v57  ;;  %v8852_v57 = vld [vmem:[%s11367_s5 + $0x1f8] sm:$0xff]   ;;  %v8853_v6 = vld [vmem:[%s11367_s5 + $0x1f0] sm:$0xff]  }
 0xe57   :  { %v3559_v33 = vrot.slane %v3558_v59, 2 }
 0xe59   :  { %v3560_v43 = vadd.f32 %v3559_v33, %v3558_v59  ;;  %v8854_v59 = vld [vmem:[%s11367_s5 + $0x1e8] sm:$0xff]   ;;  %v8855_v33 = vld [vmem:[%s11367_s5 + $0x1e0] sm:$0xff]  }
 0xe5b   :  { %v3561_v8 = vrot.slane %v3560_v43, 1 }
 0xe5d   :  { %v3562_v16 = vadd.f32 %v3561_v8, %v3560_v43  ;;  %v8310_v40 = vpop.f32.mrf.mxu1  ;;  %v4243_v8 = vld [vmem:[#allocation2] sm:$0xff] }
 0xe5e   :  { %v3847_v17 = vsel %vm110_vm1, %v8310_v40, 0.0 }
 0xe5f   :  { %v3563_v53 = vmul.f32 0.0078125, %v3562_v16  ;;  %v3837_v56 = vpop.f32.mrf.mxu1  ;;  %v4244_v16 = vld [vmem:[#allocation2 + $0x10] sm:$0xff] }
 0xe60   :  { %v3846_v47 = vsel %vm110_vm1, %v3837_v56, 0.0 }
 0xe61   :  { %v10504_v48 = vsub.f32 %v10405_v11, %v3563_v53  ;;  %v3848_v63 = vadd.f32 %v3847_v17, %v3846_v47  ;;  %v10507_v2 = vsub.f32 %v10398_v24, %v3563_v53  ;;  %v4245_v53 = vpack.c.bf16 %v4244_v16, %v4243_v8  ;;  %v10614_v47 = vld [vmem:[%s11368_s6 + $0x38] sm:$0xff] }
 0xe62   :  { %8429 = vmatprep.subr.mxu1 %v10614_v47 }
 0xe63   :  { %v3849_v50 = vrot.slane %v3848_v63, 4  ;;  %v3566_v23 = vmul.f32 %v10507_v2, %v10507_v2  ;;  %v3567_v22 = vmul.f32 %v10504_v48, %v10504_v48  ;;  %8430 = vmatpush3.msra.mxu1 %v10614_v47 }
 0xe65   :  { %v3850_v37 = vadd.f32 %v3849_v50, %v3848_v63  ;;  %8289 = vmatprep.mubr.msk.f32.mxu0 %vm110_vm1, %v3566_v23  ;;  %v10622_v63 = vld [vmem:[%s11368_s6 + $0x30] sm:$0xff]  ;;  %v10631_v50 = vld [vmem:[%s11368_s6 + $0x28] sm:$0xff]  ;;  %v10640_v23 = vld [vmem:[%s11368_s6 + $0x20] sm:$0xff] }
 0xe66   :  { %8290 = vmatmul.mubr.msk.f32.vlgmr.msra.gmra.mxu0 %vm110_vm1, %v3567_v22  ;;  %8431 = vmatprep.subr.mxu1 %v10622_v63  ;;  %v10649_v22 = vld [vmem:[%s11368_s6 + $0x18] sm:$0xff] }
 0xe67   :  { %v3851_v28 = vrot.slane %v3850_v37, 2  ;;  %8312 = vmatpush3.msra.mxu0 %v10098_v25  ;;  %8432 = vmatpush3.msra.mxu1 %v10622_v63 }
 0xe68   :  { %8313 = vmatprep.subr.mxu0 %v10106_v38  ;;  %8433 = vmatprep.subr.mxu1 %v10631_v50 }
 0xe69   :  { %v3852_v7 = vadd.f32 %v3851_v28, %v3850_v37  ;;  %8314 = vmatpush3.msra.mxu0 %v10106_v38  ;;  %8434 = vmatpush3.msra.mxu1 %v10631_v50  ;;  %v10658_v37 = vld [vmem:[%s11368_s6 + $0x10] sm:$0xff]  ;;  %v10667_v28 = vld [vmem:[%s11368_s6 + $0x8] sm:$0xff] }
 0xe6a   :  { %8315 = vmatprep.subr.mxu0 %v10115_v27  ;;  %8435 = vmatprep.subr.mxu1 %v10640_v23 }
 0xe6b   :  { %v3853_v24 = vrot.slane %v3852_v7, 1  ;;  %8316 = vmatpush3.msra.mxu0 %v10115_v27  ;;  %8436 = vmatpush3.msra.mxu1 %v10640_v23 }
 0xe6c   :  { %8317 = vmatprep.subr.mxu0 %v10124_v26  ;;  %8437 = vmatprep.subr.mxu1 %v10649_v22 }
 0xe6d   :  { %v3854_v10 = vadd.f32 %v3853_v24, %v3852_v7  ;;  %8318 = vmatpush3.msra.mxu0 %v10124_v26  ;;  %v8348_v11 = vpop.f32.mrf.mxu1  ;;  %8438 = vmatpush3.msra.mxu1 %v10649_v22  ;;  %v10676_v7 = vld [vmem:[%s11368_s6] sm:$0xff] }
 0xe6e   :  { %8319 = vmatprep.subr.mxu0 %v10133_v36  ;;  %v4117_v12 = vsel %vm110_vm1, %v8348_v11, 0.0  ;;  %8439 = vmatprep.subr.mxu1 %v10658_v37 }
 0xe6f   :  { %v3855_v5 = vmul.f32 0.0078125, %v3854_v10  ;;  %8320 = vmatpush3.msra.mxu0 %v10133_v36  ;;  %v4107_v25 = vpop.f32.mrf.mxu1  ;;  %8440 = vmatpush3.msra.mxu1 %v10658_v37 }
 0xe70   :  { %v4116_v38 = vsel %vm110_vm1, %v4107_v25, 0.0  ;;  %8321 = vmatprep.subr.mxu0 %v10142_v32  ;;  %8441 = vmatprep.subr.mxu1 %v10667_v28 }
 0xe71   :  { %v10528_v27 = vsub.f32 %v10427_v29, %v3855_v5  ;;  %v4118_v9 = vadd.f32 %v4117_v12, %v4116_v38  ;;  %8322 = vmatpush3.msra.mxu0 %v10142_v32  ;;  %v10532_v26 = vsub.f32 %v10407_v62, %v3855_v5  ;;  %v8943_v32 = vld [vmem:[%s11368_s6 + $0x38] sm:$0xff]  ;;  %v8944_v62 = vld [vmem:[%s11368_s6 + $0x30] sm:$0xff]  ;;  %8442 = vmatpush3.msra.mxu1 %v10667_v28 }
 0xe72   :  { %8323 = vmatprep.subr.mxu0 %v10151_v44  ;;  %8443 = vmatprep.subr.mxu1 %v10676_v7 }
 0xe73   :  { %v4119_v13 = vrot.slane %v4118_v9, 4  ;;  %8324 = vmatpush3.msra.mxu0 %v10151_v44  ;;  %v3858_v36 = vmul.f32 %v10532_v26, %v10532_v26  ;;  %v3859_v18 = vmul.f32 %v10528_v27, %v10528_v27  ;;  %8444 = vmatpush3.msra.mxu1 %v10676_v7 }
 0xe74   :  { %8325 = vmatprep.subr.mxu0 %v10160_v45  ;;  %8462 = vmatprep.subr.bf16.mxu1 %v8996_v1 }
 0xe75   :  { %v4120_v29 = vadd.f32 %v4119_v13, %v4118_v9  ;;  %8326 = vmatpush3.msra.mxu0 %v10160_v45  ;;  %8327 = vmatprep.mubr.msk.f32.mxu0 %vm110_vm1, %v3858_v36  ;;  %v8945_v45 = vld [vmem:[%s11368_s6 + $0x28] sm:$0xff] }
 0xe76   :  { %8328 = vmatmul.mubr.msk.f32.vlgmr.msra.gmra.mxu0 %vm110_vm1, %v3859_v18  ;;  %8349 = vmatprep.subr.mxu0 %v8943_v32 }
 0xe77   :  { %v4121_v44 = vrot.slane %v4120_v29, 2  ;;  %8350 = vmatpush3.msra.mxu0 %v8943_v32 }
 0xe78   :  { %8351 = vmatprep.subr.mxu0 %v8944_v62 }
 0xe79   :  { %v4122_v19 = vadd.f32 %v4121_v44, %v4120_v29  ;;  %8352 = vmatpush3.msra.mxu0 %v8944_v62 }
 0xe7a   :  { %8353 = vmatprep.subr.mxu0 %v8945_v45 }
 0xe7b   :  { %v4123_v34 = vrot.slane %v4122_v19, 1  ;;  %8354 = vmatpush3.msra.mxu0 %v8945_v45 }
 0xe7c   :  { %8355 = vmatprep.subr.mxu0 %v8946_v20 }
 0xe7d   :  { %v4124_v14 = vadd.f32 %v4123_v34, %v4122_v19  ;;  %8356 = vmatpush3.msra.mxu0 %v8946_v20 }
 0xe7e   :  { %8357 = vmatprep.subr.mxu0 %v8947_v31 }
 0xe7f   :  { %v4125_v41 = vmul.f32 0.0078125, %v4124_v14  ;;  %8358 = vmatpush3.msra.mxu0 %v8947_v31 }
 0xe80   :  { %8359 = vmatprep.subr.mxu0 %v8948_v49 }
 0xe81   :  { %v10563_v52 = vsub.f32 %v10392_v30, %v4125_v41  ;;  %8360 = vmatpush3.msra.mxu0 %v8948_v49  ;;  %v10565_v54 = vpop.f32.mrf.mxu1  ;;  %v10568_v46 = vsub.f32 %v10394_v55, %v4125_v41  ;;  %v8950_v55 = vld [vmem:[%s11368_s6] sm:$0xff] }
 0xe82   :  { %8361 = vmatprep.subr.mxu0 %v8949_v58 }
 0xe83   :  { %8362 = vmatpush3.msra.mxu0 %v8949_v58  ;;  %v8380_v3 = vpop.f32.mrf.mxu1  ;;  %v4128_v60 = vmul.f32 %v10568_v46, %v10568_v46  ;;  %v4129_v30 = vmul.f32 %v10563_v52, %v10563_v52 }
 0xe84   :  { %8363 = vmatprep.subr.mxu0 %v8950_v55 }
 0xe85   :  { %8364 = vmatpush3.msra.mxu0 %v8950_v55  ;;  %8365 = vmatprep.mubr.msk.f32.mxu0 %vm110_vm1, %v4128_v60  ;;  %v10584_v61 = vpop.f32.mrf.mxu1 }
 0xe86   :  { %8366 = vmatmul.mubr.msk.f32.vlgmr.msra.gmra.mxu0 %vm110_vm1, %v4129_v30  ;;  %8382 = vmatprep.subr.bf16.mxu0 %v8996_v1 }
 0xe87   :  { %v8381_v15 = vpop.f32.mrf.mxu1  ;;  %8383 = vmatpush3.bf16.msra.mxu0 %v8851_v4  ;;  %8392 = vmatprep.mubr.msk.bf16.mxu0 %vm8997_vm0, %v8996_v1  ;;  %v3663_v4 = vstv %s6869_s1  ;;  %s8971_s1 = scalar_lea.vmem %s6723_s22, 512 }
 0xe88   :  { %8384 = vmatprep.subr.bf16.mxu0 %v8996_v1  ;;  %p8972_p5 = scmp.ne.s32.totalorder %s6723_s22, %s8971_s1  ;;  %p8977_p7 = scmp.lt.s32.totalorder %s8971_s1, %s8971_s1 }
 0xe8a   :  { %p8978_p8 = por %p8977_p7, %p8976_p6 }
 0xe8b   :  { %8385 = vmatpush3.bf16.msra.mxu0 %v8852_v57 }
 0xe8c   :  { %8386 = vmatprep.subr.bf16.mxu0 %v8996_v1  ;;  %p8979_p9 = pnand %p8978_p8, %p8972_p5 }
 0xe8f   :  { %8387 = vmatpush3.bf16.msra.mxu0 %v8853_v6 }
 0xe90   :  { %8388 = vmatprep.subr.bf16.mxu0 %v8996_v1 }
 0xe93   :  { %8389 = vmatpush3.bf16.msra.mxu0 %v8854_v59 }
 0xe94   :  { %8390 = vmatprep.subr.bf16.mxu0 %v8996_v1 }
 0xe95   :  { %v10606_v43 = vpop.f32.mrf.mxu1 }
 0xe97   :  { %8391 = vmatpush3.bf16.msra.mxu0 %v8855_v33  ;;  %v8408_v40 = vpop.f32.mrf.mxu1 }
 0xe98   :  { %8410 = vmatprep.subr.mxu0 %v10614_v47 }
 0xe99   :  { %v10608_v56 = vpop.f32.mrf.mxu1 }
 0xe9a   :  { %8393 = vmatmul.mubr.msk.bf16.vlgmr.msra.gmra.mxu0 %vm1265_vm8, %v4245_v53 }
 0xe9b   :  { %v8409_v17 = vpop.f32.mrf.mxu1  ;;  %8411 = vmatpush3.msra.mxu0 %v10614_v47 }
 0xe9c   :  { %8412 = vmatprep.subr.mxu0 %v10622_v63 }
 0xe9d   :  { %8413 = vmatpush3.msra.mxu0 %v10622_v63 }
 0xe9e   :  { %8414 = vmatprep.subr.mxu0 %v10631_v50 }
 0xe9f   :  { %8415 = vmatpush3.msra.mxu0 %v10631_v50 }
 0xea0   :  { %8416 = vmatprep.subr.mxu0 %v10640_v23 }
 0xea1   :  { %8417 = vmatpush3.msra.mxu0 %v10640_v23 }
 0xea2   :  { %8418 = vmatprep.subr.mxu0 %v10649_v22 }
 0xea3   :  { %8419 = vmatpush3.msra.mxu0 %v10649_v22 }
 0xea4   :  { %8420 = vmatprep.subr.mxu0 %v10658_v37 }
 0xea5   :  { %8421 = vmatpush3.msra.mxu0 %v10658_v37 }
 0xea6   :  { %8422 = vmatprep.subr.mxu0 %v10667_v28 }
 0xea7   :  { %8423 = vmatpush3.msra.mxu0 %v10667_v28 }
 0xea8   :  { %8424 = vmatprep.subr.mxu0 %v10676_v7 }
 0xea9   :  { %8425 = vmatpush3.msra.mxu0 %v10676_v7 }
 0xeaa   :  { %8448 = vmatprep.subr.bf16.mxu0 %v8996_v1 }
 0xf26   :  { %v8291_v24 = vpop.f32.mrf.mxu0 }
 0xf27   :  { %v3650_v11 = vsel %vm110_vm1, %v8291_v24, 0.0 }
 0xf28   :  { %v3640_v10 = vpop.f32.mrf.mxu0 }
 0xf29   :  { %v3649_v5 = vsel %vm110_vm1, %v3640_v10, 0.0 }
 0xf2a   :  { %v3651_v25 = vadd.f32 %v3650_v11, %v3649_v5 }
 0xf2c   :  { %v3652_v12 = vrot.slane %v3651_v25, 4 }
 0xf2e   :  { %v3653_v38 = vadd.f32 %v3652_v12, %v3651_v25 }
 0xf30   :  { %v3654_v9 = vrot.slane %v3653_v38, 2 }
 0xf32   :  { %v3655_v13 = vadd.f32 %v3654_v9, %v3653_v38 }
 0xf34   :  { %v3656_v36 = vrot.slane %v3655_v13, 1 }
 0xf36   :  { %v3657_v18 = vadd.f32 %v3656_v36, %v3655_v13  ;;  %v8329_v29 = vpop.f32.mrf.mxu0 }
 0xf37   :  { %v3942_v62 = vsel %vm110_vm1, %v8329_v29, 0.0 }
 0xf38   :  { %v3658_v32 = vmul.f32 0.0078125, %v3657_v18  ;;  %v3932_v44 = vpop.f32.mrf.mxu0 }
 0xf39   :  { %v3941_v19 = vsel %vm110_vm1, %v3932_v44, 0.0 }
 0xf3a   :  { %v3659_v45 = vadd.f32 1e-05, %v3658_v32  ;;  %v3943_v34 = vadd.f32 %v3942_v62, %v3941_v19 }
 0xf3c   :  { %8919 = vrsqrt.f32 %v3659_v45  ;;  %v3944_v20 = vrot.slane %v3943_v34, 4  ;;  %v3676_v45 = vstv %s6974_s25 }
 0xf3e   :  { %v3945_v14 = vadd.f32 %v3944_v20, %v3943_v34 }
 0xf40   :  { %v3946_v31 = vrot.slane %v3945_v14, 2 }
 0xf42   :  { %v3947_v41 = vadd.f32 %v3946_v31, %v3945_v14  ;;  %v4225_v14 = vstv %s6980_s26  ;;  %v3678_v31 = vmul.f32 %v3676_v45, %v10251_v21 }
 0xf44   :  { %v3948_v49 = vrot.slane %v3947_v41, 1 }
 0xf46   :  { %v8367_v58 = vpop.f32.mrf.mxu0  ;;  %v3949_v3 = vadd.f32 %v3948_v49, %v3947_v41  ;;  %v3677_v41 = vmul.f32 %v3676_v45, %v10253_v51 }
 0xf47   :  { %v4212_v55 = vsel %vm110_vm1, %v8367_v58, 0.0 }
 0xf48   :  { %v4202_v60 = vpop.f32.mrf.mxu0  ;;  %v3950_v16 = vmul.f32 0.0078125, %v3949_v3 }
 0xf49   :  { %v8920_v30 = vpop.eup %8919  ;;  %v4211_v15 = vsel %vm110_vm1, %v4202_v60, 0.0 }
 0xf4a   :  { %v3661_v57 = vmul.f32 %v8920_v30, %v10507_v2  ;;  %v3662_v6 = vmul.f32 %v8920_v30, %v10504_v48  ;;  %v4213_v59 = vadd.f32 %v4212_v55, %v4211_v15  ;;  %v3951_v5 = vadd.f32 1e-05, %v3950_v16 }
 0xf4c   :  { %v3664_v33 = vmul.f32 %v3663_v4, %v3661_v57  ;;  %v3665_v8 = vmul.f32 %v3663_v4, %v3662_v6  ;;  %v4214_v40 = vrot.slane %v4213_v59, 4  ;;  %8921 = vrsqrt.f32 %v3951_v5  ;;  %v8859_v5 = vld [vmem:[%s11367_s5 + $0x270] sm:$0xff]  }
 0xf4e   :  { %v3666_v53 = vadd.f32 %v3664_v33, %v10197_v39  ;;  %v3667_v17 = vadd.f32 %v3665_v8, %v10199_v0  ;;  %v4215_v24 = vadd.f32 %v4214_v40, %v4213_v59 }
 0xf50   :  { %v3668_v10 = vadd.f32 %v3666_v53, %v10178_v42  ;;  %v3669_v11 = vadd.f32 %v3667_v17, %v10181_v35  ;;  %v4216_v25 = vrot.slane %v4215_v24, 2 }
 0xf52   :  { %3671 = vst.msk [vmem:[#allocation4 + $0x20] sm:$0xff] %vm110_vm1, %v3668_v10  ;;  %3672 = vst.msk [vmem:[#allocation4 + $0x28] sm:$0xff] %vm110_vm1, %v3669_v11  ;;  %v4217_v48 = vadd.f32 %v4216_v25, %v4215_v24  ;;  %v8856_v24 = vld [vmem:[%s11367_s5 + $0x2a0] sm:$0xff]   ;;  %v8857_v10 = vld [vmem:[%s11367_s5 + $0x278] sm:$0xff]  }
 0xf53   :  { %v8858_v11 = vld [vmem:[%s11367_s5 + $0x298] sm:$0xff]   ;;  %v8860_v25 = vld [vmem:[%s11367_s5 + $0x290] sm:$0xff]  }
 0xf54   :  { %v4218_v2 = vrot.slane %v4217_v48, 1 }
 0xf56   :  { %v4219_v12 = vadd.f32 %v4218_v2, %v4217_v48  ;;  %v8861_v48 = vld [vmem:[%s11367_s5 + $0x268] sm:$0xff]  }
 0xf58   :  { %v4220_v38 = vmul.f32 0.0078125, %v4219_v12 }
 0xf59   :  { %v6708_v9 = vld [vmem:[#allocation4 + $0x20] sm:$0xff]  ;;  %v6709_v39 = vld [vmem:[#allocation4 + $0x28] sm:$0xff]  ;;  %v8922_v44 = vpop.eup %8921 }
 0xf5a   :  { %v4221_v13 = vadd.f32 1e-05, %v4220_v38  ;;  %v4412_v0 = vpop.f32.mrf.mxu0  ;;  %6710 = vst.msk [vmem:[#allocation8] sm:$0xff] %vm110_vm1, %v6708_v9  ;;  %6711 = vst.msk [vmem:[#allocation8 + $0x8] sm:$0xff] %vm110_vm1, %v6709_v39  ;;  %v3954_v19 = vmul.f32 %v8922_v44, %v10528_v27 }
 0xf5b   :  { %v4413_v42 = vadd.f32 %v4412_v0, %v10565_v54  ;;  %v3953_v54 = vmul.f32 %v8922_v44, %v10532_v26  ;;  %v8862_v44 = vld [vmem:[%s11367_s5 + $0x288] sm:$0xff]  }
 0xf5c   :  { %8923 = vrsqrt.f32 %v4221_v13  ;;  %v8394_v35 = vpop.f32.mrf.mxu0 }
 0xf5d   :  { %v4507_v36 = vadd.f32 %v10606_v43, %v4413_v42  ;;  %v3955_v43 = vstv %s6975_s24 }
 0xf5e   :  { %v4415_v18 = vpop.f32.mrf.mxu0  ;;  %v3956_v34 = vmul.f32 %v3955_v43, %v3953_v54  ;;  %v8864_v54 = vld [vmem:[%s11367_s5 + $0x280] sm:$0xff]  }
 0xf5f   :  { %v4416_v29 = vadd.f32 %v4415_v18, %v10584_v61  ;;  %8426 = vmatprep.mubr.msk.f32.mxu0 %vm110_vm1, %v4507_v36  ;;  %v3957_v61 = vmul.f32 %v3955_v43, %v3954_v19  ;;  %v8865_v19 = vld [vmem:[%s11367_s5 + $0x258] sm:$0xff]  }
 0xf60   :  { %v8395_v32 = vpop.f32.mrf.mxu0  ;;  %v3958_v26 = vadd.f32 %v3956_v34, %v3677_v41 }
 0xf61   :  { %v4508_v62 = vadd.f32 %v10608_v56, %v4416_v29  ;;  %v3959_v58 = vadd.f32 %v3957_v61, %v3678_v31  ;;  %v10771_v31 = vld [vmem:[#allocation4 + $0x10] sm:$0xff] }
 0xf63   :  { %8427 = vmatmul.mubr.msk.f32.vlgmr.msra.gmra.mxu0 %vm110_vm1, %v4508_v62 }
 0xf64   :  { %8458 = vmatprep.mubr.msk.bf16.mxu0 %vm8997_vm0, %v8996_v1  ;;  %8449 = vmatpush3.bf16.msra.mxu0 %v8856_v24 }
 0xf65   :  { %8450 = vmatprep.subr.bf16.mxu0 %v8996_v1 }
 0xf68   :  { %8451 = vmatpush3.bf16.msra.mxu0 %v8858_v11 }
 0xf69   :  { %v8924_v20 = vpop.eup %8923  ;;  %8452 = vmatprep.subr.bf16.mxu0 %v8996_v1 }
 0xf6a   :  { %v4223_v56 = vmul.f32 %v8924_v20, %v10568_v46  ;;  %v4224_v49 = vmul.f32 %v8924_v20, %v10563_v52 }
 0xf6c   :  { %v4226_v27 = vmul.f32 %v4225_v14, %v4223_v56  ;;  %v4227_v3 = vmul.f32 %v4225_v14, %v4224_v49  ;;  %8453 = vmatpush3.bf16.msra.mxu0 %v8860_v25  ;;  %v10769_v14 = vld [vmem:[#allocation4 + $0x18] sm:$0xff] }
 0xf6d   :  { %8454 = vmatprep.subr.bf16.mxu0 %v8996_v1 }
 0xf6e   :  { %v10715_v60 = vadd.f32 %v4226_v27, %v3958_v26  ;;  %v10717_v30 = vadd.f32 %v4227_v3, %v3959_v58  ;;  %v8866_v58 = vld [vmem:[%s11367_s5 + $0x2c8] sm:$0xff]  }
 0xf70   :  { %8455 = vmatpush3.bf16.msra.mxu0 %v8862_v44 }
 0xf71   :  { %8456 = vmatprep.subr.bf16.mxu0 %v8996_v1 }
 0xf74   :  { %8457 = vmatpush3.bf16.msra.mxu0 %v8864_v54 }
 0xf75   :  { %8476 = vmatprep.subr.bf16.mxu0 %v8996_v1 }
0x1023   :  { %v8428_v4 = vpop.f32.mrf.mxu0 }
0x1024   :  { %v4599_v15 = vsel %vm110_vm1, %v8428_v4, 0.0 }
0x1025   :  { %v4589_v55 = vpop.f32.mrf.mxu0 }
0x1026   :  { %v4598_v21 = vsel %vm110_vm1, %v4589_v55, 0.0 }
0x1027   :  { %v4600_v57 = vadd.f32 %v4599_v15, %v4598_v21 }
0x1029   :  { %v4601_v51 = vrot.slane %v4600_v57, 4 }
0x102b   :  { %v4602_v6 = vadd.f32 %v4601_v51, %v4600_v57 }
0x102d   :  { %v4603_v46 = vrot.slane %v4602_v6, 2 }
0x102f   :  { %v4604_v59 = vadd.f32 %v4603_v46, %v4602_v6 }
0x1031   :  { %v4605_v52 = vrot.slane %v4604_v59, 1 }
0x1033   :  { %v4606_v33 = vadd.f32 %v4605_v52, %v4604_v59  ;;  %v8867_v59 = vld [vmem:[%s11367_s5 + $0x2c0] sm:$0xff]  }
0x1035   :  { %v4607_v8 = vmul.f32 0.0078125, %v4606_v33 }
0x1037   :  { %v4609_v16 = vsub.f32 %v4508_v62, %v4607_v8  ;;  %v4608_v40 = vsub.f32 %v4507_v36, %v4607_v8  ;;  %v8863_v62 = vld [vmem:[%s11367_s5 + $0x260] sm:$0xff]   ;;  %v8868_v8 = vld [vmem:[%s11367_s5 + $0x2b8] sm:$0xff]  }
0x1039   :  { %v4610_v53 = vmul.f32 %v4608_v40, %v4608_v40  ;;  %v4611_v17 = vmul.f32 %v4609_v16, %v4609_v16 }
0x103b   :  { %8445 = vmatprep.mubr.msk.f32.mxu1 %vm110_vm1, %v4610_v53 }
0x103c   :  { %8446 = vmatmul.mubr.msk.f32.vlgmr.msra.gmra.mxu1 %vm110_vm1, %v4611_v17  ;;  %v8870_v17 = vld [vmem:[%s11367_s5 + $0x2a8] sm:$0xff]  }
0x103d   :  { %8472 = vmatprep.mubr.msk.bf16.mxu1 %vm8997_vm0, %v8996_v1  ;;  %8463 = vmatpush3.bf16.msra.mxu1 %v8857_v10 }
0x103e   :  { %8464 = vmatprep.subr.bf16.mxu1 %v8996_v1 }
0x1041   :  { %8465 = vmatpush3.bf16.msra.mxu1 %v8859_v5 }
0x1042   :  { %8466 = vmatprep.subr.bf16.mxu1 %v8996_v1 }
0x1045   :  { %8467 = vmatpush3.bf16.msra.mxu1 %v8861_v48 }
0x1046   :  { %8468 = vmatprep.subr.bf16.mxu1 %v8996_v1 }
0x1049   :  { %8469 = vmatpush3.bf16.msra.mxu1 %v8863_v62 }
0x104a   :  { %8470 = vmatprep.subr.bf16.mxu1 %v8996_v1 }
0x104d   :  { %8471 = vmatpush3.bf16.msra.mxu1 %v8865_v19 }
0x104e   :  { %8490 = vmatprep.subr.mxu1 %v10614_v47 }
0x10fc   :  { %v8447_v2 = vpop.f32.mrf.mxu1 }
0x10fd   :  { %v4694_v38 = vsel %vm110_vm1, %v8447_v2, 0.0 }
0x10fe   :  { %v4684_v12 = vpop.f32.mrf.mxu1 }
0x10ff   :  { %v4693_v9 = vsel %vm110_vm1, %v4684_v12, 0.0  ;;  %v5747_v12 = vmax.f32 %v10769_v14, 0.0 }
0x1100   :  { %v4695_v39 = vadd.f32 %v4694_v38, %v4693_v9  ;;  %v5746_v38 = vmax.f32 %v10771_v31, 0.0 }
0x1102   :  { %v4696_v13 = vrot.slane %v4695_v39, 4 }
0x1104   :  { %v4697_v0 = vadd.f32 %v4696_v13, %v4695_v39 }
0x1106   :  { %v4698_v42 = vrot.slane %v4697_v0, 2 }
0x1108   :  { %v4699_v35 = vadd.f32 %v4698_v42, %v4697_v0 }
0x110a   :  { %v4700_v36 = vrot.slane %v4699_v35, 1 }
0x110c   :  { %v4701_v18 = vadd.f32 %v4700_v36, %v4699_v35 }
0x110e   :  { %v4702_v29 = vmul.f32 0.0078125, %v4701_v18 }
0x1110   :  { %v4703_v32 = vadd.f32 1e-05, %v4702_v29 }
0x1112   :  { %8925 = vrsqrt.f32 %v4703_v32 }
0x111f   :  { %v8926_v43 = vpop.eup %8925 }
0x1120   :  { %v4706_v45 = vmul.f32 %v8926_v43, %v4609_v16  ;;  %v4705_v34 = vmul.f32 %v8926_v43, %v4608_v40  ;;  %v8869_v16 = vld [vmem:[%s11367_s5 + $0x2b0] sm:$0xff]  }
0x1122   :  { %v4708_v61 = vmax.f32 %v4706_v45, 0.0  ;;  %v4707_v20 = vmax.f32 %v4705_v34, 0.0 }
0x1124   :  { %4713 = vrot.lane.b32.xlu1 %v4708_v61, %s8999_s2  ;;  %4711 = vrot.lane.b32.xlu0 %v4707_v20, %s8999_s2 }
0x1128   :  { %5199 = vrot.lane.b32.xlu1 %v10769_v14, %s8999_s2  ;;  %5197 = vrot.lane.b32.xlu0 %v10771_v31, %s8999_s2 }
0x1196   :  { %v4714_v41 = vpop.permute.xlu1 %4713  ;;  %v4712_v56 = vpop.permute.xlu0 %4711 }
0x1197   :  { %4718 = vst.msk [vmem:[#allocation2 + $0x11] sm:$0xff] %vm652_vm7, %v4714_v41  ;;  %4717 = vst.msk [vmem:[#allocation2 + $0x1] sm:$0xff] %vm652_vm7, %v4712_v56 }
0x119a   :  { %v5200_v49 = vpop.permute.xlu1 %5199  ;;  %v5198_v26 = vpop.permute.xlu0 %5197 }
0x119b   :  { %5477 = vst.msk [vmem:[#allocation3 + $0x11] sm:$0xff] %vm652_vm7, %v5200_v49  ;;  %5476 = vst.msk [vmem:[#allocation3 + $0x1] sm:$0xff] %vm652_vm7, %v5198_v26 }
0x119e   :  { %v4896_v27 = vld [vmem:[#allocation2 + $0x12] sm:$0xff]  ;;  %v4895_v3 = vld [vmem:[#allocation2 + $0x2] sm:$0xff] }
0x119f   :  { %v4733_v4 = vld [vmem:[#allocation2 + $0x1] sm:$0xff]  ;;  %v4734_v55 = vld [vmem:[#allocation2 + $0x11] sm:$0xff]  ;;  %v4897_v24 = vpack.c.bf16 %v4896_v27, %v4895_v3 }
0x11a0   :  { %v4719_v15 = vld [vmem:[#allocation2] sm:$0xff]  ;;  %v4720_v21 = vld [vmem:[#allocation2 + $0x10] sm:$0xff]  ;;  %v4735_v57 = vpack.c.bf16 %v4734_v55, %v4733_v4 }
0x11a1   :  { %v4721_v51 = vpack.c.bf16 %v4720_v21, %v4719_v15  ;;  %5203 = vst.msk [vmem:[#allocation2 + $0x1] sm:$0xff] %vm652_vm7, %v5198_v26  ;;  %5204 = vst.msk [vmem:[#allocation2 + $0x11] sm:$0xff] %vm652_vm7, %v5200_v49 }
0x11a2   :  { %8459 = vmatmul.mubr.msk.bf16.vlgmr.msra.gmra.mxu0 %vm1265_vm8, %v4735_v57  ;;  %v10788_v6 = vld [vmem:[#allocation3 + $0x10] sm:$0xff]  ;;  %v10790_v46 = vld [vmem:[#allocation3] sm:$0xff] }
0x11a3   :  { %8473 = vmatmul.mubr.msk.bf16.vlgmr.msra.gmra.mxu1 %vm1265_vm8, %v4721_v51  ;;  %8477 = vmatpush3.bf16.msra.mxu0 %v8866_v58  ;;  %v10873_v5 = vld [vmem:[#allocation3 + $0x11] sm:$0xff]  ;;  %v10875_v25 = vld [vmem:[#allocation3 + $0x1] sm:$0xff] }
0x11a4   :  { %5484 = vrot.lane.b32.xlu1 %v10788_v6, %s9001_s23  ;;  %5482 = vrot.lane.b32.xlu0 %v10790_v46, %s9001_s23  ;;  %v5521_v48 = vld [vmem:[#allocation3 + $0x12] sm:$0xff]  ;;  %v5520_v2 = vld [vmem:[#allocation3 + $0x2] sm:$0xff] }
0x11a5   :  { %8478 = vmatprep.subr.bf16.mxu0 %v8996_v1  ;;  %8486 = vmatprep.mubr.msk.bf16.mxu0 %vm8997_vm0, %v8996_v1 }
0x11a6   :  { %8491 = vmatpush3.msra.mxu1 %v10614_v47 }
0x11a7   :  { %8492 = vmatprep.subr.mxu1 %v10622_v63  ;;  %8479 = vmatpush3.bf16.msra.mxu0 %v8867_v59 }
0x11a8   :  { %v10804_v52 = vld [vmem:[#allocation2 + $0x10] sm:$0xff]  ;;  %v10806_v33 = vld [vmem:[#allocation2] sm:$0xff]  ;;  %8493 = vmatpush3.msra.mxu1 %v10622_v63  ;;  %8480 = vmatprep.subr.bf16.mxu0 %v8996_v1 }
0x11a9   :  { %5211 = vrot.lane.b32.xlu1 %v10804_v52, %s9001_s23  ;;  %5209 = vrot.lane.b32.xlu0 %v10806_v33, %s9001_s23  ;;  %v10830_v40 = vld [vmem:[#allocation2 + $0x11] sm:$0xff]  ;;  %v10832_v53 = vld [vmem:[#allocation2 + $0x1] sm:$0xff] }
0x11aa   :  { %8494 = vmatprep.subr.mxu1 %v10631_v50  ;;  %v5248_v10 = vld [vmem:[#allocation2 + $0x12] sm:$0xff]  ;;  %v5247_v11 = vld [vmem:[#allocation2 + $0x2] sm:$0xff] }
0x11ab   :  { %8495 = vmatpush3.msra.mxu1 %v10631_v50  ;;  %8481 = vmatpush3.bf16.msra.mxu0 %v8868_v8 }
0x11ac   :  { %8496 = vmatprep.subr.mxu1 %v10640_v23  ;;  %8482 = vmatprep.subr.bf16.mxu0 %v8996_v1 }
0x11ad   :  { %5219 = vrot.lane.b32.xlu1 %v10804_v52, %s9000_s4  ;;  %5217 = vrot.lane.b32.xlu0 %v10806_v33, %s9000_s4 }
0x11ae   :  { %8497 = vmatpush3.msra.mxu1 %v10640_v23 }
0x11af   :  { %8498 = vmatprep.subr.mxu1 %v10649_v22  ;;  %8483 = vmatpush3.bf16.msra.mxu0 %v8869_v16 }
0x11b0   :  { %8499 = vmatpush3.msra.mxu1 %v10649_v22  ;;  %8484 = vmatprep.subr.bf16.mxu0 %v8996_v1 }
0x11b1   :  { %5233 = vrot.lane.b32.xlu1 %v10830_v40, %s9001_s23  ;;  %5231 = vrot.lane.b32.xlu0 %v10832_v53, %s9001_s23 }
0x11b2   :  { %8500 = vmatprep.subr.mxu1 %v10658_v37 }
0x11b3   :  { %8501 = vmatpush3.msra.mxu1 %v10658_v37  ;;  %8485 = vmatpush3.bf16.msra.mxu0 %v8870_v17 }
0x11b4   :  { %8502 = vmatprep.subr.mxu1 %v10667_v28  ;;  %8509 = vmatprep.subr.mxu0 %v10614_v47 }
0x11b5   :  { %5241 = vrot.lane.b32.xlu1 %v10830_v40, %s9000_s4  ;;  %5239 = vrot.lane.b32.xlu0 %v10832_v53, %s9000_s4 }
0x11b6   :  { %8503 = vmatpush3.msra.mxu1 %v10667_v28  ;;  %8487 = vmatmul.mubr.msk.bf16.vlgmr.msra.gmra.mxu0 %vm1265_vm8, %v4897_v24 }
0x11b7   :  { %8504 = vmatprep.subr.mxu1 %v10676_v7  ;;  %8510 = vmatpush3.msra.mxu0 %v10614_v47 }
0x11b8   :  { %8505 = vmatpush3.msra.mxu1 %v10676_v7  ;;  %8511 = vmatprep.subr.mxu0 %v10622_v63 }
0x11b9   :  { %5255 = vrot.lane.b32.xlu1 %v5248_v10, %s9001_s23  ;;  %5253 = vrot.lane.b32.xlu0 %v5247_v11, %s9001_s23 }
0x11ba   :  { %8528 = vmatprep.subr.mxu1 %v10614_v47  ;;  %8512 = vmatpush3.msra.mxu0 %v10622_v63 }
0x11bb   :  { %8513 = vmatprep.subr.mxu0 %v10631_v50 }
0x11bc   :  { %8514 = vmatpush3.msra.mxu0 %v10631_v50 }
0x11bd   :  { %5263 = vrot.lane.b32.xlu1 %v5248_v10, %s9000_s4  ;;  %5261 = vrot.lane.b32.xlu0 %v5247_v11, %s9000_s4 }
0x11be   :  { %8515 = vmatprep.subr.mxu0 %v10640_v23 }
0x11bf   :  { %8516 = vmatpush3.msra.mxu0 %v10640_v23 }
0x11c0   :  { %8517 = vmatprep.subr.mxu0 %v10649_v22 }
0x11c1   :  { %5492 = vrot.lane.b32.xlu1 %v10788_v6, %s9000_s4  ;;  %5490 = vrot.lane.b32.xlu0 %v10790_v46, %s9000_s4 }
0x11c2   :  { %8518 = vmatpush3.msra.mxu0 %v10649_v22 }
0x11c3   :  { %8519 = vmatprep.subr.mxu0 %v10658_v37 }
0x11c4   :  { %8520 = vmatpush3.msra.mxu0 %v10658_v37 }
0x11c5   :  { %5506 = vrot.lane.b32.xlu1 %v10873_v5, %s9001_s23  ;;  %5504 = vrot.lane.b32.xlu0 %v10875_v25, %s9001_s23 }
0x11c6   :  { %8521 = vmatprep.subr.mxu0 %v10667_v28 }
0x11c7   :  { %8522 = vmatpush3.msra.mxu0 %v10667_v28 }
0x11c8   :  { %8523 = vmatprep.subr.mxu0 %v10676_v7 }
0x11c9   :  { %5514 = vrot.lane.b32.xlu1 %v10873_v5, %s9000_s4  ;;  %5512 = vrot.lane.b32.xlu0 %v10875_v25, %s9000_s4 }
0x11ca   :  { %8524 = vmatpush3.msra.mxu0 %v10676_v7 }
0x11cb   :  { %8547 = vmatprep.subr.mxu0 %v10614_v47 }
0x11cd   :  { %5528 = vrot.lane.b32.xlu1 %v5521_v48, %s9001_s23  ;;  %5526 = vrot.lane.b32.xlu0 %v5520_v2, %s9001_s23 }
0x11d1   :  { %5536 = vrot.lane.b32.xlu1 %v5521_v48, %s9000_s4  ;;  %5534 = vrot.lane.b32.xlu0 %v5520_v2, %s9000_s4 }
0x11d5   :  { %5752 = vrot.lane.b32.xlu1 %v5747_v12, %s8999_s2  ;;  %5750 = vrot.lane.b32.xlu0 %v5746_v38, %s8999_s2 }
0x1216   :  { %v5485_v9 = vpop.permute.xlu1 %5484  ;;  %v5483_v39 = vpop.permute.xlu0 %5482 }
0x1217   :  { %v5489_v57 = vmax.f32 %v10788_v6, %v5485_v9  ;;  %v5488_v51 = vmax.f32 %v10790_v46, %v5483_v39 }
0x121b   :  { %v5212_v13 = vpop.permute.xlu1 %5211  ;;  %v5210_v0 = vpop.permute.xlu0 %5209 }
0x121c   :  { %v5216_v42 = vadd.f32 %v5212_v13, %v10804_v52  ;;  %v5215_v35 = vadd.f32 %v5210_v0, %v10806_v33 }
0x121f   :  { %v5220_v36 = vpop.permute.xlu1 %5219  ;;  %v5218_v18 = vpop.permute.xlu0 %5217 }
0x1220   :  { %v5224_v29 = vadd.f32 %v5220_v36, %v5216_v42  ;;  %v5223_v32 = vadd.f32 %v5218_v18, %v5215_v35 }
0x1222   :  { %v5228_v44 = vadd.f32 %v10830_v40, %v5224_v29  ;;  %v5227_v62 = vadd.f32 %v10832_v53, %v5223_v32 }
0x1223   :  { %v5234_v54 = vpop.permute.xlu1 %5233  ;;  %v5232_v19 = vpop.permute.xlu0 %5231 }
0x1224   :  { %v5238_v43 = vadd.f32 %v5234_v54, %v5228_v44  ;;  %v5237_v45 = vadd.f32 %v5232_v19, %v5227_v62 }
0x1227   :  { %v5242_v34 = vpop.permute.xlu1 %5241  ;;  %v5240_v61 = vpop.permute.xlu0 %5239 }
0x1228   :  { %v5246_v20 = vadd.f32 %v5242_v34, %v5238_v43  ;;  %v5245_v41 = vadd.f32 %v5240_v61, %v5237_v45 }
0x122a   :  { %v5250_v56 = vadd.f32 %v5248_v10, %v5246_v20  ;;  %v5249_v49 = vadd.f32 %v5247_v11, %v5245_v41  ;;  %v5269_v41 = vld [vmem:[%s11369_s7] sm:$0xff] }
0x122b   :  { %v5256_v26 = vpop.permute.xlu1 %5255  ;;  %v5254_v58 = vpop.permute.xlu0 %5253 }
0x122c   :  { %v5260_v27 = vadd.f32 %v5256_v26, %v5250_v56  ;;  %v5259_v3 = vadd.f32 %v5254_v58, %v5249_v49 }
0x122f   :  { %v5264_v4 = vpop.permute.xlu1 %5263  ;;  %v5262_v55 = vpop.permute.xlu0 %5261 }
0x1230   :  { %v10904_v15 = vadd.f32 %v5264_v4, %v5260_v27  ;;  %v5267_v21 = vadd.f32 %v5262_v55, %v5259_v3  ;;  %v8871_v4 = vld [vmem:[%s11367_s5 + $0x318] sm:$0xff]   ;;  %v8872_v55 = vld [vmem:[%s11367_s5 + $0x310] sm:$0xff]  }
0x1232   :  { %v10925_v58 = vmul.f32 %v5269_v41, %v5267_v21  ;;  %v10945_v3 = vmul.f32 %v5269_v41, %v10904_v15  ;;  %v8873_v15 = vld [vmem:[%s11367_s5 + $0x308] sm:$0xff]   ;;  %v8874_v21 = vld [vmem:[%s11367_s5 + $0x300] sm:$0xff]  }
0x1233   :  { %v5493_v59 = vpop.permute.xlu1 %5492  ;;  %v5491_v52 = vpop.permute.xlu0 %5490 }
0x1234   :  { %v5497_v33 = vmax.f32 %v5489_v57, %v5493_v59  ;;  %v5496_v8 = vmax.f32 %v5488_v51, %v5491_v52  ;;  %v8875_v57 = vld [vmem:[%s11367_s5 + $0x2f8] sm:$0xff]   ;;  %v8876_v52 = vld [vmem:[%s11367_s5 + $0x340] sm:$0xff]  }
0x1236   :  { %v5501_v16 = vmax.f32 %v5497_v33, %v10873_v5  ;;  %v5500_v40 = vmax.f32 %v5496_v8, %v10875_v25  ;;  %v8877_v8 = vld [vmem:[%s11367_s5 + $0x338] sm:$0xff]  }
0x1237   :  { %v5507_v53 = vpop.permute.xlu1 %5506  ;;  %v5505_v17 = vpop.permute.xlu0 %5504 }
0x1238   :  { %v5511_v24 = vmax.f32 %v5501_v16, %v5507_v53  ;;  %v5510_v10 = vmax.f32 %v5500_v40, %v5505_v17  ;;  %v8878_v16 = vld [vmem:[%s11367_s5 + $0x330] sm:$0xff]   ;;  %v8879_v40 = vld [vmem:[%s11367_s5 + $0x328] sm:$0xff]   ;;  %v8880_v53 = vld [vmem:[%s11367_s5 + $0x320] sm:$0xff]  }
0x123b   :  { %v5515_v11 = vpop.permute.xlu1 %5514  ;;  %v5513_v12 = vpop.permute.xlu0 %5512 }
0x123c   :  { %v5519_v38 = vmax.f32 %v5511_v24, %v5515_v11  ;;  %v5518_v13 = vmax.f32 %v5510_v10, %v5513_v12 }
0x123e   :  { %v5523_v0 = vmax.f32 %v5519_v38, %v5521_v48  ;;  %v5522_v6 = vmax.f32 %v5518_v13, %v5520_v2 }
0x123f   :  { %v5529_v9 = vpop.permute.xlu1 %5528  ;;  %v5527_v46 = vpop.permute.xlu0 %5526 }
0x1240   :  { %v5533_v39 = vmax.f32 %v5523_v0, %v5529_v9  ;;  %v5532_v42 = vmax.f32 %v5522_v6, %v5527_v46 }
0x1243   :  { %v5537_v35 = vpop.permute.xlu1 %5536  ;;  %v5535_v36 = vpop.permute.xlu0 %5534 }
0x1244   :  { %v10910_v18 = vmax.f32 %v5533_v39, %v5537_v35  ;;  %v10912_v5 = vmax.f32 %v5532_v42, %v5535_v36 }
0x1247   :  { %v5753_v25 = vpop.permute.xlu1 %5752  ;;  %v5751_v29 = vpop.permute.xlu0 %5750 }
0x1248   :  { %5757 = vst.msk [vmem:[#allocation2 + $0x11] sm:$0xff] %vm652_vm7, %v5753_v25  ;;  %5756 = vst.msk [vmem:[#allocation2 + $0x1] sm:$0xff] %vm652_vm7, %v5751_v29 }
0x124f   :  { %v5772_v51 = vld [vmem:[#allocation2 + $0x1] sm:$0xff]  ;;  %v5773_v59 = vld [vmem:[#allocation2 + $0x11] sm:$0xff] }
0x1250   :  { %v5774_v33 = vpack.c.bf16 %v5773_v59, %v5772_v51  ;;  %v5934_v17 = vld [vmem:[#allocation2 + $0x2] sm:$0xff]  ;;  %v5935_v24 = vld [vmem:[#allocation2 + $0x12] sm:$0xff] }
0x1251   :  { %v5936_v10 = vpack.c.bf16 %v5935_v24, %v5934_v17  ;;  %v8955_v59 = vld [vmem:[%s11368_s6 + $0x18] sm:$0xff] }
0x1262   :  { %v4814_v32 = vpop.f32.mrf.mxu0 }
0x1263   :  { %v4888_v44 = vpop.f32.mrf.mxu1 }
0x1264   :  { %v8460_v48 = vpop.f32.mrf.mxu0  ;;  %v4889_v45 = vadd.f32 %v4888_v44, %v4814_v32 }
0x1265   :  { %v8474_v2 = vpop.f32.mrf.mxu1 }
0x1266   :  { %v4817_v62 = vpop.f32.mrf.mxu0 }
0x1267   :  { %v4891_v54 = vpop.f32.mrf.mxu1 }
0x1268   :  { %v8461_v19 = vpop.f32.mrf.mxu0  ;;  %v4892_v56 = vadd.f32 %v4891_v54, %v4817_v62 }
0x1269   :  { %v8475_v43 = vpop.f32.mrf.mxu1 }
0x1276   :  { %v4976_v34 = vpop.f32.mrf.mxu0 }
0x1277   :  { %v10916_v61 = vadd.f32 %v4976_v34, %v4889_v45 }
0x1278   :  { %v8488_v20 = vpop.f32.mrf.mxu0 }
0x1279   :  { %8506 = vmatprep.mubr.msk.f32.mxu1 %vm110_vm1, %v10916_v61 }
0x127a   :  { %v4979_v49 = vpop.f32.mrf.mxu0 }
0x127b   :  { %v10923_v26 = vadd.f32 %v4979_v49, %v4892_v56 }
0x127c   :  { %v8489_v27 = vpop.f32.mrf.mxu0 }
0x127d   :  { %8507 = vmatmul.mubr.msk.f32.vlgmr.msra.gmra.mxu1 %vm110_vm1, %v10923_v26 }
0x127e   :  { %8529 = vmatpush3.msra.mxu1 %v10614_v47  ;;  %8544 = vmatprep.mubr.msk.f32.mxu1 %vm110_vm1, %v10925_v58 }
0x127f   :  { %8530 = vmatprep.subr.mxu1 %v10622_v63 }
0x1280   :  { %8531 = vmatpush3.msra.mxu1 %v10622_v63 }
0x1281   :  { %8532 = vmatprep.subr.mxu1 %v10631_v50 }
0x1282   :  { %8533 = vmatpush3.msra.mxu1 %v10631_v50 }
0x1283   :  { %8534 = vmatprep.subr.mxu1 %v10640_v23 }
0x1284   :  { %8535 = vmatpush3.msra.mxu1 %v10640_v23 }
0x1285   :  { %8536 = vmatprep.subr.mxu1 %v10649_v22 }
0x1286   :  { %8537 = vmatpush3.msra.mxu1 %v10649_v22 }
0x1287   :  { %8538 = vmatprep.subr.mxu1 %v10658_v37 }
0x1288   :  { %8539 = vmatpush3.msra.mxu1 %v10658_v37 }
0x1289   :  { %8540 = vmatprep.subr.mxu1 %v10667_v28 }
0x128a   :  { %8541 = vmatpush3.msra.mxu1 %v10667_v28 }
0x128b   :  { %8542 = vmatprep.subr.mxu1 %v10676_v7 }
0x128c   :  { %8543 = vmatpush3.msra.mxu1 %v10676_v7 }
0x128d   :  { %8545 = vmatmul.mubr.msk.f32.vlgmr.msra.gmra.mxu1 %vm110_vm1, %v10945_v3  ;;  %8566 = vmatprep.subr.mxu1 %v10614_v47 }
0x128e   :  { %8567 = vmatpush3.msra.mxu1 %v10614_v47  ;;  %8582 = vmatprep.mubr.msk.f32.mxu1 %vm110_vm1, %v10912_v5 }
0x128f   :  { %8568 = vmatprep.subr.mxu1 %v10622_v63 }
0x1290   :  { %8569 = vmatpush3.msra.mxu1 %v10622_v63 }
0x1291   :  { %8570 = vmatprep.subr.mxu1 %v10631_v50 }
0x1292   :  { %8571 = vmatpush3.msra.mxu1 %v10631_v50 }
0x1293   :  { %8572 = vmatprep.subr.mxu1 %v10640_v23 }
0x1294   :  { %8573 = vmatpush3.msra.mxu1 %v10640_v23 }
0x1295   :  { %8574 = vmatprep.subr.mxu1 %v10649_v22 }
0x1296   :  { %8575 = vmatpush3.msra.mxu1 %v10649_v22 }
0x1297   :  { %8576 = vmatprep.subr.mxu1 %v10658_v37 }
0x1298   :  { %8577 = vmatpush3.msra.mxu1 %v10658_v37 }
0x1299   :  { %8578 = vmatprep.subr.mxu1 %v10667_v28 }
0x129a   :  { %8579 = vmatpush3.msra.mxu1 %v10667_v28 }
0x129b   :  { %8580 = vmatprep.subr.mxu1 %v10676_v7 }
0x129c   :  { %8581 = vmatpush3.msra.mxu1 %v10676_v7 }
0x129d   :  { %8583 = vmatmul.mubr.msk.f32.vlgmr.msra.gmra.mxu1 %vm110_vm1, %v10910_v18  ;;  %8604 = vmatprep.subr.bf16.mxu1 %v8996_v1 }
0x129e   :  { %8605 = vmatpush3.bf16.msra.mxu1 %v8871_v4  ;;  %8614 = vmatprep.mubr.msk.bf16.mxu1 %vm8997_vm0, %v8996_v1 }
0x129f   :  { %8606 = vmatprep.subr.bf16.mxu1 %v8996_v1 }
0x12a2   :  { %8607 = vmatpush3.bf16.msra.mxu1 %v8872_v55 }
0x12a3   :  { %8608 = vmatprep.subr.bf16.mxu1 %v8996_v1 }
0x12a6   :  { %8609 = vmatpush3.bf16.msra.mxu1 %v8873_v15 }
0x12a7   :  { %8610 = vmatprep.subr.bf16.mxu1 %v8996_v1 }
0x12aa   :  { %8611 = vmatpush3.bf16.msra.mxu1 %v8874_v21 }
0x12ab   :  { %8612 = vmatprep.subr.bf16.mxu1 %v8996_v1 }
0x12ae   :  { %8613 = vmatpush3.bf16.msra.mxu1 %v8875_v57  ;;  %v8954_v57 = vld [vmem:[%s11368_s6 + $0x20] sm:$0xff] }
0x12af   :  { %8632 = vmatprep.subr.bf16.mxu1 %v8996_v1 }
0x12b1   :  { %8615 = vmatmul.mubr.msk.bf16.vlgmr.msra.gmra.mxu1 %vm1265_vm8, %v5774_v33  ;;  %v8956_v33 = vld [vmem:[%s11368_s6 + $0x10] sm:$0xff] }
0x12b2   :  { %8633 = vmatpush3.bf16.msra.mxu1 %v8876_v52  ;;  %8642 = vmatprep.mubr.msk.bf16.mxu1 %vm8997_vm0, %v8996_v1 }
0x12b3   :  { %8634 = vmatprep.subr.bf16.mxu1 %v8996_v1 }
0x12b6   :  { %8635 = vmatpush3.bf16.msra.mxu1 %v8877_v8 }
0x12b7   :  { %8636 = vmatprep.subr.bf16.mxu1 %v8996_v1 }
0x12ba   :  { %8637 = vmatpush3.bf16.msra.mxu1 %v8878_v16 }
0x12bb   :  { %8638 = vmatprep.subr.bf16.mxu1 %v8996_v1 }
0x12be   :  { %8639 = vmatpush3.bf16.msra.mxu1 %v8879_v40 }
0x12bf   :  { %8640 = vmatprep.subr.bf16.mxu1 %v8996_v1 }
0x12c2   :  { %8641 = vmatpush3.bf16.msra.mxu1 %v8880_v53  ;;  %v8957_v53 = vld [vmem:[%s11368_s6 + $0x8] sm:$0xff] }
0x12c5   :  { %8643 = vmatmul.mubr.msk.bf16.vlgmr.msra.gmra.mxu1 %vm1265_vm8, %v5936_v10  ;;  %v8881_v10 = vld [vmem:[%s11367_s5 + $0x2f0] sm:$0xff]  }
0x133d   :  { %v8508_v11 = vpop.f32.mrf.mxu1 }
0x133e   :  { %v5075_v38 = vsel %vm110_vm1, %v8508_v11, 0.0 }
0x133f   :  { %v5065_v12 = vpop.f32.mrf.mxu1 }
0x1340   :  { %v5074_v13 = vsel %vm110_vm1, %v5065_v12, 0.0 }
0x1341   :  { %v5076_v0 = vadd.f32 %v5075_v38, %v5074_v13  ;;  %v8882_v38 = vld [vmem:[%s11367_s5 + $0x2e8] sm:$0xff]   ;;  %v8883_v13 = vld [vmem:[%s11367_s5 + $0x2e0] sm:$0xff]  }
0x1343   :  { %v5077_v6 = vrot.slane %v5076_v0, 4 }
0x1345   :  { %v5078_v9 = vadd.f32 %v5077_v6, %v5076_v0  ;;  %v8884_v0 = vld [vmem:[%s11367_s5 + $0x2d8] sm:$0xff]   ;;  %v8885_v6 = vld [vmem:[%s11367_s5 + $0x2d0] sm:$0xff]  }
0x1347   :  { %v5079_v46 = vrot.slane %v5078_v9, 2 }
0x1349   :  { %v5080_v39 = vadd.f32 %v5079_v46, %v5078_v9  ;;  %v5758_v46 = vld [vmem:[#allocation2] sm:$0xff] }
0x134b   :  { %v5081_v42 = vrot.slane %v5080_v39, 1 }
0x134d   :  { %v5082_v35 = vadd.f32 %v5081_v42, %v5080_v39  ;;  %v8546_v36 = vpop.f32.mrf.mxu1  ;;  %v5759_v39 = vld [vmem:[#allocation2 + $0x10] sm:$0xff] }
0x134e   :  { %v5362_v32 = vsel %vm110_vm1, %v8546_v36, 0.0 }
0x134f   :  { %v5083_v25 = vmul.f32 0.0078125, %v5082_v35  ;;  %v5352_v29 = vpop.f32.mrf.mxu1  ;;  %v5760_v35 = vpack.c.bf16 %v5759_v39, %v5758_v46 }
0x1350   :  { %v5361_v44 = vsel %vm110_vm1, %v5352_v29, 0.0  ;;  %v11132_v29 = vld [vmem:[%s11368_s6 + $0x38] sm:$0xff] }
0x1351   :  { %v11022_v48 = vsub.f32 %v10923_v26, %v5083_v25  ;;  %v5363_v2 = vadd.f32 %v5362_v32, %v5361_v44  ;;  %v11025_v62 = vsub.f32 %v10916_v61, %v5083_v25  ;;  %8665 = vmatprep.subr.mxu1 %v11132_v29  ;;  %v11140_v32 = vld [vmem:[%s11368_s6 + $0x30] sm:$0xff]  ;;  %v11149_v44 = vld [vmem:[%s11368_s6 + $0x28] sm:$0xff] }
0x1352   :  { %8666 = vmatpush3.msra.mxu1 %v11132_v29 }
0x1353   :  { %v5364_v54 = vrot.slane %v5363_v2, 4  ;;  %v5086_v19 = vmul.f32 %v11025_v62, %v11025_v62  ;;  %v5087_v43 = vmul.f32 %v11022_v48, %v11022_v48  ;;  %8667 = vmatprep.subr.mxu1 %v11140_v32 }
0x1354   :  { %8668 = vmatpush3.msra.mxu1 %v11140_v32 }
0x1355   :  { %v5365_v45 = vadd.f32 %v5364_v54, %v5363_v2  ;;  %8525 = vmatprep.mubr.msk.f32.mxu0 %vm110_vm1, %v5086_v19  ;;  %8669 = vmatprep.subr.mxu1 %v11149_v44  ;;  %v11158_v2 = vld [vmem:[%s11368_s6 + $0x20] sm:$0xff]  ;;  %v11167_v54 = vld [vmem:[%s11368_s6 + $0x18] sm:$0xff]  ;;  %v11176_v19 = vld [vmem:[%s11368_s6 + $0x10] sm:$0xff] }
0x1356   :  { %8526 = vmatmul.mubr.msk.f32.vlgmr.msra.gmra.mxu0 %vm110_vm1, %v5087_v43  ;;  %8670 = vmatpush3.msra.mxu1 %v11149_v44  ;;  %v11185_v43 = vld [vmem:[%s11368_s6 + $0x8] sm:$0xff] }
0x1357   :  { %v5366_v34 = vrot.slane %v5365_v45, 2  ;;  %8548 = vmatpush3.msra.mxu0 %v10614_v47  ;;  %8671 = vmatprep.subr.mxu1 %v11158_v2 }
0x1358   :  { %8549 = vmatprep.subr.mxu0 %v10622_v63  ;;  %8672 = vmatpush3.msra.mxu1 %v11158_v2 }
0x1359   :  { %v5367_v20 = vadd.f32 %v5366_v34, %v5365_v45  ;;  %8550 = vmatpush3.msra.mxu0 %v10622_v63  ;;  %8673 = vmatprep.subr.mxu1 %v11167_v54  ;;  %v11194_v45 = vld [vmem:[%s11368_s6] sm:$0xff] }
0x135a   :  { %8551 = vmatprep.subr.mxu0 %v10631_v50  ;;  %8674 = vmatpush3.msra.mxu1 %v11167_v54 }
0x135b   :  { %v5368_v61 = vrot.slane %v5367_v20, 1  ;;  %8552 = vmatpush3.msra.mxu0 %v10631_v50  ;;  %8675 = vmatprep.subr.mxu1 %v11176_v19 }
0x135c   :  { %8553 = vmatprep.subr.mxu0 %v10640_v23  ;;  %8676 = vmatpush3.msra.mxu1 %v11176_v19 }
0x135d   :  { %v5369_v41 = vadd.f32 %v5368_v61, %v5367_v20  ;;  %8554 = vmatpush3.msra.mxu0 %v10640_v23  ;;  %v8584_v56 = vpop.f32.mrf.mxu1  ;;  %8677 = vmatprep.subr.mxu1 %v11185_v43 }
0x135e   :  { %8555 = vmatprep.subr.mxu0 %v10649_v22  ;;  %v5632_v26 = vsel %vm110_vm1, %v8584_v56, 0.0  ;;  %8678 = vmatpush3.msra.mxu1 %v11185_v43 }
0x135f   :  { %v5370_v49 = vmul.f32 0.0078125, %v5369_v41  ;;  %8556 = vmatpush3.msra.mxu0 %v10649_v22  ;;  %v5622_v47 = vpop.f32.mrf.mxu1  ;;  %8679 = vmatprep.subr.mxu1 %v11194_v45 }
0x1360   :  { %v5631_v63 = vsel %vm110_vm1, %v5622_v47, 0.0  ;;  %8557 = vmatprep.subr.mxu0 %v10658_v37  ;;  %8680 = vmatpush3.msra.mxu1 %v11194_v45 }
0x1361   :  { %v11046_v50 = vsub.f32 %v10945_v3, %v5370_v49  ;;  %v5633_v27 = vadd.f32 %v5632_v26, %v5631_v63  ;;  %8558 = vmatpush3.msra.mxu0 %v10658_v37  ;;  %v11050_v23 = vsub.f32 %v10925_v58, %v5370_v49  ;;  %v8951_v37 = vld [vmem:[%s11368_s6 + $0x38] sm:$0xff]  ;;  %v8952_v58 = vld [vmem:[%s11368_s6 + $0x30] sm:$0xff]  ;;  %8698 = vmatprep.subr.bf16.mxu1 %v8996_v1 }
0x1362   :  { %8559 = vmatprep.subr.mxu0 %v10667_v28 }
0x1363   :  { %v5634_v4 = vrot.slane %v5633_v27, 4  ;;  %8560 = vmatpush3.msra.mxu0 %v10667_v28  ;;  %v5373_v22 = vmul.f32 %v11050_v23, %v11050_v23  ;;  %v5374_v55 = vmul.f32 %v11046_v50, %v11046_v50 }
0x1364   :  { %8561 = vmatprep.subr.mxu0 %v10676_v7 }
0x1365   :  { %v5635_v3 = vadd.f32 %v5634_v4, %v5633_v27  ;;  %8562 = vmatpush3.msra.mxu0 %v10676_v7  ;;  %8563 = vmatprep.mubr.msk.f32.mxu0 %vm110_vm1, %v5373_v22  ;;  %v8953_v7 = vld [vmem:[%s11368_s6 + $0x28] sm:$0xff] }
0x1366   :  { %8564 = vmatmul.mubr.msk.f32.vlgmr.msra.gmra.mxu0 %vm110_vm1, %v5374_v55  ;;  %8585 = vmatprep.subr.mxu0 %v8951_v37 }
0x1367   :  { %v5636_v28 = vrot.slane %v5635_v3, 2  ;;  %8586 = vmatpush3.msra.mxu0 %v8951_v37 }
0x1368   :  { %8587 = vmatprep.subr.mxu0 %v8952_v58 }
0x1369   :  { %v5637_v15 = vadd.f32 %v5636_v28, %v5635_v3  ;;  %8588 = vmatpush3.msra.mxu0 %v8952_v58 }
0x136a   :  { %8589 = vmatprep.subr.mxu0 %v8953_v7 }
0x136b   :  { %v5638_v21 = vrot.slane %v5637_v15, 1  ;;  %8590 = vmatpush3.msra.mxu0 %v8953_v7 }
0x136c   :  { %8591 = vmatprep.subr.mxu0 %v8954_v57 }
0x136d   :  { %v5639_v51 = vadd.f32 %v5638_v21, %v5637_v15  ;;  %8592 = vmatpush3.msra.mxu0 %v8954_v57 }
0x136e   :  { %8593 = vmatprep.subr.mxu0 %v8955_v59 }
0x136f   :  { %v5640_v52 = vmul.f32 0.0078125, %v5639_v51  ;;  %8594 = vmatpush3.msra.mxu0 %v8955_v59 }
0x1370   :  { %8595 = vmatprep.subr.mxu0 %v8956_v33 }
0x1371   :  { %v11081_v8 = vsub.f32 %v10910_v18, %v5640_v52  ;;  %8596 = vmatpush3.msra.mxu0 %v8956_v33  ;;  %v11083_v16 = vpop.f32.mrf.mxu1  ;;  %v11086_v40 = vsub.f32 %v10912_v5, %v5640_v52  ;;  %v8958_v5 = vld [vmem:[%s11368_s6] sm:$0xff]  ;;  %s6985_s6 = sld [smem:[#allocation5 + $0xe]] }
0x1372   :  { %8597 = vmatprep.subr.mxu0 %v8957_v53 }
0x1373   :  { %8598 = vmatpush3.msra.mxu0 %v8957_v53  ;;  %v8616_v17 = vpop.f32.mrf.mxu1  ;;  %v5643_v24 = vmul.f32 %v11086_v40, %v11086_v40  ;;  %v5644_v18 = vmul.f32 %v11081_v8, %v11081_v8 }
0x1374   :  { %8599 = vmatprep.subr.mxu0 %v8958_v5 }
0x1375   :  { %8600 = vmatpush3.msra.mxu0 %v8958_v5  ;;  %8601 = vmatprep.mubr.msk.f32.mxu0 %vm110_vm1, %v5643_v24  ;;  %v11102_v11 = vpop.f32.mrf.mxu1 }
0x1376   :  { %8602 = vmatmul.mubr.msk.f32.vlgmr.msra.gmra.mxu0 %vm110_vm1, %v5644_v18  ;;  %8618 = vmatprep.subr.bf16.mxu0 %v8996_v1 }
0x1377   :  { %v8617_v12 = vpop.f32.mrf.mxu1  ;;  %8619 = vmatpush3.bf16.msra.mxu0 %v8881_v10  ;;  %8628 = vmatprep.mubr.msk.bf16.mxu0 %vm8997_vm0, %v8996_v1  ;;  %v5183_v24 = vstv %s6985_s6 }
0x1378   :  { %8620 = vmatprep.subr.bf16.mxu0 %v8996_v1 }
0x137b   :  { %8621 = vmatpush3.bf16.msra.mxu0 %v8882_v38 }
0x137c   :  { %8622 = vmatprep.subr.bf16.mxu0 %v8996_v1 }
0x137f   :  { %8623 = vmatpush3.bf16.msra.mxu0 %v8883_v13 }
0x1380   :  { %8624 = vmatprep.subr.bf16.mxu0 %v8996_v1 }
0x1383   :  { %8625 = vmatpush3.bf16.msra.mxu0 %v8884_v0 }
0x1384   :  { %8626 = vmatprep.subr.bf16.mxu0 %v8996_v1 }
0x1385   :  { %v11124_v9 = vpop.f32.mrf.mxu1 }
0x1387   :  { %8627 = vmatpush3.bf16.msra.mxu0 %v8885_v6  ;;  %v8644_v42 = vpop.f32.mrf.mxu1 }
0x1388   :  { %8646 = vmatprep.subr.mxu0 %v11132_v29 }
0x1389   :  { %v11126_v36 = vpop.f32.mrf.mxu1 }
0x138a   :  { %8629 = vmatmul.mubr.msk.bf16.vlgmr.msra.gmra.mxu0 %vm1265_vm8, %v5760_v35 }
0x138b   :  { %v8645_v25 = vpop.f32.mrf.mxu1  ;;  %8647 = vmatpush3.msra.mxu0 %v11132_v29 }
0x138c   :  { %8648 = vmatprep.subr.mxu0 %v11140_v32 }
0x138d   :  { %8649 = vmatpush3.msra.mxu0 %v11140_v32 }
0x138e   :  { %8650 = vmatprep.subr.mxu0 %v11149_v44 }
0x138f   :  { %8651 = vmatpush3.msra.mxu0 %v11149_v44 }
0x1390   :  { %8652 = vmatprep.subr.mxu0 %v11158_v2 }
0x1391   :  { %8653 = vmatpush3.msra.mxu0 %v11158_v2 }
0x1392   :  { %8654 = vmatprep.subr.mxu0 %v11167_v54 }
0x1393   :  { %8655 = vmatpush3.msra.mxu0 %v11167_v54 }
0x1394   :  { %8656 = vmatprep.subr.mxu0 %v11176_v19 }
0x1395   :  { %8657 = vmatpush3.msra.mxu0 %v11176_v19 }
0x1396   :  { %8658 = vmatprep.subr.mxu0 %v11185_v43 }
0x1397   :  { %8659 = vmatpush3.msra.mxu0 %v11185_v43 }
0x1398   :  { %8660 = vmatprep.subr.mxu0 %v11194_v45 }
0x1399   :  { %8661 = vmatpush3.msra.mxu0 %v11194_v45 }
0x139a   :  { %8684 = vmatprep.subr.bf16.mxu0 %v8996_v1 }
0x1416   :  { %v8527_v34 = vpop.f32.mrf.mxu0 }
0x1417   :  { %v5170_v61 = vsel %vm110_vm1, %v8527_v34, 0.0 }
0x1418   :  { %v5160_v20 = vpop.f32.mrf.mxu0 }
0x1419   :  { %v5169_v41 = vsel %vm110_vm1, %v5160_v20, 0.0 }
0x141a   :  { %v5171_v56 = vadd.f32 %v5170_v61, %v5169_v41 }
0x141c   :  { %v5172_v49 = vrot.slane %v5171_v56, 4 }
0x141e   :  { %v5173_v47 = vadd.f32 %v5172_v49, %v5171_v56 }
0x1420   :  { %v5174_v26 = vrot.slane %v5173_v47, 2 }
0x1422   :  { %v5175_v63 = vadd.f32 %v5174_v26, %v5173_v47 }
0x1424   :  { %v5176_v27 = vrot.slane %v5175_v63, 1 }
0x1426   :  { %v5177_v4 = vadd.f32 %v5176_v27, %v5175_v63  ;;  %v8565_v22 = vpop.f32.mrf.mxu0 }
0x1427   :  { %v5457_v37 = vsel %vm110_vm1, %v8565_v22, 0.0 }
0x1428   :  { %v5178_v55 = vmul.f32 0.0078125, %v5177_v4  ;;  %v5447_v3 = vpop.f32.mrf.mxu0 }
0x1429   :  { %v5456_v28 = vsel %vm110_vm1, %v5447_v3, 0.0 }
0x142a   :  { %v5179_v58 = vadd.f32 1e-05, %v5178_v55  ;;  %v5458_v15 = vadd.f32 %v5457_v37, %v5456_v28  ;;  %v5191_v55 = vstv %s7090_s17  ;;  %v5740_v28 = vstv %s7096_s18 }
0x142c   :  { %8927 = vrsqrt.f32 %v5179_v58  ;;  %v5459_v7 = vrot.slane %v5458_v15, 4  ;;  %v5193_v58 = vmul.f32 %v5191_v55, %v10769_v14 }
0x142e   :  { %v5460_v21 = vadd.f32 %v5459_v7, %v5458_v15  ;;  %v5192_v15 = vmul.f32 %v5191_v55, %v10771_v31  ;;  %v8895_v55 = vld [vmem:[%s11367_s5 + $0x348] sm:$0xff]  }
0x1430   :  { %v5461_v57 = vrot.slane %v5460_v21, 2 }
0x1432   :  { %v5462_v51 = vadd.f32 %v5461_v57, %v5460_v21 }
0x1434   :  { %v5463_v59 = vrot.slane %v5462_v51, 1 }
0x1436   :  { %v8603_v52 = vpop.f32.mrf.mxu0  ;;  %v5464_v33 = vadd.f32 %v5463_v59, %v5462_v51 }
0x1437   :  { %v5727_v18 = vsel %vm110_vm1, %v8603_v52, 0.0 }
0x1438   :  { %v5717_v53 = vpop.f32.mrf.mxu0  ;;  %v5465_v6 = vmul.f32 0.0078125, %v5464_v33 }
0x1439   :  { %v8928_v17 = vpop.eup %8927  ;;  %v5726_v10 = vsel %vm110_vm1, %v5717_v53, 0.0 }
0x143a   :  { %v5181_v5 = vmul.f32 %v8928_v17, %v11025_v62  ;;  %v5182_v12 = vmul.f32 %v8928_v17, %v11022_v48  ;;  %v5728_v38 = vadd.f32 %v5727_v18, %v5726_v10  ;;  %v5466_v25 = vadd.f32 1e-05, %v5465_v6  ;;  %v8886_v6 = vld [vmem:[%s11367_s5 + $0x390] sm:$0xff]  }
0x143c   :  { %v5184_v13 = vmul.f32 %v5183_v24, %v5181_v5  ;;  %v5185_v0 = vmul.f32 %v5183_v24, %v5182_v12  ;;  %v5729_v46 = vrot.slane %v5728_v38, 4  ;;  %8929 = vrsqrt.f32 %v5466_v25  ;;  %v8889_v25 = vld [vmem:[%s11367_s5 + $0x360] sm:$0xff]  }
0x143e   :  { %v11212_v39 = vadd.f32 %v5184_v13, %v10715_v60  ;;  %v11215_v42 = vadd.f32 %v5185_v0, %v10717_v30  ;;  %v5730_v35 = vadd.f32 %v5729_v46, %v5728_v38  ;;  %v8887_v46 = vld [vmem:[%s11367_s5 + $0x368] sm:$0xff]  }
0x1440   :  { %v5731_v34 = vrot.slane %v5730_v35, 2 }
0x1442   :  { %v5732_v20 = vadd.f32 %v5731_v34, %v5730_v35  ;;  %v8888_v35 = vld [vmem:[%s11367_s5 + $0x388] sm:$0xff]   ;;  %v8890_v34 = vld [vmem:[%s11367_s5 + $0x380] sm:$0xff]  }
0x1444   :  { %v5733_v61 = vrot.slane %v5732_v20, 1 }
0x1446   :  { %v5734_v62 = vadd.f32 %v5733_v61, %v5732_v20  ;;  %v8891_v20 = vld [vmem:[%s11367_s5 + $0x358] sm:$0xff]  }
0x1448   :  { %v5735_v41 = vmul.f32 0.0078125, %v5734_v62 }
0x1449   :  { %v8930_v27 = vpop.eup %8929 }
0x144a   :  { %v5736_v48 = vadd.f32 1e-05, %v5735_v41  ;;  %v5927_v56 = vpop.f32.mrf.mxu0  ;;  %v5469_v22 = vmul.f32 %v8930_v27, %v11046_v50 }
0x144b   :  { %v5928_v49 = vadd.f32 %v5927_v56, %v11083_v16  ;;  %v5468_v16 = vmul.f32 %v8930_v27, %v11050_v23 }
0x144c   :  { %8931 = vrsqrt.f32 %v5736_v48  ;;  %v8630_v47 = vpop.f32.mrf.mxu0 }
0x144d   :  { %v6022_v60 = vadd.f32 %v11124_v9, %v5928_v49  ;;  %v5470_v9 = vstv %s7091_s16 }
0x144e   :  { %v5930_v26 = vpop.f32.mrf.mxu0  ;;  %v5471_v3 = vmul.f32 %v5470_v9, %v5468_v16  ;;  %v8892_v16 = vld [vmem:[%s11367_s5 + $0x378] sm:$0xff]  }
0x144f   :  { %v5931_v30 = vadd.f32 %v5930_v26, %v11102_v11  ;;  %8662 = vmatprep.mubr.msk.f32.mxu0 %vm110_vm1, %v6022_v60  ;;  %v5472_v11 = vmul.f32 %v5470_v9, %v5469_v22  ;;  %v8893_v22 = vld [vmem:[%s11367_s5 + $0x350] sm:$0xff]  }
0x1450   :  { %v8631_v63 = vpop.f32.mrf.mxu0  ;;  %v5473_v23 = vadd.f32 %v5471_v3, %v5192_v15  ;;  %v8894_v9 = vld [vmem:[%s11367_s5 + $0x370] sm:$0xff]  }
0x1451   :  { %v6023_v4 = vadd.f32 %v11126_v36, %v5931_v30  ;;  %v5474_v21 = vadd.f32 %v5472_v11, %v5193_v58 }
0x1453   :  { %8663 = vmatmul.mubr.msk.f32.vlgmr.msra.gmra.mxu0 %vm110_vm1, %v6023_v4 }
0x1454   :  { %8694 = vmatprep.mubr.msk.bf16.mxu0 %vm8997_vm0, %v8996_v1  ;;  %8685 = vmatpush3.bf16.msra.mxu0 %v8886_v6 }
0x1455   :  { %8686 = vmatprep.subr.bf16.mxu0 %v8996_v1 }
0x1458   :  { %8687 = vmatpush3.bf16.msra.mxu0 %v8888_v35 }
0x1459   :  { %v8932_v37 = vpop.eup %8931  ;;  %8688 = vmatprep.subr.bf16.mxu0 %v8996_v1 }
0x145a   :  { %v5738_v36 = vmul.f32 %v8932_v37, %v11086_v40  ;;  %v5739_v7 = vmul.f32 %v8932_v37, %v11081_v8 }
0x145c   :  { %v5741_v50 = vmul.f32 %v5740_v28, %v5738_v36  ;;  %v5742_v57 = vmul.f32 %v5740_v28, %v5739_v7  ;;  %8689 = vmatpush3.bf16.msra.mxu0 %v8890_v34  ;;  %v8896_v7 = vld [vmem:[%s11367_s5 + $0x3b8] sm:$0xff]  }
0x145d   :  { %8690 = vmatprep.subr.bf16.mxu0 %v8996_v1 }
0x145e   :  { %v11231_v51 = vadd.f32 %v5741_v50, %v5473_v23  ;;  %v11233_v59 = vadd.f32 %v5742_v57, %v5474_v21 }
0x1460   :  { %8691 = vmatpush3.bf16.msra.mxu0 %v8892_v16 }
0x1461   :  { %8692 = vmatprep.subr.bf16.mxu0 %v8996_v1 }
0x1464   :  { %8693 = vmatpush3.bf16.msra.mxu0 %v8894_v9 }
0x1465   :  { %8712 = vmatprep.subr.bf16.mxu0 %v8996_v1 }
0x1513   :  { %v8664_v52 = vpop.f32.mrf.mxu0 }
0x1514   :  { %v6114_v53 = vsel %vm110_vm1, %v8664_v52, 0.0 }
0x1515   :  { %v6104_v33 = vpop.f32.mrf.mxu0 }
0x1516   :  { %v6113_v14 = vsel %vm110_vm1, %v6104_v33, 0.0 }
0x1517   :  { %v6115_v17 = vadd.f32 %v6114_v53, %v6113_v14  ;;  %v8897_v53 = vld [vmem:[%s11367_s5 + $0x3b0] sm:$0xff]   ;;  %v8898_v14 = vld [vmem:[%s11367_s5 + $0x3a8] sm:$0xff]  }
0x1519   :  { %v6116_v31 = vrot.slane %v6115_v17, 4 }
0x151b   :  { %v6117_v24 = vadd.f32 %v6116_v31, %v6115_v17  ;;  %v8899_v17 = vld [vmem:[%s11367_s5 + $0x3a0] sm:$0xff]   ;;  %v8900_v31 = vld [vmem:[%s11367_s5 + $0x398] sm:$0xff]   ;;  %s7101_s5 = sld [smem:[#allocation5 + $0x13]] }
0x151d   :  { %v6118_v40 = vrot.slane %v6117_v24, 2 }
0x151f   :  { %v6119_v18 = vadd.f32 %v6118_v40, %v6117_v24 }
0x1521   :  { %v6120_v8 = vrot.slane %v6119_v18, 1 }
0x1523   :  { %v6121_v10 = vadd.f32 %v6120_v8, %v6119_v18 }
0x1525   :  { %v6122_v5 = vmul.f32 0.0078125, %v6121_v10 }
0x1527   :  { %v6124_v12 = vsub.f32 %v6023_v4, %v6122_v5  ;;  %v6123_v38 = vsub.f32 %v6022_v60, %v6122_v5 }
0x1529   :  { %v6125_v13 = vmul.f32 %v6123_v38, %v6123_v38  ;;  %v6126_v0 = vmul.f32 %v6124_v12, %v6124_v12 }
0x152b   :  { %8681 = vmatprep.mubr.msk.f32.mxu1 %vm110_vm1, %v6125_v13 }
0x152c   :  { %8682 = vmatmul.mubr.msk.f32.vlgmr.msra.gmra.mxu1 %vm110_vm1, %v6126_v0 }
0x152d   :  { %8708 = vmatprep.mubr.msk.bf16.mxu1 %vm8997_vm0, %v8996_v1  ;;  %8699 = vmatpush3.bf16.msra.mxu1 %v8887_v46 }
0x152e   :  { %8700 = vmatprep.subr.bf16.mxu1 %v8996_v1 }
0x1531   :  { %8701 = vmatpush3.bf16.msra.mxu1 %v8889_v25 }
0x1532   :  { %8702 = vmatprep.subr.bf16.mxu1 %v8996_v1 }
0x1535   :  { %8703 = vmatpush3.bf16.msra.mxu1 %v8891_v20 }
0x1536   :  { %8704 = vmatprep.subr.bf16.mxu1 %v8996_v1 }
0x1539   :  { %8705 = vmatpush3.bf16.msra.mxu1 %v8893_v22 }
0x153a   :  { %8706 = vmatprep.subr.bf16.mxu1 %v8996_v1 }
0x153d   :  { %8707 = vmatpush3.bf16.msra.mxu1 %v8895_v55 }
0x153e   :  { %8726 = vmatprep.subr.mxu1 %v11132_v29 }
0x15ec   :  { %v8683_v61 = vpop.f32.mrf.mxu1 }
0x15ed   :  { %v6209_v41 = vsel %vm110_vm1, %v8683_v61, 0.0 }
0x15ee   :  { %v6199_v62 = vpop.f32.mrf.mxu1 }
0x15ef   :  { %v6208_v48 = vsel %vm110_vm1, %v6199_v62, 0.0 }
0x15f0   :  { %v6210_v56 = vadd.f32 %v6209_v41, %v6208_v48 }
0x15f2   :  { %v6211_v49 = vrot.slane %v6210_v56, 4 }
0x15f4   :  { %v6212_v47 = vadd.f32 %v6211_v49, %v6210_v56 }
0x15f6   :  { %v6213_v60 = vrot.slane %v6212_v47, 2 }
0x15f8   :  { %v6214_v26 = vadd.f32 %v6213_v60, %v6212_v47 }
0x15fa   :  { %v6215_v30 = vrot.slane %v6214_v26, 1 }
0x15fc   :  { %v6216_v63 = vadd.f32 %v6215_v30, %v6214_v26 }
0x15fe   :  { %v6217_v27 = vmul.f32 0.0078125, %v6216_v63 }
0x1600   :  { %v6218_v4 = vadd.f32 1e-05, %v6217_v27 }
0x1602   :  { %8933 = vrsqrt.f32 %v6218_v4 }
0x160f   :  { %v8934_v3 = vpop.eup %8933 }
0x1610   :  { %v6221_v11 = vmul.f32 %v8934_v3, %v6124_v12  ;;  %v6220_v37 = vmul.f32 %v8934_v3, %v6123_v38 }
0x1612   :  { %v6223_v28 = vmax.f32 %v6221_v11, 0.0  ;;  %v6222_v58 = vmax.f32 %v6220_v37, 0.0 }
0x1614   :  { %6228 = vrot.lane.b32.xlu1 %v6223_v28, %s8999_s2  ;;  %6226 = vrot.lane.b32.xlu0 %v6222_v58, %s8999_s2 }
0x1686   :  { %v6229_v15 = vpop.permute.xlu1 %6228  ;;  %v6227_v36 = vpop.permute.xlu0 %6226 }
0x1687   :  { %6233 = vst.msk [vmem:[#allocation2 + $0x11] sm:$0xff] %vm652_vm7, %v6229_v15  ;;  %6232 = vst.msk [vmem:[#allocation2 + $0x1] sm:$0xff] %vm652_vm7, %v6227_v36 }
0x168e   :  { %v6248_v23 = vld [vmem:[#allocation2 + $0x1] sm:$0xff]  ;;  %v6249_v21 = vld [vmem:[#allocation2 + $0x11] sm:$0xff] }
0x168f   :  { %v6234_v50 = vld [vmem:[#allocation2] sm:$0xff]  ;;  %v6250_v57 = vpack.c.bf16 %v6249_v21, %v6248_v23  ;;  %v6235_v52 = vld [vmem:[#allocation2 + $0x10] sm:$0xff] }
0x1690   :  { %v6236_v33 = vpack.c.bf16 %v6235_v52, %v6234_v50  ;;  %v6410_v24 = vld [vmem:[#allocation2 + $0x2] sm:$0xff]  ;;  %v6411_v40 = vld [vmem:[#allocation2 + $0x12] sm:$0xff] }
0x1691   :  { %8695 = vmatmul.mubr.msk.bf16.vlgmr.msra.gmra.mxu0 %vm1265_vm8, %v6250_v57  ;;  %v6412_v18 = vpack.c.bf16 %v6411_v40, %v6410_v24 }
0x1692   :  { %8709 = vmatmul.mubr.msk.bf16.vlgmr.msra.gmra.mxu1 %vm1265_vm8, %v6236_v33  ;;  %8713 = vmatpush3.bf16.msra.mxu0 %v8896_v7  ;;  %v6698_v7 = vstv %s7101_s5 }
0x1693   :  { %8714 = vmatprep.subr.bf16.mxu0 %v8996_v1  ;;  %8722 = vmatprep.mubr.msk.bf16.mxu0 %vm8997_vm0, %v8996_v1 }
0x1694   :  { %8727 = vmatpush3.msra.mxu1 %v11132_v29 }
0x1695   :  { %8728 = vmatprep.subr.mxu1 %v11140_v32 }
0x1696   :  { %8715 = vmatpush3.bf16.msra.mxu0 %v8897_v53  ;;  %8729 = vmatpush3.msra.mxu1 %v11140_v32 }
0x1697   :  { %8716 = vmatprep.subr.bf16.mxu0 %v8996_v1  ;;  %8730 = vmatprep.subr.mxu1 %v11149_v44 }
0x1698   :  { %8731 = vmatpush3.msra.mxu1 %v11149_v44 }
0x1699   :  { %8732 = vmatprep.subr.mxu1 %v11158_v2 }
0x169a   :  { %8717 = vmatpush3.bf16.msra.mxu0 %v8898_v14  ;;  %8733 = vmatpush3.msra.mxu1 %v11158_v2 }
0x169b   :  { %8718 = vmatprep.subr.bf16.mxu0 %v8996_v1  ;;  %8734 = vmatprep.subr.mxu1 %v11167_v54 }
0x169c   :  { %8735 = vmatpush3.msra.mxu1 %v11167_v54 }
0x169d   :  { %8736 = vmatprep.subr.mxu1 %v11176_v19 }
0x169e   :  { %8719 = vmatpush3.bf16.msra.mxu0 %v8899_v17  ;;  %8737 = vmatpush3.msra.mxu1 %v11176_v19 }
0x169f   :  { %8720 = vmatprep.subr.bf16.mxu0 %v8996_v1  ;;  %8738 = vmatprep.subr.mxu1 %v11185_v43 }
0x16a0   :  { %8739 = vmatpush3.msra.mxu1 %v11185_v43 }
0x16a1   :  { %8740 = vmatprep.subr.mxu1 %v11194_v45 }
0x16a2   :  { %8721 = vmatpush3.bf16.msra.mxu0 %v8900_v31  ;;  %8741 = vmatpush3.msra.mxu1 %v11194_v45 }
0x16a3   :  { %8745 = vmatprep.subr.mxu0 %v11132_v29 }
0x16a5   :  { %8723 = vmatmul.mubr.msk.bf16.vlgmr.msra.gmra.mxu0 %vm1265_vm8, %v6412_v18 }
0x16a6   :  { %8746 = vmatpush3.msra.mxu0 %v11132_v29 }
0x16a7   :  { %8747 = vmatprep.subr.mxu0 %v11140_v32 }
0x16a8   :  { %8748 = vmatpush3.msra.mxu0 %v11140_v32 }
0x16a9   :  { %8749 = vmatprep.subr.mxu0 %v11149_v44 }
0x16aa   :  { %8750 = vmatpush3.msra.mxu0 %v11149_v44 }
0x16ab   :  { %8751 = vmatprep.subr.mxu0 %v11158_v2 }
0x16ac   :  { %8752 = vmatpush3.msra.mxu0 %v11158_v2 }
0x16ad   :  { %8753 = vmatprep.subr.mxu0 %v11167_v54 }
0x16ae   :  { %8754 = vmatpush3.msra.mxu0 %v11167_v54 }
0x16af   :  { %8755 = vmatprep.subr.mxu0 %v11176_v19 }
0x16b0   :  { %8756 = vmatpush3.msra.mxu0 %v11176_v19 }
0x16b1   :  { %8757 = vmatprep.subr.mxu0 %v11185_v43 }
0x16b2   :  { %8758 = vmatpush3.msra.mxu0 %v11185_v43 }
0x16b3   :  { %8759 = vmatprep.subr.mxu0 %v11194_v45 }
0x16b4   :  { %8760 = vmatpush3.msra.mxu0 %v11194_v45 }
0x1751   :  { %v6329_v1 = vpop.f32.mrf.mxu0 }
0x1752   :  { %v6403_v29 = vpop.f32.mrf.mxu1 }
0x1753   :  { %v8696_v32 = vpop.f32.mrf.mxu0  ;;  %v6404_v5 = vadd.f32 %v6403_v29, %v6329_v1 }
0x1754   :  { %v8710_v44 = vpop.f32.mrf.mxu1 }
0x1755   :  { %v6332_v2 = vpop.f32.mrf.mxu0 }
0x1756   :  { %v6406_v8 = vpop.f32.mrf.mxu1 }
0x1757   :  { %v8697_v10 = vpop.f32.mrf.mxu0  ;;  %v6407_v13 = vadd.f32 %v6406_v8, %v6332_v2 }
0x1758   :  { %v8711_v54 = vpop.f32.mrf.mxu1 }
0x1765   :  { %v6491_v12 = vpop.f32.mrf.mxu0 }
0x1766   :  { %v6498_v38 = vadd.f32 %v6491_v12, %v6404_v5 }
0x1767   :  { %v8724_v19 = vpop.f32.mrf.mxu0 }
0x1768   :  { %8742 = vmatprep.mubr.msk.f32.mxu1 %vm110_vm1, %v6498_v38 }
0x1769   :  { %v6494_v43 = vpop.f32.mrf.mxu0 }
0x176a   :  { %v6499_v0 = vadd.f32 %v6494_v43, %v6407_v13 }
0x176b   :  { %v8725_v6 = vpop.f32.mrf.mxu0 }
0x176c   :  { %8743 = vmatmul.mubr.msk.f32.vlgmr.msra.gmra.mxu1 %vm110_vm1, %v6499_v0 }
0x182c   :  { %v8744_v45 = vpop.f32.mrf.mxu1 }
0x182d   :  { %v6590_v35 = vsel %vm110_vm1, %v8744_v45, 0.0 }
0x182e   :  { %v6580_v46 = vpop.f32.mrf.mxu1 }
0x182f   :  { %v6589_v25 = vsel %vm110_vm1, %v6580_v46, 0.0 }
0x1830   :  { %v6591_v34 = vadd.f32 %v6590_v35, %v6589_v25 }
0x1832   :  { %v6592_v20 = vrot.slane %v6591_v34, 4 }
0x1834   :  { %v6593_v61 = vadd.f32 %v6592_v20, %v6591_v34 }
0x1836   :  { %v6594_v62 = vrot.slane %v6593_v61, 2 }
0x1838   :  { %v6595_v41 = vadd.f32 %v6594_v62, %v6593_v61 }
0x183a   :  { %v6596_v48 = vrot.slane %v6595_v41, 1 }
0x183c   :  { %v6597_v56 = vadd.f32 %v6596_v48, %v6595_v41 }
0x183e   :  { %v6598_v49 = vmul.f32 0.0078125, %v6597_v56 }
0x1840   :  { %v6600_v47 = vsub.f32 %v6499_v0, %v6598_v49  ;;  %v6599_v60 = vsub.f32 %v6498_v38, %v6598_v49 }
0x1842   :  { %v6601_v26 = vmul.f32 %v6599_v60, %v6599_v60  ;;  %v6602_v30 = vmul.f32 %v6600_v47, %v6600_v47 }
0x1844   :  { %8761 = vmatprep.mubr.msk.f32.mxu0 %vm110_vm1, %v6601_v26 }
0x1845   :  { %8762 = vmatmul.mubr.msk.f32.vlgmr.msra.gmra.mxu0 %vm110_vm1, %v6602_v30 }
0x1905   :  { %v8763_v63 = vpop.f32.mrf.mxu0 }
0x1906   :  { %v6685_v4 = vsel %vm110_vm1, %v8763_v63, 0.0 }
0x1907   :  { %v6675_v27 = vpop.f32.mrf.mxu0 }
0x1908   :  { %v6684_v16 = vsel %vm110_vm1, %v6675_v27, 0.0 }
0x1909   :  { %v6686_v22 = vadd.f32 %v6685_v4, %v6684_v16 }
0x190b   :  { %v6687_v9 = vrot.slane %v6686_v22, 4 }
0x190d   :  { %v6688_v55 = vadd.f32 %v6687_v9, %v6686_v22 }
0x190f   :  { %v6689_v3 = vrot.slane %v6688_v55, 2 }
0x1911   :  { %v6690_v11 = vadd.f32 %v6689_v3, %v6688_v55 }
0x1913   :  { %v6691_v37 = vrot.slane %v6690_v11, 1 }
0x1915   :  { %v6692_v28 = vadd.f32 %v6691_v37, %v6690_v11 }
0x1917   :  { %v6693_v58 = vmul.f32 0.0078125, %v6692_v28 }
0x1919   :  { %v6694_v15 = vadd.f32 1e-05, %v6693_v58 }
0x191b   :  { %8935 = vrsqrt.f32 %v6694_v15 }
0x1928   :  { %v8936_v36 = vpop.eup %8935 }
0x1929   :  { %v6696_v23 = vmul.f32 %v8936_v36, %v6599_v60  ;;  %v6697_v21 = vmul.f32 %v8936_v36, %v6600_v47 }
0x192b   :  { %v6699_v50 = vmul.f32 %v6698_v7, %v6696_v23  ;;  %v6700_v57 = vmul.f32 %v6698_v7, %v6697_v21 }
0x192d   :  { %v6701_v52 = vadd.f32 %v6699_v50, %v11231_v51  ;;  %v6702_v33 = vadd.f32 %v6700_v57, %v11233_v59 }
0x192f   :  { %v6703_v53 = vadd.f32 %v6701_v52, %v11212_v39  ;;  %v6704_v14 = vadd.f32 %v6702_v33, %v11215_v42 }
0x1931   :  { %6706 = vst.msk [vmem:[#allocation4 + $0x30] sm:$0xff] %vm110_vm1, %v6703_v53  ;;  %6707 = vst.msk [vmem:[#allocation4 + $0x38] sm:$0xff] %vm110_vm1, %v6704_v14 }
0x1938   :  { %v6712_v17 = vld [vmem:[#allocation4 + $0x30] sm:$0xff]  ;;  %v6713_v31 = vld [vmem:[#allocation4 + $0x38] sm:$0xff] }
0x1939   :  { %6715 = vst.msk [vmem:[#allocation8 + $0x10] sm:$0xff] %vm110_vm1, %v6712_v17  ;;  %6716 = vst.msk [vmem:[#allocation8 + $0x18] sm:$0xff] %vm110_vm1, %v6713_v31 }
0x193a   :  { %8982 = shalt.err (!%p8979_p9)
}
0x193b   :  { %s9003_s24 = smov 128  }
0x193c   :  { %6728 = dma.vmem_to_hbm [thread:$0]  %s6723_s22, 512, %s11370_s8, [#allocation6], %s9003_s24, %s9003_s24, %s8999_s2  }
0x193d   :  { %8993 = dma.done.wait [#allocation6], 512  }
0x193e   :  { %8994 = vsyncadd [#allocation6], 4294966784 }
0x193f   :  { %6732 = vsyncpa [#allocation6], 1 }
0x1940   :  { %6733 = vsyncpa [#allocation7], 1 }

</bundles_post_ra>
